<compile_context>
chip_gen: v6e
topology: v6e:2x2x1
jax: 0.10.0
libtpu: 0.0.40
codegen_flags: <defaults>
</compile_context>

<pallas_src>
import jax
import jax.numpy as jnp
from jax.experimental import pallas as pl
from jax.experimental.pallas import tpu as pltpu


def _round_up(x, m):
    return (x + m - 1) // m * m


# ---------------------------------------------------------------------------
# Fused conv(5x5, valid) + bias + ReLU + 2x2 max-pool  (one kernel per layer)
# ---------------------------------------------------------------------------
def _conv_relu_pool_kernel(pa_ref, pb_ref, pc_ref, pd_ref, w_ref, b_ref, o_ref):
    # Four pool-window quadrants of im2col patches -> 4 MXU matmuls (bf16 in,
    # f32 accumulate), then max / +bias / ReLU.  relu(max(.) + b) equals the
    # pooled relu(conv) because relu and the shared bias are monotone.
    w = w_ref[...]
    m0 = jnp.dot(pa_ref[...], w, preferred_element_type=jnp.float32)
    m1 = jnp.dot(pb_ref[...], w, preferred_element_type=jnp.float32)
    m2 = jnp.dot(pc_ref[...], w, preferred_element_type=jnp.float32)
    m3 = jnp.dot(pd_ref[...], w, preferred_element_type=jnp.float32)
    m = jnp.maximum(jnp.maximum(m0, m1), jnp.maximum(m2, m3))
    o_ref[...] = jnp.maximum(m + b_ref[...], 0.0).astype(o_ref.dtype)


# TODO(synk): the 25-tap im2col + pool-quadrant slicing below is still plain-JAX
# HBM glue; a further step is to DMA the NHWC input tile itself and perform the
# 25 (kh,kw) shifts as in-VMEM slices inside the conv kernel, removing the
# patch expansion in HBM entirely.
def _pooled_im2col(x, k):
    """x: (B,H,W,C) -> 4 pool-quadrant patch matrices [(B*Hp*Wp, k*k*C)]."""
    B, H, W, C = x.shape
    Ho, Wo = H - k + 1, W - k + 1
    Hp, Wp = Ho // 2, Wo // 2
    cols = []
    for kh in range(k):
        for kw in range(k):
            cols.append(x[:, kh:kh + Ho, kw:kw + Wo, :])
    p = jnp.stack(cols, axis=3).reshape(B, Ho, Wo, k * k * C)
    quads = [p[:, dh:2 * Hp:2, dw:2 * Wp:2, :].reshape(B * Hp * Wp, k * k * C)
             for dh in (0, 1) for dw in (0, 1)]
    return quads, (Hp, Wp)


def conv_relu_pool(x, w, b, *, k=5):
    """x: (B,H,W,Cin) bf16; w: (k,k,Cin,Cout) f32; b: (Cout,) f32.
    Returns mp(relu(conv(x))) as (B, Hp, Wp, Cout) bf16 via one pallas_call."""
    B, H, W, Cin = x.shape
    Cout = w.shape[-1]
    quads, (Hp, Wp) = _pooled_im2col(x, k)

    K = k * k * Cin
    Kp = _round_up(K, 128)                 # conv1: 75 -> 128 (full MXU passes)
    Mp = B * Hp * Wp
    tm = min(512, _round_up(Mp, 8))        # M tile; capped so VMEM stays small
    Mp_pad = _round_up(Mp, tm)

    def prep(q):
        return jnp.pad(q, ((0, Mp_pad - Mp), (0, Kp - K))).astype(jnp.bfloat16)

    qa, qb, qc, qd = (prep(q) for q in quads)
    wm = jnp.pad(w.reshape(K, Cout).astype(jnp.float32),
                 ((0, Kp - K), (0, 0))).astype(jnp.bfloat16)
    bm = b.reshape(1, Cout).astype(jnp.float32)

    cost = pl.CostEstimate(
        flops=2 * 4 * Mp_pad * Kp * Cout,
        transcendentals=0,
        bytes_accessed=2 * (4 * Mp_pad * Kp + Kp * Cout + Mp_pad * Cout),
    )
    out = pl.pallas_call(
        _conv_relu_pool_kernel,
        grid=(Mp_pad // tm,),
        in_specs=[pl.BlockSpec((tm, Kp), lambda i: (i, 0)),
                  pl.BlockSpec((tm, Kp), lambda i: (i, 0)),
                  pl.BlockSpec((tm, Kp), lambda i: (i, 0)),
                  pl.BlockSpec((tm, Kp), lambda i: (i, 0)),
                  pl.BlockSpec((Kp, Cout), lambda i: (0, 0)),
                  pl.BlockSpec((1, Cout), lambda i: (0, 0))],
        out_specs=pl.BlockSpec((tm, Cout), lambda i: (i, 0)),
        out_shape=jax.ShapeDtypeStruct((Mp_pad, Cout), jnp.bfloat16),
        compiler_params=pltpu.CompilerParams(
            dimension_semantics=("parallel",)),
        cost_estimate=cost,
    )(qa, qb, qc, qd, wm, bm)
    return out[:Mp].reshape(B, Hp, Wp, Cout)


# ---------------------------------------------------------------------------
# Fused FC tail: fc1(+relu) -> fc2(+relu) -> cls_head_src & pro_head(+L2 norm)
# ---------------------------------------------------------------------------
def _fc_tail_kernel(x_ref, w1_ref, b1_ref, w2_ref, b2_ref,
                    cw_ref, cb_ref, pw_ref, pb_ref,
                    p_ref, z_ref, f_ref, acc_ref):
    k = pl.program_id(0)

    @pl.when(k == 0)
    def _():
        acc_ref[...] = jnp.zeros_like(acc_ref)

    # fc1, K-tiled: bf16 operands, f32 accumulation in VMEM scratch.
    acc_ref[...] += jnp.dot(x_ref[...], w1_ref[...],
                            preferred_element_type=jnp.float32)

    @pl.when(k == pl.num_programs(0) - 1)
    def _():
        h1 = jnp.maximum(acc_ref[...] + b1_ref[...], 0.0)              # (B,1024)
        out4 = jnp.dot(h1, w2_ref[...], preferred_element_type=jnp.float32)
        out4 = jnp.maximum(out4 + b2_ref[...], 0.0)                    # (B,2)
        # 2-wide heads as broadcast multiply-adds on the VPU (no tiny matmuls).
        cw = cw_ref[...]
        pw = pw_ref[...]
        p = out4[:, 0:1] * cw[0:1, :] + out4[:, 1:2] * cw[1:2, :] + cb_ref[...]
        z = out4[:, 0:1] * pw[0:1, :] + out4[:, 1:2] * pw[1:2, :] + pb_ref[...]
        # F.normalize(z): z / max(||z||, 1e-12)  (rsqrt -> EUP slot, ~free)
        inv = jax.lax.rsqrt(
            jnp.maximum(jnp.sum(z * z, axis=-1, keepdims=True), 1e-24))
        p_ref[...] = p
        z_ref[...] = z * inv
        f_ref[...] = out4


def fc_tail(flat, params, *, tk=640):
    """flat: (B, 3200).  Returns (cls_src logits, normalized projection, out4),
    all f32, from a single pallas_call with fc1's K dimension tiled."""
    B, K = flat.shape
    assert K % tk == 0, (K, tk)
    Kt = K // tk
    N1 = params['fc1_w'].shape[1]

    cost = pl.CostEstimate(
        flops=2 * B * (K * N1 + N1 * 2 + 2 * (10 + 128)),
        transcendentals=B,
        bytes_accessed=2 * (K * N1 + B * K) + 4 * (N1 * 2 + B * (10 + 128 + 2)),
    )
    p, z, f = pl.pallas_call(
        _fc_tail_kernel,
        grid=(Kt,),
        in_specs=[
            pl.BlockSpec((B, tk), lambda k: (0, k)),    # flat activations
            pl.BlockSpec((tk, N1), lambda k: (k, 0)),   # fc1 weight (K-tiled)
            pl.BlockSpec((1, N1), lambda k: (0, 0)),    # fc1 bias
            pl.BlockSpec((N1, 2), lambda k: (0, 0)),    # fc2 weight
            pl.BlockSpec((1, 2), lambda k: (0, 0)),     # fc2 bias
            pl.BlockSpec((2, 10), lambda k: (0, 0)),    # cls_head_src weight
            pl.BlockSpec((1, 10), lambda k: (0, 0)),    # cls_head_src bias
            pl.BlockSpec((2, 128), lambda k: (0, 0)),   # pro_head weight
            pl.BlockSpec((1, 128), lambda k: (0, 0)),   # pro_head bias
        ],
        out_specs=(
            pl.BlockSpec((B, 10), lambda k: (0, 0)),
            pl.BlockSpec((B, 128), lambda k: (0, 0)),
            pl.BlockSpec((B, 2), lambda k: (0, 0)),
        ),
        out_shape=(
            jax.ShapeDtypeStruct((B, 10), jnp.float32),
            jax.ShapeDtypeStruct((B, 128), jnp.float32),
            jax.ShapeDtypeStruct((B, 2), jnp.float32),
        ),
        scratch_shapes=[pltpu.VMEM((B, N1), jnp.float32)],
        compiler_params=pltpu.CompilerParams(
            dimension_semantics=("arbitrary",)),
        cost_estimate=cost,
    )(flat.astype(jnp.bfloat16),
      params['fc1_w'].astype(jnp.bfloat16),
      params['fc1_b'].reshape(1, -1).astype(jnp.float32),
      params['fc2_w'].astype(jnp.float32),
      params['fc2_b'].reshape(1, -1).astype(jnp.float32),
      params['cls_src_w'].astype(jnp.float32),
      params['cls_src_b'].reshape(1, -1).astype(jnp.float32),
      params['pro_w'].astype(jnp.float32),
      params['pro_b'].reshape(1, -1).astype(jnp.float32))
    return p, z, f


# ---------------------------------------------------------------------------
# Parameters + forward
# ---------------------------------------------------------------------------
def init_params(key, imdim=3):
    """Deterministic PyTorch-style uniform(-1/sqrt(fan_in), 1/sqrt(fan_in))."""
    def uni(k, shape, fan_in):
        bound = 1.0 / jnp.sqrt(jnp.float32(fan_in))
        return jax.random.uniform(k, shape, jnp.float32, -bound, bound)

    keys = jax.random.split(key, 14)
    p = {}
    p['w1'] = uni(keys[0], (5, 5, imdim, 64), imdim * 25)
    p['b1'] = uni(keys[1], (64,), imdim * 25)
    p['w2'] = uni(keys[2], (5, 5, 64, 128), 64 * 25)
    p['b2'] = uni(keys[3], (128,), 64 * 25)
    p['fc1_w'] = uni(keys[4], (128 * 5 * 5, 1024), 128 * 5 * 5)
    p['fc1_b'] = uni(keys[5], (1024,), 128 * 5 * 5)
    p['fc2_w'] = uni(keys[6], (1024, 2), 1024)
    p['fc2_b'] = uni(keys[7], (2,), 1024)
    p['cls_src_w'] = uni(keys[8], (2, 10), 2)
    p['cls_src_b'] = uni(keys[9], (10,), 2)
    p['cls_tgt_w'] = uni(keys[10], (2, 10), 2)
    p['cls_tgt_b'] = uni(keys[11], (10,), 2)
    p['pro_w'] = uni(keys[12], (2, 128), 2)
    p['pro_b'] = uni(keys[13], (128,), 2)
    return p


def convnet_vis_forward(params, x_nchw, mode='test'):
    """Forward matching ConvNetVis.forward (modes: 'test', 'train', 'p_f')."""
    if mode not in ('test', 'train', 'p_f'):
        raise ValueError(f"unknown mode {mode}")
    x = jnp.transpose(x_nchw, (0, 2, 3, 1)).astype(jnp.bfloat16)  # NCHW -> NHWC
    B, H, W, _ = x.shape
    assert H == 32 and W == 32, "ConvNetVis expects 32x32 inputs (fc1 = 128*5*5)"

    h = conv_relu_pool(x, params['w1'], params['b1'])    # (B,14,14, 64) bf16
    h = conv_relu_pool(h, params['w2'], params['b2'])    # (B, 5, 5,128) bf16
    flat = h.reshape(B, -1)                              # (B,3200), (H,W,C) order

    p, z, out4 = fc_tail(flat, params)
    if mode == 'test':
        return p
    elif mode == 'train':
        return p, z
    else:  # 'p_f'
        return p, out4


if __name__ == "__main__":
    key = jax.random.PRNGKey(0)
    pkey, xkey = jax.random.split(key)
    params = init_params(pkey, imdim=3)

    # Input must be [B, 3, 32, 32] so the flattened features are 128*5*5 = 3200.
    x = jax.random.normal(xkey, (2, 3, 32, 32), jnp.float32)

    fwd = jax.jit(convnet_vis_forward, static_argnames=('mode',))

    logits = fwd(params, x, mode='test')
    jax.block_until_ready(logits)
    assert logits.shape == (2, 10), logits.shape

    p_tr, z_tr = fwd(params, x, mode='train')
    jax.block_until_ready((p_tr, z_tr))
    assert p_tr.shape == (2, 10) and z_tr.shape == (2, 128)

    p_pf, f_pf = fwd(params, x, mode='p_f')
    jax.block_until_ready((p_pf, f_pf))
    assert p_pf.shape == (2, 10) and f_pf.shape == (2, 2)

    print("KERNEL_OK")
</pallas_src>

<mosaic_0001>
module attributes {stable_mosaic.version = 11 : i64} {
  func.func @_conv_relu_pool_kernel(%arg0: i32, %arg1: memref<392x128xbf16, #tpu.memory_space<vmem>>, %arg2: memref<392x128xbf16, #tpu.memory_space<vmem>>, %arg3: memref<392x128xbf16, #tpu.memory_space<vmem>>, %arg4: memref<392x128xbf16, #tpu.memory_space<vmem>>, %arg5: memref<128x64xbf16, #tpu.memory_space<vmem>>, %arg6: memref<1x64xf32, #tpu.memory_space<vmem>>, %arg7: memref<392x64xbf16, #tpu.memory_space<vmem>>) attributes {dimension_semantics = [#tpu.dimension_semantics<parallel>], iteration_bounds = array<i64: 1>, scalar_prefetch = 0 : i64, scratch_operands = 0 : i64, tpu.core_type = #tpu.core_type<tc>, window_params = [{transform_indices = @transform_0, window_bounds = array<i64: 392, 128>}, {transform_indices = @transform_1, window_bounds = array<i64: 392, 128>}, {transform_indices = @transform_2, window_bounds = array<i64: 392, 128>}, {transform_indices = @transform_3, window_bounds = array<i64: 392, 128>}, {pipeline_mode = #tpu.pipeline_mode<synchronous>, transform_indices = @transform_4, window_bounds = array<i64: 128, 64>}, {pipeline_mode = #tpu.pipeline_mode<synchronous>, transform_indices = @transform_5, window_bounds = array<i64: 1, 64>}, {transform_indices = @transform_6, window_bounds = array<i64: 392, 64>}]} {
    %c0 = arith.constant 0 : index
    %c0_0 = arith.constant 0 : index
    %0 = vector.load %arg5[%c0, %c0_0] : memref<128x64xbf16, #tpu.memory_space<vmem>>, vector<128x64xbf16>
    %c0_1 = arith.constant 0 : index
    %c0_2 = arith.constant 0 : index
    %1 = vector.load %arg1[%c0_1, %c0_2] : memref<392x128xbf16, #tpu.memory_space<vmem>>, vector<392x128xbf16>
    %cst = arith.constant dense<0.000000e+00> : vector<392x64xf32>
    %2 = tpu.matmul %1, %0, %cst {dimension_numbers = #tpu.dot_dimension_numbers<[1], [0], [0], [1], [0, 0, 1, 1], [], []>} : vector<392x128xbf16>, vector<128x64xbf16>, vector<392x64xf32> -> vector<392x64xf32>
    %c0_3 = arith.constant 0 : index
    %c0_4 = arith.constant 0 : index
    %3 = vector.load %arg2[%c0_3, %c0_4] : memref<392x128xbf16, #tpu.memory_space<vmem>>, vector<392x128xbf16>
    %cst_5 = arith.constant dense<0.000000e+00> : vector<392x64xf32>
    %4 = tpu.matmul %3, %0, %cst_5 {dimension_numbers = #tpu.dot_dimension_numbers<[1], [0], [0], [1], [0, 0, 1, 1], [], []>} : vector<392x128xbf16>, vector<128x64xbf16>, vector<392x64xf32> -> vector<392x64xf32>
    %c0_6 = arith.constant 0 : index
    %c0_7 = arith.constant 0 : index
    %5 = vector.load %arg3[%c0_6, %c0_7] : memref<392x128xbf16, #tpu.memory_space<vmem>>, vector<392x128xbf16>
    %cst_8 = arith.constant dense<0.000000e+00> : vector<392x64xf32>
    %6 = tpu.matmul %5, %0, %cst_8 {dimension_numbers = #tpu.dot_dimension_numbers<[1], [0], [0], [1], [0, 0, 1, 1], [], []>} : vector<392x128xbf16>, vector<128x64xbf16>, vector<392x64xf32> -> vector<392x64xf32>
    %c0_9 = arith.constant 0 : index
    %c0_10 = arith.constant 0 : index
    %7 = vector.load %arg4[%c0_9, %c0_10] : memref<392x128xbf16, #tpu.memory_space<vmem>>, vector<392x128xbf16>
    %cst_11 = arith.constant dense<0.000000e+00> : vector<392x64xf32>
    %8 = tpu.matmul %7, %0, %cst_11 {dimension_numbers = #tpu.dot_dimension_numbers<[1], [0], [0], [1], [0, 0, 1, 1], [], []>} : vector<392x128xbf16>, vector<128x64xbf16>, vector<392x64xf32> -> vector<392x64xf32>
    %9 = arith.maximumf %2, %4 : vector<392x64xf32>
    %10 = arith.maximumf %6, %8 : vector<392x64xf32>
    %11 = arith.maximumf %9, %10 : vector<392x64xf32>
    %c0_12 = arith.constant 0 : index
    %c0_13 = arith.constant 0 : index
    %12 = vector.load %arg6[%c0_12, %c0_13] : memref<1x64xf32, #tpu.memory_space<vmem>>, vector<1x64xf32>
    %13 = vector.broadcast %12 : vector<1x64xf32> to vector<392x64xf32>
    %14 = arith.addf %11, %13 : vector<392x64xf32>
    %cst_14 = arith.constant 0.000000e+00 : f32
    %15 = vector.broadcast %cst_14 : f32 to vector<392x64xf32>
    %16 = arith.maximumf %14, %15 : vector<392x64xf32>
    %17 = arith.truncf %16 : vector<392x64xf32> to vector<392x64xbf16>
    %c0_15 = arith.constant 0 : index
    %c0_16 = arith.constant 0 : index
    %18 = vector.load %arg7[%c0_15, %c0_16] : memref<392x64xbf16, #tpu.memory_space<vmem>>, vector<392x64xbf16>
    tpu.vector_store %arg7[%c0_15, %c0_16], %17 {strides = array<i32>} : memref<392x64xbf16, #tpu.memory_space<vmem>>, vector<392x64xbf16>,
    return
  }
  func.func @transform_0(%arg0: i32) -> (i32, i32) {
    %c0_i32 = arith.constant 0 : i32
    %c0_i32_0 = arith.constant 0 : i32
    return %arg0, %c0_i32 : i32, i32
  }
  func.func @transform_1(%arg0: i32) -> (i32, i32) {
    %c0_i32 = arith.constant 0 : i32
    %c0_i32_0 = arith.constant 0 : i32
    return %arg0, %c0_i32 : i32, i32
  }
  func.func @transform_2(%arg0: i32) -> (i32, i32) {
    %c0_i32 = arith.constant 0 : i32
    %c0_i32_0 = arith.constant 0 : i32
    return %arg0, %c0_i32 : i32, i32
  }
  func.func @transform_3(%arg0: i32) -> (i32, i32) {
    %c0_i32 = arith.constant 0 : i32
    %c0_i32_0 = arith.constant 0 : i32
    return %arg0, %c0_i32 : i32, i32
  }
  func.func @transform_4(%arg0: i32) -> (i32, i32) {
    %c0_i32 = arith.constant 0 : i32
    %c0_i32_0 = arith.constant 0 : i32
    %c0_i32_1 = arith.constant 0 : i32
    return %c0_i32, %c0_i32_0 : i32, i32
  }
  func.func @transform_5(%arg0: i32) -> (i32, i32) {
    %c0_i32 = arith.constant 0 : i32
    %c0_i32_0 = arith.constant 0 : i32
    %c0_i32_1 = arith.constant 0 : i32
    return %c0_i32, %c0_i32_0 : i32, i32
  }
  func.func @transform_6(%arg0: i32) -> (i32, i32) {
    %c0_i32 = arith.constant 0 : i32
    %c0_i32_0 = arith.constant 0 : i32
    return %arg0, %c0_i32 : i32, i32
  }
}

module attributes {stable_mosaic.version = 11 : i64} {
  func.func @_conv_relu_pool_kernel(%arg0: i32, %arg1: memref<56x1664xbf16, #tpu.memory_space<vmem>>, %arg2: memref<56x1664xbf16, #tpu.memory_space<vmem>>, %arg3: memref<56x1664xbf16, #tpu.memory_space<vmem>>, %arg4: memref<56x1664xbf16, #tpu.memory_space<vmem>>, %arg5: memref<1664x128xbf16, #tpu.memory_space<vmem>>, %arg6: memref<1x128xf32, #tpu.memory_space<vmem>>, %arg7: memref<56x128xbf16, #tpu.memory_space<vmem>>) attributes {dimension_semantics = [#tpu.dimension_semantics<parallel>], iteration_bounds = array<i64: 1>, scalar_prefetch = 0 : i64, scratch_operands = 0 : i64, tpu.core_type = #tpu.core_type<tc>, window_params = [{transform_indices = @transform_0, window_bounds = array<i64: 56, 1664>}, {transform_indices = @transform_1, window_bounds = array<i64: 56, 1664>}, {transform_indices = @transform_2, window_bounds = array<i64: 56, 1664>}, {transform_indices = @transform_3, window_bounds = array<i64: 56, 1664>}, {pipeline_mode = #tpu.pipeline_mode<synchronous>, transform_indices = @transform_4, window_bounds = array<i64: 1664, 128>}, {pipeline_mode = #tpu.pipeline_mode<synchronous>, transform_indices = @transform_5, window_bounds = array<i64: 1, 128>}, {transform_indices = @transform_6, window_bounds = array<i64: 56, 128>}]} {
    %c0 = arith.constant 0 : index
    %c0_0 = arith.constant 0 : index
    %0 = vector.load %arg5[%c0, %c0_0] : memref<1664x128xbf16, #tpu.memory_space<vmem>>, vector<1664x128xbf16>
    %c0_1 = arith.constant 0 : index
    %c0_2 = arith.constant 0 : index
    %1 = vector.load %arg1[%c0_1, %c0_2] : memref<56x1664xbf16, #tpu.memory_space<vmem>>, vector<56x1664xbf16>
    %cst = arith.constant dense<0.000000e+00> : vector<56x128xf32>
    %2 = tpu.matmul %1, %0, %cst {dimension_numbers = #tpu.dot_dimension_numbers<[1], [0], [0], [1], [0, 0, 1, 1], [], []>} : vector<56x1664xbf16>, vector<1664x128xbf16>, vector<56x128xf32> -> vector<56x128xf32>
    %c0_3 = arith.constant 0 : index
    %c0_4 = arith.constant 0 : index
    %3 = vector.load %arg2[%c0_3, %c0_4] : memref<56x1664xbf16, #tpu.memory_space<vmem>>, vector<56x1664xbf16>
    %cst_5 = arith.constant dense<0.000000e+00> : vector<56x128xf32>
    %4 = tpu.matmul %3, %0, %cst_5 {dimension_numbers = #tpu.dot_dimension_numbers<[1], [0], [0], [1], [0, 0, 1, 1], [], []>} : vector<56x1664xbf16>, vector<1664x128xbf16>, vector<56x128xf32> -> vector<56x128xf32>
    %c0_6 = arith.constant 0 : index
    %c0_7 = arith.constant 0 : index
    %5 = vector.load %arg3[%c0_6, %c0_7] : memref<56x1664xbf16, #tpu.memory_space<vmem>>, vector<56x1664xbf16>
    %cst_8 = arith.constant dense<0.000000e+00> : vector<56x128xf32>
    %6 = tpu.matmul %5, %0, %cst_8 {dimension_numbers = #tpu.dot_dimension_numbers<[1], [0], [0], [1], [0, 0, 1, 1], [], []>} : vector<56x1664xbf16>, vector<1664x128xbf16>, vector<56x128xf32> -> vector<56x128xf32>
    %c0_9 = arith.constant 0 : index
    %c0_10 = arith.constant 0 : index
    %7 = vector.load %arg4[%c0_9, %c0_10] : memref<56x1664xbf16, #tpu.memory_space<vmem>>, vector<56x1664xbf16>
    %cst_11 = arith.constant dense<0.000000e+00> : vector<56x128xf32>
    %8 = tpu.matmul %7, %0, %cst_11 {dimension_numbers = #tpu.dot_dimension_numbers<[1], [0], [0], [1], [0, 0, 1, 1], [], []>} : vector<56x1664xbf16>, vector<1664x128xbf16>, vector<56x128xf32> -> vector<56x128xf32>
    %9 = arith.maximumf %2, %4 : vector<56x128xf32>
    %10 = arith.maximumf %6, %8 : vector<56x128xf32>
    %11 = arith.maximumf %9, %10 : vector<56x128xf32>
    %c0_12 = arith.constant 0 : index
    %c0_13 = arith.constant 0 : index
    %12 = vector.load %arg6[%c0_12, %c0_13] : memref<1x128xf32, #tpu.memory_space<vmem>>, vector<1x128xf32>
    %13 = vector.broadcast %12 : vector<1x128xf32> to vector<56x128xf32>
    %14 = arith.addf %11, %13 : vector<56x128xf32>
    %cst_14 = arith.constant 0.000000e+00 : f32
    %15 = vector.broadcast %cst_14 : f32 to vector<56x128xf32>
    %16 = arith.maximumf %14, %15 : vector<56x128xf32>
    %17 = arith.truncf %16 : vector<56x128xf32> to vector<56x128xbf16>
    %c0_15 = arith.constant 0 : index
    %c0_16 = arith.constant 0 : index
    %18 = vector.load %arg7[%c0_15, %c0_16] : memref<56x128xbf16, #tpu.memory_space<vmem>>, vector<56x128xbf16>
    tpu.vector_store %arg7[%c0_15, %c0_16], %17 {strides = array<i32>} : memref<56x128xbf16, #tpu.memory_space<vmem>>, vector<56x128xbf16>,
    return
  }
  func.func @transform_0(%arg0: i32) -> (i32, i32) {
    %c0_i32 = arith.constant 0 : i32
    %c0_i32_0 = arith.constant 0 : i32
    return %arg0, %c0_i32 : i32, i32
  }
  func.func @transform_1(%arg0: i32) -> (i32, i32) {
    %c0_i32 = arith.constant 0 : i32
    %c0_i32_0 = arith.constant 0 : i32
    return %arg0, %c0_i32 : i32, i32
  }
  func.func @transform_2(%arg0: i32) -> (i32, i32) {
    %c0_i32 = arith.constant 0 : i32
    %c0_i32_0 = arith.constant 0 : i32
    return %arg0, %c0_i32 : i32, i32
  }
  func.func @transform_3(%arg0: i32) -> (i32, i32) {
    %c0_i32 = arith.constant 0 : i32
    %c0_i32_0 = arith.constant 0 : i32
    return %arg0, %c0_i32 : i32, i32
  }
  func.func @transform_4(%arg0: i32) -> (i32, i32) {
    %c0_i32 = arith.constant 0 : i32
    %c0_i32_0 = arith.constant 0 : i32
    %c0_i32_1 = arith.constant 0 : i32
    return %c0_i32, %c0_i32_0 : i32, i32
  }
  func.func @transform_5(%arg0: i32) -> (i32, i32) {
    %c0_i32 = arith.constant 0 : i32
    %c0_i32_0 = arith.constant 0 : i32
    %c0_i32_1 = arith.constant 0 : i32
    return %c0_i32, %c0_i32_0 : i32, i32
  }
  func.func @transform_6(%arg0: i32) -> (i32, i32) {
    %c0_i32 = arith.constant 0 : i32
    %c0_i32_0 = arith.constant 0 : i32
    return %arg0, %c0_i32 : i32, i32
  }
}

module attributes {stable_mosaic.version = 11 : i64} {
  func.func @_fc_tail_kernel(%arg0: i32, %arg1: memref<2x640xbf16, #tpu.memory_space<vmem>>, %arg2: memref<640x1024xbf16, #tpu.memory_space<vmem>>, %arg3: memref<1x1024xf32, #tpu.memory_space<vmem>>, %arg4: memref<1024x2xf32, #tpu.memory_space<vmem>>, %arg5: memref<1x2xf32, #tpu.memory_space<vmem>>, %arg6: memref<2x10xf32, #tpu.memory_space<vmem>>, %arg7: memref<1x10xf32, #tpu.memory_space<vmem>>, %arg8: memref<2x128xf32, #tpu.memory_space<vmem>>, %arg9: memref<1x128xf32, #tpu.memory_space<vmem>>, %arg10: memref<2x10xf32, #tpu.memory_space<vmem>>, %arg11: memref<2x128xf32, #tpu.memory_space<vmem>>, %arg12: memref<2x2xf32, #tpu.memory_space<vmem>>, %arg13: memref<2x1024xf32, #tpu.memory_space<vmem>>) attributes {dimension_semantics = [#tpu.dimension_semantics<arbitrary>], iteration_bounds = array<i64: 5>, scalar_prefetch = 0 : i64, scratch_operands = 1 : i64, tpu.core_type = #tpu.core_type<tc>, window_params = [{transform_indices = @transform_0, window_bounds = array<i64: 2, 640>}, {transform_indices = @transform_1, window_bounds = array<i64: 640, 1024>}, {pipeline_mode = #tpu.pipeline_mode<synchronous>, transform_indices = @transform_2, window_bounds = array<i64: 1, 1024>}, {pipeline_mode = #tpu.pipeline_mode<synchronous>, transform_indices = @transform_3, window_bounds = array<i64: 1024, 2>}, {pipeline_mode = #tpu.pipeline_mode<synchronous>, transform_indices = @transform_4, window_bounds = array<i64: 1, 2>}, {pipeline_mode = #tpu.pipeline_mode<synchronous>, transform_indices = @transform_5, window_bounds = array<i64: 2, 10>}, {pipeline_mode = #tpu.pipeline_mode<synchronous>, transform_indices = @transform_6, window_bounds = array<i64: 1, 10>}, {pipeline_mode = #tpu.pipeline_mode<synchronous>, transform_indices = @transform_7, window_bounds = array<i64: 2, 128>}, {pipeline_mode = #tpu.pipeline_mode<synchronous>, transform_indices = @transform_8, window_bounds = array<i64: 1, 128>}, {pipeline_mode = #tpu.pipeline_mode<synchronous>, transform_indices = @transform_9, window_bounds = array<i64: 2, 10>}, {pipeline_mode = #tpu.pipeline_mode<synchronous>, transform_indices = @transform_10, window_bounds = array<i64: 2, 128>}, {pipeline_mode = #tpu.pipeline_mode<synchronous>, transform_indices = @transform_11, window_bounds = array<i64: 2, 2>}]} {
    %c0_i32 = arith.constant 0 : i32
    %0 = arith.cmpi eq, %arg0, %c0_i32 : i32
    %1 = arith.extui %0 : i1 to i32
    %c0_i32_0 = arith.constant 0 : i32
    %2 = arith.cmpi ne, %1, %c0_i32_0 : i32
    scf.if %2 {
      %cst_9 = arith.constant 0.000000e+00 : f32
      %12 = vector.broadcast %cst_9 : f32 to vector<2x1024xf32>
      %c0_10 = arith.constant 0 : index
      %c0_11 = arith.constant 0 : index
      %13 = vector.load %arg13[%c0_10, %c0_11] : memref<2x1024xf32, #tpu.memory_space<vmem>>, vector<2x1024xf32>
      tpu.vector_store %arg13[%c0_10, %c0_11], %12 {strides = array<i32>} : memref<2x1024xf32, #tpu.memory_space<vmem>>, vector<2x1024xf32>,
    } else {
    }
    %c0 = arith.constant 0 : index
    %c0_1 = arith.constant 0 : index
    %3 = vector.load %arg13[%c0, %c0_1] : memref<2x1024xf32, #tpu.memory_space<vmem>>, vector<2x1024xf32>
    %c0_2 = arith.constant 0 : index
    %c0_3 = arith.constant 0 : index
    %4 = vector.load %arg1[%c0_2, %c0_3] : memref<2x640xbf16, #tpu.memory_space<vmem>>, vector<2x640xbf16>
    %c0_4 = arith.constant 0 : index
    %c0_5 = arith.constant 0 : index
    %5 = vector.load %arg2[%c0_4, %c0_5] : memref<640x1024xbf16, #tpu.memory_space<vmem>>, vector<640x1024xbf16>
    %cst = arith.constant dense<0.000000e+00> : vector<2x1024xf32>
    %6 = tpu.matmul %4, %5, %cst {dimension_numbers = #tpu.dot_dimension_numbers<[1], [0], [0], [1], [0, 0, 1, 1], [], []>} : vector<2x640xbf16>, vector<640x1024xbf16>, vector<2x1024xf32> -> vector<2x1024xf32>
    %7 = arith.addf %3, %6 : vector<2x1024xf32>
    %c0_6 = arith.constant 0 : index
    %c0_7 = arith.constant 0 : index
    %8 = vector.load %arg13[%c0_6, %c0_7] : memref<2x1024xf32, #tpu.memory_space<vmem>>, vector<2x1024xf32>
    tpu.vector_store %arg13[%c0_6, %c0_7], %7 {strides = array<i32>} : memref<2x1024xf32, #tpu.memory_space<vmem>>, vector<2x1024xf32>,
    %c4_i32 = arith.constant 4 : i32
    %9 = arith.cmpi eq, %arg0, %c4_i32 : i32
    %10 = arith.extui %9 : i1 to i32
    %c0_i32_8 = arith.constant 0 : i32
    %11 = arith.cmpi ne, %10, %c0_i32_8 : i32
    scf.if %11 {
      %c0_9 = arith.constant 0 : index
      %c0_10 = arith.constant 0 : index
      %12 = vector.load %arg13[%c0_9, %c0_10] : memref<2x1024xf32, #tpu.memory_space<vmem>>, vector<2x1024xf32>
      %c0_11 = arith.constant 0 : index
      %c0_12 = arith.constant 0 : index
      %13 = vector.load %arg3[%c0_11, %c0_12] : memref<1x1024xf32, #tpu.memory_space<vmem>>, vector<1x1024xf32>
      %14 = vector.broadcast %13 : vector<1x1024xf32> to vector<2x1024xf32>
      %15 = arith.addf %12, %14 : vector<2x1024xf32>
      %cst_13 = arith.constant 0.000000e+00 : f32
      %16 = vector.broadcast %cst_13 : f32 to vector<2x1024xf32>
      %17 = arith.maximumf %15, %16 : vector<2x1024xf32>
      %c0_14 = arith.constant 0 : index
      %c0_15 = arith.constant 0 : index
      %18 = vector.load %arg4[%c0_14, %c0_15] : memref<1024x2xf32, #tpu.memory_space<vmem>>, vector<1024x2xf32>
      %cst_16 = arith.constant dense<0.000000e+00> : vector<2x2xf32>
      %19 = tpu.matmul %17, %18, %cst_16 {dimension_numbers = #tpu.dot_dimension_numbers<[1], [0], [0], [1], [0, 0, 1, 1], [], []>} : vector<2x1024xf32>, vector<1024x2xf32>, vector<2x2xf32> -> vector<2x2xf32>
      %c0_17 = arith.constant 0 : index
      %c0_18 = arith.constant 0 : index
      %20 = vector.load %arg5[%c0_17, %c0_18] : memref<1x2xf32, #tpu.memory_space<vmem>>, vector<1x2xf32>
      %21 = vector.broadcast %20 : vector<1x2xf32> to vector<2x2xf32>
      %22 = arith.addf %19, %21 : vector<2x2xf32>
      %cst_19 = arith.constant 0.000000e+00 : f32
      %23 = vector.broadcast %cst_19 : f32 to vector<2x2xf32>
      %24 = arith.maximumf %22, %23 : vector<2x2xf32>
      %c0_20 = arith.constant 0 : index
      %c0_21 = arith.constant 0 : index
      %25 = vector.load %arg6[%c0_20, %c0_21] : memref<2x10xf32, #tpu.memory_space<vmem>>, vector<2x10xf32>
      %c0_22 = arith.constant 0 : index
      %c0_23 = arith.constant 0 : index
      %26 = vector.load %arg8[%c0_22, %c0_23] : memref<2x128xf32, #tpu.memory_space<vmem>>, vector<2x128xf32>
      %27 = vector.extract_strided_slice %24 {offsets = [0, 0], sizes = [2, 1], strides = [1, 1]} : vector<2x2xf32> to vector<2x1xf32>
      %28 = vector.extract_strided_slice %25 {offsets = [0, 0], sizes = [1, 10], strides = [1, 1]} : vector<2x10xf32> to vector<1x10xf32>
      %29 = vector.broadcast %27 : vector<2x1xf32> to vector<2x10xf32>
      %30 = vector.broadcast %28 : vector<1x10xf32> to vector<2x10xf32>
      %31 = arith.mulf %29, %30 : vector<2x10xf32>
      %32 = vector.extract_strided_slice %24 {offsets = [0, 1], sizes = [2, 1], strides = [1, 1]} : vector<2x2xf32> to vector<2x1xf32>
      %33 = vector.extract_strided_slice %25 {offsets = [1, 0], sizes = [1, 10], strides = [1, 1]} : vector<2x10xf32> to vector<1x10xf32>
      %34 = vector.broadcast %32 : vector<2x1xf32> to vector<2x10xf32>
      %35 = vector.broadcast %33 : vector<1x10xf32> to vector<2x10xf32>
      %36 = arith.mulf %34, %35 : vector<2x10xf32>
      %37 = arith.addf %31, %36 : vector<2x10xf32>
      %c0_24 = arith.constant 0 : index
      %c0_25 = arith.constant 0 : index
      %38 = vector.load %arg7[%c0_24, %c0_25] : memref<1x10xf32, #tpu.memory_space<vmem>>, vector<1x10xf32>
      %39 = vector.broadcast %38 : vector<1x10xf32> to vector<2x10xf32>
      %40 = arith.addf %37, %39 : vector<2x10xf32>
      %41 = vector.extract_strided_slice %24 {offsets = [0, 0], sizes = [2, 1], strides = [1, 1]} : vector<2x2xf32> to vector<2x1xf32>
      %42 = vector.extract_strided_slice %26 {offsets = [0, 0], sizes = [1, 128], strides = [1, 1]} : vector<2x128xf32> to vector<1x128xf32>
      %43 = vector.broadcast %41 : vector<2x1xf32> to vector<2x128xf32>
      %44 = vector.broadcast %42 : vector<1x128xf32> to vector<2x128xf32>
      %45 = arith.mulf %43, %44 : vector<2x128xf32>
      %46 = vector.extract_strided_slice %24 {offsets = [0, 1], sizes = [2, 1], strides = [1, 1]} : vector<2x2xf32> to vector<2x1xf32>
      %47 = vector.extract_strided_slice %26 {offsets = [1, 0], sizes = [1, 128], strides = [1, 1]} : vector<2x128xf32> to vector<1x128xf32>
      %48 = vector.broadcast %46 : vector<2x1xf32> to vector<2x128xf32>
      %49 = vector.broadcast %47 : vector<1x128xf32> to vector<2x128xf32>
      %50 = arith.mulf %48, %49 : vector<2x128xf32>
      %51 = arith.addf %45, %50 : vector<2x128xf32>
      %c0_26 = arith.constant 0 : index
      %c0_27 = arith.constant 0 : index
      %52 = vector.load %arg9[%c0_26, %c0_27] : memref<1x128xf32, #tpu.memory_space<vmem>>, vector<1x128xf32>
      %53 = vector.broadcast %52 : vector<1x128xf32> to vector<2x128xf32>
      %54 = arith.addf %51, %53 : vector<2x128xf32>
      %55 = arith.mulf %54, %54 : vector<2x128xf32>
      %cst_28 = arith.constant dense<0.000000e+00> : vector<2xf32>
      %56 = vector.multi_reduction <add>, %55, %cst_28 [1] : vector<2x128xf32> to vector<2xf32>
      %57 = vector.shape_cast %56 : vector<2xf32> to vector<2x1xf32>
      %cst_29 = arith.constant 1.000000e-24 : f32
      %58 = vector.broadcast %cst_29 : f32 to vector<2x1xf32>
      %59 = arith.maximumf %57, %58 : vector<2x1xf32>
      %60 = math.rsqrt %59 : vector<2x1xf32>
      %c0_30 = arith.constant 0 : index
      %c0_31 = arith.constant 0 : index
      %61 = vector.load %arg10[%c0_30, %c0_31] : memref<2x10xf32, #tpu.memory_space<vmem>>, vector<2x10xf32>
      tpu.vector_store %arg10[%c0_30, %c0_31], %40 {strides = array<i32>} : memref<2x10xf32, #tpu.memory_space<vmem>>, vector<2x10xf32>,
      %62 = vector.broadcast %60 : vector<2x1xf32> to vector<2x128xf32>
      %63 = arith.mulf %54, %62 : vector<2x128xf32>
      %c0_32 = arith.constant 0 : index
      %c0_33 = arith.constant 0 : index
      %64 = vector.load %arg11[%c0_32, %c0_33] : memref<2x128xf32, #tpu.memory_space<vmem>>, vector<2x128xf32>
      tpu.vector_store %arg11[%c0_32, %c0_33], %63 {strides = array<i32>} : memref<2x128xf32, #tpu.memory_space<vmem>>, vector<2x128xf32>,
      %c0_34 = arith.constant 0 : index
      %c0_35 = arith.constant 0 : index
      %65 = vector.load %arg12[%c0_34, %c0_35] : memref<2x2xf32, #tpu.memory_space<vmem>>, vector<2x2xf32>
      tpu.vector_store %arg12[%c0_34, %c0_35], %24 {strides = array<i32>} : memref<2x2xf32, #tpu.memory_space<vmem>>, vector<2x2xf32>,
    } else {
    }
    return
  }
  func.func @transform_0(%arg0: i32) -> (i32, i32) {
    %c0_i32 = arith.constant 0 : i32
    %c0_i32_0 = arith.constant 0 : i32
    return %c0_i32, %arg0 : i32, i32
  }
  func.func @transform_1(%arg0: i32) -> (i32, i32) {
    %c0_i32 = arith.constant 0 : i32
    %c0_i32_0 = arith.constant 0 : i32
    return %arg0, %c0_i32 : i32, i32
  }
  func.func @transform_2(%arg0: i32) -> (i32, i32) {
    %c0_i32 = arith.constant 0 : i32
    %c0_i32_0 = arith.constant 0 : i32
    %c0_i32_1 = arith.constant 0 : i32
    return %c0_i32, %c0_i32_0 : i32, i32
  }
  func.func @transform_3(%arg0: i32) -> (i32, i32) {
    %c0_i32 = arith.constant 0 : i32
    %c0_i32_0 = arith.constant 0 : i32
    %c0_i32_1 = arith.constant 0 : i32
    return %c0_i32, %c0_i32_0 : i32, i32
  }
  func.func @transform_4(%arg0: i32) -> (i32, i32) {
    %c0_i32 = arith.constant 0 : i32
    %c0_i32_0 = arith.constant 0 : i32
    %c0_i32_1 = arith.constant 0 : i32
    return %c0_i32, %c0_i32_0 : i32, i32
  }
  func.func @transform_5(%arg0: i32) -> (i32, i32) {
    %c0_i32 = arith.constant 0 : i32
    %c0_i32_0 = arith.constant 0 : i32
    %c0_i32_1 = arith.constant 0 : i32
    return %c0_i32, %c0_i32_0 : i32, i32
  }
  func.func @transform_6(%arg0: i32) -> (i32, i32) {
    %c0_i32 = arith.constant 0 : i32
    %c0_i32_0 = arith.constant 0 : i32
    %c0_i32_1 = arith.constant 0 : i32
    return %c0_i32, %c0_i32_0 : i32, i32
  }
  func.func @transform_7(%arg0: i32) -> (i32, i32) {
    %c0_i32 = arith.constant 0 : i32
    %c0_i32_0 = arith.constant 0 : i32
    %c0_i32_1 = arith.constant 0 : i32
    return %c0_i32, %c0_i32_0 : i32, i32
  }
  func.func @transform_8(%arg0: i32) -> (i32, i32) {
    %c0_i32 = arith.constant 0 : i32
    %c0_i32_0 = arith.constant 0 : i32
    %c0_i32_1 = arith.constant 0 : i32
    return %c0_i32, %c0_i32_0 : i32, i32
  }
  func.func @transform_9(%arg0: i32) -> (i32, i32) {
    %c0_i32 = arith.constant 0 : i32
    %c0_i32_0 = arith.constant 0 : i32
    %c0_i32_1 = arith.constant 0 : i32
    return %c0_i32, %c0_i32_0 : i32, i32
  }
  func.func @transform_10(%arg0: i32) -> (i32, i32) {
    %c0_i32 = arith.constant 0 : i32
    %c0_i32_0 = arith.constant 0 : i32
    %c0_i32_1 = arith.constant 0 : i32
    return %c0_i32, %c0_i32_0 : i32, i32
  }
  func.func @transform_11(%arg0: i32) -> (i32, i32) {
    %c0_i32 = arith.constant 0 : i32
    %c0_i32_0 = arith.constant 0 : i32
    %c0_i32_1 = arith.constant 0 : i32
    return %c0_i32, %c0_i32_0 : i32, i32
  }
}

</mosaic_0001>

<bundles_post_ra>
// kernel: convnet_vis_forward.3
= control target key start
LH: loop header
LB: loop body
LE: loop exit
PB: predicated region body
PF: predicated region fallthrough
CT: control target
= control target key end

     0   :  { %v4511_v0 = vmov 0.0   ;;  %vm3221_vm0 = vmmov 0   ;;  %vm2253_vm1 = vcmask 519168   ;;  %s4504_s4 = inlined_call_operand.vmem [shape: bf16[128,64], index: 4, kind: input, shape index: {}]   ;;  %s4505_s0 = inlined_call_operand.vmem [shape: bf16[392,128], index: 0, kind: input, shape index: {}]   ;;  %s4506_s1 = inlined_call_operand.vmem [shape: bf16[392,128], index: 1, kind: input, shape index: {}]   ;;  %s4507_s2 = inlined_call_operand.vmem [shape: bf16[392,128], index: 2, kind: input, shape index: {}]   ;;  %s4508_s3 = inlined_call_operand.vmem [shape: bf16[392,128], index: 3, kind: input, shape index: {}]   ;;  %s4509_s5 = inlined_call_operand.vmem [shape: f32[1,64], index: 5, kind: input, shape index: {}]   ;;  %s4510_s6 = inlined_call_operand.vmem [shape: bf16[392,64], index: 6, kind: output, shape index: {}]  }
   0x1   :  { %2646 = vmatprep.subr.bf16.mxu0 %v4511_v0  ;;  %2762 = vmatprep.subr.bf16.mxu1 %v4511_v0  ;;  %v3112_v1 = vld [vmem:[%s4504_s4 + $0x38] sm:$0xff]   ;;  %v3113_v2 = vld [vmem:[%s4504_s4 + $0x30] sm:$0xff]   ;;  %v3114_v3 = vld [vmem:[%s4504_s4 + $0x28] sm:$0xff]  }
   0x2   :  { %2662 = vmatprep.mubr.msk.bf16.mxu0 %vm3221_vm0, %v4511_v0  ;;  %2778 = vmatprep.mubr.msk.bf16.mxu1 %vm3221_vm0, %v4511_v0  ;;  %v3115_v4 = vld [vmem:[%s4504_s4 + $0x20] sm:$0xff]   ;;  %v3116_v5 = vld [vmem:[%s4504_s4 + $0x18] sm:$0xff]   ;;  %v3117_v6 = vld [vmem:[%s4504_s4 + $0x10] sm:$0xff]  }
   0x3   :  { %2647 = vmatpush3.bf16.msra.mxu0 %v3112_v1  ;;  %2763 = vmatpush3.bf16.msra.mxu1 %v3112_v1  ;;  %v3118_v7 = vld [vmem:[%s4504_s4 + $0x8] sm:$0xff]   ;;  %v3119_v8 = vld [vmem:[%s4504_s4] sm:$0xff]   ;;  %v3124_v13 = vld [vmem:[%s4505_s0 + $0x10] sm:$0xff]  }
   0x4   :  { %2648 = vmatprep.subr.bf16.mxu0 %v4511_v0  ;;  %2764 = vmatprep.subr.bf16.mxu1 %v4511_v0  ;;  %v3120_v9 = vld [vmem:[%s4505_s0] sm:$0xff]   ;;  %v3122_v11 = vld [vmem:[%s4505_s0 + $0x8] sm:$0xff]   ;;  %v3125_v14 = vld [vmem:[%s4506_s1 + $0x10] sm:$0xff]  }
   0x5   :  { %v3121_v10 = vld [vmem:[%s4506_s1] sm:$0xff]   ;;  %v3123_v12 = vld [vmem:[%s4506_s1 + $0x8] sm:$0xff]   ;;  %v3126_v15 = vld [vmem:[%s4505_s0 + $0x18] sm:$0xff]  }
   0x6   :  { %v3127_v16 = vld [vmem:[%s4506_s1 + $0x18] sm:$0xff]   ;;  %v3128_v17 = vld [vmem:[%s4505_s0 + $0x20] sm:$0xff]   ;;  %v3130_v19 = vld [vmem:[%s4505_s0 + $0x28] sm:$0xff]  }
   0x7   :  { %2649 = vmatpush3.bf16.msra.mxu0 %v3113_v2  ;;  %2765 = vmatpush3.bf16.msra.mxu1 %v3113_v2  ;;  %v3129_v18 = vld [vmem:[%s4506_s1 + $0x20] sm:$0xff]   ;;  %v3131_v20 = vld [vmem:[%s4506_s1 + $0x28] sm:$0xff]   ;;  %v3132_v21 = vld [vmem:[%s4505_s0 + $0x30] sm:$0xff]  }
   0x8   :  { %2650 = vmatprep.subr.bf16.mxu0 %v4511_v0  ;;  %2766 = vmatprep.subr.bf16.mxu1 %v4511_v0  ;;  %v3133_v22 = vld [vmem:[%s4506_s1 + $0x30] sm:$0xff]   ;;  %v3134_v23 = vld [vmem:[%s4505_s0 + $0x38] sm:$0xff]   ;;  %v3136_v25 = vld [vmem:[%s4505_s0 + $0x40] sm:$0xff]  }
   0x9   :  { %v3135_v24 = vld [vmem:[%s4506_s1 + $0x38] sm:$0xff]   ;;  %v3137_v26 = vld [vmem:[%s4506_s1 + $0x40] sm:$0xff]   ;;  %v3138_v27 = vld [vmem:[%s4505_s0 + $0x48] sm:$0xff]  }
   0xa   :  { %v3139_v28 = vld [vmem:[%s4506_s1 + $0x48] sm:$0xff]   ;;  %v3140_v29 = vld [vmem:[%s4505_s0 + $0x50] sm:$0xff]   ;;  %v3142_v31 = vld [vmem:[%s4505_s0 + $0x58] sm:$0xff]  }
   0xb   :  { %2651 = vmatpush3.bf16.msra.mxu0 %v3114_v3  ;;  %2767 = vmatpush3.bf16.msra.mxu1 %v3114_v3  ;;  %v3141_v30 = vld [vmem:[%s4506_s1 + $0x50] sm:$0xff]   ;;  %v3143_v32 = vld [vmem:[%s4506_s1 + $0x58] sm:$0xff]   ;;  %v3144_v33 = vld [vmem:[%s4505_s0 + $0x60] sm:$0xff]  }
   0xc   :  { %2652 = vmatprep.subr.bf16.mxu0 %v4511_v0  ;;  %2768 = vmatprep.subr.bf16.mxu1 %v4511_v0  ;;  %v3145_v34 = vld [vmem:[%s4506_s1 + $0x60] sm:$0xff]   ;;  %v3146_v35 = vld [vmem:[%s4505_s0 + $0x68] sm:$0xff]   ;;  %v3148_v37 = vld [vmem:[%s4505_s0 + $0x70] sm:$0xff]  }
   0xd   :  { %v3147_v36 = vld [vmem:[%s4506_s1 + $0x68] sm:$0xff]   ;;  %v3149_v38 = vld [vmem:[%s4506_s1 + $0x70] sm:$0xff]   ;;  %v3150_v39 = vld [vmem:[%s4505_s0 + $0x78] sm:$0xff]  }
   0xe   :  { %v3151_v40 = vld [vmem:[%s4506_s1 + $0x78] sm:$0xff]   ;;  %v3152_v41 = vld [vmem:[%s4505_s0 + $0x80] sm:$0xff]   ;;  %v3154_v43 = vld [vmem:[%s4505_s0 + $0x88] sm:$0xff]  }
   0xf   :  { %2653 = vmatpush3.bf16.msra.mxu0 %v3115_v4  ;;  %2769 = vmatpush3.bf16.msra.mxu1 %v3115_v4  ;;  %v3153_v42 = vld [vmem:[%s4506_s1 + $0x80] sm:$0xff]   ;;  %v3155_v44 = vld [vmem:[%s4506_s1 + $0x88] sm:$0xff]   ;;  %v3156_v45 = vld [vmem:[%s4505_s0 + $0x90] sm:$0xff]  }
  0x10   :  { %2654 = vmatprep.subr.bf16.mxu0 %v4511_v0  ;;  %2770 = vmatprep.subr.bf16.mxu1 %v4511_v0  ;;  %v3157_v46 = vld [vmem:[%s4506_s1 + $0x90] sm:$0xff]   ;;  %v3158_v47 = vld [vmem:[%s4505_s0 + $0x98] sm:$0xff]   ;;  %v3160_v49 = vld [vmem:[%s4505_s0 + $0xa0] sm:$0xff]  }
  0x11   :  { %v3159_v48 = vld [vmem:[%s4506_s1 + $0x98] sm:$0xff]   ;;  %v3161_v50 = vld [vmem:[%s4506_s1 + $0xa0] sm:$0xff]   ;;  %v3162_v51 = vld [vmem:[%s4505_s0 + $0xa8] sm:$0xff]  }
  0x12   :  { %v3163_v52 = vld [vmem:[%s4506_s1 + $0xa8] sm:$0xff]   ;;  %v3164_v53 = vld [vmem:[%s4505_s0 + $0xb0] sm:$0xff]   ;;  %v3166_v55 = vld [vmem:[%s4505_s0 + $0xb8] sm:$0xff]  }
  0x13   :  { %2655 = vmatpush3.bf16.msra.mxu0 %v3116_v5  ;;  %2771 = vmatpush3.bf16.msra.mxu1 %v3116_v5  ;;  %v3165_v54 = vld [vmem:[%s4506_s1 + $0xb0] sm:$0xff]   ;;  %v3167_v56 = vld [vmem:[%s4506_s1 + $0xb8] sm:$0xff]   ;;  %v3168_v57 = vld [vmem:[%s4505_s0 + $0xc0] ss:$0 sps:$4 sm:$0xff]  }
  0x14   :  { %2656 = vmatprep.subr.bf16.mxu0 %v4511_v0  ;;  %2772 = vmatprep.subr.bf16.mxu1 %v4511_v0  ;;  %v3169_v58 = vld [vmem:[%s4506_s1 + $0xc0] ss:$0 sps:$4 sm:$0xff]  }
  0x17   :  { %2657 = vmatpush3.bf16.msra.mxu0 %v3117_v6  ;;  %2773 = vmatpush3.bf16.msra.mxu1 %v3117_v6 }
  0x18   :  { %2658 = vmatprep.subr.bf16.mxu0 %v4511_v0  ;;  %2774 = vmatprep.subr.bf16.mxu1 %v4511_v0 }
  0x1b   :  { %2659 = vmatpush3.bf16.msra.mxu0 %v3118_v7  ;;  %2775 = vmatpush3.bf16.msra.mxu1 %v3118_v7 }
  0x1c   :  { %2660 = vmatprep.subr.bf16.mxu0 %v4511_v0  ;;  %2776 = vmatprep.subr.bf16.mxu1 %v4511_v0 }
  0x1f   :  { %2661 = vmatpush3.bf16.msra.mxu0 %v3119_v8  ;;  %2777 = vmatpush3.bf16.msra.mxu1 %v3119_v8 }
  0x20   :  { %2878 = vmatprep.subr.bf16.mxu0 %v4511_v0  ;;  %2994 = vmatprep.subr.bf16.mxu1 %v4511_v0 }
  0x22   :  { %2663 = vmatmul.mubr.bf16.vlgmr.msra.gmra.mxu0 %v3120_v9  ;;  %2779 = vmatmul.mubr.bf16.vlgmr.msra.gmra.mxu1 %v3121_v10 }
  0x23   :  { %2879 = vmatpush3.bf16.msra.mxu0 %v3112_v1  ;;  %2995 = vmatpush3.bf16.msra.mxu1 %v3112_v1 }
  0x24   :  { %2666 = vmatprep.mubr.msk.bf16.mxu0 %vm3221_vm0, %v4511_v0  ;;  %2782 = vmatprep.mubr.msk.bf16.mxu1 %vm3221_vm0, %v4511_v0 }
  0x25   :  { %2880 = vmatprep.subr.bf16.mxu0 %v4511_v0  ;;  %2996 = vmatprep.subr.bf16.mxu1 %v4511_v0 }
  0x27   :  { %2881 = vmatpush3.bf16.msra.mxu0 %v3113_v2  ;;  %2997 = vmatpush3.bf16.msra.mxu1 %v3113_v2 }
  0x28   :  { %2882 = vmatprep.subr.bf16.mxu0 %v4511_v0  ;;  %2998 = vmatprep.subr.bf16.mxu1 %v4511_v0 }
  0x2a   :  { %2667 = vmatmul.mubr.bf16.gmra.mxu0 %v3122_v11  ;;  %2783 = vmatmul.mubr.bf16.gmra.mxu1 %v3123_v12 }
  0x2b   :  { %2670 = vmatprep.mubr.msk.bf16.mxu0 %vm3221_vm0, %v4511_v0  ;;  %2786 = vmatprep.mubr.msk.bf16.mxu1 %vm3221_vm0, %v4511_v0 }
  0x2c   :  { %2883 = vmatpush3.bf16.msra.mxu0 %v3114_v3  ;;  %2999 = vmatpush3.bf16.msra.mxu1 %v3114_v3  ;;  %v3170_v3 = vld [vmem:[%s4507_s2] sm:$0xff]  }
  0x2d   :  { %2884 = vmatprep.subr.bf16.mxu0 %v4511_v0  ;;  %3000 = vmatprep.subr.bf16.mxu1 %v4511_v0 }
  0x30   :  { %2885 = vmatpush3.bf16.msra.mxu0 %v3115_v4  ;;  %3001 = vmatpush3.bf16.msra.mxu1 %v3115_v4  ;;  %v3171_v4 = vld [vmem:[%s4508_s3] sm:$0xff]  }
  0x31   :  { %2886 = vmatprep.subr.bf16.mxu0 %v4511_v0  ;;  %3002 = vmatprep.subr.bf16.mxu1 %v4511_v0 }
  0x32   :  { %2671 = vmatmul.mubr.bf16.gmra.mxu0 %v3124_v13  ;;  %2787 = vmatmul.mubr.bf16.gmra.mxu1 %v3125_v14 }
  0x33   :  { %2674 = vmatprep.mubr.msk.bf16.mxu0 %vm3221_vm0, %v4511_v0  ;;  %2790 = vmatprep.mubr.msk.bf16.mxu1 %vm3221_vm0, %v4511_v0 }
  0x34   :  { %2887 = vmatpush3.bf16.msra.mxu0 %v3116_v5  ;;  %3003 = vmatpush3.bf16.msra.mxu1 %v3116_v5 }
  0x35   :  { %2888 = vmatprep.subr.bf16.mxu0 %v4511_v0  ;;  %3004 = vmatprep.subr.bf16.mxu1 %v4511_v0 }
  0x38   :  { %2889 = vmatpush3.bf16.msra.mxu0 %v3117_v6  ;;  %3005 = vmatpush3.bf16.msra.mxu1 %v3117_v6 }
  0x39   :  { %2890 = vmatprep.subr.bf16.mxu0 %v4511_v0  ;;  %3006 = vmatprep.subr.bf16.mxu1 %v4511_v0 }
  0x3a   :  { %2675 = vmatmul.mubr.bf16.gmra.mxu0 %v3126_v15  ;;  %2791 = vmatmul.mubr.bf16.gmra.mxu1 %v3127_v16  ;;  %v3172_v15 = vld [vmem:[%s4507_s2 + $0x8] sm:$0xff]  }
  0x3b   :  { %2678 = vmatprep.mubr.msk.bf16.mxu0 %vm3221_vm0, %v4511_v0  ;;  %2794 = vmatprep.mubr.msk.bf16.mxu1 %vm3221_vm0, %v4511_v0  ;;  %v3173_v16 = vld [vmem:[%s4508_s3 + $0x8] sm:$0xff]  }
  0x3c   :  { %2891 = vmatpush3.bf16.msra.mxu0 %v3118_v7  ;;  %3007 = vmatpush3.bf16.msra.mxu1 %v3118_v7 }
  0x3d   :  { %2892 = vmatprep.subr.bf16.mxu0 %v4511_v0  ;;  %3008 = vmatprep.subr.bf16.mxu1 %v4511_v0 }
  0x40   :  { %2893 = vmatpush3.bf16.msra.mxu0 %v3119_v8  ;;  %3009 = vmatpush3.bf16.msra.mxu1 %v3119_v8 }
  0x42   :  { %2679 = vmatmul.mubr.bf16.gmra.mxu0 %v3128_v17  ;;  %2795 = vmatmul.mubr.bf16.gmra.mxu1 %v3129_v18 }
  0x43   :  { %2682 = vmatprep.mubr.msk.bf16.mxu0 %vm3221_vm0, %v4511_v0  ;;  %2798 = vmatprep.mubr.msk.bf16.mxu1 %vm3221_vm0, %v4511_v0 }
  0x4a   :  { %2683 = vmatmul.mubr.bf16.gmra.mxu0 %v3130_v19  ;;  %2799 = vmatmul.mubr.bf16.gmra.mxu1 %v3131_v20 }
  0x4b   :  { %2686 = vmatprep.mubr.msk.bf16.mxu0 %vm3221_vm0, %v4511_v0  ;;  %2802 = vmatprep.mubr.msk.bf16.mxu1 %vm3221_vm0, %v4511_v0 }
  0x52   :  { %2687 = vmatmul.mubr.bf16.gmra.mxu0 %v3132_v21  ;;  %2803 = vmatmul.mubr.bf16.gmra.mxu1 %v3133_v22 }
  0x53   :  { %2690 = vmatprep.mubr.msk.bf16.mxu0 %vm3221_vm0, %v4511_v0  ;;  %2806 = vmatprep.mubr.msk.bf16.mxu1 %vm3221_vm0, %v4511_v0 }
  0x5a   :  { %2691 = vmatmul.mubr.bf16.gmra.mxu0 %v3134_v23  ;;  %2807 = vmatmul.mubr.bf16.gmra.mxu1 %v3135_v24 }
  0x5b   :  { %2694 = vmatprep.mubr.msk.bf16.mxu0 %vm3221_vm0, %v4511_v0  ;;  %2810 = vmatprep.mubr.msk.bf16.mxu1 %vm3221_vm0, %v4511_v0 }
  0x62   :  { %2695 = vmatmul.mubr.bf16.gmra.mxu0 %v3136_v25  ;;  %2811 = vmatmul.mubr.bf16.gmra.mxu1 %v3137_v26 }
  0x63   :  { %2698 = vmatprep.mubr.msk.bf16.mxu0 %vm3221_vm0, %v4511_v0  ;;  %2814 = vmatprep.mubr.msk.bf16.mxu1 %vm3221_vm0, %v4511_v0 }
  0x6a   :  { %2699 = vmatmul.mubr.bf16.gmra.mxu0 %v3138_v27  ;;  %2815 = vmatmul.mubr.bf16.gmra.mxu1 %v3139_v28  ;;  %v3174_v27 = vld [vmem:[%s4507_s2 + $0x10] sm:$0xff]  }
  0x6b   :  { %2702 = vmatprep.mubr.msk.bf16.mxu0 %vm3221_vm0, %v4511_v0  ;;  %2818 = vmatprep.mubr.msk.bf16.mxu1 %vm3221_vm0, %v4511_v0  ;;  %v3175_v28 = vld [vmem:[%s4508_s3 + $0x10] sm:$0xff]  }
  0x72   :  { %2703 = vmatmul.mubr.bf16.gmra.mxu0 %v3140_v29  ;;  %2819 = vmatmul.mubr.bf16.gmra.mxu1 %v3141_v30 }
  0x73   :  { %2706 = vmatprep.mubr.msk.bf16.mxu0 %vm3221_vm0, %v4511_v0  ;;  %2822 = vmatprep.mubr.msk.bf16.mxu1 %vm3221_vm0, %v4511_v0 }
  0x7a   :  { %2707 = vmatmul.mubr.bf16.gmra.mxu0 %v3142_v31  ;;  %2823 = vmatmul.mubr.bf16.gmra.mxu1 %v3143_v32 }
  0x7b   :  { %2710 = vmatprep.mubr.msk.bf16.mxu0 %vm3221_vm0, %v4511_v0  ;;  %2826 = vmatprep.mubr.msk.bf16.mxu1 %vm3221_vm0, %v4511_v0 }
  0x82   :  { %2711 = vmatmul.mubr.bf16.gmra.mxu0 %v3144_v33  ;;  %2827 = vmatmul.mubr.bf16.gmra.mxu1 %v3145_v34 }
  0x83   :  { %2714 = vmatprep.mubr.msk.bf16.mxu0 %vm3221_vm0, %v4511_v0  ;;  %2830 = vmatprep.mubr.msk.bf16.mxu1 %vm3221_vm0, %v4511_v0 }
  0x8a   :  { %2715 = vmatmul.mubr.bf16.gmra.mxu0 %v3146_v35  ;;  %2831 = vmatmul.mubr.bf16.gmra.mxu1 %v3147_v36 }
  0x8b   :  { %2718 = vmatprep.mubr.msk.bf16.mxu0 %vm3221_vm0, %v4511_v0  ;;  %2834 = vmatprep.mubr.msk.bf16.mxu1 %vm3221_vm0, %v4511_v0 }
  0x92   :  { %2719 = vmatmul.mubr.bf16.gmra.mxu0 %v3148_v37  ;;  %2835 = vmatmul.mubr.bf16.gmra.mxu1 %v3149_v38 }
  0x93   :  { %2722 = vmatprep.mubr.msk.bf16.mxu0 %vm3221_vm0, %v4511_v0  ;;  %2838 = vmatprep.mubr.msk.bf16.mxu1 %vm3221_vm0, %v4511_v0 }
  0x9a   :  { %2723 = vmatmul.mubr.bf16.gmra.mxu0 %v3150_v39  ;;  %2839 = vmatmul.mubr.bf16.gmra.mxu1 %v3151_v40  ;;  %v3176_v39 = vld [vmem:[%s4507_s2 + $0x18] sm:$0xff]  }
  0x9b   :  { %2726 = vmatprep.mubr.msk.bf16.mxu0 %vm3221_vm0, %v4511_v0  ;;  %2842 = vmatprep.mubr.msk.bf16.mxu1 %vm3221_vm0, %v4511_v0  ;;  %v3177_v40 = vld [vmem:[%s4508_s3 + $0x18] sm:$0xff]  }
  0xa2   :  { %2727 = vmatmul.mubr.bf16.gmra.mxu0 %v3152_v41  ;;  %2843 = vmatmul.mubr.bf16.gmra.mxu1 %v3153_v42 }
  0xa3   :  { %2730 = vmatprep.mubr.msk.bf16.mxu0 %vm3221_vm0, %v4511_v0  ;;  %2846 = vmatprep.mubr.msk.bf16.mxu1 %vm3221_vm0, %v4511_v0 }
  0xaa   :  { %2731 = vmatmul.mubr.bf16.gmra.mxu0 %v3154_v43  ;;  %2847 = vmatmul.mubr.bf16.gmra.mxu1 %v3155_v44 }
  0xab   :  { %2734 = vmatprep.mubr.msk.bf16.mxu0 %vm3221_vm0, %v4511_v0  ;;  %2850 = vmatprep.mubr.msk.bf16.mxu1 %vm3221_vm0, %v4511_v0 }
  0xb2   :  { %2735 = vmatmul.mubr.bf16.gmra.mxu0 %v3156_v45  ;;  %2851 = vmatmul.mubr.bf16.gmra.mxu1 %v3157_v46 }
  0xb3   :  { %2738 = vmatprep.mubr.msk.bf16.mxu0 %vm3221_vm0, %v4511_v0  ;;  %2854 = vmatprep.mubr.msk.bf16.mxu1 %vm3221_vm0, %v4511_v0 }
  0xba   :  { %2739 = vmatmul.mubr.bf16.gmra.mxu0 %v3158_v47  ;;  %2855 = vmatmul.mubr.bf16.gmra.mxu1 %v3159_v48 }
  0xbb   :  { %2742 = vmatprep.mubr.msk.bf16.mxu0 %vm3221_vm0, %v4511_v0  ;;  %2858 = vmatprep.mubr.msk.bf16.mxu1 %vm3221_vm0, %v4511_v0 }
  0xc2   :  { %2743 = vmatmul.mubr.bf16.gmra.mxu0 %v3160_v49  ;;  %2859 = vmatmul.mubr.bf16.gmra.mxu1 %v3161_v50 }
  0xc3   :  { %2746 = vmatprep.mubr.msk.bf16.mxu0 %vm3221_vm0, %v4511_v0  ;;  %2862 = vmatprep.mubr.msk.bf16.mxu1 %vm3221_vm0, %v4511_v0 }
  0xca   :  { %2747 = vmatmul.mubr.bf16.gmra.mxu0 %v3162_v51  ;;  %2863 = vmatmul.mubr.bf16.gmra.mxu1 %v3163_v52  ;;  %v3178_v51 = vld [vmem:[%s4507_s2 + $0x20] sm:$0xff]  }
  0xcb   :  { %2750 = vmatprep.mubr.msk.bf16.mxu0 %vm3221_vm0, %v4511_v0  ;;  %2866 = vmatprep.mubr.msk.bf16.mxu1 %vm3221_vm0, %v4511_v0  ;;  %v3179_v52 = vld [vmem:[%s4508_s3 + $0x20] sm:$0xff]  }
  0xd2   :  { %2751 = vmatmul.mubr.bf16.gmra.mxu0 %v3164_v53  ;;  %2867 = vmatmul.mubr.bf16.gmra.mxu1 %v3165_v54 }
  0xd3   :  { %2754 = vmatprep.mubr.msk.bf16.mxu0 %vm3221_vm0, %v4511_v0  ;;  %2870 = vmatprep.mubr.msk.bf16.mxu1 %vm3221_vm0, %v4511_v0 }
  0xda   :  { %2755 = vmatmul.mubr.bf16.gmra.mxu0 %v3166_v55  ;;  %2871 = vmatmul.mubr.bf16.gmra.mxu1 %v3167_v56 }
  0xdb   :  { %2758 = vmatprep.mubr.msk.bf16.mxu0 %vm3221_vm0, %v4511_v0  ;;  %2874 = vmatprep.mubr.msk.bf16.mxu1 %vm3221_vm0, %v4511_v0 }
  0xe2   :  { %v3563_v59 = vpop.f32.mrf.mxu0  ;;  %2759 = vmatmul.mubr.bf16.gmra.mxu0 %v3168_v57  ;;  %v3565_v60 = vpop.f32.mrf.mxu1  ;;  %2875 = vmatmul.mubr.bf16.gmra.mxu1 %v3169_v58 }
  0xe3   :  { %2894 = vmatprep.mubr.msk.bf16.mxu0 %vm3221_vm0, %v4511_v0  ;;  %3010 = vmatprep.mubr.msk.bf16.mxu1 %vm3221_vm0, %v4511_v0 }
  0xe4   :  { %v2664_v62 = vpop.f32.mrf.mxu0  ;;  %v2780_v63 = vpop.f32.mrf.mxu1 }
  0xe6   :  { %v3573_v1 = vpop.f32.mrf.mxu0  ;;  %v3575_v2 = vpop.f32.mrf.mxu1 }
  0xe8   :  { %v2665_v6 = vpop.f32.mrf.mxu0  ;;  %v2781_v7 = vpop.f32.mrf.mxu1 }
  0xe9   :  { %v3180_v6 = vld [vmem:[%s4507_s2 + $0x28] sm:$0xff]  }
  0xea   :  { %v3585_v8 = vpop.f32.mrf.mxu0  ;;  %v3587_v9 = vpop.f32.mrf.mxu1  ;;  %2895 = vmatmul.mubr.bf16.vlgmr.msra.gmra.mxu0 %v3170_v3  ;;  %3011 = vmatmul.mubr.bf16.vlgmr.msra.gmra.mxu1 %v3171_v4  ;;  %v3181_v7 = vld [vmem:[%s4508_s3 + $0x28] sm:$0xff]  }
  0xeb   :  { %2898 = vmatprep.mubr.msk.bf16.mxu0 %vm3221_vm0, %v4511_v0  ;;  %3014 = vmatprep.mubr.msk.bf16.mxu1 %vm3221_vm0, %v4511_v0 }
  0xec   :  { %v2668_v11 = vpop.f32.mrf.mxu0  ;;  %v2784_v12 = vpop.f32.mrf.mxu1 }
  0xee   :  { %v3595_v13 = vpop.f32.mrf.mxu0  ;;  %v3597_v14 = vpop.f32.mrf.mxu1 }
  0xf0   :  { %v2669_v18 = vpop.f32.mrf.mxu0  ;;  %v2785_v19 = vpop.f32.mrf.mxu1 }
  0xf2   :  { %v3607_v20 = vpop.f32.mrf.mxu0  ;;  %v3609_v21 = vpop.f32.mrf.mxu1  ;;  %2899 = vmatmul.mubr.bf16.gmra.mxu0 %v3172_v15  ;;  %3015 = vmatmul.mubr.bf16.gmra.mxu1 %v3173_v16 }
  0xf3   :  { %2902 = vmatprep.mubr.msk.bf16.mxu0 %vm3221_vm0, %v4511_v0  ;;  %3018 = vmatprep.mubr.msk.bf16.mxu1 %vm3221_vm0, %v4511_v0 }
  0xf4   :  { %v2672_v23 = vpop.f32.mrf.mxu0  ;;  %v2788_v24 = vpop.f32.mrf.mxu1 }
  0xf6   :  { %v3617_v25 = vpop.f32.mrf.mxu0  ;;  %v3619_v26 = vpop.f32.mrf.mxu1 }
  0xf8   :  { %v2673_v30 = vpop.f32.mrf.mxu0  ;;  %v2789_v31 = vpop.f32.mrf.mxu1 }
  0xf9   :  { %v3182_v30 = vld [vmem:[%s4507_s2 + $0x30] sm:$0xff]  }
  0xfa   :  { %v3629_v32 = vpop.f32.mrf.mxu0  ;;  %v3631_v33 = vpop.f32.mrf.mxu1  ;;  %2903 = vmatmul.mubr.bf16.gmra.mxu0 %v3174_v27  ;;  %3019 = vmatmul.mubr.bf16.gmra.mxu1 %v3175_v28  ;;  %v3183_v31 = vld [vmem:[%s4508_s3 + $0x30] sm:$0xff]  }
  0xfb   :  { %2906 = vmatprep.mubr.msk.bf16.mxu0 %vm3221_vm0, %v4511_v0  ;;  %3022 = vmatprep.mubr.msk.bf16.mxu1 %vm3221_vm0, %v4511_v0 }
  0xfc   :  { %v2676_v35 = vpop.f32.mrf.mxu0  ;;  %v2792_v36 = vpop.f32.mrf.mxu1 }
  0xfe   :  { %v3639_v37 = vpop.f32.mrf.mxu0  ;;  %v3641_v38 = vpop.f32.mrf.mxu1 }
 0x100   :  { %v2677_v42 = vpop.f32.mrf.mxu0  ;;  %v2793_v43 = vpop.f32.mrf.mxu1 }
 0x102   :  { %v3651_v44 = vpop.f32.mrf.mxu0  ;;  %v3653_v45 = vpop.f32.mrf.mxu1  ;;  %2907 = vmatmul.mubr.bf16.gmra.mxu0 %v3176_v39  ;;  %3023 = vmatmul.mubr.bf16.gmra.mxu1 %v3177_v40 }
 0x103   :  { %2910 = vmatprep.mubr.msk.bf16.mxu0 %vm3221_vm0, %v4511_v0  ;;  %3026 = vmatprep.mubr.msk.bf16.mxu1 %vm3221_vm0, %v4511_v0 }
 0x104   :  { %v2680_v47 = vpop.f32.mrf.mxu0  ;;  %v2796_v48 = vpop.f32.mrf.mxu1 }
 0x106   :  { %v3661_v49 = vpop.f32.mrf.mxu0  ;;  %v3663_v50 = vpop.f32.mrf.mxu1 }
 0x108   :  { %v2681_v54 = vpop.f32.mrf.mxu0  ;;  %v2797_v55 = vpop.f32.mrf.mxu1 }
 0x109   :  { %v3184_v54 = vld [vmem:[%s4507_s2 + $0x38] sm:$0xff]  }
 0x10a   :  { %v3673_v56 = vpop.f32.mrf.mxu0  ;;  %v3675_v57 = vpop.f32.mrf.mxu1  ;;  %2911 = vmatmul.mubr.bf16.gmra.mxu0 %v3178_v51  ;;  %3027 = vmatmul.mubr.bf16.gmra.mxu1 %v3179_v52  ;;  %v3185_v55 = vld [vmem:[%s4508_s3 + $0x38] sm:$0xff]  }
 0x10b   :  { %2914 = vmatprep.mubr.msk.bf16.mxu0 %vm3221_vm0, %v4511_v0  ;;  %3030 = vmatprep.mubr.msk.bf16.mxu1 %vm3221_vm0, %v4511_v0 }
 0x10c   :  { %v2684_v62 = vpop.f32.mrf.mxu0  ;;  %v2800_v63 = vpop.f32.mrf.mxu1 }
 0x10e   :  { %v3683_v3 = vpop.f32.mrf.mxu0  ;;  %v3685_v4 = vpop.f32.mrf.mxu1 }
 0x110   :  { %v2685_v12 = vpop.f32.mrf.mxu0  ;;  %v2801_v15 = vpop.f32.mrf.mxu1 }
 0x112   :  { %v3695_v16 = vpop.f32.mrf.mxu0  ;;  %v3697_v18 = vpop.f32.mrf.mxu1  ;;  %2915 = vmatmul.mubr.bf16.gmra.mxu0 %v3180_v6  ;;  %3031 = vmatmul.mubr.bf16.gmra.mxu1 %v3181_v7 }
 0x113   :  { %2918 = vmatprep.mubr.msk.bf16.mxu0 %vm3221_vm0, %v4511_v0  ;;  %3034 = vmatprep.mubr.msk.bf16.mxu1 %vm3221_vm0, %v4511_v0 }
 0x114   :  { %v2688_v23 = vpop.f32.mrf.mxu0  ;;  %v2804_v24 = vpop.f32.mrf.mxu1 }
 0x116   :  { %v3705_v27 = vpop.f32.mrf.mxu0  ;;  %v3707_v28 = vpop.f32.mrf.mxu1 }
 0x118   :  { %v2689_v36 = vpop.f32.mrf.mxu0  ;;  %v2805_v39 = vpop.f32.mrf.mxu1 }
 0x119   :  { %v3186_v36 = vld [vmem:[%s4507_s2 + $0x40] sm:$0xff]  }
 0x11a   :  { %v3717_v40 = vpop.f32.mrf.mxu0  ;;  %v3719_v42 = vpop.f32.mrf.mxu1  ;;  %2919 = vmatmul.mubr.bf16.gmra.mxu0 %v3182_v30  ;;  %3035 = vmatmul.mubr.bf16.gmra.mxu1 %v3183_v31  ;;  %v3187_v39 = vld [vmem:[%s4508_s3 + $0x40] sm:$0xff]  }
 0x11b   :  { %2922 = vmatprep.mubr.msk.bf16.mxu0 %vm3221_vm0, %v4511_v0  ;;  %3038 = vmatprep.mubr.msk.bf16.mxu1 %vm3221_vm0, %v4511_v0 }
 0x11c   :  { %v2692_v47 = vpop.f32.mrf.mxu0  ;;  %v2808_v48 = vpop.f32.mrf.mxu1 }
 0x11e   :  { %v3727_v51 = vpop.f32.mrf.mxu0  ;;  %v3729_v52 = vpop.f32.mrf.mxu1 }
 0x120   :  { %v2693_v63 = vpop.f32.mrf.mxu0  ;;  %v2809_v6 = vpop.f32.mrf.mxu1 }
 0x122   :  { %v3739_v7 = vpop.f32.mrf.mxu0  ;;  %v3741_v12 = vpop.f32.mrf.mxu1  ;;  %2923 = vmatmul.mubr.bf16.gmra.mxu0 %v3184_v54  ;;  %3039 = vmatmul.mubr.bf16.gmra.mxu1 %v3185_v55 }
 0x123   :  { %2926 = vmatprep.mubr.msk.bf16.mxu0 %vm3221_vm0, %v4511_v0  ;;  %3042 = vmatprep.mubr.msk.bf16.mxu1 %vm3221_vm0, %v4511_v0 }
 0x124   :  { %v2696_v23 = vpop.f32.mrf.mxu0  ;;  %v2812_v24 = vpop.f32.mrf.mxu1 }
 0x126   :  { %v3749_v30 = vpop.f32.mrf.mxu0  ;;  %v3751_v31 = vpop.f32.mrf.mxu1 }
 0x128   :  { %v2697_v48 = vpop.f32.mrf.mxu0  ;;  %v2813_v54 = vpop.f32.mrf.mxu1 }
 0x12a   :  { %v3761_v55 = vpop.f32.mrf.mxu0  ;;  %v3763_v63 = vpop.f32.mrf.mxu1  ;;  %2927 = vmatmul.mubr.bf16.gmra.mxu0 %v3186_v36  ;;  %3043 = vmatmul.mubr.bf16.gmra.mxu1 %v3187_v39  ;;  %v3188_v36 = vld [vmem:[%s4507_s2 + $0x48] sm:$0xff]  }
 0x12b   :  { %2930 = vmatprep.mubr.msk.bf16.mxu0 %vm3221_vm0, %v4511_v0  ;;  %3046 = vmatprep.mubr.msk.bf16.mxu1 %vm3221_vm0, %v4511_v0  ;;  %v3189_v39 = vld [vmem:[%s4508_s3 + $0x48] sm:$0xff]  }
 0x12c   :  { %v2700_v23 = vpop.f32.mrf.mxu0  ;;  %v2816_v24 = vpop.f32.mrf.mxu1 }
 0x12e   :  { %v3771_v47 = vpop.f32.mrf.mxu0  ;;  %v3773_v48 = vpop.f32.mrf.mxu1 }
 0x130   :  { %v2701_v6 = vpop.f32.mrf.mxu0  ;;  %v2817_v15 = vpop.f32.mrf.mxu1 }
 0x131   :  { %v3190_v6 = vld [vmem:[%s4507_s2 + $0x50] sm:$0xff]  }
 0x132   :  { %v3783_v62 = vpop.f32.mrf.mxu0  ;;  %v3785_v23 = vpop.f32.mrf.mxu1  ;;  %2931 = vmatmul.mubr.bf16.gmra.mxu0 %v3188_v36  ;;  %3047 = vmatmul.mubr.bf16.gmra.mxu1 %v3189_v39  ;;  %v3191_v36 = vld [vmem:[%s4508_s3 + $0x50] sm:$0xff]  }
 0x133   :  { %2934 = vmatprep.mubr.msk.bf16.mxu0 %vm3221_vm0, %v4511_v0  ;;  %3050 = vmatprep.mubr.msk.bf16.mxu1 %vm3221_vm0, %v4511_v0 }
 0x134   :  { %v2704_v43 = vpop.f32.mrf.mxu0  ;;  %v2820_v35 = vpop.f32.mrf.mxu1 }
 0x136   :  { %v3793_v54 = vpop.f32.mrf.mxu0  ;;  %v3795_v15 = vpop.f32.mrf.mxu1 }
 0x138   :  { %v2705_v24 = vpop.f32.mrf.mxu0  ;;  %v2821_v19 = vpop.f32.mrf.mxu1 }
 0x139   :  { %v3192_v24 = vld [vmem:[%s4507_s2 + $0x58] sm:$0xff]  }
 0x13a   :  { %v3805_v11 = vpop.f32.mrf.mxu0  ;;  %v3807_v35 = vpop.f32.mrf.mxu1  ;;  %2935 = vmatmul.mubr.bf16.gmra.mxu0 %v3190_v6  ;;  %3051 = vmatmul.mubr.bf16.gmra.mxu1 %v3191_v36  ;;  %v3193_v6 = vld [vmem:[%s4508_s3 + $0x58] sm:$0xff]  }
 0x13b   :  { %2938 = vmatprep.mubr.msk.bf16.mxu0 %vm3221_vm0, %v4511_v0  ;;  %3054 = vmatprep.mubr.msk.bf16.mxu1 %vm3221_vm0, %v4511_v0 }
 0x13c   :  { %v2708_v58 = vpop.f32.mrf.mxu0  ;;  %v2824_v53 = vpop.f32.mrf.mxu1 }
 0x13e   :  { %v3815_v39 = vpop.f32.mrf.mxu0  ;;  %v3817_v19 = vpop.f32.mrf.mxu1 }
 0x13f   :  { %4564 = vst [vmem:[#allocation2_spill] sm:$0xff] %v3817_v19 }
 0x140   :  { %v2709_v43 = vpop.f32.mrf.mxu0  ;;  %v2825_v46 = vpop.f32.mrf.mxu1 }
 0x141   :  { %v3194_v43 = vld [vmem:[%s4507_s2 + $0x60] sm:$0xff]  }
 0x142   :  { %v3827_v41 = vpop.f32.mrf.mxu0  ;;  %v3829_v53 = vpop.f32.mrf.mxu1  ;;  %2939 = vmatmul.mubr.bf16.gmra.mxu0 %v3192_v24  ;;  %3055 = vmatmul.mubr.bf16.gmra.mxu1 %v3193_v6  ;;  %v3195_v24 = vld [vmem:[%s4508_s3 + $0x60] sm:$0xff]  }
 0x143   :  { %4565 = vst [vmem:[#allocation3_spill] sm:$0xff] %v3827_v41  ;;  %4566 = vst [vmem:[#allocation4_spill] sm:$0xff] %v3829_v53  ;;  %2942 = vmatprep.mubr.msk.bf16.mxu0 %vm3221_vm0, %v4511_v0  ;;  %3058 = vmatprep.mubr.msk.bf16.mxu1 %vm3221_vm0, %v4511_v0 }
 0x144   :  { %v2712_v34 = vpop.f32.mrf.mxu0  ;;  %v2828_v29 = vpop.f32.mrf.mxu1 }
 0x146   :  { %v3837_v36 = vpop.f32.mrf.mxu0  ;;  %v3839_v46 = vpop.f32.mrf.mxu1 }
 0x147   :  { %4567 = vst [vmem:[#allocation5_spill] sm:$0xff] %v3837_v36  ;;  %4568 = vst [vmem:[#allocation6_spill] sm:$0xff] %v3839_v46 }
 0x148   :  { %v2713_v58 = vpop.f32.mrf.mxu0  ;;  %v2829_v22 = vpop.f32.mrf.mxu1 }
 0x149   :  { %v3196_v58 = vld [vmem:[%s4507_s2 + $0x68] sm:$0xff]  }
 0x14a   :  { %v3849_v17 = vpop.f32.mrf.mxu0  ;;  %v3851_v29 = vpop.f32.mrf.mxu1  ;;  %2943 = vmatmul.mubr.bf16.gmra.mxu0 %v3194_v43  ;;  %3059 = vmatmul.mubr.bf16.gmra.mxu1 %v3195_v24  ;;  %v3197_v43 = vld [vmem:[%s4508_s3 + $0x68] sm:$0xff]  }
 0x14b   :  { %4569 = vst [vmem:[#allocation7_spill] sm:$0xff] %v3849_v17  ;;  %4570 = vst [vmem:[#allocation8_spill] sm:$0xff] %v3851_v29  ;;  %2946 = vmatprep.mubr.msk.bf16.mxu0 %vm3221_vm0, %v4511_v0  ;;  %3062 = vmatprep.mubr.msk.bf16.mxu1 %vm3221_vm0, %v4511_v0  ;;  %v4575_v29 = vmov 0.0  }
 0x14c   :  { %v2716_v10 = vpop.f32.mrf.mxu0  ;;  %v2832_v5 = vpop.f32.mrf.mxu1 }
 0x14e   :  { %v3859_v6 = vpop.f32.mrf.mxu0  ;;  %v3861_v22 = vpop.f32.mrf.mxu1 }
 0x14f   :  { %4571 = vst [vmem:[#allocation9_spill] sm:$0xff] %v3859_v6  ;;  %4572 = vst [vmem:[#allocation10_spill] sm:$0xff] %v3861_v22 }
 0x150   :  { %v2717_v34 = vpop.f32.mrf.mxu0  ;;  %v2833_v61 = vpop.f32.mrf.mxu1 }
 0x151   :  { %v3198_v34 = vld [vmem:[%s4507_s2 + $0x70] sm:$0xff]  }
 0x152   :  { %v3871_v0 = vpop.f32.mrf.mxu0  ;;  %v3873_v5 = vpop.f32.mrf.mxu1  ;;  %2947 = vmatmul.mubr.bf16.gmra.mxu0 %v3196_v58  ;;  %3063 = vmatmul.mubr.bf16.gmra.mxu1 %v3197_v43  ;;  %v3199_v58 = vld [vmem:[%s4508_s3 + $0x70] sm:$0xff]  }
 0x153   :  { %4573 = vst [vmem:[#allocation11_spill] sm:$0xff] %v3871_v0  ;;  %4574 = vst [vmem:[#allocation12_spill] sm:$0xff] %v3873_v5  ;;  %2950 = vmatprep.mubr.msk.bf16.mxu0 %vm3221_vm0, %v4575_v29  ;;  %3066 = vmatprep.mubr.msk.bf16.mxu1 %vm3221_vm0, %v4575_v29 }
 0x154   :  { %v2720_v17 = vpop.f32.mrf.mxu0  ;;  %v2836_v46 = vpop.f32.mrf.mxu1 }
 0x156   :  { %v3881_v24 = vpop.f32.mrf.mxu0  ;;  %v3883_v61 = vpop.f32.mrf.mxu1 }
 0x157   :  { %4576 = vst [vmem:[#allocation13_spill] sm:$0xff] %v3881_v24  ;;  %4577 = vst [vmem:[#allocation14_spill] sm:$0xff] %v3883_v61 }
 0x158   :  { %v2721_v10 = vpop.f32.mrf.mxu0  ;;  %v2837_v5 = vpop.f32.mrf.mxu1 }
 0x159   :  { %v3200_v10 = vld [vmem:[%s4507_s2 + $0x78] sm:$0xff]  }
 0x15a   :  { %v3893_v0 = vpop.f32.mrf.mxu0  ;;  %v3895_v17 = vpop.f32.mrf.mxu1  ;;  %2951 = vmatmul.mubr.bf16.gmra.mxu0 %v3198_v34  ;;  %3067 = vmatmul.mubr.bf16.gmra.mxu1 %v3199_v58  ;;  %v3201_v34 = vld [vmem:[%s4508_s3 + $0x78] sm:$0xff]  }
 0x15b   :  { %4578 = vst [vmem:[#allocation15_spill] sm:$0xff] %v3893_v0  ;;  %4579 = vst [vmem:[#allocation16_spill] sm:$0xff] %v3895_v17  ;;  %2954 = vmatprep.mubr.msk.bf16.mxu0 %vm3221_vm0, %v4575_v29  ;;  %3070 = vmatprep.mubr.msk.bf16.mxu1 %vm3221_vm0, %v4575_v29 }
 0x15c   :  { %v2724_v22 = vpop.f32.mrf.mxu0  ;;  %v2840_v6 = vpop.f32.mrf.mxu1 }
 0x15e   :  { %v3903_v43 = vpop.f32.mrf.mxu0  ;;  %v3905_v5 = vpop.f32.mrf.mxu1 }
 0x15f   :  { %4580 = vst [vmem:[#allocation17_spill] sm:$0xff] %v3903_v43  ;;  %4581 = vst [vmem:[#allocation18_spill] sm:$0xff] %v3905_v5 }
 0x160   :  { %v2725_v46 = vpop.f32.mrf.mxu0  ;;  %v2841_v17 = vpop.f32.mrf.mxu1 }
 0x161   :  { %v3202_v46 = vld [vmem:[%s4507_s2 + $0x80] sm:$0xff]  }
 0x162   :  { %v3915_v0 = vpop.f32.mrf.mxu0  ;;  %v3917_v6 = vpop.f32.mrf.mxu1  ;;  %2955 = vmatmul.mubr.bf16.gmra.mxu0 %v3200_v10  ;;  %3071 = vmatmul.mubr.bf16.gmra.mxu1 %v3201_v34  ;;  %v3203_v10 = vld [vmem:[%s4508_s3 + $0x80] sm:$0xff]  }
 0x163   :  { %4582 = vst [vmem:[#allocation19_spill] sm:$0xff] %v3915_v0  ;;  %4583 = vst [vmem:[#allocation20_spill] sm:$0xff] %v3917_v6  ;;  %2958 = vmatprep.mubr.msk.bf16.mxu0 %vm3221_vm0, %v4575_v29  ;;  %3074 = vmatprep.mubr.msk.bf16.mxu1 %vm3221_vm0, %v4575_v29 }
 0x164   :  { %v2728_v61 = vpop.f32.mrf.mxu0  ;;  %v2844_v24 = vpop.f32.mrf.mxu1 }
 0x166   :  { %v3925_v58 = vpop.f32.mrf.mxu0  ;;  %v3927_v17 = vpop.f32.mrf.mxu1 }
 0x167   :  { %4584 = vst [vmem:[#allocation21_spill] sm:$0xff] %v3925_v58  ;;  %4585 = vst [vmem:[#allocation22_spill] sm:$0xff] %v3927_v17 }
 0x168   :  { %v2729_v22 = vpop.f32.mrf.mxu0  ;;  %v2845_v6 = vpop.f32.mrf.mxu1 }
 0x169   :  { %v3204_v22 = vld [vmem:[%s4507_s2 + $0x88] sm:$0xff]  }
 0x16a   :  { %v3937_v0 = vpop.f32.mrf.mxu0  ;;  %v3939_v24 = vpop.f32.mrf.mxu1  ;;  %2959 = vmatmul.mubr.bf16.gmra.mxu0 %v3202_v46  ;;  %3075 = vmatmul.mubr.bf16.gmra.mxu1 %v3203_v10  ;;  %v3205_v46 = vld [vmem:[%s4508_s3 + $0x88] sm:$0xff]  }
 0x16b   :  { %4586 = vst [vmem:[#allocation23_spill] sm:$0xff] %v3937_v0  ;;  %4587 = vst [vmem:[#allocation24_spill] sm:$0xff] %v3939_v24  ;;  %2962 = vmatprep.mubr.msk.bf16.mxu0 %vm3221_vm0, %v4575_v29  ;;  %3078 = vmatprep.mubr.msk.bf16.mxu1 %vm3221_vm0, %v4575_v29 }
 0x16c   :  { %v2732_v5 = vpop.f32.mrf.mxu0  ;;  %v2848_v43 = vpop.f32.mrf.mxu1 }
 0x16e   :  { %v3947_v34 = vpop.f32.mrf.mxu0  ;;  %v3949_v6 = vpop.f32.mrf.mxu1 }
 0x16f   :  { %4588 = vst [vmem:[#allocation25_spill] sm:$0xff] %v3947_v34  ;;  %4589 = vst [vmem:[#allocation26_spill] sm:$0xff] %v3949_v6 }
 0x170   :  { %v2733_v61 = vpop.f32.mrf.mxu0  ;;  %v2849_v24 = vpop.f32.mrf.mxu1 }
 0x171   :  { %v3206_v61 = vld [vmem:[%s4507_s2 + $0x90] sm:$0xff]  }
 0x172   :  { %v3959_v0 = vpop.f32.mrf.mxu0  ;;  %v3961_v43 = vpop.f32.mrf.mxu1  ;;  %2963 = vmatmul.mubr.bf16.gmra.mxu0 %v3204_v22  ;;  %3079 = vmatmul.mubr.bf16.gmra.mxu1 %v3205_v46  ;;  %v3207_v22 = vld [vmem:[%s4508_s3 + $0x90] sm:$0xff]  }
 0x173   :  { %4590 = vst [vmem:[#allocation27_spill] sm:$0xff] %v3959_v0  ;;  %4591 = vst [vmem:[#allocation28_spill] sm:$0xff] %v3961_v43  ;;  %2966 = vmatprep.mubr.msk.bf16.mxu0 %vm3221_vm0, %v4575_v29  ;;  %3082 = vmatprep.mubr.msk.bf16.mxu1 %vm3221_vm0, %v4575_v29 }
 0x174   :  { %v2736_v17 = vpop.f32.mrf.mxu0  ;;  %v2852_v58 = vpop.f32.mrf.mxu1 }
 0x176   :  { %v3969_v10 = vpop.f32.mrf.mxu0  ;;  %v3971_v24 = vpop.f32.mrf.mxu1 }
 0x177   :  { %4592 = vst [vmem:[#allocation29_spill] sm:$0xff] %v3969_v10  ;;  %4593 = vst [vmem:[#allocation30_spill] sm:$0xff] %v3971_v24 }
 0x178   :  { %v2737_v5 = vpop.f32.mrf.mxu0  ;;  %v2853_v43 = vpop.f32.mrf.mxu1 }
 0x179   :  { %v3208_v5 = vld [vmem:[%s4507_s2 + $0x98] sm:$0xff]  }
 0x17a   :  { %v3981_v0 = vpop.f32.mrf.mxu0  ;;  %v3983_v58 = vpop.f32.mrf.mxu1  ;;  %2967 = vmatmul.mubr.bf16.gmra.mxu0 %v3206_v61  ;;  %3083 = vmatmul.mubr.bf16.gmra.mxu1 %v3207_v22  ;;  %v3209_v61 = vld [vmem:[%s4508_s3 + $0x98] sm:$0xff]  }
 0x17b   :  { %4594 = vst [vmem:[#allocation31_spill] sm:$0xff] %v3981_v0  ;;  %4595 = vst [vmem:[#allocation32_spill] sm:$0xff] %v3983_v58  ;;  %2970 = vmatprep.mubr.msk.bf16.mxu0 %vm3221_vm0, %v4575_v29  ;;  %3086 = vmatprep.mubr.msk.bf16.mxu1 %vm3221_vm0, %v4575_v29 }
 0x17c   :  { %v2740_v6 = vpop.f32.mrf.mxu0  ;;  %v2856_v34 = vpop.f32.mrf.mxu1 }
 0x17e   :  { %v3991_v46 = vpop.f32.mrf.mxu0  ;;  %v3993_v43 = vpop.f32.mrf.mxu1 }
 0x17f   :  { %4596 = vst [vmem:[#allocation33_spill] sm:$0xff] %v3991_v46  ;;  %4597 = vst [vmem:[#allocation34_spill] sm:$0xff] %v3993_v43 }
 0x180   :  { %v2741_v17 = vpop.f32.mrf.mxu0  ;;  %v2857_v58 = vpop.f32.mrf.mxu1 }
 0x181   :  { %v3210_v17 = vld [vmem:[%s4507_s2 + $0xa0] sm:$0xff]  }
 0x182   :  { %v4003_v0 = vpop.f32.mrf.mxu0  ;;  %v4005_v34 = vpop.f32.mrf.mxu1  ;;  %2971 = vmatmul.mubr.bf16.gmra.mxu0 %v3208_v5  ;;  %3087 = vmatmul.mubr.bf16.gmra.mxu1 %v3209_v61  ;;  %v3211_v5 = vld [vmem:[%s4508_s3 + $0xa0] sm:$0xff]  }
 0x183   :  { %4598 = vst [vmem:[#allocation35_spill] sm:$0xff] %v4003_v0  ;;  %4599 = vst [vmem:[#allocation36_spill] sm:$0xff] %v4005_v34  ;;  %2974 = vmatprep.mubr.msk.bf16.mxu0 %vm3221_vm0, %v4575_v29  ;;  %3090 = vmatprep.mubr.msk.bf16.mxu1 %vm3221_vm0, %v4575_v29 }
 0x184   :  { %v2744_v24 = vpop.f32.mrf.mxu0  ;;  %v2860_v10 = vpop.f32.mrf.mxu1 }
 0x186   :  { %v4013_v22 = vpop.f32.mrf.mxu0  ;;  %v4015_v58 = vpop.f32.mrf.mxu1 }
 0x187   :  { %4600 = vst [vmem:[#allocation37_spill] sm:$0xff] %v4013_v22  ;;  %4601 = vst [vmem:[#allocation38_spill] sm:$0xff] %v4015_v58 }
 0x188   :  { %v2745_v6 = vpop.f32.mrf.mxu0  ;;  %v2861_v34 = vpop.f32.mrf.mxu1 }
 0x189   :  { %v3212_v6 = vld [vmem:[%s4507_s2 + $0xa8] sm:$0xff]  }
 0x18a   :  { %v4025_v0 = vpop.f32.mrf.mxu0  ;;  %v4027_v10 = vpop.f32.mrf.mxu1  ;;  %2975 = vmatmul.mubr.bf16.gmra.mxu0 %v3210_v17  ;;  %3091 = vmatmul.mubr.bf16.gmra.mxu1 %v3211_v5  ;;  %v3213_v17 = vld [vmem:[%s4508_s3 + $0xa8] sm:$0xff]  }
 0x18b   :  { %4602 = vst [vmem:[#allocation39_spill] sm:$0xff] %v4025_v0  ;;  %4603 = vst [vmem:[#allocation40_spill] sm:$0xff] %v4027_v10  ;;  %2978 = vmatprep.mubr.msk.bf16.mxu0 %vm3221_vm0, %v4575_v29  ;;  %3094 = vmatprep.mubr.msk.bf16.mxu1 %vm3221_vm0, %v4575_v29 }
 0x18c   :  { %v2748_v43 = vpop.f32.mrf.mxu0  ;;  %v2864_v46 = vpop.f32.mrf.mxu1 }
 0x18e   :  { %v4035_v61 = vpop.f32.mrf.mxu0  ;;  %v4037_v34 = vpop.f32.mrf.mxu1 }
 0x18f   :  { %4604 = vst [vmem:[#allocation41_spill] sm:$0xff] %v4035_v61  ;;  %4605 = vst [vmem:[#allocation42_spill] sm:$0xff] %v4037_v34 }
 0x190   :  { %v2749_v24 = vpop.f32.mrf.mxu0  ;;  %v2865_v10 = vpop.f32.mrf.mxu1 }
 0x191   :  { %v3214_v24 = vld [vmem:[%s4507_s2 + $0xb0] sm:$0xff]  }
 0x192   :  { %v4047_v0 = vpop.f32.mrf.mxu0  ;;  %v4049_v46 = vpop.f32.mrf.mxu1  ;;  %2979 = vmatmul.mubr.bf16.gmra.mxu0 %v3212_v6  ;;  %3095 = vmatmul.mubr.bf16.gmra.mxu1 %v3213_v17  ;;  %v3215_v6 = vld [vmem:[%s4508_s3 + $0xb0] sm:$0xff]  }
 0x193   :  { %4606 = vst [vmem:[#allocation43_spill] sm:$0xff] %v4047_v0  ;;  %4607 = vst [vmem:[#allocation44_spill] sm:$0xff] %v4049_v46  ;;  %2982 = vmatprep.mubr.msk.bf16.mxu0 %vm3221_vm0, %v4575_v29  ;;  %3098 = vmatprep.mubr.msk.bf16.mxu1 %vm3221_vm0, %v4575_v29 }
 0x194   :  { %v2752_v58 = vpop.f32.mrf.mxu0  ;;  %v2868_v22 = vpop.f32.mrf.mxu1 }
 0x196   :  { %v4057_v5 = vpop.f32.mrf.mxu0  ;;  %v4059_v10 = vpop.f32.mrf.mxu1 }
 0x197   :  { %4608 = vst [vmem:[#allocation45_spill] sm:$0xff] %v4057_v5  ;;  %4609 = vst [vmem:[#allocation46_spill] sm:$0xff] %v4059_v10 }
 0x198   :  { %v2753_v43 = vpop.f32.mrf.mxu0  ;;  %v2869_v46 = vpop.f32.mrf.mxu1 }
 0x199   :  { %v3216_v43 = vld [vmem:[%s4507_s2 + $0xb8] sm:$0xff]  }
 0x19a   :  { %v4069_v0 = vpop.f32.mrf.mxu0  ;;  %v4071_v22 = vpop.f32.mrf.mxu1  ;;  %2983 = vmatmul.mubr.bf16.gmra.mxu0 %v3214_v24  ;;  %3099 = vmatmul.mubr.bf16.gmra.mxu1 %v3215_v6  ;;  %v3217_v24 = vld [vmem:[%s4508_s3 + $0xb8] sm:$0xff]  }
 0x19b   :  { %4610 = vst [vmem:[#allocation47_spill] sm:$0xff] %v4069_v0  ;;  %4611 = vst [vmem:[#allocation48_spill] sm:$0xff] %v4071_v22  ;;  %2986 = vmatprep.mubr.msk.bf16.mxu0 %vm3221_vm0, %v4575_v29  ;;  %3102 = vmatprep.mubr.msk.bf16.mxu1 %vm3221_vm0, %v4575_v29 }
 0x19c   :  { %v2756_v34 = vpop.f32.mrf.mxu0  ;;  %v2872_v61 = vpop.f32.mrf.mxu1 }
 0x19e   :  { %v4079_v17 = vpop.f32.mrf.mxu0  ;;  %v4081_v46 = vpop.f32.mrf.mxu1 }
 0x19f   :  { %4612 = vst [vmem:[#allocation49_spill] sm:$0xff] %v4079_v17  ;;  %4613 = vst [vmem:[#allocation50_spill] sm:$0xff] %v4081_v46 }
 0x1a0   :  { %v2757_v58 = vpop.f32.mrf.mxu0  ;;  %v2873_v22 = vpop.f32.mrf.mxu1 }
 0x1a1   :  { %v3218_v22 = vld [vmem:[%s4507_s2 + $0xc0] ss:$0 sps:$4 sm:$0xff]  }
 0x1a2   :  { %v4091_v0 = vpop.f32.mrf.mxu0  ;;  %v4093_v61 = vpop.f32.mrf.mxu1  ;;  %2987 = vmatmul.mubr.bf16.gmra.mxu0 %v3216_v43  ;;  %3103 = vmatmul.mubr.bf16.gmra.mxu1 %v3217_v24  ;;  %v3219_v43 = vld [vmem:[%s4508_s3 + $0xc0] ss:$0 sps:$4 sm:$0xff]  }
 0x1a3   :  { %4614 = vst [vmem:[#allocation51_spill] sm:$0xff] %v4091_v0  ;;  %4615 = vst [vmem:[#allocation52_spill] sm:$0xff] %v4093_v61  ;;  %2990 = vmatprep.mubr.msk.bf16.mxu0 %vm3221_vm0, %v4575_v29  ;;  %3106 = vmatprep.mubr.msk.bf16.mxu1 %vm3221_vm0, %v4575_v29  ;;  %v4110_v29 = vld [vmem:[%s4509_s5] ss:$0 sm:$0xff] }
 0x1a4   :  { %v2760_v10 = vpop.f32.mrf.mxu0  ;;  %v2876_v5 = vpop.f32.mrf.mxu1 }
 0x1a6   :  { %v514_v6 = vpop.f32.mrf.mxu0  ;;  %v943_v58 = vpop.f32.mrf.mxu1 }
 0x1a7   :  { %v4616_v6 = vmax.f32 %v3563_v59, %v3565_v60 }
 0x1a8   :  { %v2761_v24 = vpop.f32.mrf.mxu0  ;;  %v2877_v34 = vpop.f32.mrf.mxu1 }
 0x1aa   :  { %v1177_v61 = vpop.f32.mrf.mxu0  ;;  %2991 = vmatmul.mubr.bf16.gmra.mxu0 %v3218_v22  ;;  %v1606_v0 = vpop.f32.mrf.mxu1  ;;  %3107 = vmatmul.mubr.bf16.gmra.mxu1 %v3219_v43 }
 0x1ab   :  { %v1853_v46 = vmax.f32 %v1177_v61, %v1606_v0  ;;  %v4617_v0 = vmax.f32 %v3573_v1, %v3575_v2 }
 0x1ac   :  { %v2896_v5 = vpop.f32.mrf.mxu0  ;;  %v3012_v10 = vpop.f32.mrf.mxu1 }
 0x1ad   :  { %v1902_v58 = vmax.f32 %v4616_v6, %v1853_v46 }
 0x1ae   :  { %v1180_v17 = vpop.f32.mrf.mxu0  ;;  %v1609_v36 = vpop.f32.mrf.mxu1 }
 0x1af   :  { %v1958_v34 = vadd.f32 %v4110_v29, %v1902_v58  ;;  %v1854_v24 = vmax.f32 %v1180_v17, %v1609_v36 }
 0x1b0   :  { %v2897_v22 = vpop.f32.mrf.mxu0  ;;  %v3013_v53 = vpop.f32.mrf.mxu1 }
 0x1b1   :  { %v2007_v43 = vmax.f32 %v1958_v34, 0.0  ;;  %v1903_v61 = vmax.f32 %v4617_v0, %v1854_v24  ;;  %v4618_v53 = vmax.f32 %v3585_v8, %v3587_v9 }
 0x1b2   :  { %v1185_v41 = vpop.f32.mrf.mxu0  ;;  %v1614_v5 = vpop.f32.mrf.mxu1 }
 0x1b3   :  { %v2465_v10 = vpack.c.bf16 %v2007_v43, %v2007_v43  ;;  %v1959_v19 = vadd.f32 %v4110_v29, %v1903_v61  ;;  %v1855_v59 = vmax.f32 %v1185_v41, %v1614_v5 }
 0x1b4   :  { %v2900_v60 = vpop.f32.mrf.mxu0  ;;  %v3016_v46 = vpop.f32.mrf.mxu1 }
 0x1b5   :  { %2254 = vst.msk [vmem:[%s4510_s6] sm:$0xf] %vm2253_vm1, %v2465_v10  ;;  %v2008_v36 = vmax.f32 %v1959_v19, 0.0  ;;  %v1904_v1 = vmax.f32 %v4618_v53, %v1855_v59  ;;  %v4619_v19 = vmax.f32 %v3595_v13, %v3597_v14  ;;  %v4620_v46 = vmax.f32 %v3607_v20, %v3609_v21 }
 0x1b6   :  { %v1188_v2 = vpop.f32.mrf.mxu0  ;;  %v1617_v17 = vpop.f32.mrf.mxu1 }
 0x1b7   :  { %v2466_v6 = vpack.c.bf16 %v2008_v36, %v2008_v36  ;;  %v1960_v58 = vadd.f32 %v4110_v29, %v1904_v1  ;;  %v1856_v34 = vmax.f32 %v1188_v2, %v1617_v17 }
 0x1b8   :  { %v2901_v24 = vpop.f32.mrf.mxu0  ;;  %v3017_v41 = vpop.f32.mrf.mxu1 }
 0x1b9   :  { %2255 = vst.msk [vmem:[%s4510_s6 + $0x4] sm:$0xf] %vm2253_vm1, %v2466_v6  ;;  %v2009_v22 = vmax.f32 %v1960_v58, 0.0  ;;  %v1905_v43 = vmax.f32 %v4619_v19, %v1856_v34  ;;  %v4621_v34 = vmax.f32 %v3617_v25, %v3619_v26 }
 0x1ba   :  { %v1193_v8 = vpop.f32.mrf.mxu0  ;;  %v1622_v9 = vpop.f32.mrf.mxu1 }
 0x1bb   :  { %v2467_v0 = vpack.c.bf16 %v2009_v22, %v2009_v22  ;;  %v1961_v61 = vadd.f32 %v4110_v29, %v1905_v43  ;;  %v1857_v5 = vmax.f32 %v1193_v8, %v1622_v9 }
 0x1bc   :  { %v2904_v10 = vpop.f32.mrf.mxu0  ;;  %v3020_v59 = vpop.f32.mrf.mxu1 }
 0x1bd   :  { %2256 = vst.msk [vmem:[%s4510_s6 + $0x8] sm:$0xf] %vm2253_vm1, %v2467_v0  ;;  %v2010_v60 = vmax.f32 %v1961_v61, 0.0  ;;  %v1906_v36 = vmax.f32 %v4620_v46, %v1857_v5  ;;  %v4622_v0 = vmax.f32 %v3629_v32, %v3631_v33 }
 0x1be   :  { %v1196_v13 = vpop.f32.mrf.mxu0  ;;  %v1625_v14 = vpop.f32.mrf.mxu1 }
 0x1bf   :  { %v2468_v53 = vpack.c.bf16 %v2010_v60, %v2010_v60  ;;  %v1962_v1 = vadd.f32 %v4110_v29, %v1906_v36  ;;  %v1858_v2 = vmax.f32 %v1196_v13, %v1625_v14  ;;  %v4623_v13 = vmax.f32 %v3639_v37, %v3641_v38 }
 0x1c0   :  { %v2905_v17 = vpop.f32.mrf.mxu0  ;;  %v3021_v6 = vpop.f32.mrf.mxu1 }
 0x1c1   :  { %2257 = vst.msk [vmem:[%s4510_s6 + $0xc] sm:$0xf] %vm2253_vm1, %v2468_v53  ;;  %v2011_v58 = vmax.f32 %v1962_v1, 0.0  ;;  %v1907_v24 = vmax.f32 %v4621_v34, %v1858_v2  ;;  %v4624_v34 = vmax.f32 %v3651_v44, %v3653_v45 }
 0x1c2   :  { %v1201_v20 = vpop.f32.mrf.mxu0  ;;  %v1630_v21 = vpop.f32.mrf.mxu1 }
 0x1c3   :  { %v2469_v41 = vpack.c.bf16 %v2011_v58, %v2011_v58  ;;  %v1963_v22 = vadd.f32 %v4110_v29, %v1907_v24  ;;  %v1859_v19 = vmax.f32 %v1201_v20, %v1630_v21 }
 0x1c4   :  { %v2908_v43 = vpop.f32.mrf.mxu0  ;;  %v3024_v8 = vpop.f32.mrf.mxu1 }
 0x1c5   :  { %2258 = vst.msk [vmem:[%s4510_s6 + $0x10] sm:$0xf] %vm2253_vm1, %v2469_v41  ;;  %v2012_v9 = vmax.f32 %v1963_v22, 0.0  ;;  %v1908_v61 = vmax.f32 %v4622_v0, %v1859_v19  ;;  %v4625_v8 = vmax.f32 %v3661_v49, %v3663_v50 }
 0x1c6   :  { %v1204_v25 = vpop.f32.mrf.mxu0  ;;  %v1633_v26 = vpop.f32.mrf.mxu1 }
 0x1c7   :  { %v2470_v5 = vpack.c.bf16 %v2012_v9, %v2012_v9  ;;  %v1964_v10 = vadd.f32 %v4110_v29, %v1908_v61  ;;  %v1860_v59 = vmax.f32 %v1204_v25, %v1633_v26 }
 0x1c8   :  { %v2909_v60 = vpop.f32.mrf.mxu0  ;;  %v3025_v46 = vpop.f32.mrf.mxu1 }
 0x1c9   :  { %2259 = vst.msk [vmem:[%s4510_s6 + $0x14] sm:$0xf] %vm2253_vm1, %v2470_v5  ;;  %v2013_v36 = vmax.f32 %v1964_v10, 0.0  ;;  %v1909_v14 = vmax.f32 %v4623_v13, %v1860_v59  ;;  %v4626_v59 = vmax.f32 %v3673_v56, %v3675_v57 }
 0x1ca   :  { %v1209_v32 = vpop.f32.mrf.mxu0  ;;  %v1638_v33 = vpop.f32.mrf.mxu1 }
 0x1cb   :  { %v2471_v53 = vpack.c.bf16 %v2013_v36, %v2013_v36  ;;  %v1965_v1 = vadd.f32 %v4110_v29, %v1909_v14  ;;  %v1861_v2 = vmax.f32 %v1209_v32, %v1638_v33 }
 0x1cc   :  { %v2912_v17 = vpop.f32.mrf.mxu0  ;;  %v3028_v6 = vpop.f32.mrf.mxu1 }
 0x1cd   :  { %2260 = vst.msk [vmem:[%s4510_s6 + $0x18] sm:$0xf] %vm2253_vm1, %v2471_v53  ;;  %v2014_v58 = vmax.f32 %v1965_v1, 0.0  ;;  %v1910_v24 = vmax.f32 %v4624_v34, %v1861_v2  ;;  %v4627_v53 = vmax.f32 %v3683_v3, %v3685_v4 }
 0x1ce   :  { %v1212_v37 = vpop.f32.mrf.mxu0  ;;  %v1641_v38 = vpop.f32.mrf.mxu1 }
 0x1cf   :  { %v2472_v20 = vpack.c.bf16 %v2014_v58, %v2014_v58  ;;  %v1966_v21 = vadd.f32 %v4110_v29, %v1910_v24  ;;  %v1862_v41 = vmax.f32 %v1212_v37, %v1641_v38  ;;  %v4628_v37 = vmax.f32 %v3695_v16, %v3697_v18 }
 0x1d0   :  { %v2913_v22 = vpop.f32.mrf.mxu0  ;;  %v3029_v19 = vpop.f32.mrf.mxu1 }
 0x1d1   :  { %2261 = vst.msk [vmem:[%s4510_s6 + $0x1c] sm:$0xf] %vm2253_vm1, %v2472_v20  ;;  %v2015_v43 = vmax.f32 %v1966_v21, 0.0  ;;  %v1911_v9 = vmax.f32 %v4625_v8, %v1862_v41  ;;  %v4629_v8 = vmax.f32 %v3705_v27, %v3707_v28 }
 0x1d2   :  { %v1217_v44 = vpop.f32.mrf.mxu0  ;;  %v1646_v45 = vpop.f32.mrf.mxu1 }
 0x1d3   :  { %v2473_v0 = vpack.c.bf16 %v2015_v43, %v2015_v43  ;;  %v1967_v61 = vadd.f32 %v4110_v29, %v1911_v9  ;;  %v1863_v25 = vmax.f32 %v1217_v44, %v1646_v45 }
 0x1d4   :  { %v2916_v26 = vpop.f32.mrf.mxu0  ;;  %v3032_v5 = vpop.f32.mrf.mxu1 }
 0x1d5   :  { %2262 = vst.msk [vmem:[%s4510_s6 + $0x20] sm:$0xf] %vm2253_vm1, %v2473_v0  ;;  %v2016_v10 = vmax.f32 %v1967_v61, 0.0  ;;  %v1912_v60 = vmax.f32 %v4626_v59, %v1863_v25  ;;  %v4630_v5 = vmax.f32 %v3717_v40, %v3719_v42 }
 0x1d6   :  { %v1220_v49 = vpop.f32.mrf.mxu0  ;;  %v1649_v50 = vpop.f32.mrf.mxu1 }
 0x1d7   :  { %v2474_v46 = vpack.c.bf16 %v2016_v10, %v2016_v10  ;;  %v1968_v36 = vadd.f32 %v4110_v29, %v1912_v60  ;;  %v1864_v13 = vmax.f32 %v1220_v49, %v1649_v50 }
 0x1d8   :  { %v2917_v14 = vpop.f32.mrf.mxu0  ;;  %v3033_v32 = vpop.f32.mrf.mxu1 }
 0x1d9   :  { %2263 = vst.msk [vmem:[%s4510_s6 + $0x24] sm:$0xf] %vm2253_vm1, %v2474_v46  ;;  %v2017_v33 = vmax.f32 %v1968_v36, 0.0  ;;  %v1913_v1 = vmax.f32 %v4627_v53, %v1864_v13  ;;  %v4631_v13 = vmax.f32 %v3727_v51, %v3729_v52 }
 0x1da   :  { %v1225_v56 = vpop.f32.mrf.mxu0  ;;  %v1654_v57 = vpop.f32.mrf.mxu1 }
 0x1db   :  { %v2475_v2 = vpack.c.bf16 %v2017_v33, %v2017_v33  ;;  %v1969_v17 = vadd.f32 %v4110_v29, %v1913_v1  ;;  %v1865_v6 = vmax.f32 %v1225_v56, %v1654_v57 }
 0x1dc   :  { %v2920_v58 = vpop.f32.mrf.mxu0  ;;  %v3036_v34 = vpop.f32.mrf.mxu1 }
 0x1dd   :  { %2264 = vst.msk [vmem:[%s4510_s6 + $0x28] sm:$0xf] %vm2253_vm1, %v2475_v2  ;;  %v2018_v24 = vmax.f32 %v1969_v17, 0.0  ;;  %v1914_v38 = vmax.f32 %v4628_v37, %v1865_v6  ;;  %v4632_v2 = vmax.f32 %v3739_v7, %v3741_v12 }
 0x1de   :  { %v1228_v3 = vpop.f32.mrf.mxu0  ;;  %v1657_v4 = vpop.f32.mrf.mxu1 }
 0x1df   :  { %v2476_v20 = vpack.c.bf16 %v2018_v24, %v2018_v24  ;;  %v1970_v21 = vadd.f32 %v4110_v29, %v1914_v38  ;;  %v1866_v41 = vmax.f32 %v1228_v3, %v1657_v4  ;;  %v4633_v3 = vmax.f32 %v3749_v30, %v3751_v31 }
 0x1e0   :  { %v2921_v22 = vpop.f32.mrf.mxu0  ;;  %v3037_v19 = vpop.f32.mrf.mxu1 }
 0x1e1   :  { %2265 = vst.msk [vmem:[%s4510_s6 + $0x2c] sm:$0xf] %vm2253_vm1, %v2476_v20  ;;  %v2019_v43 = vmax.f32 %v1970_v21, 0.0  ;;  %v1915_v9 = vmax.f32 %v4629_v8, %v1866_v41  ;;  %v4634_v8 = vmax.f32 %v3761_v55, %v3763_v63 }
 0x1e2   :  { %v1233_v16 = vpop.f32.mrf.mxu0  ;;  %v1662_v18 = vpop.f32.mrf.mxu1 }
 0x1e3   :  { %v2477_v44 = vpack.c.bf16 %v2019_v43, %v2019_v43  ;;  %v1971_v45 = vadd.f32 %v4110_v29, %v1915_v9  ;;  %v1867_v0 = vmax.f32 %v1233_v16, %v1662_v18 }
 0x1e4   :  { %v2924_v61 = vpop.f32.mrf.mxu0  ;;  %v3040_v25 = vpop.f32.mrf.mxu1 }
 0x1e5   :  { %2266 = vst.msk [vmem:[%s4510_s6 + $0x30] sm:$0xf] %vm2253_vm1, %v2477_v44  ;;  %v2020_v26 = vmax.f32 %v1971_v45, 0.0  ;;  %v1916_v10 = vmax.f32 %v4630_v5, %v1867_v0  ;;  %v4635_v25 = vmax.f32 %v3771_v47, %v3773_v48 }
 0x1e6   :  { %v1236_v27 = vpop.f32.mrf.mxu0  ;;  %v1665_v28 = vpop.f32.mrf.mxu1 }
 0x1e7   :  { %v2478_v59 = vpack.c.bf16 %v2020_v26, %v2020_v26  ;;  %v1972_v60 = vadd.f32 %v4110_v29, %v1916_v10  ;;  %v1868_v49 = vmax.f32 %v1236_v27, %v1665_v28 }
 0x1e8   :  { %v2925_v50 = vpop.f32.mrf.mxu0  ;;  %v3041_v46 = vpop.f32.mrf.mxu1 }
 0x1e9   :  { %2267 = vst.msk [vmem:[%s4510_s6 + $0x34] sm:$0xf] %vm2253_vm1, %v2478_v59  ;;  %v2021_v36 = vmax.f32 %v1972_v60, 0.0  ;;  %v1917_v14 = vmax.f32 %v4631_v13, %v1868_v49  ;;  %v4636_v49 = vmax.f32 %v3783_v62, %v3785_v23 }
 0x1ea   :  { %v1241_v40 = vpop.f32.mrf.mxu0  ;;  %v1670_v42 = vpop.f32.mrf.mxu1 }
 0x1eb   :  { %v2479_v32 = vpack.c.bf16 %v2021_v36, %v2021_v36  ;;  %v1973_v33 = vadd.f32 %v4110_v29, %v1917_v14  ;;  %v1869_v53 = vmax.f32 %v1241_v40, %v1670_v42 }
 0x1ec   :  { %v2928_v1 = vpop.f32.mrf.mxu0  ;;  %v3044_v56 = vpop.f32.mrf.mxu1 }
 0x1ed   :  { %2268 = vst.msk [vmem:[%s4510_s6 + $0x38] sm:$0xf] %vm2253_vm1, %v2479_v32  ;;  %v2022_v57 = vmax.f32 %v1973_v33, 0.0  ;;  %v1918_v17 = vmax.f32 %v4632_v2, %v1869_v53  ;;  %v4637_v32 = vmax.f32 %v3793_v54, %v3795_v15 }
 0x1ee   :  { %v1244_v51 = vpop.f32.mrf.mxu0  ;;  %v1673_v52 = vpop.f32.mrf.mxu1 }
 0x1ef   :  { %v2480_v6 = vpack.c.bf16 %v2022_v57, %v2022_v57  ;;  %v1974_v58 = vadd.f32 %v4110_v29, %v1918_v17  ;;  %v1870_v34 = vmax.f32 %v1244_v51, %v1673_v52  ;;  %v4638_v51 = vmax.f32 %v3805_v11, %v3807_v35 }
 0x1f0   :  { %v2929_v24 = vpop.f32.mrf.mxu0  ;;  %v3045_v37 = vpop.f32.mrf.mxu1 }
 0x1f1   :  { %2269 = vst.msk [vmem:[%s4510_s6 + $0x3c] sm:$0xf] %vm2253_vm1, %v2480_v6  ;;  %v2023_v38 = vmax.f32 %v1974_v58, 0.0  ;;  %v1919_v4 = vmax.f32 %v4633_v3, %v1870_v34  ;;  %v4639_v3 = vld [vmem:[#allocation2_spill] sm:$0xff] }
 0x1f2   :  { %v1249_v7 = vpop.f32.mrf.mxu0  ;;  %v1678_v12 = vpop.f32.mrf.mxu1 }
 0x1f3   :  { %v2481_v20 = vpack.c.bf16 %v2023_v38, %v2023_v38  ;;  %v1975_v21 = vadd.f32 %v4110_v29, %v1919_v4  ;;  %v1871_v41 = vmax.f32 %v1249_v7, %v1678_v12  ;;  %v4640_v4 = vmax.f32 %v3815_v39, %v4639_v3 }
 0x1f4   :  { %v2932_v22 = vpop.f32.mrf.mxu0  ;;  %v3048_v19 = vpop.f32.mrf.mxu1 }
 0x1f5   :  { %2270 = vst.msk [vmem:[%s4510_s6 + $0x40] sm:$0xf] %vm2253_vm1, %v2481_v20  ;;  %v2024_v43 = vmax.f32 %v1975_v21, 0.0  ;;  %v1920_v9 = vmax.f32 %v4634_v8, %v1871_v41  ;;  %v4642_v8 = vld [vmem:[#allocation4_spill] sm:$0xff] }
 0x1f6   :  { %v1252_v30 = vpop.f32.mrf.mxu0  ;;  %v1681_v31 = vpop.f32.mrf.mxu1 }
 0x1f7   :  { %v2482_v16 = vpack.c.bf16 %v2024_v43, %v2024_v43  ;;  %v1976_v18 = vadd.f32 %v4110_v29, %v1920_v9  ;;  %v1872_v44 = vmax.f32 %v1252_v30, %v1681_v31  ;;  %v4641_v43 = vld [vmem:[#allocation3_spill] sm:$0xff] }
 0x1f8   :  { %v2933_v45 = vpop.f32.mrf.mxu0  ;;  %v3049_v0 = vpop.f32.mrf.mxu1  ;;  %v4643_v9 = vmax.f32 %v4641_v43, %v4642_v8 }
 0x1f9   :  { %2271 = vst.msk [vmem:[%s4510_s6 + $0x44] sm:$0xf] %vm2253_vm1, %v2482_v16  ;;  %v2025_v61 = vmax.f32 %v1976_v18, 0.0  ;;  %v1921_v26 = vmax.f32 %v4635_v25, %v1872_v44  ;;  %v4644_v25 = vld [vmem:[#allocation5_spill] sm:$0xff] }
 0x1fa   :  { %v1257_v55 = vpop.f32.mrf.mxu0  ;;  %v1686_v63 = vpop.f32.mrf.mxu1 }
 0x1fb   :  { %v2483_v5 = vpack.c.bf16 %v2025_v61, %v2025_v61  ;;  %v1977_v10 = vadd.f32 %v4110_v29, %v1921_v26  ;;  %v1873_v27 = vmax.f32 %v1257_v55, %v1686_v63  ;;  %v4645_v26 = vld [vmem:[#allocation6_spill] sm:$0xff] }
 0x1fc   :  { %v2936_v28 = vpop.f32.mrf.mxu0  ;;  %v3052_v59 = vpop.f32.mrf.mxu1  ;;  %v4646_v55 = vmax.f32 %v4644_v25, %v4645_v26 }
 0x1fd   :  { %2272 = vst.msk [vmem:[%s4510_s6 + $0x48] sm:$0xf] %vm2253_vm1, %v2483_v5  ;;  %v2026_v60 = vmax.f32 %v1977_v10, 0.0  ;;  %v1922_v50 = vmax.f32 %v4636_v49, %v1873_v27 }
 0x1fe   :  { %v1260_v47 = vpop.f32.mrf.mxu0  ;;  %v1689_v48 = vpop.f32.mrf.mxu1 }
 0x1ff   :  { %v2484_v46 = vpack.c.bf16 %v2026_v60, %v2026_v60  ;;  %v1978_v36 = vadd.f32 %v4110_v29, %v1922_v50  ;;  %v1874_v13 = vmax.f32 %v1260_v47, %v1689_v48  ;;  %v4647_v47 = vld [vmem:[#allocation7_spill] sm:$0xff]  ;;  %v4648_v48 = vld [vmem:[#allocation8_spill] sm:$0xff] }
 0x200   :  { %v2937_v14 = vpop.f32.mrf.mxu0  ;;  %v3053_v40 = vpop.f32.mrf.mxu1 }
 0x201   :  { %2273 = vst.msk [vmem:[%s4510_s6 + $0x4c] sm:$0xf] %vm2253_vm1, %v2484_v46  ;;  %v2027_v42 = vmax.f32 %v1978_v36, 0.0  ;;  %v1923_v33 = vmax.f32 %v4637_v32, %v1874_v13  ;;  %v4649_v46 = vmax.f32 %v4647_v47, %v4648_v48 }
 0x202   :  { %v1265_v62 = vpop.f32.mrf.mxu0  ;;  %v1694_v23 = vpop.f32.mrf.mxu1 }
 0x203   :  { %v2485_v53 = vpack.c.bf16 %v2027_v42, %v2027_v42  ;;  %v1979_v1 = vadd.f32 %v4110_v29, %v1923_v33  ;;  %v1875_v56 = vmax.f32 %v1265_v62, %v1694_v23 }
 0x204   :  { %v2940_v57 = vpop.f32.mrf.mxu0  ;;  %v3056_v2 = vpop.f32.mrf.mxu1 }
 0x205   :  { %2274 = vst.msk [vmem:[%s4510_s6 + $0x50] sm:$0xf] %vm2253_vm1, %v2485_v53  ;;  %v2028_v17 = vmax.f32 %v1979_v1, 0.0  ;;  %v1924_v52 = vmax.f32 %v4638_v51, %v1875_v56  ;;  %v4650_v53 = vld [vmem:[#allocation9_spill] sm:$0xff]  ;;  %v4651_v1 = vld [vmem:[#allocation10_spill] sm:$0xff] }
 0x206   :  { %v1268_v54 = vpop.f32.mrf.mxu0  ;;  %v1697_v15 = vpop.f32.mrf.mxu1  ;;  %v4652_v56 = vmax.f32 %v4650_v53, %v4651_v1 }
 0x207   :  { %v2486_v6 = vpack.c.bf16 %v2028_v17, %v2028_v17  ;;  %v1980_v58 = vadd.f32 %v4110_v29, %v1924_v52  ;;  %v1876_v34 = vmax.f32 %v1268_v54, %v1697_v15 }
 0x208   :  { %v2941_v24 = vpop.f32.mrf.mxu0  ;;  %v3057_v37 = vpop.f32.mrf.mxu1 }
 0x209   :  { %2275 = vst.msk [vmem:[%s4510_s6 + $0x54] sm:$0xf] %vm2253_vm1, %v2486_v6  ;;  %v2029_v38 = vmax.f32 %v1980_v58, 0.0  ;;  %v1925_v7 = vmax.f32 %v4640_v4, %v1876_v34  ;;  %v4653_v34 = vld [vmem:[#allocation11_spill] sm:$0xff]  ;;  %v4654_v24 = vld [vmem:[#allocation12_spill] sm:$0xff] }
 0x20a   :  { %v1273_v11 = vpop.f32.mrf.mxu0  ;;  %v1702_v35 = vpop.f32.mrf.mxu1  ;;  %v4655_v37 = vmax.f32 %v4653_v34, %v4654_v24 }
 0x20b   :  { %v2487_v12 = vpack.c.bf16 %v2029_v38, %v2029_v38  ;;  %v1981_v20 = vadd.f32 %v4110_v29, %v1925_v7  ;;  %v1877_v21 = vmax.f32 %v1273_v11, %v1702_v35 }
 0x20c   :  { %v2944_v41 = vpop.f32.mrf.mxu0  ;;  %v3060_v22 = vpop.f32.mrf.mxu1 }
 0x20d   :  { %2276 = vst.msk [vmem:[%s4510_s6 + $0x58] sm:$0xf] %vm2253_vm1, %v2487_v12  ;;  %v2030_v19 = vmax.f32 %v1981_v20, 0.0  ;;  %v1926_v30 = vmax.f32 %v4643_v9, %v1877_v21  ;;  %v4656_v41 = vld [vmem:[#allocation13_spill] sm:$0xff]  ;;  %v4657_v22 = vld [vmem:[#allocation14_spill] sm:$0xff] }
 0x20e   :  { %v1276_v39 = vpop.f32.mrf.mxu0  ;;  %v1705_v31 = vpop.f32.mrf.mxu1 }
 0x20f   :  { %v2488_v16 = vpack.c.bf16 %v2030_v19, %v2030_v19  ;;  %v1982_v18 = vadd.f32 %v4110_v29, %v1926_v30  ;;  %v1878_v44 = vmax.f32 %v1276_v39, %v1705_v31  ;;  %v4658_v19 = vmax.f32 %v4656_v41, %v4657_v22 }
 0x210   :  { %v2945_v45 = vpop.f32.mrf.mxu0  ;;  %v3061_v0 = vpop.f32.mrf.mxu1 }
 0x211   :  { %2277 = vst.msk [vmem:[%s4510_s6 + $0x5c] sm:$0xf] %vm2253_vm1, %v2488_v16  ;;  %v2031_v61 = vmax.f32 %v1982_v18, 0.0  ;;  %v1927_v63 = vmax.f32 %v4646_v55, %v1878_v44  ;;  %v4659_v45 = vld [vmem:[#allocation15_spill] sm:$0xff]  ;;  %v4660_v0 = vld [vmem:[#allocation16_spill] sm:$0xff] }
 0x212   :  { %v1281_v5 = vpop.f32.mrf.mxu0  ;;  %v1710_v10 = vpop.f32.mrf.mxu1 }
 0x213   :  { %v2489_v27 = vpack.c.bf16 %v2031_v61, %v2031_v61  ;;  %v1983_v28 = vadd.f32 %v4110_v29, %v1927_v63  ;;  %v1879_v59 = vmax.f32 %v1281_v5, %v1710_v10  ;;  %v4661_v61 = vmax.f32 %v4659_v45, %v4660_v0 }
 0x214   :  { %v2948_v60 = vpop.f32.mrf.mxu0  ;;  %v3064_v49 = vpop.f32.mrf.mxu1 }
 0x215   :  { %2278 = vst.msk [vmem:[%s4510_s6 + $0x60] sm:$0xf] %vm2253_vm1, %v2489_v27  ;;  %v2032_v50 = vmax.f32 %v1983_v28, 0.0  ;;  %v1928_v36 = vmax.f32 %v4649_v46, %v1879_v59  ;;  %v4662_v60 = vld [vmem:[#allocation17_spill] sm:$0xff]  ;;  %v4663_v49 = vld [vmem:[#allocation18_spill] sm:$0xff] }
 0x216   :  { %v1284_v13 = vpop.f32.mrf.mxu0  ;;  %v1713_v14 = vpop.f32.mrf.mxu1 }
 0x217   :  { %v2490_v40 = vpack.c.bf16 %v2032_v50, %v2032_v50  ;;  %v1984_v42 = vadd.f32 %v4110_v29, %v1928_v36  ;;  %v1880_v32 = vmax.f32 %v1284_v13, %v1713_v14  ;;  %v4664_v50 = vmax.f32 %v4662_v60, %v4663_v49 }
 0x218   :  { %v2949_v33 = vpop.f32.mrf.mxu0  ;;  %v3065_v62 = vpop.f32.mrf.mxu1 }
 0x219   :  { %2279 = vst.msk [vmem:[%s4510_s6 + $0x64] sm:$0xf] %vm2253_vm1, %v2490_v40  ;;  %v2033_v23 = vmax.f32 %v1984_v42, 0.0  ;;  %v1929_v57 = vmax.f32 %v4652_v56, %v1880_v32  ;;  %v4665_v33 = vld [vmem:[#allocation19_spill] sm:$0xff]  ;;  %v4666_v62 = vld [vmem:[#allocation20_spill] sm:$0xff] }
 0x21a   :  { %v1289_v2 = vpop.f32.mrf.mxu0  ;;  %v1718_v17 = vpop.f32.mrf.mxu1 }
 0x21b   :  { %v2491_v51 = vpack.c.bf16 %v2033_v23, %v2033_v23  ;;  %v1985_v52 = vadd.f32 %v4110_v29, %v1929_v57  ;;  %v1881_v54 = vmax.f32 %v1289_v2, %v1718_v17  ;;  %v4667_v23 = vmax.f32 %v4665_v33, %v4666_v62 }
 0x21c   :  { %v2952_v15 = vpop.f32.mrf.mxu0  ;;  %v3068_v6 = vpop.f32.mrf.mxu1 }
 0x21d   :  { %2280 = vst.msk [vmem:[%s4510_s6 + $0x68] sm:$0xf] %vm2253_vm1, %v2491_v51  ;;  %v2034_v58 = vmax.f32 %v1985_v52, 0.0  ;;  %v1930_v38 = vmax.f32 %v4655_v37, %v1881_v54  ;;  %v4668_v15 = vld [vmem:[#allocation21_spill] sm:$0xff]  ;;  %v4669_v6 = vld [vmem:[#allocation22_spill] sm:$0xff] }
 0x21e   :  { %v1292_v3 = vpop.f32.mrf.mxu0  ;;  %v1721_v4 = vpop.f32.mrf.mxu1 }
 0x21f   :  { %v2492_v7 = vpack.c.bf16 %v2034_v58, %v2034_v58  ;;  %v1986_v11 = vadd.f32 %v4110_v29, %v1930_v38  ;;  %v1882_v35 = vmax.f32 %v1292_v3, %v1721_v4  ;;  %v4670_v58 = vmax.f32 %v4668_v15, %v4669_v6 }
 0x220   :  { %v2953_v12 = vpop.f32.mrf.mxu0  ;;  %v3069_v20 = vpop.f32.mrf.mxu1 }
 0x221   :  { %2281 = vst.msk [vmem:[%s4510_s6 + $0x6c] sm:$0xf] %vm2253_vm1, %v2492_v7  ;;  %v2035_v21 = vmax.f32 %v1986_v11, 0.0  ;;  %v1931_v43 = vmax.f32 %v4658_v19, %v1882_v35  ;;  %v4671_v12 = vld [vmem:[#allocation23_spill] sm:$0xff]  ;;  %v4672_v20 = vld [vmem:[#allocation24_spill] sm:$0xff] }
 0x222   :  { %v1297_v8 = vpop.f32.mrf.mxu0  ;;  %v1726_v9 = vpop.f32.mrf.mxu1 }
 0x223   :  { %v2493_v30 = vpack.c.bf16 %v2035_v21, %v2035_v21  ;;  %v1987_v39 = vadd.f32 %v4110_v29, %v1931_v43  ;;  %v1883_v31 = vmax.f32 %v1297_v8, %v1726_v9  ;;  %v4673_v21 = vmax.f32 %v4671_v12, %v4672_v20 }
 0x224   :  { %v2956_v16 = vpop.f32.mrf.mxu0  ;;  %v3072_v18 = vpop.f32.mrf.mxu1 }
 0x225   :  { %2282 = vst.msk [vmem:[%s4510_s6 + $0x70] sm:$0xf] %vm2253_vm1, %v2493_v30  ;;  %v2036_v44 = vmax.f32 %v1987_v39, 0.0  ;;  %v1932_v25 = vmax.f32 %v4661_v61, %v1883_v31  ;;  %v4674_v16 = vld [vmem:[#allocation25_spill] sm:$0xff]  ;;  %v4675_v18 = vld [vmem:[#allocation26_spill] sm:$0xff] }
 0x226   :  { %v1300_v26 = vpop.f32.mrf.mxu0  ;;  %v1729_v55 = vpop.f32.mrf.mxu1 }
 0x227   :  { %v2494_v63 = vpack.c.bf16 %v2036_v44, %v2036_v44  ;;  %v1988_v5 = vadd.f32 %v4110_v29, %v1932_v25  ;;  %v1884_v10 = vmax.f32 %v1300_v26, %v1729_v55  ;;  %v4676_v44 = vmax.f32 %v4674_v16, %v4675_v18 }
 0x228   :  { %v2957_v27 = vpop.f32.mrf.mxu0  ;;  %v3073_v28 = vpop.f32.mrf.mxu1 }
 0x229   :  { %2283 = vst.msk [vmem:[%s4510_s6 + $0x74] sm:$0xf] %vm2253_vm1, %v2494_v63  ;;  %v2037_v59 = vmax.f32 %v1988_v5, 0.0  ;;  %v1933_v47 = vmax.f32 %v4664_v50, %v1884_v10  ;;  %v4677_v27 = vld [vmem:[#allocation27_spill] sm:$0xff]  ;;  %v4678_v28 = vld [vmem:[#allocation28_spill] sm:$0xff] }
 0x22a   :  { %v1305_v48 = vpop.f32.mrf.mxu0  ;;  %v1734_v46 = vpop.f32.mrf.mxu1 }
 0x22b   :  { %v2495_v36 = vpack.c.bf16 %v2037_v59, %v2037_v59  ;;  %v1989_v13 = vadd.f32 %v4110_v29, %v1933_v47  ;;  %v1885_v14 = vmax.f32 %v1305_v48, %v1734_v46  ;;  %v4679_v59 = vmax.f32 %v4677_v27, %v4678_v28 }
 0x22c   :  { %v2960_v40 = vpop.f32.mrf.mxu0  ;;  %v3076_v42 = vpop.f32.mrf.mxu1 }
 0x22d   :  { %2284 = vst.msk [vmem:[%s4510_s6 + $0x78] sm:$0xf] %vm2253_vm1, %v2495_v36  ;;  %v2038_v32 = vmax.f32 %v1989_v13, 0.0  ;;  %v1934_v53 = vmax.f32 %v4667_v23, %v1885_v14  ;;  %v4680_v40 = vld [vmem:[#allocation29_spill] sm:$0xff]  ;;  %v4681_v42 = vld [vmem:[#allocation30_spill] sm:$0xff] }
 0x22e   :  { %v1308_v1 = vpop.f32.mrf.mxu0  ;;  %v1737_v56 = vpop.f32.mrf.mxu1 }
 0x22f   :  { %v2496_v57 = vpack.c.bf16 %v2038_v32, %v2038_v32  ;;  %v1990_v2 = vadd.f32 %v4110_v29, %v1934_v53  ;;  %v1886_v17 = vmax.f32 %v1308_v1, %v1737_v56  ;;  %v4682_v32 = vmax.f32 %v4680_v40, %v4681_v42 }
 0x230   :  { %v2961_v51 = vpop.f32.mrf.mxu0  ;;  %v3077_v52 = vpop.f32.mrf.mxu1 }
 0x231   :  { %2285 = vst.msk [vmem:[%s4510_s6 + $0x7c] sm:$0xf] %vm2253_vm1, %v2496_v57  ;;  %v2039_v54 = vmax.f32 %v1990_v2, 0.0  ;;  %v1935_v34 = vmax.f32 %v4670_v58, %v1886_v17  ;;  %v4683_v51 = vld [vmem:[#allocation31_spill] sm:$0xff]  ;;  %v4684_v52 = vld [vmem:[#allocation32_spill] sm:$0xff] }
 0x232   :  { %v1313_v24 = vpop.f32.mrf.mxu0  ;;  %v1742_v37 = vpop.f32.mrf.mxu1 }
 0x233   :  { %v2497_v38 = vpack.c.bf16 %v2039_v54, %v2039_v54  ;;  %v1991_v3 = vadd.f32 %v4110_v29, %v1935_v34  ;;  %v1887_v4 = vmax.f32 %v1313_v24, %v1742_v37  ;;  %v4685_v54 = vmax.f32 %v4683_v51, %v4684_v52 }
 0x234   :  { %v2964_v7 = vpop.f32.mrf.mxu0  ;;  %v3080_v11 = vpop.f32.mrf.mxu1 }
 0x235   :  { %2286 = vst.msk [vmem:[%s4510_s6 + $0x80] sm:$0xf] %vm2253_vm1, %v2497_v38  ;;  %v2040_v35 = vmax.f32 %v1991_v3, 0.0  ;;  %v1936_v41 = vmax.f32 %v4673_v21, %v1887_v4  ;;  %v4686_v7 = vld [vmem:[#allocation33_spill] sm:$0xff]  ;;  %v4687_v11 = vld [vmem:[#allocation34_spill] sm:$0xff] }
 0x236   :  { %v1316_v22 = vpop.f32.mrf.mxu0  ;;  %v1745_v19 = vpop.f32.mrf.mxu1 }
 0x237   :  { %v2498_v43 = vpack.c.bf16 %v2040_v35, %v2040_v35  ;;  %v1992_v8 = vadd.f32 %v4110_v29, %v1936_v41  ;;  %v1888_v9 = vmax.f32 %v1316_v22, %v1745_v19  ;;  %v4688_v35 = vmax.f32 %v4686_v7, %v4687_v11 }
 0x238   :  { %v2965_v30 = vpop.f32.mrf.mxu0  ;;  %v3081_v39 = vpop.f32.mrf.mxu1 }
 0x239   :  { %2287 = vst.msk [vmem:[%s4510_s6 + $0x84] sm:$0xf] %vm2253_vm1, %v2498_v43  ;;  %v2041_v31 = vmax.f32 %v1992_v8, 0.0  ;;  %v1937_v45 = vmax.f32 %v4676_v44, %v1888_v9  ;;  %v4689_v30 = vld [vmem:[#allocation35_spill] sm:$0xff]  ;;  %v4690_v39 = vld [vmem:[#allocation36_spill] sm:$0xff] }
 0x23a   :  { %v1321_v0 = vpop.f32.mrf.mxu0  ;;  %v1750_v61 = vpop.f32.mrf.mxu1 }
 0x23b   :  { %v2499_v25 = vpack.c.bf16 %v2041_v31, %v2041_v31  ;;  %v1993_v26 = vadd.f32 %v4110_v29, %v1937_v45  ;;  %v1889_v55 = vmax.f32 %v1321_v0, %v1750_v61  ;;  %v4691_v31 = vmax.f32 %v4689_v30, %v4690_v39 }
 0x23c   :  { %v2968_v63 = vpop.f32.mrf.mxu0  ;;  %v3084_v5 = vpop.f32.mrf.mxu1 }
 0x23d   :  { %2288 = vst.msk [vmem:[%s4510_s6 + $0x88] sm:$0xf] %vm2253_vm1, %v2499_v25  ;;  %v2042_v10 = vmax.f32 %v1993_v26, 0.0  ;;  %v1938_v60 = vmax.f32 %v4679_v59, %v1889_v55  ;;  %v4692_v63 = vld [vmem:[#allocation37_spill] sm:$0xff]  ;;  %v4693_v5 = vld [vmem:[#allocation38_spill] sm:$0xff] }
 0x23e   :  { %v1324_v49 = vpop.f32.mrf.mxu0  ;;  %v1753_v50 = vpop.f32.mrf.mxu1 }
 0x23f   :  { %v2500_v47 = vpack.c.bf16 %v2042_v10, %v2042_v10  ;;  %v1994_v48 = vadd.f32 %v4110_v29, %v1938_v60  ;;  %v1890_v46 = vmax.f32 %v1324_v49, %v1753_v50  ;;  %v4694_v10 = vmax.f32 %v4692_v63, %v4693_v5 }
 0x240   :  { %v2969_v36 = vpop.f32.mrf.mxu0  ;;  %v3085_v13 = vpop.f32.mrf.mxu1 }
 0x241   :  { %2289 = vst.msk [vmem:[%s4510_s6 + $0x8c] sm:$0xf] %vm2253_vm1, %v2500_v47  ;;  %v2043_v14 = vmax.f32 %v1994_v48, 0.0  ;;  %v1939_v33 = vmax.f32 %v4682_v32, %v1890_v46  ;;  %v4695_v36 = vld [vmem:[#allocation39_spill] sm:$0xff]  ;;  %v4696_v13 = vld [vmem:[#allocation40_spill] sm:$0xff] }
 0x242   :  { %v1329_v62 = vpop.f32.mrf.mxu0  ;;  %v1758_v23 = vpop.f32.mrf.mxu1 }
 0x243   :  { %v2501_v53 = vpack.c.bf16 %v2043_v14, %v2043_v14  ;;  %v1995_v1 = vadd.f32 %v4110_v29, %v1939_v33  ;;  %v1891_v56 = vmax.f32 %v1329_v62, %v1758_v23  ;;  %v4697_v14 = vmax.f32 %v4695_v36, %v4696_v13 }
 0x244   :  { %v2972_v57 = vpop.f32.mrf.mxu0  ;;  %v3088_v2 = vpop.f32.mrf.mxu1 }
 0x245   :  { %2290 = vst.msk [vmem:[%s4510_s6 + $0x90] sm:$0xf] %vm2253_vm1, %v2501_v53  ;;  %v2044_v17 = vmax.f32 %v1995_v1, 0.0  ;;  %v1940_v15 = vmax.f32 %v4685_v54, %v1891_v56  ;;  %v4698_v57 = vld [vmem:[#allocation41_spill] sm:$0xff]  ;;  %v4699_v2 = vld [vmem:[#allocation42_spill] sm:$0xff] }
 0x246   :  { %v1332_v6 = vpop.f32.mrf.mxu0  ;;  %v1761_v58 = vpop.f32.mrf.mxu1 }
 0x247   :  { %v2502_v34 = vpack.c.bf16 %v2044_v17, %v2044_v17  ;;  %v1996_v24 = vadd.f32 %v4110_v29, %v1940_v15  ;;  %v1892_v37 = vmax.f32 %v1332_v6, %v1761_v58  ;;  %v4700_v17 = vmax.f32 %v4698_v57, %v4699_v2 }
 0x248   :  { %v2973_v38 = vpop.f32.mrf.mxu0  ;;  %v3089_v3 = vpop.f32.mrf.mxu1 }
 0x249   :  { %2291 = vst.msk [vmem:[%s4510_s6 + $0x94] sm:$0xf] %vm2253_vm1, %v2502_v34  ;;  %v2045_v4 = vmax.f32 %v1996_v24, 0.0  ;;  %v1941_v12 = vmax.f32 %v4688_v35, %v1892_v37  ;;  %v4701_v38 = vld [vmem:[#allocation43_spill] sm:$0xff]  ;;  %v4702_v3 = vld [vmem:[#allocation44_spill] sm:$0xff] }
 0x24a   :  { %v1337_v20 = vpop.f32.mrf.mxu0  ;;  %v1766_v21 = vpop.f32.mrf.mxu1 }
 0x24b   :  { %v2503_v41 = vpack.c.bf16 %v2045_v4, %v2045_v4  ;;  %v1997_v22 = vadd.f32 %v4110_v29, %v1941_v12  ;;  %v1893_v19 = vmax.f32 %v1337_v20, %v1766_v21  ;;  %v4703_v4 = vmax.f32 %v4701_v38, %v4702_v3 }
 0x24c   :  { %v2976_v43 = vpop.f32.mrf.mxu0  ;;  %v3092_v8 = vpop.f32.mrf.mxu1 }
 0x24d   :  { %2292 = vst.msk [vmem:[%s4510_s6 + $0x98] sm:$0xf] %vm2253_vm1, %v2503_v41  ;;  %v2046_v9 = vmax.f32 %v1997_v22, 0.0  ;;  %v1942_v16 = vmax.f32 %v4691_v31, %v1893_v19  ;;  %v4704_v43 = vld [vmem:[#allocation45_spill] sm:$0xff]  ;;  %v4705_v8 = vld [vmem:[#allocation46_spill] sm:$0xff] }
 0x24e   :  { %v1340_v18 = vpop.f32.mrf.mxu0  ;;  %v1769_v44 = vpop.f32.mrf.mxu1 }
 0x24f   :  { %v2504_v45 = vpack.c.bf16 %v2046_v9, %v2046_v9  ;;  %v1998_v0 = vadd.f32 %v4110_v29, %v1942_v16  ;;  %v1894_v61 = vmax.f32 %v1340_v18, %v1769_v44  ;;  %v4706_v9 = vmax.f32 %v4704_v43, %v4705_v8 }
 0x250   :  { %v2977_v25 = vpop.f32.mrf.mxu0  ;;  %v3093_v26 = vpop.f32.mrf.mxu1 }
 0x251   :  { %2293 = vst.msk [vmem:[%s4510_s6 + $0x9c] sm:$0xf] %vm2253_vm1, %v2504_v45  ;;  %v2047_v55 = vmax.f32 %v1998_v0, 0.0  ;;  %v1943_v27 = vmax.f32 %v4694_v10, %v1894_v61  ;;  %v4707_v25 = vld [vmem:[#allocation47_spill] sm:$0xff]  ;;  %v4708_v26 = vld [vmem:[#allocation48_spill] sm:$0xff] }
 0x252   :  { %v1345_v28 = vpop.f32.mrf.mxu0  ;;  %v1774_v59 = vpop.f32.mrf.mxu1 }
 0x253   :  { %v2505_v60 = vpack.c.bf16 %v2047_v55, %v2047_v55  ;;  %v1999_v49 = vadd.f32 %v4110_v29, %v1943_v27  ;;  %v1895_v50 = vmax.f32 %v1345_v28, %v1774_v59  ;;  %v4709_v55 = vmax.f32 %v4707_v25, %v4708_v26 }
 0x254   :  { %v2980_v47 = vpop.f32.mrf.mxu0  ;;  %v3096_v48 = vpop.f32.mrf.mxu1 }
 0x255   :  { %2294 = vst.msk [vmem:[%s4510_s6 + $0xa0] sm:$0xf] %vm2253_vm1, %v2505_v60  ;;  %v2048_v46 = vmax.f32 %v1999_v49, 0.0  ;;  %v1944_v40 = vmax.f32 %v4697_v14, %v1895_v50  ;;  %v4710_v47 = vld [vmem:[#allocation49_spill] sm:$0xff]  ;;  %v4711_v48 = vld [vmem:[#allocation50_spill] sm:$0xff] }
 0x256   :  { %v1348_v42 = vpop.f32.mrf.mxu0  ;;  %v1777_v32 = vpop.f32.mrf.mxu1 }
 0x257   :  { %v2506_v33 = vpack.c.bf16 %v2048_v46, %v2048_v46  ;;  %v2000_v62 = vadd.f32 %v4110_v29, %v1944_v40  ;;  %v1896_v23 = vmax.f32 %v1348_v42, %v1777_v32  ;;  %v4712_v46 = vmax.f32 %v4710_v47, %v4711_v48 }
 0x258   :  { %v2981_v53 = vpop.f32.mrf.mxu0  ;;  %v3097_v1 = vpop.f32.mrf.mxu1 }
 0x259   :  { %2295 = vst.msk [vmem:[%s4510_s6 + $0xa4] sm:$0xf] %vm2253_vm1, %v2506_v33  ;;  %v2049_v56 = vmax.f32 %v2000_v62, 0.0  ;;  %v1945_v51 = vmax.f32 %v4700_v17, %v1896_v23  ;;  %v4713_v53 = vld [vmem:[#allocation51_spill] sm:$0xff]  ;;  %v4714_v1 = vld [vmem:[#allocation52_spill] sm:$0xff] }
 0x25a   :  { %v1353_v52 = vpop.f32.mrf.mxu0  ;;  %v1782_v54 = vpop.f32.mrf.mxu1 }
 0x25b   :  { %v2507_v15 = vpack.c.bf16 %v2049_v56, %v2049_v56  ;;  %v2001_v6 = vadd.f32 %v4110_v29, %v1945_v51  ;;  %v1897_v58 = vmax.f32 %v1353_v52, %v1782_v54  ;;  %v4715_v56 = vmax.f32 %v4713_v53, %v4714_v1 }
 0x25c   :  { %v2984_v34 = vpop.f32.mrf.mxu0  ;;  %v3100_v24 = vpop.f32.mrf.mxu1 }
 0x25d   :  { %2296 = vst.msk [vmem:[%s4510_s6 + $0xa8] sm:$0xf] %vm2253_vm1, %v2507_v15  ;;  %v2050_v37 = vmax.f32 %v2001_v6, 0.0  ;;  %v1946_v7 = vmax.f32 %v4703_v4, %v1897_v58 }
 0x25e   :  { %v1356_v11 = vpop.f32.mrf.mxu0  ;;  %v1785_v35 = vpop.f32.mrf.mxu1 }
 0x25f   :  { %v2508_v12 = vpack.c.bf16 %v2050_v37, %v2050_v37  ;;  %v2002_v20 = vadd.f32 %v4110_v29, %v1946_v7  ;;  %v1898_v21 = vmax.f32 %v1356_v11, %v1785_v35 }
 0x260   :  { %v2985_v41 = vpop.f32.mrf.mxu0  ;;  %v3101_v22 = vpop.f32.mrf.mxu1 }
 0x261   :  { %2297 = vst.msk [vmem:[%s4510_s6 + $0xac] sm:$0xf] %vm2253_vm1, %v2508_v12  ;;  %v2051_v19 = vmax.f32 %v2002_v20, 0.0  ;;  %v1947_v30 = vmax.f32 %v4706_v9, %v1898_v21 }
 0x262   :  { %v1361_v39 = vpop.f32.mrf.mxu0  ;;  %v1790_v31 = vpop.f32.mrf.mxu1 }
 0x263   :  { %v2509_v16 = vpack.c.bf16 %v2051_v19, %v2051_v19  ;;  %v2003_v18 = vadd.f32 %v4110_v29, %v1947_v30  ;;  %v1899_v44 = vmax.f32 %v1361_v39, %v1790_v31 }
 0x264   :  { %v2988_v45 = vpop.f32.mrf.mxu0  ;;  %v3104_v0 = vpop.f32.mrf.mxu1 }
 0x265   :  { %2298 = vst.msk [vmem:[%s4510_s6 + $0xb0] sm:$0xf] %vm2253_vm1, %v2509_v16  ;;  %v2052_v61 = vmax.f32 %v2003_v18, 0.0  ;;  %v1948_v63 = vmax.f32 %v4709_v55, %v1899_v44 }
 0x266   :  { %v1364_v5 = vpop.f32.mrf.mxu0  ;;  %v1793_v10 = vpop.f32.mrf.mxu1 }
 0x267   :  { %v2510_v27 = vpack.c.bf16 %v2052_v61, %v2052_v61  ;;  %v2004_v28 = vadd.f32 %v4110_v29, %v1948_v63  ;;  %v1900_v59 = vmax.f32 %v1364_v5, %v1793_v10 }
 0x268   :  { %v2989_v60 = vpop.f32.mrf.mxu0  ;;  %v3105_v49 = vpop.f32.mrf.mxu1 }
 0x269   :  { %2299 = vst.msk [vmem:[%s4510_s6 + $0xb4] sm:$0xf] %vm2253_vm1, %v2510_v27  ;;  %v2053_v50 = vmax.f32 %v2004_v28, 0.0  ;;  %v1949_v36 = vmax.f32 %v4712_v46, %v1900_v59 }
 0x26a   :  { %v1369_v13 = vpop.f32.mrf.mxu0  ;;  %v1798_v14 = vpop.f32.mrf.mxu1 }
 0x26b   :  { %v2511_v40 = vpack.c.bf16 %v2053_v50, %v2053_v50  ;;  %v2005_v42 = vadd.f32 %v4110_v29, %v1949_v36  ;;  %v1901_v32 = vmax.f32 %v1369_v13, %v1798_v14 }
 0x26c   :  { %v2992_v33 = vpop.f32.mrf.mxu0  ;;  %v3108_v62 = vpop.f32.mrf.mxu1 }
 0x26d   :  { %2300 = vst.msk [vmem:[%s4510_s6 + $0xb8] sm:$0xf] %vm2253_vm1, %v2511_v40  ;;  %v2054_v23 = vmax.f32 %v2005_v42, 0.0  ;;  %v1950_v57 = vmax.f32 %v4715_v56, %v1901_v32 }
 0x26e   :  { %v1372_v2 = vpop.f32.mrf.mxu0  ;;  %v1801_v17 = vpop.f32.mrf.mxu1 }
 0x26f   :  { %v2512_v51 = vpack.c.bf16 %v2054_v23, %v2054_v23  ;;  %v2006_v52 = vadd.f32 %v4110_v29, %v1950_v57 }
 0x270   :  { %v2993_v54 = vpop.f32.mrf.mxu0  ;;  %v3109_v15 = vpop.f32.mrf.mxu1 }
 0x271   :  { %2301 = vst.msk [vmem:[%s4510_s6 + $0xbc] sm:$0xf] %vm2253_vm1, %v2512_v51  ;;  %v2055_v6 = vmax.f32 %v2006_v52, 0.0 }
 0x273   :  { %v2513_v58 = vpack.c.bf16 %v2055_v6, %v2055_v6 }
 0x275   :  { %2302 = vst.msk [vmem:[%s4510_s6 + $0xc0] sm:$0xf] %vm2253_vm1, %v2513_v58 }

// kernel: convnet_vis_forward.4
= control target key start
LH: loop header
LB: loop body
LE: loop exit
PB: predicated region body
PF: predicated region fallthrough
CT: control target
= control target key end

     0   :  { %s8249_s4 = inlined_call_operand.vmem [shape: bf16[1664,128], index: 4, kind: input, shape index: {}]   ;;  %s8250_s0 = inlined_call_operand.vmem [shape: bf16[56,1664], index: 0, kind: input, shape index: {}]   ;;  %s8251_s1 = inlined_call_operand.vmem [shape: bf16[56,1664], index: 1, kind: input, shape index: {}]   ;;  %s8252_s2 = inlined_call_operand.vmem [shape: bf16[56,1664], index: 2, kind: input, shape index: {}]   ;;  %s8253_s3 = inlined_call_operand.vmem [shape: bf16[56,1664], index: 3, kind: input, shape index: {}]   ;;  %s8254_s5 = inlined_call_operand.vmem [shape: f32[1,128], index: 5, kind: input, shape index: {}]   ;;  %s8255_s6 = inlined_call_operand.vmem [shape: bf16[56,128], index: 6, kind: output, shape index: {}]  }
   0x1   :  { %v5905_v0 = vld [vmem:[%s8249_s4 + $0x78] sm:$0xff]   ;;  %v5923_v4 = vld [vmem:[%s8249_s4 + $0x70] sm:$0xff]   ;;  %v5941_v8 = vld [vmem:[%s8249_s4 + $0x68] sm:$0xff]  }
   0x2   :  { %v5351_v1 = vld [vmem:[%s8249_s4 + $0xf8] sm:$0xff]   ;;  %4246 = vmatprep.subr.bf16.mxu0 %v5905_v0  ;;  %v5355_v5 = vld [vmem:[%s8249_s4 + $0xf0] sm:$0xff]   ;;  %v5359_v9 = vld [vmem:[%s8249_s4 + $0xe8] sm:$0xff]  }
   0x3   :  { %v5914_v2 = vld [vmem:[%s8249_s4 + $0x38] sm:$0xff]   ;;  %4286 = vmatprep.subr.bf16.mxu1 %v5351_v1  ;;  %v5932_v6 = vld [vmem:[%s8249_s4 + $0x30] sm:$0xff]   ;;  %v5950_v10 = vld [vmem:[%s8249_s4 + $0x28] sm:$0xff]  }
   0x4   :  { %v5353_v3 = vld [vmem:[%s8249_s4 + $0xb8] sm:$0xff]   ;;  %4247 = vmatpush3.bf16.msra.mxu0 %v5914_v2  ;;  %v5357_v7 = vld [vmem:[%s8249_s4 + $0xb0] sm:$0xff]   ;;  %v5361_v11 = vld [vmem:[%s8249_s4 + $0xa8] sm:$0xff]  }
   0x5   :  { %4287 = vmatpush3.bf16.msra.mxu1 %v5353_v3  ;;  %4248 = vmatprep.subr.bf16.mxu0 %v5923_v4  ;;  %v5959_v12 = vld [vmem:[%s8249_s4 + $0x60] sm:$0xff]   ;;  %v5977_v16 = vld [vmem:[%s8249_s4 + $0x58] sm:$0xff]   ;;  %v5995_v20 = vld [vmem:[%s8249_s4 + $0x50] sm:$0xff]  }
   0x6   :  { %4288 = vmatprep.subr.bf16.mxu1 %v5355_v5  ;;  %v5363_v13 = vld [vmem:[%s8249_s4 + $0xe0] sm:$0xff]   ;;  %v5367_v17 = vld [vmem:[%s8249_s4 + $0xd8] sm:$0xff]   ;;  %v5371_v21 = vld [vmem:[%s8249_s4 + $0xd0] sm:$0xff]  }
   0x7   :  { %v5968_v14 = vld [vmem:[%s8249_s4 + $0x20] sm:$0xff]   ;;  %v5986_v18 = vld [vmem:[%s8249_s4 + $0x18] sm:$0xff]   ;;  %v6004_v22 = vld [vmem:[%s8249_s4 + $0x10] sm:$0xff]  }
   0x8   :  { %4249 = vmatpush3.bf16.msra.mxu0 %v5932_v6  ;;  %v5365_v15 = vld [vmem:[%s8249_s4 + $0xa0] sm:$0xff]   ;;  %v5369_v19 = vld [vmem:[%s8249_s4 + $0x98] sm:$0xff]   ;;  %v5373_v23 = vld [vmem:[%s8249_s4 + $0x90] sm:$0xff]  }
   0x9   :  { %4289 = vmatpush3.bf16.msra.mxu1 %v5357_v7  ;;  %4250 = vmatprep.subr.bf16.mxu0 %v5941_v8  ;;  %v6013_v24 = vld [vmem:[%s8249_s4 + $0x48] sm:$0xff]   ;;  %v6031_v28 = vld [vmem:[%s8249_s4 + $0x40] sm:$0xff]   ;;  %v6061_v36 = vld [vmem:[%s8249_s4 + $0x178] sm:$0xff]  }
   0xa   :  { %4290 = vmatprep.subr.bf16.mxu1 %v5359_v9  ;;  %v5375_v25 = vld [vmem:[%s8249_s4 + $0xc8] sm:$0xff]   ;;  %v5379_v29 = vld [vmem:[%s8249_s4 + $0xc0] sm:$0xff]   ;;  %v5389_v37 = vld [vmem:[%s8249_s4 + $0x1f8] sm:$0xff]  }
   0xb   :  { %v6022_v26 = vld [vmem:[%s8249_s4 + $0x8] sm:$0xff]   ;;  %v6040_v30 = vld [vmem:[%s8249_s4] sm:$0xff]   ;;  %v6070_v38 = vld [vmem:[%s8249_s4 + $0x138] sm:$0xff]  }
   0xc   :  { %4251 = vmatpush3.bf16.msra.mxu0 %v5950_v10  ;;  %v5377_v27 = vld [vmem:[%s8249_s4 + $0x88] sm:$0xff]   ;;  %v5381_v31 = vld [vmem:[%s8249_s4 + $0x80] sm:$0xff]   ;;  %v5391_v39 = vld [vmem:[%s8249_s4 + $0x1b8] sm:$0xff]  }
   0xd   :  { %4291 = vmatpush3.bf16.msra.mxu1 %v5361_v11  ;;  %4252 = vmatprep.subr.bf16.mxu0 %v5959_v12  ;;  %v5382_v32 = vld [vmem:[%s8250_s0] ss:$52 sps:$4 sm:$0xff]   ;;  %v5384_v33 = vld [vmem:[%s8250_s0 + $0x4] ss:$52 sps:$4 sm:$0xff]   ;;  %v5385_v34 = vld [vmem:[%s8250_s0 + $0x8] ss:$52 sps:$4 sm:$0xff]  }
   0xe   :  { %4292 = vmatprep.subr.bf16.mxu1 %v5363_v13  ;;  %v5387_v35 = vld [vmem:[%s8250_s0 + $0xc] ss:$52 sps:$4 sm:$0xff]   ;;  %1181 = vmatprep.mubr.bf16.mxu0 %v5384_v33  ;;  %v6079_v40 = vld [vmem:[%s8249_s4 + $0x170] sm:$0xff]   ;;  %v5400_v46 = vld [vmem:[%s8250_s0 + $0x68] ss:$52 sps:$4 sm:$0xff]  }
   0xf   :  { %1245 = vmatprep.mubr.bf16.mxu1 %v5387_v35  ;;  %v5393_v41 = vld [vmem:[%s8249_s4 + $0x1f0] sm:$0xff]   ;;  %v5396_v44 = vld [vmem:[%s8250_s0 + $0x6c] ss:$52 sps:$4 sm:$0xff]   ;;  %v6157_v60 = vld [vmem:[%s8249_s4 + $0x158] sm:$0xff]  }
  0x10   :  { %4253 = vmatpush3.bf16.msra.mxu0 %v5968_v14  ;;  %v6088_v42 = vld [vmem:[%s8249_s4 + $0x130] sm:$0xff]   ;;  %v6109_v48 = vld [vmem:[%s8249_s4 + $0x168] sm:$0xff]   ;;  %v6127_v52 = vld [vmem:[%s8249_s4 + $0x160] sm:$0xff]  }
  0x11   :  { %4293 = vmatpush3.bf16.msra.mxu1 %v5365_v15  ;;  %4254 = vmatprep.subr.bf16.mxu0 %v5977_v16  ;;  %v5395_v43 = vld [vmem:[%s8249_s4 + $0x1b0] sm:$0xff]   ;;  %v5403_v49 = vld [vmem:[%s8249_s4 + $0x1e8] sm:$0xff]   ;;  %v5407_v53 = vld [vmem:[%s8249_s4 + $0x1e0] sm:$0xff]  }
  0x12   :  { %4294 = vmatprep.subr.bf16.mxu1 %v5367_v17  ;;  %v5398_v45 = vld [vmem:[%s8250_s0 + $0x74] ss:$52 sps:$4 sm:$0xff]   ;;  %v5401_v47 = vld [vmem:[%s8250_s0 + $0x70] ss:$52 sps:$4 sm:$0xff]   ;;  %v5415_v59 = vld [vmem:[%s8250_s0 + $0xd8] ss:$52 sps:$4 sm:$0xff]  }
  0x13   :  { %v6118_v50 = vld [vmem:[%s8249_s4 + $0x128] sm:$0xff]   ;;  %v6136_v54 = vld [vmem:[%s8249_s4 + $0x120] sm:$0xff]   ;;  %v5412_v57 = vld [vmem:[%s8250_s0 + $0xdc] ss:$52 sps:$4 sm:$0xff]  }
  0x14   :  { %4255 = vmatpush3.bf16.msra.mxu0 %v5986_v18  ;;  %v5405_v51 = vld [vmem:[%s8249_s4 + $0x1a8] sm:$0xff]   ;;  %v5409_v55 = vld [vmem:[%s8249_s4 + $0x1a0] sm:$0xff]   ;;  %v5417_v61 = vld [vmem:[%s8249_s4 + $0x1d8] sm:$0xff]  }
  0x15   :  { %4295 = vmatpush3.bf16.msra.mxu1 %v5369_v19  ;;  %4256 = vmatprep.subr.bf16.mxu0 %v5995_v20  ;;  %v5410_v56 = vld [vmem:[%s8250_s0 + $0xd4] ss:$52 sps:$4 sm:$0xff]   ;;  %v5414_v58 = vld [vmem:[%s8250_s0 + $0xd0] ss:$52 sps:$4 sm:$0xff]   ;;  %v6166_v62 = vld [vmem:[%s8249_s4 + $0x118] sm:$0xff]  }
  0x16   :  { %4296 = vmatprep.subr.bf16.mxu1 %v5371_v21  ;;  %v5419_v63 = vld [vmem:[%s8249_s4 + $0x198] sm:$0xff]   ;;  %v6175_v1 = vld [vmem:[%s8249_s4 + $0x150] sm:$0xff]   ;;  %v275_v11 = vld [vmem:[%s8250_s0 + $0x140] sm:$0xff] }
  0x17   :  { %v5421_v3 = vld [vmem:[%s8249_s4 + $0x1d0] sm:$0xff]   ;;  %v274_v9 = vld [vmem:[%s8250_s0 + $0x138] sm:$0xff]  ;;  %v3944_v15 = vcombine.high %v275_v11, %v275_v11  ;;  %v3943_v19 = vcombine.low %v275_v11, %v275_v11  ;;  %v6199_v21 = vld [vmem:[%s8249_s4 + $0x148] sm:$0xff]  }
  0x18   :  { %4257 = vmatpush3.bf16.msra.mxu0 %v6004_v22  ;;  %v6184_v5 = vld [vmem:[%s8249_s4 + $0x110] sm:$0xff]   ;;  %v3942_v13 = vcombine.high %v274_v9, %v274_v9  ;;  %v3941_v17 = vcombine.low %v274_v9, %v274_v9  ;;  %v6237_v33 = vld [vmem:[%s8249_s4 + $0x180] sm:$0xff]  }
  0x19   :  { %4297 = vmatpush3.bf16.msra.mxu1 %v5373_v23  ;;  %4258 = vmatprep.subr.bf16.mxu0 %v6013_v24  ;;  %v5423_v7 = vld [vmem:[%s8249_s4 + $0x190] sm:$0xff]   ;;  %v5429_v23 = vld [vmem:[%s8249_s4 + $0x1c8] sm:$0xff]   ;;  %v6351_v9 = vld [vmem:[%s8249_s4 + $0x220] sm:$0xff]  }
  0x1a   :  { %4298 = vmatprep.subr.bf16.mxu1 %v5375_v25  ;;  %v6207_v25 = vld [vmem:[%s8249_s4 + $0x108] sm:$0xff]   ;;  %v6357_v11 = vld [vmem:[%s8249_s4 + $0x2a0] sm:$0xff]  }
  0x1b   :  { %v5438_v35 = vld [vmem:[%s8250_s0 + $0x14] ss:$52 sps:$4 sm:$0xff]   ;;  %8298 = vst [vmem:[#allocation2_spill] sm:$0xff] %v6357_v11 }
  0x1c   :  { %4259 = vmatpush3.bf16.msra.mxu0 %v6022_v26 }
  0x1d   :  { %4299 = vmatpush3.bf16.msra.mxu1 %v5377_v27  ;;  %4260 = vmatprep.subr.bf16.mxu0 %v6031_v28  ;;  %v6212_v27 = vld [vmem:[%s8249_s4 + $0x188] sm:$0xff]  }
  0x1e   :  { %4300 = vmatprep.subr.bf16.mxu1 %v5379_v29  ;;  %v6218_v29 = vld [vmem:[%s8249_s4 + $0x140] sm:$0xff]  }
  0x20   :  { %4261 = vmatpush3.bf16.msra.mxu0 %v6040_v30 }
  0x21   :  { %4301 = vmatpush3.bf16.msra.mxu1 %v5381_v31  ;;  %4326 = vmatprep.subr.bf16.mxu0 %v6061_v36  ;;  %v6225_v31 = vld [vmem:[%s8249_s4 + $0x1c0] sm:$0xff]  }
  0x22   :  { %4366 = vmatprep.subr.bf16.mxu1 %v5389_v37  ;;  %v5439_v37 = vld [vmem:[%s8250_s0 + $0x18] ss:$52 sps:$4 sm:$0xff]  }
  0x23   :  { %1182 = vmatmul.mubr.bf16.vlgmr.msra.gmra.mxu0 %v5382_v32  ;;  %v6231_v32 = vld [vmem:[%s8249_s4 + $0x100] sm:$0xff]  }
  0x24   :  { %1246 = vmatmul.mubr.bf16.vlgmr.msra.gmra.mxu1 %v5385_v34  ;;  %4327 = vmatpush3.bf16.msra.mxu0 %v6070_v38  ;;  %v5436_v34 = vld [vmem:[%s8250_s0 + $0x10] ss:$52 sps:$4 sm:$0xff]  }
  0x25   :  { %4367 = vmatpush3.bf16.msra.mxu1 %v5391_v39  ;;  %4328 = vmatprep.subr.bf16.mxu0 %v6079_v40  ;;  %v5441_v39 = vld [vmem:[%s8250_s0 + $0x1c] ss:$52 sps:$4 sm:$0xff]  }
  0x26   :  { %4368 = vmatprep.subr.bf16.mxu1 %v5393_v41  ;;  %1189 = vmatprep.mubr.bf16.mxu0 %v5396_v44  ;;  %v6256_v41 = vld [vmem:[%s8249_s4 + $0x278] sm:$0xff]  }
  0x27   :  { %1253 = vmatprep.mubr.bf16.mxu1 %v5398_v45  ;;  %v6267_v44 = vld [vmem:[%s8249_s4 + $0x238] sm:$0xff]  }
  0x28   :  { %4329 = vmatpush3.bf16.msra.mxu0 %v6088_v42  ;;  %v6273_v45 = vld [vmem:[%s8249_s4 + $0x2b8] sm:$0xff]  }
  0x29   :  { %4369 = vmatpush3.bf16.msra.mxu1 %v5395_v43  ;;  %4330 = vmatprep.subr.bf16.mxu0 %v6109_v48  ;;  %v6261_v43 = vld [vmem:[%s8249_s4 + $0x2f8] sm:$0xff]  }
  0x2a   :  { %4370 = vmatprep.subr.bf16.mxu1 %v5403_v49  ;;  %v6291_v49 = vld [vmem:[%s8249_s4 + $0x230] sm:$0xff]  }
  0x2b   :  { %1190 = vmatmul.mubr.bf16.gmra.mxu0 %v5400_v46  ;;  %v6279_v46 = vld [vmem:[%s8249_s4 + $0x270] sm:$0xff]  }
  0x2c   :  { %1254 = vmatmul.mubr.bf16.gmra.mxu1 %v5401_v47  ;;  %4331 = vmatpush3.bf16.msra.mxu0 %v6118_v50  ;;  %v6285_v47 = vld [vmem:[%s8249_s4 + $0x2f0] sm:$0xff]  }
  0x2d   :  { %4371 = vmatpush3.bf16.msra.mxu1 %v5405_v51  ;;  %4332 = vmatprep.subr.bf16.mxu0 %v6127_v52  ;;  %v6297_v51 = vld [vmem:[%s8249_s4 + $0x2b0] sm:$0xff]  }
  0x2e   :  { %4372 = vmatprep.subr.bf16.mxu1 %v5407_v53  ;;  %1197 = vmatprep.mubr.bf16.mxu0 %v5410_v56  ;;  %v5450_v53 = vld [vmem:[%s8250_s0 + $0x7c] ss:$52 sps:$4 sm:$0xff]   ;;  %v5453_v56 = vld [vmem:[%s8250_s0 + $0x84] ss:$52 sps:$4 sm:$0xff]  }
  0x2f   :  { %1261 = vmatprep.mubr.bf16.mxu1 %v5412_v57  ;;  %v6313_v57 = vld [vmem:[%s8249_s4 + $0x268] sm:$0xff]  }
  0x30   :  { %4333 = vmatpush3.bf16.msra.mxu0 %v6136_v54 }
  0x31   :  { %4373 = vmatpush3.bf16.msra.mxu1 %v5409_v55  ;;  %4334 = vmatprep.subr.bf16.mxu0 %v6157_v60  ;;  %v5452_v55 = vld [vmem:[%s8250_s0 + $0x78] ss:$52 sps:$4 sm:$0xff]  }
  0x32   :  { %4374 = vmatprep.subr.bf16.mxu1 %v5417_v61  ;;  %v6327_v61 = vld [vmem:[%s8249_s4 + $0x228] sm:$0xff]  }
  0x33   :  { %1198 = vmatmul.mubr.bf16.gmra.mxu0 %v5414_v58  ;;  %v6318_v58 = vld [vmem:[%s8249_s4 + $0x2e8] sm:$0xff]  }
  0x34   :  { %1262 = vmatmul.mubr.bf16.gmra.mxu1 %v5415_v59  ;;  %4335 = vmatpush3.bf16.msra.mxu0 %v6166_v62  ;;  %v5457_v59 = vld [vmem:[%s8250_s0 + $0x80] ss:$52 sps:$4 sm:$0xff]  }
  0x35   :  { %4375 = vmatpush3.bf16.msra.mxu1 %v5419_v63  ;;  %4336 = vmatprep.subr.bf16.mxu0 %v6175_v1  ;;  %v6333_v63 = vld [vmem:[%s8249_s4 + $0x2a8] sm:$0xff]  }
  0x36   :  { %4376 = vmatprep.subr.bf16.mxu1 %v5421_v3  ;;  %1205 = vmatprep.mubr.bf16.mxu0 %v3942_v13  ;;  %v6339_v3 = vld [vmem:[%s8249_s4 + $0x260] sm:$0xff]  }
  0x37   :  { %1269 = vmatprep.mubr.bf16.mxu1 %v3944_v15  ;;  %v5464_v13 = vld [vmem:[%s8250_s0 + $0xe4] ss:$52 sps:$4 sm:$0xff]   ;;  %v5466_v15 = vld [vmem:[%s8250_s0 + $0xe0] ss:$52 sps:$4 sm:$0xff]  }
  0x38   :  { %4337 = vmatpush3.bf16.msra.mxu0 %v6184_v5 }
  0x39   :  { %4377 = vmatpush3.bf16.msra.mxu1 %v5423_v7  ;;  %4338 = vmatprep.subr.bf16.mxu0 %v6199_v21  ;;  %v6345_v7 = vld [vmem:[%s8249_s4 + $0x2e0] sm:$0xff]  }
  0x3a   :  { %4378 = vmatprep.subr.bf16.mxu1 %v5429_v23  ;;  %v6378_v23 = vld [vmem:[%s8249_s4 + $0x2d8] sm:$0xff]  }
  0x3b   :  { %1206 = vmatmul.mubr.bf16.gmra.mxu0 %v3941_v17  ;;  %v5467_v17 = vld [vmem:[%s8250_s0 + $0xec] ss:$52 sps:$4 sm:$0xff]   ;;  %8299 = vst [vmem:[#allocation3_spill] sm:$0xff] %v6378_v23 }
  0x3c   :  { %1270 = vmatmul.mubr.bf16.gmra.mxu1 %v3943_v19  ;;  %4339 = vmatpush3.bf16.msra.mxu0 %v6207_v25  ;;  %v6373_v19 = vld [vmem:[%s8249_s4 + $0x258] sm:$0xff]  }
  0x3d   :  { %4379 = vmatpush3.bf16.msra.mxu1 %v6212_v27  ;;  %4340 = vmatprep.subr.bf16.mxu0 %v6218_v29 }
  0x3e   :  { %4380 = vmatprep.subr.bf16.mxu1 %v6225_v31  ;;  %1309 = vmatprep.mubr.bf16.mxu0 %v5438_v35  ;;  %v6387_v35 = vld [vmem:[%s8249_s4 + $0x218] sm:$0xff]  }
  0x3f   :  { %1373 = vmatprep.mubr.bf16.mxu1 %v5441_v39  ;;  %v6399_v39 = vld [vmem:[%s8249_s4 + $0x250] sm:$0xff]  }
  0x40   :  { %4341 = vmatpush3.bf16.msra.mxu0 %v6231_v32 }
  0x41   :  { %4381 = vmatpush3.bf16.msra.mxu1 %v6237_v33  ;;  %4406 = vmatprep.subr.bf16.mxu0 %v6256_v41 }
  0x42   :  { %4446 = vmatprep.subr.bf16.mxu1 %v6261_v43 }
  0x43   :  { %1310 = vmatmul.mubr.bf16.vlgmr.msra.gmra.mxu0 %v5436_v34  ;;  %v5471_v34 = vld [vmem:[%s8250_s0 + $0xe8] ss:$52 sps:$4 sm:$0xff]  }
  0x44   :  { %1374 = vmatmul.mubr.bf16.vlgmr.msra.gmra.mxu1 %v5439_v37  ;;  %4407 = vmatpush3.bf16.msra.mxu0 %v6267_v44  ;;  %v6393_v37 = vld [vmem:[%s8249_s4 + $0x298] sm:$0xff]  }
  0x45   :  { %4447 = vmatpush3.bf16.msra.mxu1 %v6273_v45  ;;  %4408 = vmatprep.subr.bf16.mxu0 %v6279_v46  ;;  %8300 = vst [vmem:[#allocation4_spill] sm:$0xff] %v6393_v37 }
  0x46   :  { %4448 = vmatprep.subr.bf16.mxu1 %v6285_v47  ;;  %1317 = vmatprep.mubr.bf16.mxu0 %v5450_v53  ;;  %v6405_v53 = vld [vmem:[%s8249_s4 + $0x2d0] sm:$0xff]  }
  0x47   :  { %1381 = vmatprep.mubr.bf16.mxu1 %v5453_v56  ;;  %8301 = vst [vmem:[#allocation5_spill] sm:$0xff] %v6405_v53  ;;  %v6417_v56 = vld [vmem:[%s8249_s4 + $0x290] sm:$0xff]  }
  0x48   :  { %4409 = vmatpush3.bf16.msra.mxu0 %v6291_v49  ;;  %8302 = vst [vmem:[#allocation6_spill] sm:$0xff] %v6417_v56 }
  0x49   :  { %4449 = vmatpush3.bf16.msra.mxu1 %v6297_v51  ;;  %4410 = vmatprep.subr.bf16.mxu0 %v6313_v57 }
  0x4a   :  { %4450 = vmatprep.subr.bf16.mxu1 %v6318_v58 }
  0x4b   :  { %1318 = vmatmul.mubr.bf16.gmra.mxu0 %v5452_v55  ;;  %v6411_v55 = vld [vmem:[%s8249_s4 + $0x210] sm:$0xff]  }
  0x4c   :  { %1382 = vmatmul.mubr.bf16.gmra.mxu1 %v5457_v59  ;;  %4411 = vmatpush3.bf16.msra.mxu0 %v6327_v61  ;;  %v276_v59 = vld [vmem:[%s8250_s0 + $0x148] sm:$0xff] }
  0x4d   :  { %4451 = vmatpush3.bf16.msra.mxu1 %v6333_v63  ;;  %4412 = vmatprep.subr.bf16.mxu0 %v6339_v3 }
  0x4e   :  { %4452 = vmatprep.subr.bf16.mxu1 %v6345_v7  ;;  %1325 = vmatprep.mubr.bf16.mxu0 %v5464_v13  ;;  %v3946_v13 = vcombine.high %v276_v59, %v276_v59 }
  0x4f   :  { %1389 = vmatprep.mubr.bf16.mxu1 %v5467_v17  ;;  %v277_v17 = vld [vmem:[%s8250_s0 + $0x150] sm:$0xff] }
  0x50   :  { %4413 = vmatpush3.bf16.msra.mxu0 %v6351_v9 }
  0x51   :  { %4453 = vmatpush3.bf16.msra.mxu1 %v6357_v11  ;;  %4414 = vmatprep.subr.bf16.mxu0 %v6373_v19  ;;  %v6490_v11 = vld [vmem:[%s8249_s4 + $0x338] sm:$0xff]  }
  0x52   :  { %4454 = vmatprep.subr.bf16.mxu1 %v6378_v23  ;;  %v6435_v23 = vld [vmem:[%s8249_s4 + $0x2c8] sm:$0xff]  }
  0x53   :  { %1326 = vmatmul.mubr.bf16.gmra.mxu0 %v5466_v15  ;;  %v3945_v15 = vcombine.low %v276_v59, %v276_v59  ;;  %8303 = vst [vmem:[#allocation7_spill] sm:$0xff] %v6435_v23  ;;  %v6440_v59 = vld [vmem:[%s8249_s4 + $0x208] sm:$0xff]  }
  0x54   :  { %1390 = vmatmul.mubr.bf16.gmra.mxu1 %v5471_v34  ;;  %4415 = vmatpush3.bf16.msra.mxu0 %v6387_v35  ;;  %v3948_v34 = vcombine.high %v277_v17, %v277_v17 }
  0x55   :  { %4455 = vmatpush3.bf16.msra.mxu1 %v6393_v37  ;;  %4416 = vmatprep.subr.bf16.mxu0 %v6399_v39  ;;  %v3947_v37 = vcombine.low %v277_v17, %v277_v17  ;;  %v6459_v17 = vld [vmem:[%s8249_s4 + $0x2c0] sm:$0xff]  }
  0x56   :  { %4456 = vmatprep.subr.bf16.mxu1 %v6405_v53  ;;  %v6430_v53 = vld [vmem:[%s8249_s4 + $0x248] sm:$0xff]   ;;  %1333 = vmatprep.mubr.bf16.mxu0 %v3946_v13  ;;  %8305 = vst [vmem:[#allocation9_spill] sm:$0xff] %v6459_v17 }
  0x57   :  { %1397 = vmatprep.mubr.bf16.mxu1 %v3948_v34  ;;  %v6447_v13 = vld [vmem:[%s8249_s4 + $0x288] sm:$0xff]   ;;  %v6471_v34 = vld [vmem:[%s8249_s4 + $0x280] sm:$0xff]  }
  0x58   :  { %4417 = vmatpush3.bf16.msra.mxu0 %v6411_v55  ;;  %8304 = vst [vmem:[#allocation8_spill] sm:$0xff] %v6447_v13  ;;  %8306 = vst [vmem:[#allocation10_spill] sm:$0xff] %v6471_v34 }
  0x59   :  { %4457 = vmatpush3.bf16.msra.mxu1 %v6417_v56  ;;  %4418 = vmatprep.subr.bf16.mxu0 %v6430_v53  ;;  %v5495_v56 = vld [vmem:[%s8250_s0 + $0x2c] ss:$52 sps:$4 sm:$0xff]  }
  0x5a   :  { %4458 = vmatprep.subr.bf16.mxu1 %v6435_v23  ;;  %v5492_v23 = vld [vmem:[%s8250_s0 + $0x24] ss:$52 sps:$4 sm:$0xff]  }
  0x5b   :  { %1334 = vmatmul.mubr.bf16.gmra.mxu0 %v3945_v15  ;;  %v6453_v15 = vld [vmem:[%s8249_s4 + $0x240] sm:$0xff]  }
  0x5c   :  { %1398 = vmatmul.mubr.bf16.gmra.mxu1 %v3947_v37  ;;  %4419 = vmatpush3.bf16.msra.mxu0 %v6440_v59  ;;  %v6465_v37 = vld [vmem:[%s8249_s4 + $0x200] sm:$0xff]  }
  0x5d   :  { %4459 = vmatpush3.bf16.msra.mxu1 %v6447_v13  ;;  %4420 = vmatprep.subr.bf16.mxu0 %v6453_v15  ;;  %v5490_v13 = vld [vmem:[%s8250_s0 + $0x20] ss:$52 sps:$4 sm:$0xff]  }
  0x5e   :  { %4460 = vmatprep.subr.bf16.mxu1 %v6459_v17  ;;  %v5493_v17 = vld [vmem:[%s8250_s0 + $0x28] ss:$52 sps:$4 sm:$0xff]   ;;  %1437 = vmatprep.mubr.bf16.mxu0 %v5492_v23  ;;  %v5498_v23 = vld [vmem:[%s8250_s0 + $0x8c] ss:$52 sps:$4 sm:$0xff]  }
  0x5f   :  { %1501 = vmatprep.mubr.bf16.mxu1 %v5495_v56  ;;  %v5500_v56 = vld [vmem:[%s8250_s0 + $0x88] ss:$52 sps:$4 sm:$0xff]  }
  0x60   :  { %4421 = vmatpush3.bf16.msra.mxu0 %v6465_v37 }
  0x61   :  { %4461 = vmatpush3.bf16.msra.mxu1 %v6471_v34  ;;  %v6496_v34 = vld [vmem:[%s8249_s4 + $0x330] sm:$0xff]   ;;  %5254 = vmatprep.subr.bf16.mxu0 %v6490_v11 }
  0x62   :  { %4498 = vmatprep.subr.bf16.mxu1 %v5905_v0  ;;  %v5501_v0 = vld [vmem:[%s8250_s0 + $0x94] ss:$52 sps:$4 sm:$0xff]  }
  0x63   :  { %1438 = vmatmul.mubr.bf16.vlgmr.msra.gmra.mxu0 %v5490_v13  ;;  %v6515_v13 = vld [vmem:[%s8249_s4 + $0x328] sm:$0xff]  }
  0x64   :  { %1502 = vmatmul.mubr.bf16.vlgmr.msra.gmra.mxu1 %v5493_v17  ;;  %5255 = vmatpush3.bf16.msra.mxu0 %v6490_v11  ;;  %v6530_v17 = vld [vmem:[%s8249_s4 + $0x320] sm:$0xff]  }
  0x65   :  { %4499 = vmatpush3.bf16.msra.mxu1 %v5914_v2  ;;  %5256 = vmatprep.subr.bf16.mxu0 %v6496_v34  ;;  %v5504_v2 = vld [vmem:[%s8250_s0 + $0x90] ss:$52 sps:$4 sm:$0xff]  }
  0x66   :  { %4500 = vmatprep.subr.bf16.mxu1 %v5923_v4  ;;  %1445 = vmatprep.mubr.bf16.mxu0 %v5498_v23  ;;  %v5506_v4 = vld [vmem:[%s8250_s0 + $0xf4] ss:$52 sps:$4 sm:$0xff]   ;;  %v5509_v23 = vld [vmem:[%s8250_s0 + $0xfc] ss:$52 sps:$4 sm:$0xff]  }
  0x67   :  { %1509 = vmatprep.mubr.bf16.mxu1 %v5501_v0  ;;  %v6548_v0 = vld [vmem:[%s8249_s4 + $0x318] sm:$0xff]  }
  0x68   :  { %5257 = vmatpush3.bf16.msra.mxu0 %v6496_v34 }
  0x69   :  { %4501 = vmatpush3.bf16.msra.mxu1 %v5932_v6  ;;  %5258 = vmatprep.subr.bf16.mxu0 %v6515_v13  ;;  %v5508_v6 = vld [vmem:[%s8250_s0 + $0xf0] ss:$52 sps:$4 sm:$0xff]  }
  0x6a   :  { %4502 = vmatprep.subr.bf16.mxu1 %v5941_v8  ;;  %v278_v8 = vld [vmem:[%s8250_s0 + $0x158] sm:$0xff] }
  0x6b   :  { %1446 = vmatmul.mubr.bf16.gmra.mxu0 %v5500_v56  ;;  %v3950_v56 = vcombine.high %v278_v8, %v278_v8 }
  0x6c   :  { %1510 = vmatmul.mubr.bf16.gmra.mxu1 %v5504_v2  ;;  %1453 = vmatprep.mubr.bf16.mxu0 %v5506_v4  ;;  %v279_v2 = vld [vmem:[%s8250_s0 + $0x160] sm:$0xff] }
  0x6d   :  { %5259 = vmatpush3.bf16.msra.mxu0 %v6515_v13  ;;  %4503 = vmatpush3.bf16.msra.mxu1 %v5950_v10  ;;  %v5512_v10 = vld [vmem:[%s8250_s0 + $0xf8] ss:$52 sps:$4 sm:$0xff]   ;;  %v3952_v4 = vcombine.high %v279_v2, %v279_v2 }
  0x6e   :  { %5260 = vmatprep.subr.bf16.mxu0 %v6530_v17  ;;  %4504 = vmatprep.subr.bf16.mxu1 %v5959_v12  ;;  %v6563_v12 = vld [vmem:[%s8249_s4 + $0x310] sm:$0xff]  }
  0x6f   :  { %1517 = vmatprep.mubr.bf16.mxu1 %v5509_v23  ;;  %v3951_v23 = vcombine.low %v279_v2, %v279_v2  ;;  %v5530_v2 = vld [vmem:[%s8251_s1 + $0xd4] ss:$52 sps:$4 sm:$0xff]  }
  0x71   :  { %5261 = vmatpush3.bf16.msra.mxu0 %v6530_v17  ;;  %4505 = vmatpush3.bf16.msra.mxu1 %v5968_v14  ;;  %v6572_v14 = vld [vmem:[%s8249_s4 + $0x308] sm:$0xff]  }
  0x72   :  { %5262 = vmatprep.subr.bf16.mxu0 %v6548_v0  ;;  %4506 = vmatprep.subr.bf16.mxu1 %v5977_v16  ;;  %v3949_v16 = vcombine.low %v278_v8, %v278_v8  ;;  %v5527_v8 = vld [vmem:[%s8251_s1 + $0x6c] ss:$52 sps:$4 sm:$0xff]  }
  0x73   :  { %1454 = vmatmul.mubr.bf16.gmra.mxu0 %v5508_v6  ;;  %v5520_v6 = vld [vmem:[%s8250_s0 + $0x30] ss:$52 sps:$4 sm:$0xff]  }
  0x74   :  { %1518 = vmatmul.mubr.bf16.gmra.mxu1 %v5512_v10  ;;  %1461 = vmatprep.mubr.bf16.mxu0 %v3950_v56  ;;  %v5526_v10 = vld [vmem:[%s8250_s0 + $0x168] ss:$0 sps:$4 sm:$0xff]  }
  0x75   :  { %5263 = vmatpush3.bf16.msra.mxu0 %v6548_v0  ;;  %4507 = vmatpush3.bf16.msra.mxu1 %v5986_v18  ;;  %v6584_v18 = vld [vmem:[%s8249_s4 + $0x300] sm:$0xff]   ;;  %v5529_v56 = vld [vmem:[%s8251_s1 + $0x68] ss:$52 sps:$4 sm:$0xff]  }
  0x76   :  { %5264 = vmatprep.subr.bf16.mxu0 %v6563_v12  ;;  %4508 = vmatprep.subr.bf16.mxu1 %v5995_v20  ;;  %v5524_v20 = vld [vmem:[%s8251_s1 + $0x4] ss:$52 sps:$4 sm:$0xff]  }
  0x77   :  { %1525 = vmatprep.mubr.bf16.mxu1 %v3952_v4  ;;  %v5537_v4 = vld [vmem:[%s8251_s1 + $0xc] ss:$52 sps:$4 sm:$0xff]  }
  0x79   :  { %5265 = vmatpush3.bf16.msra.mxu0 %v6563_v12  ;;  %4509 = vmatpush3.bf16.msra.mxu1 %v6004_v22  ;;  %v5521_v22 = vld [vmem:[%s8250_s0 + $0x98] ss:$52 sps:$4 sm:$0xff]  }
  0x7a   :  { %5266 = vmatprep.subr.bf16.mxu0 %v6572_v14  ;;  %4510 = vmatprep.subr.bf16.mxu1 %v6013_v24  ;;  %v5522_v24 = vld [vmem:[%s8251_s1] ss:$52 sps:$4 sm:$0xff]  }
  0x7b   :  { %1462 = vmatmul.mubr.bf16.gmra.mxu0 %v3949_v16  ;;  %v5532_v16 = vld [vmem:[%s8251_s1 + $0xd0] ss:$52 sps:$4 sm:$0xff]  }
  0x7c   :  { %1526 = vmatmul.mubr.bf16.gmra.mxu1 %v3951_v23  ;;  %5270 = vmatprep.mubr.bf16.mxu0 %v5520_v6  ;;  %v1639_v23 = vld [vmem:[%s8251_s1 + $0x138] sm:$0xff] }
  0x7d   :  { %5267 = vmatpush3.bf16.msra.mxu0 %v6572_v14  ;;  %4511 = vmatpush3.bf16.msra.mxu1 %v6022_v26  ;;  %v6604_v26 = vld [vmem:[%s8249_s4 + $0xf8] sm:$0xff]   ;;  %v4098_v6 = vcombine.high %v1639_v23, %v1639_v23 }
  0x7e   :  { %5268 = vmatprep.subr.bf16.mxu0 %v6584_v18  ;;  %4512 = vmatprep.subr.bf16.mxu1 %v6031_v28  ;;  %v5525_v28 = vld [vmem:[%s8250_s0 + $0x100] ss:$52 sps:$4 sm:$0xff]  }
  0x7f   :  { %1922 = vmatprep.mubr.bf16.mxu1 %v5524_v20  ;;  %v6691_v20 = vld [vmem:[%s8249_s4 + $0x98] sm:$0xff]  }
  0x81   :  { %5269 = vmatpush3.bf16.msra.mxu0 %v6584_v18  ;;  %4513 = vmatpush3.bf16.msra.mxu1 %v6040_v30  ;;  %v6617_v30 = vld [vmem:[%s8249_s4 + $0xb8] sm:$0xff]  }
  0x82   :  { %4538 = vmatprep.subr.bf16.mxu0 %v6604_v26  ;;  %4578 = vmatprep.subr.bf16.mxu1 %v6061_v36  ;;  %v6624_v36 = vld [vmem:[%s8249_s4 + $0xf0] sm:$0xff]  }
  0x84   :  { %5271 = vmatmul.mubr.bf16.vlgmr.msra.gmra.mxu0 %v5521_v22  ;;  %1923 = vmatmul.mubr.bf16.vlgmr.msra.gmra.mxu1 %v5522_v24  ;;  %v6705_v22 = vld [vmem:[%s8249_s4 + $0x90] sm:$0xff]   ;;  %v6715_v24 = vld [vmem:[%s8249_s4 + $0xc8] sm:$0xff]  }
  0x85   :  { %4539 = vmatpush3.bf16.msra.mxu0 %v6617_v30  ;;  %4579 = vmatpush3.bf16.msra.mxu1 %v6070_v38  ;;  %v6637_v38 = vld [vmem:[%s8249_s4 + $0xb0] sm:$0xff]  }
  0x86   :  { %4540 = vmatprep.subr.bf16.mxu0 %v6624_v36  ;;  %4580 = vmatprep.subr.bf16.mxu1 %v6079_v40  ;;  %v6644_v40 = vld [vmem:[%s8249_s4 + $0xe8] sm:$0xff]  }
  0x87   :  { %5274 = vmatprep.mubr.bf16.mxu0 %v5525_v28  ;;  %1930 = vmatprep.mubr.bf16.mxu1 %v5527_v8  ;;  %v5538_v28 = vld [vmem:[%s8251_s1 + $0x10] ss:$52 sps:$4 sm:$0xff]   ;;  %v6752_v8 = vld [vmem:[%s8249_s4 + $0x1f8] sm:$0xff]  }
  0x89   :  { %4541 = vmatpush3.bf16.msra.mxu0 %v6637_v38  ;;  %4581 = vmatpush3.bf16.msra.mxu1 %v6088_v42  ;;  %v6657_v42 = vld [vmem:[%s8249_s4 + $0xa8] sm:$0xff]  }
  0x8a   :  { %4542 = vmatprep.subr.bf16.mxu0 %v6644_v40  ;;  %4582 = vmatprep.subr.bf16.mxu1 %v6109_v48  ;;  %v6664_v48 = vld [vmem:[%s8249_s4 + $0xe0] sm:$0xff]  }
  0x8c   :  { %5275 = vmatmul.mubr.bf16.gmra.mxu0 %v5526_v10  ;;  %1931 = vmatmul.mubr.bf16.gmra.mxu1 %v5529_v56  ;;  %v5544_v10 = vld [vmem:[%s8251_s1 + $0x7c] ss:$52 sps:$4 sm:$0xff]  }
  0x8d   :  { %4543 = vmatpush3.bf16.msra.mxu0 %v6657_v42  ;;  %4583 = vmatpush3.bf16.msra.mxu1 %v6118_v50  ;;  %v6677_v50 = vld [vmem:[%s8249_s4 + $0xa0] sm:$0xff]   ;;  %v6769_v56 = vld [vmem:[%s8249_s4 + $0x1f0] sm:$0xff]  }
  0x8e   :  { %4544 = vmatprep.subr.bf16.mxu0 %v6664_v48  ;;  %4584 = vmatprep.subr.bf16.mxu1 %v6127_v52  ;;  %v6684_v52 = vld [vmem:[%s8249_s4 + $0xd8] sm:$0xff]  }
  0x8f   :  { %1938 = vmatprep.mubr.bf16.mxu1 %v5530_v2  ;;  %1986 = vmatprep.mubr.bf16.mxu0 %v5537_v4  ;;  %v5546_v2 = vld [vmem:[%s8251_s1 + $0x78] ss:$52 sps:$4 sm:$0xff]   ;;  %v5547_v4 = vld [vmem:[%s8251_s1 + $0xdc] ss:$52 sps:$4 sm:$0xff]  }
  0x91   :  { %4545 = vmatpush3.bf16.msra.mxu0 %v6677_v50  ;;  %4585 = vmatpush3.bf16.msra.mxu1 %v6136_v54  ;;  %v6698_v54 = vld [vmem:[%s8249_s4 + $0xd0] sm:$0xff]  }
  0x92   :  { %4546 = vmatprep.subr.bf16.mxu0 %v6684_v52  ;;  %4586 = vmatprep.subr.bf16.mxu1 %v6157_v60  ;;  %v4097_v60 = vcombine.low %v1639_v23, %v1639_v23  ;;  %v5549_v23 = vld [vmem:[%s8251_s1 + $0xd8] ss:$52 sps:$4 sm:$0xff]  }
  0x94   :  { %1939 = vmatmul.mubr.bf16.gmra.mxu1 %v5532_v16  ;;  %v5550_v16 = vld [vmem:[%s8251_s1 + $0xe4] ss:$52 sps:$4 sm:$0xff]  }
  0x95   :  { %4547 = vmatpush3.bf16.msra.mxu0 %v6691_v20  ;;  %4587 = vmatpush3.bf16.msra.mxu1 %v6166_v62  ;;  %v5540_v62 = vld [vmem:[%s8251_s1 + $0x14] ss:$52 sps:$4 sm:$0xff]  }
  0x96   :  { %4548 = vmatprep.subr.bf16.mxu0 %v6698_v54  ;;  %4588 = vmatprep.subr.bf16.mxu1 %v6175_v1  ;;  %v6722_v1 = vld [vmem:[%s8249_s4 + $0x88] sm:$0xff]  }
  0x97   :  { %1946 = vmatprep.mubr.bf16.mxu1 %v4098_v6  ;;  %v5552_v6 = vld [vmem:[%s8251_s1 + $0xe0] ss:$52 sps:$4 sm:$0xff]  }
  0x99   :  { %4549 = vmatpush3.bf16.msra.mxu0 %v6705_v22  ;;  %4589 = vmatpush3.bf16.msra.mxu1 %v6184_v5  ;;  %v6729_v5 = vld [vmem:[%s8249_s4 + $0xc0] sm:$0xff]  }
  0x9a   :  { %4550 = vmatprep.subr.bf16.mxu0 %v6715_v24  ;;  %4590 = vmatprep.subr.bf16.mxu1 %v6199_v21  ;;  %v5535_v21 = vld [vmem:[%s8251_s1 + $0x8] ss:$52 sps:$4 sm:$0xff]  }
  0x9c   :  { %1947 = vmatmul.mubr.bf16.gmra.mxu1 %v4097_v60  ;;  %v1641_v60 = vld [vmem:[%s8251_s1 + $0x148] sm:$0xff] }
  0x9d   :  { %4551 = vmatpush3.bf16.msra.mxu0 %v6722_v1  ;;  %4591 = vmatpush3.bf16.msra.mxu1 %v6207_v25  ;;  %v6742_v25 = vld [vmem:[%s8249_s4 + $0x80] sm:$0xff]  }
  0x9e   :  { %4552 = vmatprep.subr.bf16.mxu0 %v6729_v5  ;;  %4592 = vmatprep.subr.bf16.mxu1 %v6218_v29  ;;  %v5541_v29 = vld [vmem:[%s8251_s1 + $0x74] ss:$52 sps:$4 sm:$0xff]  }
  0x9f   :  { %2050 = vmatprep.mubr.bf16.mxu1 %v5540_v62  ;;  %v6835_v62 = vld [vmem:[%s8249_s4 + $0x1d8] sm:$0xff]  }
  0xa1   :  { %4553 = vmatpush3.bf16.msra.mxu0 %v6742_v25  ;;  %4593 = vmatpush3.bf16.msra.mxu1 %v6231_v32  ;;  %v6762_v32 = vld [vmem:[%s8249_s4 + $0x1b8] sm:$0xff]  }
  0xa2   :  { %4618 = vmatprep.subr.bf16.mxu0 %v6752_v8  ;;  %4658 = vmatprep.subr.bf16.mxu1 %v6256_v41  ;;  %v5543_v41 = vld [vmem:[%s8251_s1 + $0x70] ss:$52 sps:$4 sm:$0xff]  }
  0xa4   :  { %1987 = vmatmul.mubr.bf16.vlgmr.msra.gmra.mxu0 %v5535_v21  ;;  %2051 = vmatmul.mubr.bf16.vlgmr.msra.gmra.mxu1 %v5538_v28  ;;  %v4102_v28 = vcombine.high %v1641_v60, %v1641_v60 }
  0xa5   :  { %4619 = vmatpush3.bf16.msra.mxu0 %v6762_v32  ;;  %4659 = vmatpush3.bf16.msra.mxu1 %v6267_v44  ;;  %v6782_v44 = vld [vmem:[%s8249_s4 + $0x1b0] sm:$0xff]  }
  0xa6   :  { %4620 = vmatprep.subr.bf16.mxu0 %v6769_v56  ;;  %4660 = vmatprep.subr.bf16.mxu1 %v6279_v46  ;;  %v6789_v46 = vld [vmem:[%s8249_s4 + $0x1e8] sm:$0xff]  }
  0xa7   :  { %1994 = vmatprep.mubr.bf16.mxu0 %v5541_v29  ;;  %2058 = vmatprep.mubr.bf16.mxu1 %v5544_v10  ;;  %v6842_v29 = vld [vmem:[%s8249_s4 + $0x198] sm:$0xff]   ;;  %v4101_v10 = vcombine.low %v1641_v60, %v1641_v60 }
  0xa9   :  { %4621 = vmatpush3.bf16.msra.mxu0 %v6782_v44  ;;  %4661 = vmatpush3.bf16.msra.mxu1 %v6291_v49  ;;  %v6802_v49 = vld [vmem:[%s8249_s4 + $0x1a8] sm:$0xff]  }
  0xaa   :  { %4622 = vmatprep.subr.bf16.mxu0 %v6789_v46  ;;  %4662 = vmatprep.subr.bf16.mxu1 %v6313_v57  ;;  %v6809_v57 = vld [vmem:[%s8249_s4 + $0x1e0] sm:$0xff]  }
  0xac   :  { %1995 = vmatmul.mubr.bf16.gmra.mxu0 %v5543_v41  ;;  %2059 = vmatmul.mubr.bf16.gmra.mxu1 %v5546_v2  ;;  %v6856_v41 = vld [vmem:[%s8249_s4 + $0x190] sm:$0xff]   ;;  %v5562_v2 = vld [vmem:[%s8251_s1 + $0x24] ss:$52 sps:$4 sm:$0xff]  }
  0xad   :  { %4623 = vmatpush3.bf16.msra.mxu0 %v6802_v49  ;;  %4663 = vmatpush3.bf16.msra.mxu1 %v6327_v61  ;;  %v1640_v61 = vld [vmem:[%s8251_s1 + $0x140] sm:$0xff] }
  0xae   :  { %4624 = vmatprep.subr.bf16.mxu0 %v6809_v57  ;;  %4664 = vmatprep.subr.bf16.mxu1 %v6339_v3  ;;  %v6828_v3 = vld [vmem:[%s8249_s4 + $0x1a0] sm:$0xff]   ;;  %v4100_v21 = vcombine.high %v1640_v61, %v1640_v61 }
  0xaf   :  { %2002 = vmatprep.mubr.bf16.mxu0 %v5547_v4  ;;  %2066 = vmatprep.mubr.bf16.mxu1 %v5550_v16  ;;  %v8309_v16 = vld [vmem:[#allocation4_spill] sm:$0xff] }
  0xb1   :  { %4625 = vmatpush3.bf16.msra.mxu0 %v6828_v3  ;;  %4665 = vmatpush3.bf16.msra.mxu1 %v6351_v9  ;;  %v6849_v9 = vld [vmem:[%s8249_s4 + $0x1d0] sm:$0xff]  }
  0xb2   :  { %4626 = vmatprep.subr.bf16.mxu0 %v6835_v62  ;;  %4666 = vmatprep.subr.bf16.mxu1 %v6373_v19  ;;  %v4099_v19 = vcombine.low %v1640_v61, %v1640_v61  ;;  %v8310_v61 = vld [vmem:[#allocation5_spill] sm:$0xff] }
  0xb4   :  { %2003 = vmatmul.mubr.bf16.gmra.mxu0 %v5549_v23  ;;  %2067 = vmatmul.mubr.bf16.gmra.mxu1 %v5552_v6 }
  0xb5   :  { %4627 = vmatpush3.bf16.msra.mxu0 %v6842_v29  ;;  %4667 = vmatpush3.bf16.msra.mxu1 %v6387_v35  ;;  %v6863_v35 = vld [vmem:[%s8249_s4 + $0x1c8] sm:$0xff]  }
  0xb6   :  { %4628 = vmatprep.subr.bf16.mxu0 %v6849_v9  ;;  %4668 = vmatprep.subr.bf16.mxu1 %v6399_v39  ;;  %v5559_v39 = vld [vmem:[%s8251_s1 + $0x1c] ss:$52 sps:$4 sm:$0xff]  }
  0xb7   :  { %2010 = vmatprep.mubr.bf16.mxu0 %v4100_v21  ;;  %2074 = vmatprep.mubr.bf16.mxu1 %v4102_v28 }
  0xb9   :  { %4629 = vmatpush3.bf16.msra.mxu0 %v6856_v41  ;;  %4669 = vmatpush3.bf16.msra.mxu1 %v6411_v55  ;;  %v5560_v55 = vld [vmem:[%s8251_s1 + $0x20] ss:$52 sps:$4 sm:$0xff]  }
  0xba   :  { %4630 = vmatprep.subr.bf16.mxu0 %v6863_v35  ;;  %4670 = vmatprep.subr.bf16.mxu1 %v6430_v53  ;;  %v5557_v53 = vld [vmem:[%s8251_s1 + $0x18] ss:$52 sps:$4 sm:$0xff]  }
  0xbc   :  { %2011 = vmatmul.mubr.bf16.gmra.mxu0 %v4099_v19  ;;  %2075 = vmatmul.mubr.bf16.gmra.mxu1 %v4101_v10 }
  0xbd   :  { %4631 = vmatpush3.bf16.msra.mxu0 %v6212_v27  ;;  %4671 = vmatpush3.bf16.msra.mxu1 %v6440_v59  ;;  %v5563_v27 = vld [vmem:[%s8251_s1 + $0x84] ss:$52 sps:$4 sm:$0xff]   ;;  %v8308_v59 = vld [vmem:[#allocation3_spill] sm:$0xff] }
  0xbe   :  { %4632 = vmatprep.subr.bf16.mxu0 %v6225_v31  ;;  %4672 = vmatprep.subr.bf16.mxu1 %v6453_v15  ;;  %v5566_v31 = vld [vmem:[%s8251_s1 + $0x8c] ss:$52 sps:$4 sm:$0xff]  }
  0xbf   :  { %2114 = vmatprep.mubr.bf16.mxu0 %v5559_v39  ;;  %2178 = vmatprep.mubr.bf16.mxu1 %v5562_v2  ;;  %v8311_v2 = vld [vmem:[#allocation6_spill] sm:$0xff] }
  0xc1   :  { %4633 = vmatpush3.bf16.msra.mxu0 %v6237_v33  ;;  %4673 = vmatpush3.bf16.msra.mxu1 %v6465_v37  ;;  %v5565_v33 = vld [vmem:[%s8251_s1 + $0x80] ss:$52 sps:$4 sm:$0xff]  }
  0xc2   :  { %4698 = vmatprep.subr.bf16.mxu0 %v6261_v43  ;;  %5278 = vmatprep.subr.bf16.mxu1 %v6490_v11  ;;  %v5568_v43 = vld [vmem:[%s8251_s1 + $0x88] ss:$52 sps:$4 sm:$0xff]  }
  0xc4   :  { %2115 = vmatmul.mubr.bf16.vlgmr.msra.gmra.mxu0 %v5557_v53  ;;  %2179 = vmatmul.mubr.bf16.vlgmr.msra.gmra.mxu1 %v5560_v55  ;;  %v8312_v55 = vld [vmem:[#allocation7_spill] sm:$0xff] }
  0xc5   :  { %4699 = vmatpush3.bf16.msra.mxu0 %v6273_v45  ;;  %5279 = vmatpush3.bf16.msra.mxu1 %v6490_v11  ;;  %v5569_v45 = vld [vmem:[%s8251_s1 + $0xec] ss:$52 sps:$4 sm:$0xff]  }
  0xc6   :  { %4700 = vmatprep.subr.bf16.mxu0 %v6285_v47  ;;  %5280 = vmatprep.subr.bf16.mxu1 %v6496_v34  ;;  %v5572_v47 = vld [vmem:[%s8251_s1 + $0xf4] ss:$52 sps:$4 sm:$0xff]   ;;  %v8307_v11 = vld [vmem:[#allocation2_spill] sm:$0xff] }
  0xc7   :  { %2122 = vmatprep.mubr.bf16.mxu0 %v5563_v27  ;;  %2186 = vmatprep.mubr.bf16.mxu1 %v5566_v31  ;;  %v5581_v31 = vld [vmem:[%s8251_s1 + $0x2c] ss:$52 sps:$4 sm:$0xff]  }
  0xc9   :  { %4701 = vmatpush3.bf16.msra.mxu0 %v6297_v51  ;;  %5281 = vmatpush3.bf16.msra.mxu1 %v6496_v34  ;;  %v5571_v51 = vld [vmem:[%s8251_s1 + $0xe8] ss:$52 sps:$4 sm:$0xff]  }
  0xca   :  { %4702 = vmatprep.subr.bf16.mxu0 %v6318_v58  ;;  %5282 = vmatprep.subr.bf16.mxu1 %v6515_v13  ;;  %v5574_v58 = vld [vmem:[%s8251_s1 + $0xf0] ss:$52 sps:$4 sm:$0xff]  }
  0xcc   :  { %2123 = vmatmul.mubr.bf16.gmra.mxu0 %v5565_v33  ;;  %2187 = vmatmul.mubr.bf16.gmra.mxu1 %v5568_v43  ;;  %v5582_v33 = vld [vmem:[%s8251_s1 + $0x30] ss:$52 sps:$4 sm:$0xff]  }
  0xcd   :  { %4703 = vmatpush3.bf16.msra.mxu0 %v6333_v63  ;;  %5283 = vmatpush3.bf16.msra.mxu1 %v6515_v13  ;;  %v1642_v63 = vld [vmem:[%s8251_s1 + $0x150] sm:$0xff] }
  0xce   :  { %4704 = vmatprep.subr.bf16.mxu0 %v6345_v7  ;;  %5284 = vmatprep.subr.bf16.mxu1 %v6530_v17  ;;  %v1643_v7 = vld [vmem:[%s8251_s1 + $0x158] sm:$0xff]  ;;  %v4104_v37 = vcombine.high %v1642_v63, %v1642_v63  ;;  %v4103_v28 = vcombine.low %v1642_v63, %v1642_v63 }
  0xcf   :  { %2130 = vmatprep.mubr.bf16.mxu0 %v5569_v45  ;;  %2194 = vmatprep.mubr.bf16.mxu1 %v5572_v47  ;;  %v4106_v34 = vcombine.high %v1643_v7, %v1643_v7  ;;  %v4105_v19 = vcombine.low %v1643_v7, %v1643_v7  ;;  %v8313_v45 = vld [vmem:[#allocation8_spill] sm:$0xff] }
  0xd1   :  { %4705 = vmatpush3.bf16.msra.mxu0 %v8307_v11  ;;  %5285 = vmatpush3.bf16.msra.mxu1 %v6530_v17  ;;  %v5579_v11 = vld [vmem:[%s8251_s1 + $0x28] ss:$52 sps:$4 sm:$0xff]  }
  0xd2   :  { %4706 = vmatprep.subr.bf16.mxu0 %v8308_v59  ;;  %5286 = vmatprep.subr.bf16.mxu1 %v6548_v0  ;;  %v5583_v59 = vld [vmem:[%s8251_s1 + $0x98] ss:$52 sps:$4 sm:$0xff]  }
  0xd4   :  { %2131 = vmatmul.mubr.bf16.gmra.mxu0 %v5571_v51  ;;  %2195 = vmatmul.mubr.bf16.gmra.mxu1 %v5574_v58  ;;  %v8314_v51 = vld [vmem:[#allocation9_spill] sm:$0xff] }
  0xd5   :  { %4707 = vmatpush3.bf16.msra.mxu0 %v8309_v16  ;;  %5287 = vmatpush3.bf16.msra.mxu1 %v6548_v0 }
  0xd6   :  { %4708 = vmatprep.subr.bf16.mxu0 %v8310_v61  ;;  %5288 = vmatprep.subr.bf16.mxu1 %v6563_v12 }
  0xd7   :  { %2138 = vmatprep.mubr.bf16.mxu0 %v4104_v37  ;;  %2202 = vmatprep.mubr.bf16.mxu1 %v4106_v34  ;;  %v8315_v37 = vld [vmem:[#allocation10_spill] sm:$0xff] }
  0xd9   :  { %4709 = vmatpush3.bf16.msra.mxu0 %v8311_v2  ;;  %5289 = vmatpush3.bf16.msra.mxu1 %v6563_v12  ;;  %v7003_v2 = vld [vmem:[%s8249_s4 + $0x30] sm:$0xff]  }
  0xda   :  { %4710 = vmatprep.subr.bf16.mxu0 %v8312_v55  ;;  %5290 = vmatprep.subr.bf16.mxu1 %v6572_v14 }
  0xdc   :  { %2139 = vmatmul.mubr.bf16.gmra.mxu0 %v4103_v28  ;;  %2203 = vmatmul.mubr.bf16.gmra.mxu1 %v4105_v19  ;;  %v5591_v19 = vld [vmem:[%s8251_s1 + $0x168] ss:$0 sps:$4 sm:$0xff]  }
  0xdd   :  { %4711 = vmatpush3.bf16.msra.mxu0 %v8313_v45  ;;  %5291 = vmatpush3.bf16.msra.mxu1 %v6572_v14  ;;  %v7023_v45 = vld [vmem:[%s8249_s4 + $0x28] sm:$0xff]  }
  0xde   :  { %4712 = vmatprep.subr.bf16.mxu0 %v8314_v51  ;;  %5292 = vmatprep.subr.bf16.mxu1 %v6584_v18  ;;  %v7032_v51 = vld [vmem:[%s8249_s4 + $0x60] sm:$0xff]  }
  0xdf   :  { %2242 = vmatprep.mubr.bf16.mxu0 %v5581_v31  ;;  %5294 = vmatprep.mubr.bf16.mxu1 %v5582_v33 }
  0xe1   :  { %4713 = vmatpush3.bf16.msra.mxu0 %v8315_v37  ;;  %5293 = vmatpush3.bf16.msra.mxu1 %v6584_v18  ;;  %v5590_v18 = vld [vmem:[%s8251_s1 + $0x100] ss:$52 sps:$4 sm:$0xff]  }
  0xe2   :  { %4790 = vmatprep.subr.bf16.mxu1 %v6604_v26  ;;  %v6981_v26 = vld [vmem:[%s8249_s4 + $0x38] sm:$0xff]  }
  0xe3   :  { %v4262_v15 = vpop.f32.mrf.mxu0 }
  0xe4   :  { %v4302_v13 = vpop.f32.mrf.mxu1  ;;  %2243 = vmatmul.mubr.bf16.vlgmr.msra.gmra.mxu0 %v5579_v11  ;;  %5295 = vmatmul.mubr.bf16.vlgmr.msra.gmra.mxu1 %v5583_v59  ;;  %v7045_v59 = vld [vmem:[%s8249_s4 + $0x20] sm:$0xff]  }
  0xe5   :  { %v4263_v4 = vpop.f32.mrf.mxu0  ;;  %4791 = vmatpush3.bf16.msra.mxu1 %v6617_v30  ;;  %5298 = vmatprep.mubr.bf16.mxu1 %v5590_v18 }
  0xe6   :  { %v4264_v23 = vadd.f32 %v4263_v4, %v4262_v15  ;;  %v4303_v6 = vpop.f32.mrf.mxu1  ;;  %v5584_v4 = vld [vmem:[%s8251_s1 + $0x94] ss:$52 sps:$4 sm:$0xff]   ;;  %4792 = vmatprep.subr.bf16.mxu1 %v6624_v36 }
  0xe7   :  { %v4304_v17 = vadd.f32 %v4303_v6, %v4302_v13  ;;  %v4265_v60 = vpop.f32.mrf.mxu0  ;;  %v6966_v13 = vld [vmem:[%s8249_s4 + $0x78] sm:$0xff]   ;;  %2250 = vmatprep.mubr.bf16.mxu0 %v5584_v4 }
  0xe8   :  { %v4305_v21 = vpop.f32.mrf.mxu1  ;;  %4750 = vmatprep.subr.bf16.mxu0 %v6966_v13 }
  0xe9   :  { %v6937_v10 = vadd.f32 %v4304_v17, %v4264_v23  ;;  %v4266_v39 = vpop.f32.mrf.mxu0  ;;  %4751 = vmatpush3.bf16.msra.mxu0 %v6981_v26  ;;  %4793 = vmatpush3.bf16.msra.mxu1 %v6637_v38  ;;  %v5599_v38 = vld [vmem:[%s8252_s2 + $0xc] ss:$52 sps:$4 sm:$0xff]  }
  0xea   :  { %v4267_v0 = vadd.f32 %v4266_v39, %v4265_v60  ;;  %v4306_v53 = vpop.f32.mrf.mxu1  ;;  %v6988_v60 = vld [vmem:[%s8249_s4 + $0x70] sm:$0xff]   ;;  %4794 = vmatprep.subr.bf16.mxu1 %v6644_v40 }
  0xeb   :  { %v4307_v27 = vadd.f32 %v4306_v53, %v4305_v21  ;;  %v4268_v12 = vpop.f32.mrf.mxu0  ;;  %4752 = vmatprep.subr.bf16.mxu0 %v6988_v60  ;;  %v5586_v21 = vld [vmem:[%s8251_s1 + $0x90] ss:$52 sps:$4 sm:$0xff]  }
  0xec   :  { %v4308_v47 = vpop.f32.mrf.mxu1  ;;  %v5587_v53 = vld [vmem:[%s8251_s1 + $0xfc] ss:$52 sps:$4 sm:$0xff]   ;;  %2251 = vmatmul.mubr.bf16.gmra.mxu0 %v5586_v21  ;;  %5299 = vmatmul.mubr.bf16.gmra.mxu1 %v5591_v19 }
  0xed   :  { %v6949_v43 = vadd.f32 %v4307_v27, %v4267_v0  ;;  %v4269_v58 = vpop.f32.mrf.mxu0  ;;  %4753 = vmatpush3.bf16.msra.mxu0 %v7003_v2  ;;  %v7010_v0 = vld [vmem:[%s8249_s4 + $0x68] sm:$0xff]   ;;  %4795 = vmatpush3.bf16.msra.mxu1 %v6657_v42  ;;  %v1644_v42 = vld [vmem:[%s8251_s1 + $0x160] sm:$0xff] }
  0xee   :  { %v4270_v63 = vadd.f32 %v4269_v58, %v4268_v12  ;;  %v4309_v7 = vpop.f32.mrf.mxu1  ;;  %4754 = vmatprep.subr.bf16.mxu0 %v7010_v0  ;;  %4796 = vmatprep.subr.bf16.mxu1 %v6664_v48  ;;  %v5589_v58 = vld [vmem:[%s8251_s1 + $0xf8] ss:$52 sps:$4 sm:$0xff]   ;;  %v4107_v19 = vcombine.low %v1644_v42, %v1644_v42 }
  0xef   :  { %v4310_v15 = vadd.f32 %v4309_v7, %v4308_v47  ;;  %v4271_v14 = vpop.f32.mrf.mxu0  ;;  %2258 = vmatprep.mubr.bf16.mxu0 %v5587_v53  ;;  %2727 = vmatprep.mubr.bf16.mxu1 %v5599_v38 }
  0xf0   :  { %v4311_v34 = vpop.f32.mrf.mxu1 }
  0xf1   :  { %v6973_v16 = vadd.f32 %v4310_v15, %v4270_v63  ;;  %v4272_v23 = vpop.f32.mrf.mxu0  ;;  %4755 = vmatpush3.bf16.msra.mxu0 %v7023_v45  ;;  %4797 = vmatpush3.bf16.msra.mxu1 %v6677_v50  ;;  %v7054_v15 = vld [vmem:[%s8249_s4 + $0x58] sm:$0xff]  }
  0xf2   :  { %v4273_v6 = vadd.f32 %v4272_v23, %v4271_v14  ;;  %v4312_v61 = vpop.f32.mrf.mxu1  ;;  %4756 = vmatprep.subr.bf16.mxu0 %v7032_v51  ;;  %4798 = vmatprep.subr.bf16.mxu1 %v6684_v52  ;;  %v7061_v50 = vld [vmem:[%s8249_s4 + $0x18] sm:$0xff]   ;;  %v7068_v52 = vld [vmem:[%s8249_s4 + $0x50] sm:$0xff]  }
  0xf3   :  { %v4313_v17 = vadd.f32 %v4312_v61, %v4311_v34  ;;  %v4274_v30 = vpop.f32.mrf.mxu0  ;;  %v4108_v34 = vcombine.high %v1644_v42, %v1644_v42  ;;  %v7122_v42 = vld [vmem:[%s8249_s4 + $0x178] sm:$0xff]  }
  0xf4   :  { %v4314_v39 = vpop.f32.mrf.mxu1  ;;  %2259 = vmatmul.mubr.bf16.gmra.mxu0 %v5589_v58 }
  0xf5   :  { %v6995_v28 = vadd.f32 %v4313_v17, %v4273_v6  ;;  %v4275_v36 = vpop.f32.mrf.mxu0  ;;  %4757 = vmatpush3.bf16.msra.mxu0 %v7045_v59  ;;  %4799 = vmatpush3.bf16.msra.mxu1 %v6691_v20  ;;  %v7077_v20 = vld [vmem:[%s8249_s4 + $0x10] sm:$0xff]  }
  0xf6   :  { %v4276_v55 = vadd.f32 %v4275_v36, %v4274_v30  ;;  %v4315_v27 = vpop.f32.mrf.mxu1  ;;  %4758 = vmatprep.subr.bf16.mxu0 %v7054_v15  ;;  %4800 = vmatprep.subr.bf16.mxu1 %v6698_v54  ;;  %v7084_v54 = vld [vmem:[%s8249_s4 + $0x48] sm:$0xff]   ;;  %v5596_v36 = vld [vmem:[%s8252_s2 + $0x4] ss:$52 sps:$4 sm:$0xff]  }
  0xf7   :  { %v4316_v31 = vadd.f32 %v4315_v27, %v4314_v39  ;;  %v4277_v33 = vpop.f32.mrf.mxu0  ;;  %2266 = vmatprep.mubr.bf16.mxu0 %v4108_v34 }
  0xf8   :  { %v4317_v12 = vpop.f32.mrf.mxu1 }
  0xf9   :  { %v7027_v40 = vadd.f32 %v4316_v31, %v4276_v55  ;;  %v4278_v47 = vpop.f32.mrf.mxu0  ;;  %4759 = vmatpush3.bf16.msra.mxu0 %v7061_v50  ;;  %4801 = vmatpush3.bf16.msra.mxu1 %v6705_v22  ;;  %v7094_v22 = vld [vmem:[%s8249_s4 + $0x8] sm:$0xff]  }
  0xfa   :  { %v4279_v63 = vadd.f32 %v4278_v47, %v4277_v33  ;;  %v4318_v7 = vpop.f32.mrf.mxu1  ;;  %4760 = vmatprep.subr.bf16.mxu0 %v7068_v52  ;;  %4802 = vmatprep.subr.bf16.mxu1 %v6715_v24  ;;  %v7101_v24 = vld [vmem:[%s8249_s4 + $0x40] sm:$0xff]  }
  0xfb   :  { %v4319_v11 = vadd.f32 %v4318_v7, %v4317_v12  ;;  %v4280_v14 = vpop.f32.mrf.mxu0  ;;  %v5594_v47 = vld [vmem:[%s8252_s2] ss:$52 sps:$4 sm:$0xff]  }
  0xfc   :  { %v4320_v37 = vpop.f32.mrf.mxu1  ;;  %2267 = vmatmul.mubr.bf16.gmra.mxu0 %v4107_v19 }
  0xfd   :  { %v7049_v48 = vadd.f32 %v4319_v11, %v4279_v63  ;;  %v4281_v4 = vpop.f32.mrf.mxu0  ;;  %4761 = vmatpush3.bf16.msra.mxu0 %v7077_v20  ;;  %4803 = vmatpush3.bf16.msra.mxu1 %v6722_v1  ;;  %v5597_v1 = vld [vmem:[%s8252_s2 + $0x8] ss:$52 sps:$4 sm:$0xff]  }
  0xfe   :  { %v4321_v23 = vpop.f32.mrf.mxu1  ;;  %v4282_v6 = vadd.f32 %v4281_v4, %v4280_v14  ;;  %4762 = vmatprep.subr.bf16.mxu0 %v7084_v54  ;;  %4804 = vmatprep.subr.bf16.mxu1 %v6729_v5  ;;  %v7115_v5 = vld [vmem:[%s8249_s4] sm:$0xff]  }
  0xff   :  { %v4322_v61 = vadd.f32 %v4321_v23, %v4320_v37  ;;  %v4283_v18 = vpop.f32.mrf.mxu0  ;;  %2663 = vmatprep.mubr.bf16.mxu0 %v5596_v36  ;;  %v5600_v37 = vld [vmem:[%s8252_s2 + $0x6c] ss:$52 sps:$4 sm:$0xff]  }
 0x100   :  { %v4323_v17 = vpop.f32.mrf.mxu1  ;;  %v7167_v36 = vld [vmem:[%s8249_s4 + $0x168] sm:$0xff]  }
 0x101   :  { %v7072_v21 = vadd.f32 %v4322_v61, %v4282_v6  ;;  %v4284_v30 = vpop.f32.mrf.mxu0  ;;  %4763 = vmatpush3.bf16.msra.mxu0 %v7094_v22  ;;  %4805 = vmatpush3.bf16.msra.mxu1 %v6742_v25  ;;  %v5602_v25 = vld [vmem:[%s8252_s2 + $0x74] ss:$52 sps:$4 sm:$0xff]   ;;  %v5605_v17 = vld [vmem:[%s8252_s2 + $0x70] ss:$52 sps:$4 sm:$0xff]  }
 0x102   :  { %v4324_v39 = vpop.f32.mrf.mxu1  ;;  %4764 = vmatprep.subr.bf16.mxu0 %v7101_v24  ;;  %4870 = vmatprep.subr.bf16.mxu1 %v6752_v8  ;;  %v7138_v8 = vld [vmem:[%s8249_s4 + $0x138] sm:$0xff]   ;;  %v7145_v6 = vld [vmem:[%s8249_s4 + $0x170] sm:$0xff]  }
 0x103   :  { %v4342_v53 = vpop.f32.mrf.mxu0  ;;  %v7160_v30 = vld [vmem:[%s8249_s4 + $0x130] sm:$0xff]  }
 0x104   :  { %v4382_v55 = vpop.f32.mrf.mxu1  ;;  %2728 = vmatmul.mubr.bf16.vlgmr.msra.gmra.mxu1 %v5597_v1 }
 0x105   :  { %v4343_v27 = vpop.f32.mrf.mxu0  ;;  %4765 = vmatpush3.bf16.msra.mxu0 %v7115_v5  ;;  %4871 = vmatpush3.bf16.msra.mxu1 %v6762_v32  ;;  %v5604_v32 = vld [vmem:[%s8252_s2 + $0x68] ss:$52 sps:$4 sm:$0xff]  }
 0x106   :  { %v4344_v31 = vadd.f32 %v4343_v27, %v4342_v53  ;;  %v4383_v33 = vpop.f32.mrf.mxu1  ;;  %4830 = vmatprep.subr.bf16.mxu0 %v7122_v42  ;;  %4872 = vmatprep.subr.bf16.mxu1 %v6769_v56 }
 0x107   :  { %v4345_v38 = vpop.f32.mrf.mxu0  ;;  %v4384_v12 = vadd.f32 %v4383_v33, %v4382_v55  ;;  %2735 = vmatprep.mubr.bf16.mxu1 %v5602_v25  ;;  %v5611_v33 = vld [vmem:[%s8252_s2 + $0xdc] ss:$52 sps:$4 sm:$0xff]  }
 0x108   :  { %v1312_v58 = vadd.f32 %v4344_v31, %v6937_v10  ;;  %v4385_v63 = vpop.f32.mrf.mxu1  ;;  %2664 = vmatmul.mubr.bf16.vlgmr.msra.gmra.mxu0 %v5594_v47  ;;  %v7190_v47 = vld [vmem:[%s8249_s4 + $0x160] sm:$0xff]   ;;  %v7219_v25 = vld [vmem:[%s8249_s4 + $0x158] sm:$0xff]  }
 0x109   :  { %v4346_v7 = vpop.f32.mrf.mxu0  ;;  %4831 = vmatpush3.bf16.msra.mxu0 %v7138_v8  ;;  %2671 = vmatprep.mubr.bf16.mxu0 %v5600_v37 }
 0x10a   :  { %v7126_v10 = vadd.f32 %v4384_v12, %v1312_v58  ;;  %v4347_v11 = vadd.f32 %v4346_v7, %v4345_v38  ;;  %v4386_v14 = vpop.f32.mrf.mxu1  ;;  %4832 = vmatprep.subr.bf16.mxu0 %v7145_v6  ;;  %4873 = vmatpush3.bf16.msra.mxu1 %v6782_v44  ;;  %v5608_v44 = vld [vmem:[%s8252_s2 + $0xd4] ss:$52 sps:$4 sm:$0xff]   ;;  %v5609_v7 = vld [vmem:[%s8252_s2 + $0xd8] ss:$52 sps:$4 sm:$0xff]  }
 0x10b   :  { %v4387_v34 = vadd.f32 %v4386_v14, %v4385_v63  ;;  %v4348_v23 = vpop.f32.mrf.mxu0  ;;  %4874 = vmatprep.subr.bf16.mxu1 %v6789_v46  ;;  %v7183_v46 = vld [vmem:[%s8249_s4 + $0x128] sm:$0xff]   ;;  %v5606_v63 = vld [vmem:[%s8252_s2 + $0xd0] ss:$52 sps:$4 sm:$0xff]  }
 0x10c   :  { %v1315_v4 = vadd.f32 %v4347_v11, %v6949_v43  ;;  %v4388_v18 = vpop.f32.mrf.mxu1  ;;  %2736 = vmatmul.mubr.bf16.gmra.mxu1 %v5605_v17  ;;  %v7212_v14 = vld [vmem:[%s8249_s4 + $0x120] sm:$0xff]   ;;  %v7227_v17 = vld [vmem:[%s8249_s4 + $0x118] sm:$0xff]  }
 0x10d   :  { %v4349_v61 = vpop.f32.mrf.mxu0  ;;  %4833 = vmatpush3.bf16.msra.mxu0 %v7160_v30  ;;  %2743 = vmatprep.mubr.bf16.mxu1 %v5611_v33 }
 0x10e   :  { %v7149_v43 = vadd.f32 %v4387_v34, %v1315_v4  ;;  %v4350_v19 = vadd.f32 %v4349_v61, %v4348_v23  ;;  %v4389_v39 = vpop.f32.mrf.mxu1  ;;  %4834 = vmatprep.subr.bf16.mxu0 %v7167_v36  ;;  %4875 = vmatpush3.bf16.msra.mxu1 %v6802_v49 }
 0x10f   :  { %v4351_v56 = vpop.f32.mrf.mxu0  ;;  %v4390_v55 = vadd.f32 %v4389_v39, %v4388_v18  ;;  %4876 = vmatprep.subr.bf16.mxu1 %v6809_v57  ;;  %v2381_v57 = vld [vmem:[%s8252_s2 + $0x140] sm:$0xff] }
 0x110   :  { %v1320_v53 = vadd.f32 %v4350_v19, %v6973_v16  ;;  %v4391_v31 = vpop.f32.mrf.mxu1  ;;  %2672 = vmatmul.mubr.bf16.gmra.mxu0 %v5604_v32  ;;  %v4152_v18 = vcombine.high %v2381_v57, %v2381_v57 }
 0x111   :  { %v4352_v27 = vpop.f32.mrf.mxu0  ;;  %4835 = vmatpush3.bf16.msra.mxu0 %v7183_v46  ;;  %2679 = vmatprep.mubr.bf16.mxu0 %v5608_v44  ;;  %v7244_v44 = vld [vmem:[%s8249_s4 + $0x110] sm:$0xff]  }
 0x112   :  { %v7178_v38 = vadd.f32 %v4390_v55, %v1320_v53  ;;  %v4353_v12 = vadd.f32 %v4352_v27, %v4351_v56  ;;  %v4392_v16 = vpop.f32.mrf.mxu1  ;;  %4836 = vmatprep.subr.bf16.mxu0 %v7190_v47  ;;  %4877 = vmatpush3.bf16.msra.mxu1 %v6828_v3  ;;  %v4151_v27 = vcombine.low %v2381_v57, %v2381_v57  ;;  %v7278_v57 = vld [vmem:[%s8249_s4 + $0x140] sm:$0xff]  }
 0x113   :  { %v4393_v58 = vadd.f32 %v4392_v16, %v4391_v31  ;;  %v4354_v49 = vpop.f32.mrf.mxu0  ;;  %4878 = vmatprep.subr.bf16.mxu1 %v6835_v62  ;;  %v7234_v62 = vld [vmem:[%s8249_s4 + $0x150] sm:$0xff]  }
 0x114   :  { %v1323_v1 = vadd.f32 %v4353_v12, %v6995_v28  ;;  %v2380_v28 = vld [vmem:[%s8252_s2 + $0x138] sm:$0xff]  ;;  %v4394_v4 = vpop.f32.mrf.mxu1  ;;  %2744 = vmatmul.mubr.bf16.gmra.mxu1 %v5609_v7  ;;  %v7251_v12 = vld [vmem:[%s8249_s4 + $0x148] sm:$0xff]  }
 0x115   :  { %4837 = vmatpush3.bf16.msra.mxu0 %v7212_v14  ;;  %v4355_v37 = vpop.f32.mrf.mxu0  ;;  %v4150_v61 = vcombine.high %v2380_v28, %v2380_v28  ;;  %2751 = vmatprep.mubr.bf16.mxu1 %v4152_v18  ;;  %v5618_v16 = vld [vmem:[%s8252_s2 + $0x14] ss:$52 sps:$4 sm:$0xff]   ;;  %v5616_v18 = vld [vmem:[%s8252_s2 + $0x10] ss:$52 sps:$4 sm:$0xff]  }
 0x116   :  { %v7201_v11 = vadd.f32 %v4393_v58, %v1323_v1  ;;  %4838 = vmatprep.subr.bf16.mxu0 %v7219_v25  ;;  %v4356_v34 = vadd.f32 %v4355_v37, %v4354_v49  ;;  %v4395_v3 = vpop.f32.mrf.mxu1  ;;  %4879 = vmatpush3.bf16.msra.mxu1 %v6842_v29  ;;  %v4149_v29 = vcombine.low %v2380_v28, %v2380_v28  ;;  %v7272_v49 = vld [vmem:[%s8249_s4 + $0x188] sm:$0xff]   ;;  %v7284_v37 = vld [vmem:[%s8249_s4 + $0x1c0] sm:$0xff]  }
 0x117   :  { %v4357_v23 = vpop.f32.mrf.mxu0  ;;  %v4396_v19 = vadd.f32 %v4395_v3, %v4394_v4  ;;  %4880 = vmatprep.subr.bf16.mxu1 %v6849_v9  ;;  %8316 = vst [vmem:[#allocation2_spill] sm:$0xff] %v7272_v49  ;;  %8317 = vst [vmem:[#allocation3_spill] sm:$0xff] %v7284_v37 }
 0x118   :  { %2680 = vmatmul.mubr.bf16.gmra.mxu0 %v5606_v63  ;;  %v1328_v32 = vadd.f32 %v4356_v34, %v7027_v40  ;;  %v4397_v39 = vpop.f32.mrf.mxu1  ;;  %v7266_v63 = vld [vmem:[%s8249_s4 + $0x108] sm:$0xff]  }
 0x119   :  { %4839 = vmatpush3.bf16.msra.mxu0 %v7227_v17  ;;  %v4358_v56 = vpop.f32.mrf.mxu0  ;;  %2687 = vmatprep.mubr.bf16.mxu0 %v4150_v61 }
 0x11a   :  { %4840 = vmatprep.subr.bf16.mxu0 %v7234_v62  ;;  %v4359_v40 = vadd.f32 %v4358_v56, %v4357_v23  ;;  %v7238_v53 = vadd.f32 %v4396_v19, %v1328_v32  ;;  %v4398_v31 = vpop.f32.mrf.mxu1  ;;  %4881 = vmatpush3.bf16.msra.mxu1 %v6856_v41  ;;  %v5621_v41 = vld [vmem:[%s8252_s2 + $0x1c] ss:$52 sps:$4 sm:$0xff]   ;;  %v5619_v32 = vld [vmem:[%s8252_s2 + $0x18] ss:$52 sps:$4 sm:$0xff]   ;;  %v7299_v19 = vld [vmem:[%s8249_s4 + $0x100] sm:$0xff]  }
 0x11b   :  { %v4399_v33 = vadd.f32 %v4398_v31, %v4397_v39  ;;  %v4360_v9 = vpop.f32.mrf.mxu0  ;;  %4882 = vmatprep.subr.bf16.mxu1 %v6863_v35  ;;  %v7317_v39 = vld [vmem:[%s8249_s4 + $0x2f8] sm:$0xff]  }
 0x11c   :  { %v1331_v55 = vadd.f32 %v4359_v40, %v7049_v48  ;;  %2752 = vmatmul.mubr.bf16.gmra.mxu1 %v4151_v27  ;;  %v4400_v58 = vpop.f32.mrf.mxu1  ;;  %v7311_v40 = vld [vmem:[%s8249_s4 + $0x278] sm:$0xff]   ;;  %8319 = vst [vmem:[#allocation5_spill] sm:$0xff] %v7317_v39 }
 0x11d   :  { %4841 = vmatpush3.bf16.msra.mxu0 %v7244_v44  ;;  %v4361_v1 = vpop.f32.mrf.mxu0  ;;  %2855 = vmatprep.mubr.bf16.mxu1 %v5621_v41  ;;  %v5627_v27 = vld [vmem:[%s8252_s2 + $0x84] ss:$52 sps:$4 sm:$0xff]  }
 0x11e   :  { %4842 = vmatprep.subr.bf16.mxu0 %v7251_v12  ;;  %v7255_v48 = vadd.f32 %v4399_v33, %v1331_v55  ;;  %v4362_v35 = vadd.f32 %v4361_v1, %v4360_v9  ;;  %4883 = vmatpush3.bf16.msra.mxu1 %v7272_v49  ;;  %v4401_v28 = vpop.f32.mrf.mxu1  ;;  %v7329_v33 = vld [vmem:[%s8249_s4 + $0x238] sm:$0xff]  }
 0x11f   :  { %v4363_v7 = vpop.f32.mrf.mxu0  ;;  %4884 = vmatprep.subr.bf16.mxu1 %v7284_v37  ;;  %v4402_v4 = vadd.f32 %v4401_v28, %v4400_v58  ;;  %v7341_v58 = vld [vmem:[%s8249_s4 + $0x270] sm:$0xff]  }
 0x120   :  { %2688 = vmatmul.mubr.bf16.gmra.mxu0 %v4149_v29  ;;  %v1336_v34 = vadd.f32 %v4362_v35, %v7072_v21  ;;  %v4403_v61 = vpop.f32.mrf.mxu1  ;;  %v7305_v21 = vld [vmem:[%s8249_s4 + $0x180] sm:$0xff]   ;;  %v5624_v29 = vld [vmem:[%s8252_s2 + $0x7c] ss:$52 sps:$4 sm:$0xff]  }
 0x121   :  { %4843 = vmatpush3.bf16.msra.mxu0 %v7266_v63  ;;  %2791 = vmatprep.mubr.bf16.mxu0 %v5618_v16  ;;  %v4364_v23 = vpop.f32.mrf.mxu0  ;;  %8318 = vst [vmem:[#allocation4_spill] sm:$0xff] %v7305_v21  ;;  %v7335_v16 = vld [vmem:[%s8249_s4 + $0x2b8] sm:$0xff]   ;;  %v7347_v35 = vld [vmem:[%s8249_s4 + $0x2f0] sm:$0xff]  }
 0x122   :  { %4844 = vmatprep.subr.bf16.mxu0 %v7278_v57  ;;  %v7294_v3 = vadd.f32 %v4402_v4, %v1336_v34  ;;  %4885 = vmatpush3.bf16.msra.mxu1 %v7305_v21  ;;  %v4404_v56 = vpop.f32.mrf.mxu1  ;;  %8320 = vst [vmem:[#allocation6_spill] sm:$0xff] %v7335_v16  ;;  %8321 = vst [vmem:[#allocation7_spill] sm:$0xff] %v7347_v35  ;;  %v5622_v23 = vld [vmem:[%s8252_s2 + $0x78] ss:$52 sps:$4 sm:$0xff]   ;;  %v5625_v61 = vld [vmem:[%s8252_s2 + $0x80] ss:$52 sps:$4 sm:$0xff]  }
 0x123   :  { %4950 = vmatprep.subr.bf16.mxu1 %v7317_v39  ;;  %v4422_v55 = vpop.f32.mrf.mxu0 }
 0x124   :  { %v4462_v31 = vpop.f32.mrf.mxu1 }
 0x125   :  { %4845 = vmatpush3.bf16.msra.mxu0 %v7299_v19  ;;  %2856 = vmatmul.mubr.bf16.vlgmr.msra.gmra.mxu1 %v5619_v32  ;;  %v4423_v9 = vpop.f32.mrf.mxu0 }
 0x126   :  { %4910 = vmatprep.subr.bf16.mxu0 %v7311_v40  ;;  %4951 = vmatpush3.bf16.msra.mxu1 %v7335_v16  ;;  %v4424_v41 = vadd.f32 %v4423_v9, %v4422_v55  ;;  %v4463_v1 = vpop.f32.mrf.mxu1  ;;  %v5631_v16 = vld [vmem:[%s8252_s2 + $0xe8] ss:$52 sps:$4 sm:$0xff]  }
 0x127   :  { %4952 = vmatprep.subr.bf16.mxu1 %v7347_v35  ;;  %v4425_v7 = vpop.f32.mrf.mxu0  ;;  %v4464_v28 = vadd.f32 %v4463_v1, %v4462_v31  ;;  %2863 = vmatprep.mubr.bf16.mxu1 %v5627_v27  ;;  %v7378_v27 = vld [vmem:[%s8249_s4 + $0x2e8] sm:$0xff]   ;;  %v5630_v1 = vld [vmem:[%s8252_s2 + $0xe4] ss:$52 sps:$4 sm:$0xff]  }
 0x128   :  { %2792 = vmatmul.mubr.bf16.vlgmr.msra.gmra.mxu0 %v5616_v18  ;;  %v1440_v34 = vadd.f32 %v4424_v41, %v7126_v10  ;;  %v4465_v4 = vpop.f32.mrf.mxu1  ;;  %v7360_v18 = vld [vmem:[%s8249_s4 + $0x230] sm:$0xff]   ;;  %8323 = vst [vmem:[#allocation9_spill] sm:$0xff] %v7378_v27 }
 0x129   :  { %4911 = vmatpush3.bf16.msra.mxu0 %v7329_v33  ;;  %2799 = vmatprep.mubr.bf16.mxu0 %v5624_v29  ;;  %v4426_v32 = vpop.f32.mrf.mxu0  ;;  %v7366_v10 = vld [vmem:[%s8249_s4 + $0x2b0] sm:$0xff]   ;;  %v7372_v29 = vld [vmem:[%s8249_s4 + $0x268] sm:$0xff]  }
 0x12a   :  { %4912 = vmatprep.subr.bf16.mxu0 %v7341_v58  ;;  %8322 = vst [vmem:[#allocation8_spill] sm:$0xff] %v7366_v10  ;;  %4953 = vmatpush3.bf16.msra.mxu1 %v7366_v10  ;;  %v4427_v56 = vadd.f32 %v4426_v32, %v4425_v7  ;;  %v4466_v55 = vpop.f32.mrf.mxu1  ;;  %v7381_v31 = vadd.f32 %v4464_v28, %v1440_v34  ;;  %v5633_v7 = vld [vmem:[%s8252_s2 + $0xec] ss:$52 sps:$4 sm:$0xff]  }
 0x12b   :  { %4954 = vmatprep.subr.bf16.mxu1 %v7378_v27  ;;  %v4428_v9 = vpop.f32.mrf.mxu0  ;;  %v4467_v41 = vadd.f32 %v4466_v55, %v4465_v4  ;;  %v7393_v28 = vld [vmem:[%s8249_s4 + $0x228] sm:$0xff]  }
 0x12c   :  { %v1443_v32 = vadd.f32 %v4427_v56, %v7149_v43  ;;  %v4468_v10 = vpop.f32.mrf.mxu1  ;;  %v7399_v4 = vld [vmem:[%s8249_s4 + $0x2a8] sm:$0xff]  }
 0x12d   :  { %4913 = vmatpush3.bf16.msra.mxu0 %v7360_v18  ;;  %2864 = vmatmul.mubr.bf16.gmra.mxu1 %v5625_v61  ;;  %v4429_v34 = vpop.f32.mrf.mxu0  ;;  %8324 = vst [vmem:[#allocation10_spill] sm:$0xff] %v7399_v4  ;;  %v7411_v61 = vld [vmem:[%s8249_s4 + $0x2e0] sm:$0xff]  }
 0x12e   :  { %4914 = vmatprep.subr.bf16.mxu0 %v7372_v29  ;;  %4955 = vmatpush3.bf16.msra.mxu1 %v7399_v4  ;;  %v4430_v55 = vadd.f32 %v4429_v34, %v4428_v9  ;;  %v4469_v43 = vpop.f32.mrf.mxu1  ;;  %8325 = vst [vmem:[#allocation11_spill] sm:$0xff] %v7411_v61  ;;  %v7414_v56 = vadd.f32 %v4467_v41, %v1443_v32  ;;  %v5628_v9 = vld [vmem:[%s8252_s2 + $0xe0] ss:$52 sps:$4 sm:$0xff]   ;;  %v2382_v41 = vld [vmem:[%s8252_s2 + $0x148] sm:$0xff] }
 0x12f   :  { %4956 = vmatprep.subr.bf16.mxu1 %v7411_v61  ;;  %v4431_v27 = vpop.f32.mrf.mxu0  ;;  %v4470_v4 = vadd.f32 %v4469_v43, %v4468_v10  ;;  %2871 = vmatprep.mubr.bf16.mxu1 %v5633_v7  ;;  %v2383_v10 = vld [vmem:[%s8252_s2 + $0x150] sm:$0xff]  ;;  %v7438_v7 = vld [vmem:[%s8249_s4 + $0x2a0] sm:$0xff]   ;;  %v7444_v43 = vld [vmem:[%s8249_s4 + $0x258] sm:$0xff]  }
 0x130   :  { %2800 = vmatmul.mubr.bf16.gmra.mxu0 %v5622_v23  ;;  %v7405_v23 = vld [vmem:[%s8249_s4 + $0x260] sm:$0xff]   ;;  %v1448_v34 = vadd.f32 %v4430_v55, %v7178_v38  ;;  %v4471_v35 = vpop.f32.mrf.mxu1  ;;  %8327 = vst [vmem:[#allocation13_spill] sm:$0xff] %v7438_v7  ;;  %8328 = vst [vmem:[#allocation14_spill] sm:$0xff] %v7444_v43  ;;  %v7450_v61 = vld [vmem:[%s8249_s4 + $0x2d8] sm:$0xff]  }
 0x131   :  { %4915 = vmatpush3.bf16.msra.mxu0 %v7393_v28  ;;  %2807 = vmatprep.mubr.bf16.mxu0 %v5630_v1  ;;  %v7432_v1 = vld [vmem:[%s8249_s4 + $0x220] sm:$0xff]   ;;  %v4432_v38 = vpop.f32.mrf.mxu0  ;;  %8329 = vst [vmem:[#allocation15_spill] sm:$0xff] %v7450_v61 }
 0x132   :  { %4916 = vmatprep.subr.bf16.mxu0 %v7405_v23  ;;  %8326 = vst [vmem:[#allocation12_spill] sm:$0xff] %v7432_v1  ;;  %4957 = vmatpush3.bf16.msra.mxu1 %v7438_v7  ;;  %v4433_v32 = vadd.f32 %v4432_v38, %v4431_v27  ;;  %v4472_v55 = vpop.f32.mrf.mxu1  ;;  %v7453_v39 = vadd.f32 %v4470_v4, %v1448_v34  ;;  %v7465_v4 = vld [vmem:[%s8249_s4 + $0x298] sm:$0xff]  }
 0x133   :  { %4958 = vmatprep.subr.bf16.mxu1 %v7450_v61  ;;  %v4434_v21 = vpop.f32.mrf.mxu0  ;;  %v4473_v7 = vadd.f32 %v4472_v55, %v4471_v35  ;;  %v4154_v27 = vcombine.high %v2382_v41, %v2382_v41  ;;  %v4156_v38 = vcombine.high %v2383_v10, %v2383_v10  ;;  %8331 = vst [vmem:[#allocation17_spill] sm:$0xff] %v7465_v4 }
 0x134   :  { %v1451_v37 = vadd.f32 %v4433_v32, %v7201_v11  ;;  %v4474_v49 = vpop.f32.mrf.mxu1  ;;  %v4155_v61 = vcombine.low %v2383_v10, %v2383_v10  ;;  %v7504_v10 = vld [vmem:[%s8249_s4 + $0x2c8] sm:$0xff]  }
 0x135   :  { %4917 = vmatpush3.bf16.msra.mxu0 %v7432_v1  ;;  %2872 = vmatmul.mubr.bf16.gmra.mxu1 %v5631_v16  ;;  %v4435_v1 = vpop.f32.mrf.mxu0  ;;  %v7471_v16 = vld [vmem:[%s8249_s4 + $0x250] sm:$0xff]   ;;  %8335 = vst [vmem:[#allocation21_spill] sm:$0xff] %v7504_v10 }
 0x136   :  { %4918 = vmatprep.subr.bf16.mxu0 %v7444_v43  ;;  %v7459_v43 = vld [vmem:[%s8249_s4 + $0x218] sm:$0xff]   ;;  %4959 = vmatpush3.bf16.msra.mxu1 %v7465_v4  ;;  %v4436_v35 = vadd.f32 %v4435_v1, %v4434_v21  ;;  %v4475_v11 = vpop.f32.mrf.mxu1  ;;  %8332 = vst [vmem:[#allocation18_spill] sm:$0xff] %v7471_v16  ;;  %v7480_v34 = vadd.f32 %v4473_v7, %v1451_v37  ;;  %v7492_v37 = vld [vmem:[%s8249_s4 + $0x290] sm:$0xff]  }
 0x137   :  { %8330 = vst [vmem:[#allocation16_spill] sm:$0xff] %v7459_v43  ;;  %v4437_v32 = vpop.f32.mrf.mxu0  ;;  %v4476_v55 = vadd.f32 %v4475_v11, %v4474_v49  ;;  %2879 = vmatprep.mubr.bf16.mxu1 %v4156_v38  ;;  %v4153_v4 = vcombine.low %v2382_v41, %v2382_v41  ;;  %8334 = vst [vmem:[#allocation20_spill] sm:$0xff] %v7492_v37  ;;  %v7498_v41 = vld [vmem:[%s8249_s4 + $0x248] sm:$0xff]  }
 0x138   :  { %2808 = vmatmul.mubr.bf16.gmra.mxu0 %v5628_v9  ;;  %v7477_v9 = vld [vmem:[%s8249_s4 + $0x2d0] sm:$0xff]   ;;  %v1456_v21 = vadd.f32 %v4436_v35, %v7238_v53  ;;  %v4477_v1 = vpop.f32.mrf.mxu1  ;;  %v5643_v35 = vld [vmem:[%s8252_s2 + $0x2c] ss:$52 sps:$4 sm:$0xff]  }
 0x139   :  { %4919 = vmatpush3.bf16.msra.mxu0 %v7459_v43  ;;  %8333 = vst [vmem:[#allocation19_spill] sm:$0xff] %v7477_v9  ;;  %4960 = vmatprep.subr.bf16.mxu1 %v7477_v9  ;;  %v4438_v43 = vpop.f32.mrf.mxu0  ;;  %v5641_v9 = vld [vmem:[%s8252_s2 + $0x28] ss:$52 sps:$4 sm:$0xff]  }
 0x13a   :  { %4920 = vmatprep.subr.bf16.mxu0 %v7471_v16  ;;  %2815 = vmatprep.mubr.bf16.mxu0 %v4154_v27  ;;  %v7486_v16 = vld [vmem:[%s8249_s4 + $0x210] sm:$0xff]   ;;  %v4439_v49 = vadd.f32 %v4438_v43, %v4437_v32  ;;  %v4478_v53 = vpop.f32.mrf.mxu1  ;;  %v7507_v7 = vadd.f32 %v4476_v55, %v1456_v21  ;;  %v5640_v43 = vld [vmem:[%s8252_s2 + $0x24] ss:$52 sps:$4 sm:$0xff]   ;;  %v7519_v55 = vld [vmem:[%s8249_s4 + $0x208] sm:$0xff]  }
 0x13b   :  { %4961 = vmatpush3.bf16.msra.mxu1 %v7492_v37  ;;  %v4440_v27 = vpop.f32.mrf.mxu0  ;;  %v4479_v38 = vadd.f32 %v4478_v53, %v4477_v1  ;;  %v7525_v1 = vld [vmem:[%s8249_s4 + $0x288] sm:$0xff]   ;;  %v5638_v37 = vld [vmem:[%s8252_s2 + $0x20] ss:$52 sps:$4 sm:$0xff]  }
 0x13c   :  { %4962 = vmatprep.subr.bf16.mxu1 %v7504_v10  ;;  %v1459_v11 = vadd.f32 %v4439_v49, %v7255_v48  ;;  %v4480_v32 = vpop.f32.mrf.mxu1  ;;  %8336 = vst [vmem:[#allocation22_spill] sm:$0xff] %v7525_v1 }
 0x13d   :  { %4921 = vmatpush3.bf16.msra.mxu0 %v7486_v16  ;;  %2880 = vmatmul.mubr.bf16.gmra.mxu1 %v4155_v61  ;;  %v4441_v21 = vpop.f32.mrf.mxu0  ;;  %v7531_v61 = vld [vmem:[%s8249_s4 + $0x240] sm:$0xff]  }
 0x13e   :  { %4922 = vmatprep.subr.bf16.mxu0 %v7498_v41  ;;  %v4442_v53 = vadd.f32 %v4441_v21, %v4440_v27  ;;  %v4481_v48 = vpop.f32.mrf.mxu1  ;;  %v7540_v49 = vadd.f32 %v4479_v38, %v1459_v11  ;;  %2983 = vmatprep.mubr.bf16.mxu1 %v5643_v35  ;;  %v7552_v38 = vld [vmem:[%s8249_s4 + $0x200] sm:$0xff]   ;;  %v7564_v35 = vld [vmem:[%s8249_s4 + $0x338] sm:$0xff]  }
 0x13f   :  { %4963 = vmatpush3.bf16.msra.mxu1 %v7525_v1  ;;  %v4443_v10 = vpop.f32.mrf.mxu0  ;;  %v4482_v1 = vadd.f32 %v4481_v48, %v4480_v32  ;;  %v5646_v32 = vld [vmem:[%s8252_s2 + $0x8c] ss:$52 sps:$4 sm:$0xff]  }
 0x140   :  { %2816 = vmatmul.mubr.bf16.gmra.mxu0 %v4153_v4  ;;  %v7537_v4 = vld [vmem:[%s8249_s4 + $0x2c0] sm:$0xff]   ;;  %v1464_v27 = vadd.f32 %v4442_v53, %v7294_v3  ;;  %v4483_v21 = vpop.f32.mrf.mxu1  ;;  %v5649_v53 = vld [vmem:[%s8252_s2 + $0x94] ss:$52 sps:$4 sm:$0xff]  }
 0x141   :  { %4923 = vmatpush3.bf16.msra.mxu0 %v7519_v55  ;;  %8337 = vst [vmem:[#allocation23_spill] sm:$0xff] %v7537_v4  ;;  %4964 = vmatprep.subr.bf16.mxu1 %v7537_v4  ;;  %v4444_v10 = vpop.f32.mrf.mxu0  ;;  %v7558_v3 = vld [vmem:[%s8249_s4 + $0x280] sm:$0xff]   ;;  %v7667_v4 = vld [vmem:[%s8249_s4 + $0x310] sm:$0xff]  }
 0x142   :  { %4924 = vmatprep.subr.bf16.mxu0 %v7531_v61  ;;  %2919 = vmatprep.mubr.bf16.mxu0 %v5640_v43  ;;  %8338 = vst [vmem:[#allocation24_spill] sm:$0xff] %v7558_v3  ;;  %v4484_v43 = vpop.f32.mrf.mxu1  ;;  %v1528_v11 = vadd.f32 %v4482_v1, %v1464_v27  ;;  %v7582_v27 = vld [vmem:[%s8249_s4 + $0x330] sm:$0xff]  }
 0x143   :  { %4965 = vmatpush3.bf16.msra.mxu1 %v7558_v3  ;;  %v5644_v43 = vld [vmem:[%s8252_s2 + $0x88] ss:$52 sps:$4 sm:$0xff]  }
 0x144   :  { %5002 = vmatprep.subr.bf16.mxu1 %v6966_v13  ;;  %v5272_v48 = vpop.f32.mrf.mxu0  ;;  %v4514_v21 = vpop.f32.mrf.mxu1 }
 0x145   :  { %4925 = vmatpush3.bf16.msra.mxu0 %v7552_v38  ;;  %v7575_v10 = vadd.f32 %v5272_v48, %v7453_v39  ;;  %v5647_v48 = vld [vmem:[%s8252_s2 + $0x90] ss:$52 sps:$4 sm:$0xff]  }
 0x146   :  { %5302 = vmatprep.subr.bf16.mxu0 %v7564_v35  ;;  %2984 = vmatmul.mubr.bf16.vlgmr.msra.gmra.mxu1 %v5641_v9  ;;  %v1567_v13 = vpop.f32.mrf.mxu0  ;;  %v4515_v1 = vpop.f32.mrf.mxu1 }
 0x147   :  { %8339 = vst [vmem:[#allocation25_spill] sm:$0xff] %v7575_v10  ;;  %5003 = vmatpush3.bf16.msra.mxu1 %v6981_v26  ;;  %v7587_v9 = vadd.f32 %v1567_v13, %v7381_v31  ;;  %v7589_v39 = vadd.f32 %v4515_v1, %v4514_v21  ;;  %2991 = vmatprep.mubr.bf16.mxu1 %v5649_v53  ;;  %v5655_v21 = vld [vmem:[%s8252_s2 + $0xfc] ss:$52 sps:$4 sm:$0xff]  }
 0x148   :  { %2920 = vmatmul.mubr.bf16.vlgmr.msra.gmra.mxu0 %v5638_v37  ;;  %5004 = vmatprep.subr.bf16.mxu1 %v6988_v60  ;;  %v5273_v37 = vpop.f32.mrf.mxu0  ;;  %v4517_v26 = vpop.f32.mrf.mxu1 }
 0x149   :  { %5303 = vmatpush3.bf16.msra.mxu0 %v7564_v35  ;;  %2927 = vmatprep.mubr.bf16.mxu0 %v5646_v32  ;;  %v7598_v3 = vadd.f32 %v5273_v37, %v7480_v34  ;;  %v7605_v32 = vld [vmem:[%s8249_s4 + $0x328] sm:$0xff]  }
 0x14a   :  { %5304 = vmatprep.subr.bf16.mxu0 %v7582_v27  ;;  %v1570_v60 = vpop.f32.mrf.mxu0  ;;  %v4518_v31 = vpop.f32.mrf.mxu1 }
 0x14b   :  { %8340 = vst [vmem:[#allocation26_spill] sm:$0xff] %v7598_v3  ;;  %5005 = vmatpush3.bf16.msra.mxu1 %v7003_v2  ;;  %v7610_v53 = vadd.f32 %v1570_v60, %v7414_v56  ;;  %v7612_v34 = vadd.f32 %v4518_v31, %v4517_v26  ;;  %v5652_v2 = vld [vmem:[%s8252_s2 + $0xf4] ss:$52 sps:$4 sm:$0xff]   ;;  %v7627_v26 = vld [vmem:[%s8249_s4 + $0x320] sm:$0xff]   ;;  %v5653_v31 = vld [vmem:[%s8252_s2 + $0xf8] ss:$52 sps:$4 sm:$0xff]  }
 0x14c   :  { %5006 = vmatprep.subr.bf16.mxu1 %v7010_v0  ;;  %v5276_v13 = vpop.f32.mrf.mxu0  ;;  %v4520_v1 = vpop.f32.mrf.mxu1 }
 0x14d   :  { %5305 = vmatpush3.bf16.msra.mxu0 %v7582_v27  ;;  %v7620_v37 = vadd.f32 %v5276_v13, %v1528_v11  ;;  %v7653_v13 = vld [vmem:[%s8249_s4 + $0x318] sm:$0xff]  }
 0x14e   :  { %5306 = vmatprep.subr.bf16.mxu0 %v7605_v32  ;;  %2992 = vmatmul.mubr.bf16.gmra.mxu1 %v5647_v48  ;;  %v1583_v0 = vpop.f32.mrf.mxu0  ;;  %v4521_v56 = vpop.f32.mrf.mxu1 }
 0x14f   :  { %8341 = vst [vmem:[#allocation27_spill] sm:$0xff] %v7620_v37  ;;  %5007 = vmatpush3.bf16.msra.mxu1 %v7023_v45  ;;  %v7634_v11 = vadd.f32 %v4521_v56, %v4520_v1  ;;  %v5650_v45 = vld [vmem:[%s8252_s2 + $0xf0] ss:$52 sps:$4 sm:$0xff]   ;;  %2999 = vmatprep.mubr.bf16.mxu1 %v5655_v21 }
 0x150   :  { %2928 = vmatmul.mubr.bf16.gmra.mxu0 %v5644_v43  ;;  %5008 = vmatprep.subr.bf16.mxu1 %v7032_v51  ;;  %v7632_v43 = vadd.f32 %v1583_v0, %v7507_v7  ;;  %v5277_v48 = vpop.f32.mrf.mxu0  ;;  %v4523_v60 = vpop.f32.mrf.mxu1  ;;  %v2384_v51 = vld [vmem:[%s8252_s2 + $0x158] sm:$0xff]  ;;  %v2385_v7 = vld [vmem:[%s8252_s2 + $0x160] sm:$0xff] }
 0x151   :  { %5307 = vmatpush3.bf16.msra.mxu0 %v7605_v32  ;;  %2935 = vmatprep.mubr.bf16.mxu0 %v5652_v2  ;;  %v4158_v56 = vcombine.high %v2384_v51, %v2384_v51  ;;  %v4160_v48 = vcombine.high %v2385_v7, %v2385_v7 }
 0x152   :  { %5308 = vmatprep.subr.bf16.mxu0 %v7627_v26  ;;  %8342 = vst [vmem:[#allocation28_spill] sm:$0xff] %v7632_v43  ;;  %v1586_v2 = vpop.f32.mrf.mxu0  ;;  %v4524_v21 = vpop.f32.mrf.mxu1 }
 0x153   :  { %5009 = vmatpush3.bf16.msra.mxu1 %v7045_v59  ;;  %v7658_v1 = vadd.f32 %v1586_v2, %v7540_v49  ;;  %v7660_v0 = vadd.f32 %v4524_v21, %v4523_v60  ;;  %v4159_v60 = vcombine.low %v2385_v7, %v2385_v7 }
 0x154   :  { %5010 = vmatprep.subr.bf16.mxu1 %v7054_v15  ;;  %v4526_v59 = vpop.f32.mrf.mxu1 }
 0x155   :  { %5309 = vmatpush3.bf16.msra.mxu0 %v7627_v26  ;;  %8343 = vst [vmem:[#allocation29_spill] sm:$0xff] %v7658_v1 }
 0x156   :  { %5310 = vmatprep.subr.bf16.mxu0 %v7653_v13  ;;  %3000 = vmatmul.mubr.bf16.gmra.mxu1 %v5653_v31  ;;  %v4527_v37 = vpop.f32.mrf.mxu1  ;;  %v7678_v31 = vld [vmem:[%s8249_s4 + $0x308] sm:$0xff]  }
 0x157   :  { %5011 = vmatpush3.bf16.msra.mxu1 %v7061_v50  ;;  %v7671_v15 = vadd.f32 %v4527_v37, %v4526_v59  ;;  %3007 = vmatprep.mubr.bf16.mxu1 %v4160_v48  ;;  %v5660_v37 = vld [vmem:[%s8252_s2 + $0x30] ss:$52 sps:$4 sm:$0xff]   ;;  %v5665_v59 = vld [vmem:[%s8252_s2 + $0x100] ss:$52 sps:$4 sm:$0xff]  }
 0x158   :  { %2936 = vmatmul.mubr.bf16.gmra.mxu0 %v5650_v45  ;;  %5012 = vmatprep.subr.bf16.mxu1 %v7068_v52  ;;  %v4529_v49 = vpop.f32.mrf.mxu1  ;;  %v4157_v45 = vcombine.low %v2384_v51, %v2384_v51 }
 0x159   :  { %5311 = vmatpush3.bf16.msra.mxu0 %v7653_v13  ;;  %2943 = vmatprep.mubr.bf16.mxu0 %v4158_v56  ;;  %v5661_v56 = vld [vmem:[%s8252_s2 + $0x98] ss:$52 sps:$4 sm:$0xff]  }
 0x15a   :  { %5312 = vmatprep.subr.bf16.mxu0 %v7667_v4  ;;  %v4530_v50 = vpop.f32.mrf.mxu1 }
 0x15b   :  { %5013 = vmatpush3.bf16.msra.mxu1 %v7077_v20  ;;  %v7682_v52 = vadd.f32 %v4530_v50, %v4529_v49  ;;  %v5664_v20 = vld [vmem:[%s8253_s3 + $0x4] ss:$52 sps:$4 sm:$0xff]   ;;  %v5669_v49 = vld [vmem:[%s8253_s3 + $0x6c] ss:$52 sps:$4 sm:$0xff]  }
 0x15c   :  { %5014 = vmatprep.subr.bf16.mxu1 %v7084_v54  ;;  %v4532_v51 = vpop.f32.mrf.mxu1  ;;  %v7695_v54 = vld [vmem:[%s8249_s4 + $0x300] sm:$0xff]  }
 0x15d   :  { %5313 = vmatpush3.bf16.msra.mxu0 %v7667_v4 }
 0x15e   :  { %5314 = vmatprep.subr.bf16.mxu0 %v7678_v31  ;;  %3008 = vmatmul.mubr.bf16.gmra.mxu1 %v4159_v60  ;;  %v4533_v7 = vpop.f32.mrf.mxu1 }
 0x15f   :  { %5015 = vmatpush3.bf16.msra.mxu1 %v7094_v22  ;;  %v7699_v2 = vadd.f32 %v4533_v7, %v4532_v51  ;;  %3404 = vmatprep.mubr.bf16.mxu1 %v5664_v20  ;;  %v5662_v22 = vld [vmem:[%s8253_s3] ss:$52 sps:$4 sm:$0xff]  }
 0x160   :  { %2944 = vmatmul.mubr.bf16.gmra.mxu0 %v4157_v45  ;;  %5016 = vmatprep.subr.bf16.mxu1 %v7101_v24  ;;  %v4535_v21 = vpop.f32.mrf.mxu1  ;;  %v5838_v24 = vld [vmem:[%s8249_s4 + $0xf8] sm:$0xff]  }
 0x161   :  { %5315 = vmatpush3.bf16.msra.mxu0 %v7678_v31  ;;  %5318 = vmatprep.mubr.bf16.mxu0 %v5660_v37  ;;  %v5840_v37 = vld [vmem:[%s8249_s4 + $0xf0] sm:$0xff]  }
 0x162   :  { %5316 = vmatprep.subr.bf16.mxu0 %v7695_v54  ;;  %v4536_v48 = vpop.f32.mrf.mxu1 }
 0x163   :  { %5017 = vmatpush3.bf16.msra.mxu1 %v7115_v5  ;;  %v5839_v5 = vld [vmem:[%s8249_s4 + $0xb8] sm:$0xff]  }
 0x164   :  { %5082 = vmatprep.subr.bf16.mxu1 %v7122_v42  ;;  %v4554_v45 = vpop.f32.mrf.mxu0  ;;  %v4594_v60 = vpop.f32.mrf.mxu1 }
 0x165   :  { %5317 = vmatpush3.bf16.msra.mxu0 %v7695_v54 }
 0x166   :  { %5042 = vmatprep.subr.bf16.mxu0 %v5838_v24  ;;  %3405 = vmatmul.mubr.bf16.vlgmr.msra.gmra.mxu1 %v5662_v22  ;;  %v4555_v42 = vpop.f32.mrf.mxu0  ;;  %v4595_v50 = vpop.f32.mrf.mxu1 }
 0x167   :  { %5083 = vmatpush3.bf16.msra.mxu1 %v7138_v8  ;;  %v4556_v20 = vadd.f32 %v4555_v42, %v4554_v45  ;;  %v4596_v51 = vadd.f32 %v4595_v50, %v4594_v60  ;;  %3412 = vmatprep.mubr.bf16.mxu1 %v5669_v49  ;;  %v5667_v8 = vld [vmem:[%s8253_s3 + $0x68] ss:$52 sps:$4 sm:$0xff]  }
 0x168   :  { %5319 = vmatmul.mubr.bf16.vlgmr.msra.gmra.mxu0 %v5661_v56  ;;  %5084 = vmatprep.subr.bf16.mxu1 %v7145_v6  ;;  %v4557_v7 = vpop.f32.mrf.mxu0  ;;  %v4597_v21 = vpop.f32.mrf.mxu1  ;;  %v5666_v56 = vld [vmem:[%s8252_s2 + $0x168] ss:$0 sps:$4 sm:$0xff]   ;;  %v5841_v6 = vld [vmem:[%s8249_s4 + $0xb0] sm:$0xff]  }
 0x169   :  { %5043 = vmatpush3.bf16.msra.mxu0 %v5839_v5  ;;  %5322 = vmatprep.mubr.bf16.mxu0 %v5665_v59  ;;  %v1989_v22 = vadd.f32 %v4556_v20, %v7589_v39  ;;  %v5842_v59 = vld [vmem:[%s8249_s4 + $0xe8] sm:$0xff]  }
 0x16a   :  { %5044 = vmatprep.subr.bf16.mxu0 %v5840_v37  ;;  %v4558_v48 = vpop.f32.mrf.mxu0  ;;  %v4598_v24 = vpop.f32.mrf.mxu1  ;;  %v5672_v60 = vld [vmem:[%s8253_s3 + $0xd4] ss:$52 sps:$4 sm:$0xff]  }
 0x16b   :  { %5085 = vmatpush3.bf16.msra.mxu1 %v7160_v30  ;;  %v7742_v49 = vadd.f32 %v4596_v51, %v1989_v22  ;;  %v4559_v45 = vadd.f32 %v4558_v48, %v4557_v7  ;;  %v4599_v39 = vadd.f32 %v4598_v24, %v4597_v21  ;;  %v5677_v30 = vld [vmem:[%s8253_s3 + $0xc] ss:$52 sps:$4 sm:$0xff]   ;;  %v3121_v22 = vld [vmem:[%s8253_s3 + $0x138] sm:$0xff] }
 0x16c   :  { %5086 = vmatprep.subr.bf16.mxu1 %v7167_v36  ;;  %v4560_v5 = vpop.f32.mrf.mxu0  ;;  %v4600_v42 = vpop.f32.mrf.mxu1  ;;  %v5843_v36 = vld [vmem:[%s8249_s4 + $0xa8] sm:$0xff]   ;;  %v5844_v51 = vld [vmem:[%s8249_s4 + $0xe0] sm:$0xff]  }
 0x16d   :  { %5045 = vmatpush3.bf16.msra.mxu0 %v5841_v6  ;;  %v1992_v50 = vadd.f32 %v4559_v45, %v7612_v34 }
 0x16e   :  { %5046 = vmatprep.subr.bf16.mxu0 %v5842_v59  ;;  %3413 = vmatmul.mubr.bf16.gmra.mxu1 %v5667_v8  ;;  %v4561_v37 = vpop.f32.mrf.mxu0  ;;  %v4601_v20 = vpop.f32.mrf.mxu1  ;;  %v5846_v59 = vld [vmem:[%s8249_s4 + $0xd8] sm:$0xff]  }
 0x16f   :  { %5087 = vmatpush3.bf16.msra.mxu1 %v7183_v46  ;;  %v7759_v7 = vadd.f32 %v4599_v39, %v1992_v50  ;;  %v4562_v21 = vadd.f32 %v4561_v37, %v4560_v5  ;;  %v4602_v34 = vadd.f32 %v4601_v20, %v4600_v42  ;;  %3420 = vmatprep.mubr.bf16.mxu1 %v5672_v60  ;;  %v5670_v46 = vld [vmem:[%s8253_s3 + $0xd0] ss:$52 sps:$4 sm:$0xff]  }
 0x170   :  { %5323 = vmatmul.mubr.bf16.gmra.mxu0 %v5666_v56  ;;  %5088 = vmatprep.subr.bf16.mxu1 %v7190_v47  ;;  %v4563_v56 = vpop.f32.mrf.mxu0  ;;  %v4603_v8 = vpop.f32.mrf.mxu1  ;;  %v5845_v47 = vld [vmem:[%s8249_s4 + $0xa0] sm:$0xff]   ;;  %v4202_v60 = vcombine.high %v3121_v22, %v3121_v22 }
 0x171   :  { %5047 = vmatpush3.bf16.msra.mxu0 %v5843_v36  ;;  %3468 = vmatprep.mubr.bf16.mxu0 %v5677_v30  ;;  %v1997_v6 = vadd.f32 %v4562_v21, %v7634_v11 }
 0x172   :  { %5048 = vmatprep.subr.bf16.mxu0 %v5844_v51  ;;  %v4564_v48 = vpop.f32.mrf.mxu0  ;;  %v4604_v24 = vpop.f32.mrf.mxu1 }
 0x173   :  { %5089 = vmatpush3.bf16.msra.mxu1 %v7212_v14  ;;  %v7776_v45 = vadd.f32 %v4602_v34, %v1997_v6  ;;  %v4565_v39 = vadd.f32 %v4564_v48, %v4563_v56  ;;  %v4605_v11 = vadd.f32 %v4604_v24, %v4603_v8  ;;  %v5847_v14 = vld [vmem:[%s8249_s4 + $0x98] sm:$0xff]   ;;  %v4201_v34 = vcombine.low %v3121_v22, %v3121_v22 }
 0x174   :  { %5090 = vmatprep.subr.bf16.mxu1 %v7219_v25  ;;  %v4566_v30 = vpop.f32.mrf.mxu0  ;;  %v4606_v5 = vpop.f32.mrf.mxu1  ;;  %v5848_v25 = vld [vmem:[%s8249_s4 + $0xd0] sm:$0xff]  }
 0x175   :  { %5049 = vmatpush3.bf16.msra.mxu0 %v5845_v47  ;;  %v2000_v42 = vadd.f32 %v4565_v39, %v7660_v0  ;;  %v5680_v47 = vld [vmem:[%s8253_s3 + $0x14] ss:$52 sps:$4 sm:$0xff]  }
 0x176   :  { %5050 = vmatprep.subr.bf16.mxu0 %v5846_v59  ;;  %3421 = vmatmul.mubr.bf16.gmra.mxu1 %v5670_v46  ;;  %v4567_v50 = vpop.f32.mrf.mxu0  ;;  %v4607_v36 = vpop.f32.mrf.mxu1  ;;  %v5851_v59 = vld [vmem:[%s8249_s4 + $0x88] sm:$0xff]  }
 0x177   :  { %5091 = vmatpush3.bf16.msra.mxu1 %v7227_v17  ;;  %v7787_v37 = vadd.f32 %v4605_v11, %v2000_v42  ;;  %v4568_v20 = vadd.f32 %v4567_v50, %v4566_v30  ;;  %v4608_v0 = vadd.f32 %v4607_v36, %v4606_v5  ;;  %3428 = vmatprep.mubr.bf16.mxu1 %v4202_v60  ;;  %v5849_v17 = vld [vmem:[%s8249_s4 + $0x90] sm:$0xff]   ;;  %v5852_v11 = vld [vmem:[%s8249_s4 + $0xc0] sm:$0xff]  }
 0x178   :  { %5092 = vmatprep.subr.bf16.mxu1 %v7234_v62  ;;  %v4569_v51 = vpop.f32.mrf.mxu0  ;;  %v4609_v21 = vpop.f32.mrf.mxu1  ;;  %v5850_v62 = vld [vmem:[%s8249_s4 + $0xc8] sm:$0xff]  }
 0x179   :  { %5051 = vmatpush3.bf16.msra.mxu0 %v5847_v14  ;;  %v2005_v56 = vadd.f32 %v4568_v20, %v7671_v15  ;;  %v5678_v14 = vld [vmem:[%s8253_s3 + $0x10] ss:$52 sps:$4 sm:$0xff]   ;;  %v5854_v20 = vld [vmem:[%s8249_s4 + $0x1f8] sm:$0xff]  }
 0x17a   :  { %5052 = vmatprep.subr.bf16.mxu0 %v5848_v25  ;;  %v4570_v8 = vpop.f32.mrf.mxu0  ;;  %v4610_v46 = vpop.f32.mrf.mxu1 }
 0x17b   :  { %5093 = vmatpush3.bf16.msra.mxu1 %v7244_v44  ;;  %v7798_v6 = vadd.f32 %v4608_v0, %v2005_v56  ;;  %v4571_v22 = vadd.f32 %v4570_v8, %v4569_v51  ;;  %v4611_v15 = vadd.f32 %v4610_v46, %v4609_v21  ;;  %v5686_v51 = vld [vmem:[%s8253_s3 + $0x7c] ss:$52 sps:$4 sm:$0xff]  }
 0x17c   :  { %5094 = vmatprep.subr.bf16.mxu1 %v7251_v12  ;;  %v4572_v48 = vpop.f32.mrf.mxu0  ;;  %v4612_v24 = vpop.f32.mrf.mxu1 }
 0x17d   :  { %5053 = vmatpush3.bf16.msra.mxu0 %v5849_v17  ;;  %v2008_v44 = vadd.f32 %v4571_v22, %v7682_v52  ;;  %v5856_v17 = vld [vmem:[%s8249_s4 + $0x1f0] sm:$0xff]  }
 0x17e   :  { %5054 = vmatprep.subr.bf16.mxu0 %v5850_v62  ;;  %3429 = vmatmul.mubr.bf16.gmra.mxu1 %v4201_v34  ;;  %v4573_v12 = vpop.f32.mrf.mxu0  ;;  %v4613_v39 = vpop.f32.mrf.mxu1  ;;  %v5855_v34 = vld [vmem:[%s8249_s4 + $0x1b8] sm:$0xff]  }
 0x17f   :  { %5095 = vmatpush3.bf16.msra.mxu1 %v7266_v63  ;;  %v7812_v60 = vadd.f32 %v4611_v15, %v2008_v44  ;;  %v4574_v30 = vadd.f32 %v4573_v12, %v4572_v48  ;;  %v4614_v52 = vadd.f32 %v4613_v39, %v4612_v24  ;;  %3532 = vmatprep.mubr.bf16.mxu1 %v5680_v47  ;;  %v5675_v63 = vld [vmem:[%s8253_s3 + $0x8] ss:$52 sps:$4 sm:$0xff]   ;;  %v5681_v15 = vld [vmem:[%s8253_s3 + $0x70] ss:$52 sps:$4 sm:$0xff]  }
 0x180   :  { %5096 = vmatprep.subr.bf16.mxu1 %v7278_v57  ;;  %v4575_v5 = vpop.f32.mrf.mxu0  ;;  %v4615_v42 = vpop.f32.mrf.mxu1  ;;  %v5853_v57 = vld [vmem:[%s8249_s4 + $0x80] sm:$0xff]   ;;  %v5858_v44 = vld [vmem:[%s8249_s4 + $0x1e8] sm:$0xff]   ;;  %v5689_v39 = vld [vmem:[%s8253_s3 + $0xdc] ss:$52 sps:$4 sm:$0xff]  }
 0x181   :  { %5055 = vmatpush3.bf16.msra.mxu0 %v5851_v59  ;;  %v2013_v50 = vadd.f32 %v4574_v30, %v7699_v2  ;;  %v5683_v2 = vld [vmem:[%s8253_s3 + $0x74] ss:$52 sps:$4 sm:$0xff]  }
 0x182   :  { %5056 = vmatprep.subr.bf16.mxu0 %v5852_v11  ;;  %v4576_v36 = vpop.f32.mrf.mxu0  ;;  %v4616_v25 = vpop.f32.mrf.mxu1 }
 0x183   :  { %5097 = vmatpush3.bf16.msra.mxu1 %v7299_v19  ;;  %v7829_v0 = vadd.f32 %v4614_v52, %v2013_v50  ;;  %v5687_v25 = vld [vmem:[%s8253_s3 + $0xd8] ss:$52 sps:$4 sm:$0xff]  }
 0x184   :  { %5162 = vmatprep.subr.bf16.mxu1 %v7311_v40  ;;  %v4634_v19 = vpop.f32.mrf.mxu0  ;;  %v4674_v21 = vpop.f32.mrf.mxu1 }
 0x185   :  { %5057 = vmatpush3.bf16.msra.mxu0 %v5853_v57  ;;  %v3122_v57 = vld [vmem:[%s8253_s3 + $0x140] sm:$0xff] }
 0x186   :  { %5122 = vmatprep.subr.bf16.mxu0 %v5854_v20  ;;  %3533 = vmatmul.mubr.bf16.vlgmr.msra.gmra.mxu1 %v5678_v14  ;;  %v4635_v40 = vpop.f32.mrf.mxu0  ;;  %v4675_v56 = vpop.f32.mrf.mxu1  ;;  %v3123_v20 = vld [vmem:[%s8253_s3 + $0x148] sm:$0xff] }
 0x187   :  { %5163 = vmatpush3.bf16.msra.mxu1 %v7329_v33  ;;  %v4636_v8 = vadd.f32 %v4635_v40, %v4634_v19  ;;  %v4676_v46 = vadd.f32 %v4675_v56, %v4674_v21  ;;  %3540 = vmatprep.mubr.bf16.mxu1 %v5686_v51  ;;  %v5684_v33 = vld [vmem:[%s8253_s3 + $0x78] ss:$52 sps:$4 sm:$0xff]   ;;  %v5861_v51 = vld [vmem:[%s8249_s4 + $0x1a0] sm:$0xff]   ;;  %v8344_v19 = vld [vmem:[#allocation12_spill] sm:$0xff] }
 0x188   :  { %3469 = vmatmul.mubr.bf16.vlgmr.msra.gmra.mxu0 %v5675_v63  ;;  %5164 = vmatprep.subr.bf16.mxu1 %v7341_v58  ;;  %v4637_v62 = vpop.f32.mrf.mxu0  ;;  %v4677_v22 = vpop.f32.mrf.mxu1  ;;  %v5857_v58 = vld [vmem:[%s8249_s4 + $0x1b0] sm:$0xff]   ;;  %v5860_v63 = vld [vmem:[%s8249_s4 + $0x1e0] sm:$0xff]   ;;  %v5862_v40 = vld [vmem:[%s8249_s4 + $0x1d8] sm:$0xff]  }
 0x189   :  { %5123 = vmatpush3.bf16.msra.mxu0 %v5855_v34  ;;  %3476 = vmatprep.mubr.bf16.mxu0 %v5683_v2  ;;  %v2117_v47 = vadd.f32 %v4636_v8, %v7742_v49  ;;  %v8345_v56 = vld [vmem:[#allocation14_spill] sm:$0xff] }
 0x18a   :  { %5124 = vmatprep.subr.bf16.mxu0 %v5856_v17  ;;  %v4638_v48 = vpop.f32.mrf.mxu0  ;;  %v4678_v24 = vpop.f32.mrf.mxu1  ;;  %v4204_v17 = vcombine.high %v3122_v57, %v3122_v57 }
 0x18b   :  { %5165 = vmatpush3.bf16.msra.mxu1 %v7360_v18  ;;  %v7860_v59 = vadd.f32 %v4676_v46, %v2117_v47  ;;  %v4639_v12 = vadd.f32 %v4638_v48, %v4637_v62  ;;  %v4679_v49 = vadd.f32 %v4678_v24, %v4677_v22  ;;  %v5692_v18 = vld [vmem:[%s8253_s3 + $0xe4] ss:$52 sps:$4 sm:$0xff]   ;;  %v4206_v62 = vcombine.high %v3123_v20, %v3123_v20 }
 0x18c   :  { %5166 = vmatprep.subr.bf16.mxu1 %v7372_v29  ;;  %v4640_v11 = vpop.f32.mrf.mxu0  ;;  %v4680_v30 = vpop.f32.mrf.mxu1  ;;  %v5859_v29 = vld [vmem:[%s8249_s4 + $0x1a8] sm:$0xff]   ;;  %v5863_v47 = vld [vmem:[%s8249_s4 + $0x198] sm:$0xff]  }
 0x18d   :  { %5125 = vmatpush3.bf16.msra.mxu0 %v5857_v58  ;;  %v2120_v52 = vadd.f32 %v4639_v12, %v7759_v7  ;;  %v8346_v58 = vld [vmem:[#allocation16_spill] sm:$0xff]  ;;  %v8347_v12 = vld [vmem:[#allocation18_spill] sm:$0xff] }
 0x18e   :  { %5126 = vmatprep.subr.bf16.mxu0 %v5858_v44  ;;  %3541 = vmatmul.mubr.bf16.gmra.mxu1 %v5684_v33  ;;  %v4641_v5 = vpop.f32.mrf.mxu0  ;;  %v4681_v42 = vpop.f32.mrf.mxu1  ;;  %v5864_v44 = vld [vmem:[%s8249_s4 + $0x1d0] sm:$0xff]  }
 0x18f   :  { %5167 = vmatpush3.bf16.msra.mxu1 %v7393_v28  ;;  %v7877_v14 = vadd.f32 %v4679_v49, %v2120_v52  ;;  %v4642_v50 = vadd.f32 %v4641_v5, %v4640_v11  ;;  %v4682_v7 = vadd.f32 %v4681_v42, %v4680_v30  ;;  %3548 = vmatprep.mubr.bf16.mxu1 %v5692_v18  ;;  %v5865_v5 = vld [vmem:[%s8249_s4 + $0x190] sm:$0xff]  }
 0x190   :  { %3477 = vmatmul.mubr.bf16.gmra.mxu0 %v5681_v15  ;;  %5168 = vmatprep.subr.bf16.mxu1 %v7405_v23  ;;  %v4643_v28 = vpop.f32.mrf.mxu0  ;;  %v4683_v36 = vpop.f32.mrf.mxu1  ;;  %v5690_v23 = vld [vmem:[%s8253_s3 + $0xe0] ss:$52 sps:$4 sm:$0xff]   ;;  %v4203_v30 = vcombine.low %v3122_v57, %v3122_v57  ;;  %v4205_v52 = vcombine.low %v3123_v20, %v3123_v20 }
 0x191   :  { %5127 = vmatpush3.bf16.msra.mxu0 %v5859_v29  ;;  %3484 = vmatprep.mubr.bf16.mxu0 %v5689_v39  ;;  %v2125_v2 = vadd.f32 %v4642_v50, %v7776_v45  ;;  %v5866_v50 = vld [vmem:[%s8249_s4 + $0x1c8] sm:$0xff]   ;;  %v8348_v20 = vld [vmem:[#allocation2_spill] sm:$0xff] }
 0x192   :  { %5128 = vmatprep.subr.bf16.mxu0 %v5860_v63  ;;  %v4644_v21 = vpop.f32.mrf.mxu0  ;;  %v4684_v34 = vpop.f32.mrf.mxu1 }
 0x193   :  { %5169 = vmatpush3.bf16.msra.mxu1 %v8344_v19  ;;  %v7900_v8 = vadd.f32 %v4682_v7, %v2125_v2  ;;  %v4645_v45 = vadd.f32 %v4644_v21, %v4643_v28  ;;  %v4685_v46 = vadd.f32 %v4684_v34, %v4683_v36  ;;  %v5699_v28 = vld [vmem:[%s8253_s3 + $0x1c] ss:$52 sps:$4 sm:$0xff]  }
 0x194   :  { %5170 = vmatprep.subr.bf16.mxu1 %v8345_v56  ;;  %v4646_v22 = vpop.f32.mrf.mxu0  ;;  %v4686_v15 = vpop.f32.mrf.mxu1 }
 0x195   :  { %5129 = vmatpush3.bf16.msra.mxu0 %v5861_v51  ;;  %v2128_v33 = vadd.f32 %v4645_v45, %v7787_v37  ;;  %v8349_v51 = vld [vmem:[#allocation3_spill] sm:$0xff]  ;;  %v8350_v45 = vld [vmem:[#allocation4_spill] sm:$0xff] }
 0x196   :  { %5130 = vmatprep.subr.bf16.mxu0 %v5862_v40  ;;  %3549 = vmatmul.mubr.bf16.gmra.mxu1 %v5690_v23  ;;  %v4647_v48 = vpop.f32.mrf.mxu0  ;;  %v4687_v24 = vpop.f32.mrf.mxu1 }
 0x197   :  { %5171 = vmatpush3.bf16.msra.mxu1 %v8346_v58  ;;  %v7911_v49 = vadd.f32 %v4685_v46, %v2128_v33  ;;  %v4648_v39 = vadd.f32 %v4647_v48, %v4646_v22  ;;  %v4688_v37 = vadd.f32 %v4687_v24, %v4686_v15  ;;  %3556 = vmatprep.mubr.bf16.mxu1 %v4206_v62  ;;  %v8351_v46 = vld [vmem:[#allocation5_spill] sm:$0xff]  ;;  %v8353_v48 = vld [vmem:[#allocation7_spill] sm:$0xff] }
 0x198   :  { %3485 = vmatmul.mubr.bf16.gmra.mxu0 %v5687_v25  ;;  %5172 = vmatprep.subr.bf16.mxu1 %v8347_v12  ;;  %v4649_v18 = vpop.f32.mrf.mxu0  ;;  %v4689_v11 = vpop.f32.mrf.mxu1  ;;  %v5705_v22 = vld [vmem:[%s8253_s3 + $0x84] ss:$52 sps:$4 sm:$0xff]  }
 0x199   :  { %5131 = vmatpush3.bf16.msra.mxu0 %v5863_v47  ;;  %3492 = vmatprep.mubr.bf16.mxu0 %v4204_v17  ;;  %v2133_v29 = vadd.f32 %v4648_v39, %v7798_v6  ;;  %v8352_v47 = vld [vmem:[#allocation6_spill] sm:$0xff] }
 0x19a   :  { %5132 = vmatprep.subr.bf16.mxu0 %v5864_v44  ;;  %v4650_v42 = vpop.f32.mrf.mxu0  ;;  %v4690_v63 = vpop.f32.mrf.mxu1  ;;  %v5703_v39 = vld [vmem:[%s8253_s3 + $0x80] ss:$52 sps:$4 sm:$0xff]  }
 0x19b   :  { %5173 = vmatpush3.bf16.msra.mxu1 %v7486_v16  ;;  %v7922_v7 = vadd.f32 %v4688_v37, %v2133_v29  ;;  %v4651_v57 = vadd.f32 %v4650_v42, %v4649_v18  ;;  %v4691_v6 = vadd.f32 %v4690_v63, %v4689_v11  ;;  %v5702_v16 = vld [vmem:[%s8253_s3 + $0x24] ss:$52 sps:$4 sm:$0xff]   ;;  %v5706_v18 = vld [vmem:[%s8253_s3 + $0x88] ss:$52 sps:$4 sm:$0xff]  }
 0x19c   :  { %5174 = vmatprep.subr.bf16.mxu1 %v7498_v41  ;;  %v4652_v36 = vpop.f32.mrf.mxu0  ;;  %v4692_v25 = vpop.f32.mrf.mxu1 }
 0x19d   :  { %5133 = vmatpush3.bf16.msra.mxu0 %v5865_v5  ;;  %v2136_v23 = vadd.f32 %v4651_v57, %v7812_v60  ;;  %v5697_v60 = vld [vmem:[%s8253_s3 + $0x18] ss:$52 sps:$4 sm:$0xff]  }
 0x19e   :  { %5134 = vmatprep.subr.bf16.mxu0 %v5866_v50  ;;  %3557 = vmatmul.mubr.bf16.gmra.mxu1 %v4205_v52  ;;  %v4653_v41 = vpop.f32.mrf.mxu0  ;;  %v4693_v2 = vpop.f32.mrf.mxu1  ;;  %v8355_v52 = vld [vmem:[#allocation9_spill] sm:$0xff]  ;;  %v5711_v5 = vld [vmem:[%s8253_s3 + $0xec] ss:$52 sps:$4 sm:$0xff]   ;;  %v5714_v50 = vld [vmem:[%s8253_s3 + $0xf4] ss:$52 sps:$4 sm:$0xff]  }
 0x19f   :  { %5175 = vmatpush3.bf16.msra.mxu1 %v7519_v55  ;;  %v7935_v19 = vadd.f32 %v4691_v6, %v2136_v23  ;;  %v4654_v21 = vadd.f32 %v4653_v41, %v4652_v36  ;;  %v4694_v34 = vadd.f32 %v4693_v2, %v4692_v25  ;;  %3660 = vmatprep.mubr.bf16.mxu1 %v5702_v16  ;;  %v5700_v55 = vld [vmem:[%s8253_s3 + $0x20] ss:$52 sps:$4 sm:$0xff]   ;;  %v8357_v36 = vld [vmem:[#allocation11_spill] sm:$0xff] }
 0x1a0   :  { %3493 = vmatmul.mubr.bf16.gmra.mxu0 %v4203_v30  ;;  %5176 = vmatprep.subr.bf16.mxu1 %v7531_v61  ;;  %v4655_v40 = vpop.f32.mrf.mxu0  ;;  %v4695_v56 = vpop.f32.mrf.mxu1  ;;  %v8356_v6 = vld [vmem:[#allocation10_spill] sm:$0xff]  ;;  %v3124_v41 = vld [vmem:[%s8253_s3 + $0x150] sm:$0xff] }
 0x1a1   :  { %5135 = vmatpush3.bf16.msra.mxu0 %v8348_v20  ;;  %3596 = vmatprep.mubr.bf16.mxu0 %v5699_v28  ;;  %v2141_v17 = vadd.f32 %v4654_v21, %v7829_v0  ;;  %v5708_v0 = vld [vmem:[%s8253_s3 + $0x8c] ss:$52 sps:$4 sm:$0xff]   ;;  %v3125_v21 = vld [vmem:[%s8253_s3 + $0x158] sm:$0xff] }
 0x1a2   :  { %5136 = vmatprep.subr.bf16.mxu0 %v8349_v51  ;;  %v4656_v61 = vpop.f32.mrf.mxu0  ;;  %v4696_v62 = vpop.f32.mrf.mxu1 }
 0x1a3   :  { %5177 = vmatpush3.bf16.msra.mxu1 %v7552_v38  ;;  %v7951_v15 = vadd.f32 %v4694_v34, %v2141_v17  ;;  %v4208_v17 = vcombine.high %v3124_v41, %v3124_v41 }
 0x1a4   :  { %5326 = vmatprep.subr.bf16.mxu1 %v7564_v35  ;;  %v4714_v33 = vpop.f32.mrf.mxu0  ;;  %v5296_v38 = vpop.f32.mrf.mxu1 }
 0x1a5   :  { %5137 = vmatpush3.bf16.msra.mxu0 %v8350_v45 }
 0x1a6   :  { %5202 = vmatprep.subr.bf16.mxu0 %v8351_v46  ;;  %3661 = vmatmul.mubr.bf16.vlgmr.msra.gmra.mxu1 %v5700_v55  ;;  %v4715_v58 = vpop.f32.mrf.mxu0  ;;  %v2308_v24 = vpop.f32.mrf.mxu1  ;;  %v8359_v55 = vld [vmem:[#allocation15_spill] sm:$0xff]  ;;  %v4210_v46 = vcombine.high %v3125_v21, %v3125_v21 }
 0x1a7   :  { %5327 = vmatpush3.bf16.msra.mxu1 %v7564_v35  ;;  %v4716_v44 = vadd.f32 %v4715_v58, %v4714_v33  ;;  %3668 = vmatprep.mubr.bf16.mxu1 %v5708_v0  ;;  %v8354_v35 = vld [vmem:[#allocation8_spill] sm:$0xff]  ;;  %v8361_v0 = vld [vmem:[#allocation17_spill] sm:$0xff]  ;;  %v8362_v33 = vld [vmem:[#allocation19_spill] sm:$0xff] }
 0x1a8   :  { %3597 = vmatmul.mubr.bf16.vlgmr.msra.gmra.mxu0 %v5697_v60  ;;  %5328 = vmatprep.subr.bf16.mxu1 %v7582_v27  ;;  %v4717_v12 = vpop.f32.mrf.mxu0  ;;  %v5297_v37 = vpop.f32.mrf.mxu1  ;;  %v8358_v60 = vld [vmem:[#allocation13_spill] sm:$0xff] }
 0x1a9   :  { %5203 = vmatpush3.bf16.msra.mxu0 %v8352_v47  ;;  %3604 = vmatprep.mubr.bf16.mxu0 %v5705_v22  ;;  %v2245_v11 = vadd.f32 %v4716_v44, %v7860_v59  ;;  %v8364_v44 = vld [vmem:[#allocation20_spill] sm:$0xff] }
 0x1aa   :  { %5204 = vmatprep.subr.bf16.mxu0 %v8353_v48  ;;  %v4718_v30 = vpop.f32.mrf.mxu0  ;;  %v2311_v29 = vpop.f32.mrf.mxu1  ;;  %v4207_v48 = vcombine.low %v3124_v41, %v3124_v41 }
 0x1ab   :  { %5329 = vmatpush3.bf16.msra.mxu1 %v7582_v27  ;;  %v4719_v42 = vadd.f32 %v4718_v30, %v4717_v12  ;;  %v7974_v63 = vadd.f32 %v2308_v24, %v2245_v11  ;;  %v4209_v24 = vcombine.low %v3125_v21, %v3125_v21  ;;  %v5722_v11 = vld [vmem:[%s8253_s3 + $0x30] ss:$52 sps:$4 sm:$0xff]  }
 0x1ac   :  { %5330 = vmatprep.subr.bf16.mxu1 %v7605_v32  ;;  %v4720_v59 = vpop.f32.mrf.mxu0  ;;  %v7979_v27 = vpop.f32.mrf.mxu1 }
 0x1ad   :  { %5205 = vmatpush3.bf16.msra.mxu0 %v8354_v35  ;;  %v2248_v28 = vadd.f32 %v4719_v42, %v7877_v14  ;;  %v5712_v14 = vld [vmem:[%s8253_s3 + $0xf0] ss:$52 sps:$4 sm:$0xff]   ;;  %v8368_v42 = vld [vmem:[#allocation23_spill] sm:$0xff] }
 0x1ae   :  { %5206 = vmatprep.subr.bf16.mxu0 %v8355_v52  ;;  %3669 = vmatmul.mubr.bf16.gmra.mxu1 %v5706_v18  ;;  %v4721_v16 = vpop.f32.mrf.mxu0  ;;  %v2324_v25 = vpop.f32.mrf.mxu1  ;;  %v8367_v52 = vld [vmem:[#allocation22_spill] sm:$0xff] }
 0x1af   :  { %5331 = vmatpush3.bf16.msra.mxu1 %v7605_v32  ;;  %v4722_v23 = vadd.f32 %v4721_v16, %v4720_v59  ;;  %v7987_v20 = vadd.f32 %v2311_v29, %v2248_v28  ;;  %3676 = vmatprep.mubr.bf16.mxu1 %v5714_v50  ;;  %v5709_v32 = vld [vmem:[%s8253_s3 + $0xe8] ss:$52 sps:$4 sm:$0xff]  }
 0x1b0   :  { %3605 = vmatmul.mubr.bf16.gmra.mxu0 %v5703_v39  ;;  %5332 = vmatprep.subr.bf16.mxu1 %v7627_v26  ;;  %v4723_v2 = vpop.f32.mrf.mxu0  ;;  %v5301_v51 = vpop.f32.mrf.mxu1  ;;  %v8365_v39 = vld [vmem:[#allocation21_spill] sm:$0xff] }
 0x1b1   :  { %5207 = vmatpush3.bf16.msra.mxu0 %v8356_v6  ;;  %3612 = vmatprep.mubr.bf16.mxu0 %v5711_v5  ;;  %v2253_v34 = vadd.f32 %v4722_v23, %v7900_v8  ;;  %v5719_v28 = vld [vmem:[%s8253_s3 + $0x28] ss:$52 sps:$4 sm:$0xff]   ;;  %v5730_v23 = vld [vmem:[%s8253_s3 + $0x100] ss:$52 sps:$4 sm:$0xff]  }
 0x1b2   :  { %5208 = vmatprep.subr.bf16.mxu0 %v8357_v36  ;;  %v4724_v56 = vpop.f32.mrf.mxu0  ;;  %v8370_v36 = vld [vmem:[#allocation24_spill] sm:$0xff] }
 0x1b3   :  { %5333 = vmatpush3.bf16.msra.mxu1 %v7627_v26  ;;  %v8009_v45 = vadd.f32 %v5296_v38, %v2253_v34  ;;  %v4725_v61 = vadd.f32 %v4724_v56, %v4723_v2 }
 0x1b4   :  { %5334 = vmatprep.subr.bf16.mxu1 %v7653_v13  ;;  %v4726_v62 = vpop.f32.mrf.mxu0 }
 0x1b5   :  { %5209 = vmatpush3.bf16.msra.mxu0 %v8358_v60  ;;  %8360 = vst [vmem:[#allocation12_spill] sm:$0xff] %v8009_v45  ;;  %v2256_v22 = vadd.f32 %v4725_v61, %v7911_v49 }
 0x1b6   :  { %5210 = vmatprep.subr.bf16.mxu0 %v8359_v55  ;;  %3677 = vmatmul.mubr.bf16.gmra.mxu1 %v5712_v14  ;;  %v4727_v26 = vpop.f32.mrf.mxu0 }
 0x1b7   :  { %5335 = vmatpush3.bf16.msra.mxu1 %v7653_v13  ;;  %v8017_v38 = vadd.f32 %v5297_v37, %v2256_v22  ;;  %v4728_v47 = vadd.f32 %v4727_v26, %v4726_v62  ;;  %3684 = vmatprep.mubr.bf16.mxu1 %v4210_v46  ;;  %v5721_v37 = vld [vmem:[%s8253_s3 + $0x2c] ss:$52 sps:$4 sm:$0xff]   ;;  %v5729_v46 = vld [vmem:[%s8253_s3 + $0xfc] ss:$52 sps:$4 sm:$0xff]  }
 0x1b8   :  { %3613 = vmatmul.mubr.bf16.gmra.mxu0 %v5709_v32  ;;  %5336 = vmatprep.subr.bf16.mxu1 %v7667_v4  ;;  %v4729_v58 = vpop.f32.mrf.mxu0 }
 0x1b9   :  { %5211 = vmatpush3.bf16.msra.mxu0 %v8361_v0  ;;  %3620 = vmatprep.mubr.bf16.mxu0 %v4208_v17  ;;  %8363 = vst [vmem:[#allocation14_spill] sm:$0xff] %v8017_v38  ;;  %v2261_v13 = vadd.f32 %v4728_v47, %v7922_v7  ;;  %v2327_v7 = vpop.f32.mrf.mxu1  ;;  %v5731_v17 = vld [vmem:[%s8253_s3 + $0x168] ss:$0 sps:$4 sm:$0xff]  }
 0x1ba   :  { %5212 = vmatprep.subr.bf16.mxu0 %v8362_v33  ;;  %v4730_v12 = vpop.f32.mrf.mxu0 }
 0x1bb   :  { %5337 = vmatpush3.bf16.msra.mxu1 %v7667_v4  ;;  %v4731_v18 = vadd.f32 %v4730_v12, %v4729_v58  ;;  %v8030_v35 = vadd.f32 %v2324_v25, %v2261_v13  ;;  %v5726_v25 = vld [vmem:[%s8253_s3 + $0x94] ss:$52 sps:$4 sm:$0xff]  }
 0x1bc   :  { %5338 = vmatprep.subr.bf16.mxu1 %v7678_v31  ;;  %v4732_v30 = vpop.f32.mrf.mxu0 }
 0x1bd   :  { %5213 = vmatpush3.bf16.msra.mxu0 %v8364_v44  ;;  %8366 = vst [vmem:[#allocation16_spill] sm:$0xff] %v8030_v35  ;;  %v2264_v29 = vadd.f32 %v4731_v18, %v7935_v19  ;;  %v5723_v19 = vld [vmem:[%s8253_s3 + $0x98] ss:$52 sps:$4 sm:$0xff]   ;;  %v3126_v44 = vld [vmem:[%s8253_s3 + $0x160] sm:$0xff] }
 0x1be   :  { %5214 = vmatprep.subr.bf16.mxu0 %v8365_v39  ;;  %3685 = vmatmul.mubr.bf16.gmra.mxu1 %v4209_v24  ;;  %v4733_v5 = vpop.f32.mrf.mxu0  ;;  %v5727_v18 = vld [vmem:[%s8253_s3 + $0xf8] ss:$52 sps:$4 sm:$0xff]  }
 0x1bf   :  { %5339 = vmatpush3.bf16.msra.mxu1 %v7678_v31  ;;  %v4734_v50 = vadd.f32 %v4733_v5, %v4732_v30  ;;  %v8041_v59 = vadd.f32 %v2327_v7, %v2264_v29  ;;  %5342 = vmatprep.mubr.bf16.mxu1 %v5722_v11  ;;  %v4212_v30 = vcombine.high %v3126_v44, %v3126_v44 }
 0x1c0   :  { %3621 = vmatmul.mubr.bf16.gmra.mxu0 %v4207_v48  ;;  %5340 = vmatprep.subr.bf16.mxu1 %v7695_v54  ;;  %v4735_v6 = vpop.f32.mrf.mxu0 }
 0x1c1   :  { %5215 = vmatpush3.bf16.msra.mxu0 %v8367_v52  ;;  %3724 = vmatprep.mubr.bf16.mxu0 %v5721_v37  ;;  %8369 = vst [vmem:[#allocation18_spill] sm:$0xff] %v8041_v59  ;;  %v2269_v31 = vadd.f32 %v4734_v50, %v7951_v15 }
 0x1c2   :  { %5216 = vmatprep.subr.bf16.mxu0 %v8368_v42  ;;  %v4736_v41 = vpop.f32.mrf.mxu0 }
 0x1c3   :  { %5341 = vmatpush3.bf16.msra.mxu1 %v7695_v54  ;;  %v8062_v2 = vadd.f32 %v7979_v27, %v2269_v31  ;;  %v5724_v27 = vld [vmem:[%s8253_s3 + $0x90] ss:$52 sps:$4 sm:$0xff]   ;;  %v4211_v41 = vcombine.low %v3126_v44, %v3126_v44 }
 0x1c4   :  { %v4806_v32 = vpop.f32.mrf.mxu1 }
 0x1c5   :  { %5217 = vmatpush3.bf16.msra.mxu0 %v8370_v36  ;;  %8371 = vst [vmem:[#allocation2_spill] sm:$0xff] %v8062_v2 }
 0x1c6   :  { %5343 = vmatmul.mubr.bf16.vlgmr.msra.gmra.mxu1 %v5723_v19  ;;  %v4807_v21 = vpop.f32.mrf.mxu1 }
 0x1c7   :  { %5346 = vmatprep.mubr.bf16.mxu1 %v5730_v23  ;;  %v4808_v60 = vadd.f32 %v4807_v21, %v4806_v32 }
 0x1c8   :  { %v4766_v15 = vpop.f32.mrf.mxu0  ;;  %3725 = vmatmul.mubr.bf16.vlgmr.msra.gmra.mxu0 %v5719_v28  ;;  %v4809_v55 = vpop.f32.mrf.mxu1 }
 0x1c9   :  { %3732 = vmatprep.mubr.bf16.mxu0 %v5726_v25 }
 0x1ca   :  { %v4767_v54 = vpop.f32.mrf.mxu0  ;;  %v4810_v22 = vpop.f32.mrf.mxu1 }
 0x1cb   :  { %v4768_v34 = vadd.f32 %v4767_v54, %v4766_v15  ;;  %v4811_v26 = vadd.f32 %v4810_v22, %v4809_v55 }
 0x1cc   :  { %v4769_v56 = vpop.f32.mrf.mxu0  ;;  %v4812_v47 = vpop.f32.mrf.mxu1 }
 0x1cd   :  { %v8072_v61 = vadd.f32 %v4808_v60, %v4768_v34 }
 0x1ce   :  { %v4770_v62 = vpop.f32.mrf.mxu0  ;;  %5347 = vmatmul.mubr.bf16.gmra.mxu1 %v5731_v17  ;;  %v4813_v24 = vpop.f32.mrf.mxu1 }
 0x1cf   :  { %v4771_v0 = vadd.f32 %v4770_v62, %v4769_v56  ;;  %v4814_v12 = vadd.f32 %v4813_v24, %v4812_v47 }
 0x1d0   :  { %v4772_v33 = vpop.f32.mrf.mxu0  ;;  %3733 = vmatmul.mubr.bf16.gmra.mxu0 %v5724_v27  ;;  %v4815_v37 = vpop.f32.mrf.mxu1 }
 0x1d1   :  { %v2733_v58 = vadd.f32 %v4811_v26, %v4771_v0  ;;  %3740 = vmatprep.mubr.bf16.mxu0 %v5729_v46 }
 0x1d2   :  { %v4773_v48 = vpop.f32.mrf.mxu0  ;;  %v4816_v52 = vpop.f32.mrf.mxu1 }
 0x1d3   :  { %v4774_v13 = vadd.f32 %v4773_v48, %v4772_v33  ;;  %v4817_v5 = vadd.f32 %v4816_v52, %v4815_v37 }
 0x1d4   :  { %v4775_v39 = vpop.f32.mrf.mxu0  ;;  %v4818_v50 = vpop.f32.mrf.mxu1 }
 0x1d5   :  { %v2738_v11 = vadd.f32 %v4814_v12, %v4774_v13 }
 0x1d6   :  { %v4776_v7 = vpop.f32.mrf.mxu0  ;;  %v4819_v19 = vpop.f32.mrf.mxu1 }
 0x1d7   :  { %v4777_v29 = vadd.f32 %v4776_v7, %v4775_v39  ;;  %v4820_v36 = vadd.f32 %v4819_v19, %v4818_v50 }
 0x1d8   :  { %v4778_v42 = vpop.f32.mrf.mxu0  ;;  %3741 = vmatmul.mubr.bf16.gmra.mxu0 %v5727_v18  ;;  %v4821_v23 = vpop.f32.mrf.mxu1 }
 0x1d9   :  { %v2741_v6 = vadd.f32 %v4817_v5, %v4777_v29  ;;  %3748 = vmatprep.mubr.bf16.mxu0 %v4212_v30 }
 0x1da   :  { %v4779_v28 = vpop.f32.mrf.mxu0  ;;  %v4822_v54 = vpop.f32.mrf.mxu1 }
 0x1db   :  { %v4780_v31 = vadd.f32 %v4779_v28, %v4778_v42  ;;  %v4823_v34 = vadd.f32 %v4822_v54, %v4821_v23 }
 0x1dc   :  { %v4781_v25 = vpop.f32.mrf.mxu0  ;;  %v4824_v56 = vpop.f32.mrf.mxu1 }
 0x1dd   :  { %v2746_v15 = vadd.f32 %v4820_v36, %v4780_v31 }
 0x1de   :  { %v4782_v32 = vpop.f32.mrf.mxu0  ;;  %v4825_v17 = vpop.f32.mrf.mxu1 }
 0x1df   :  { %v4783_v21 = vadd.f32 %v4782_v32, %v4781_v25  ;;  %v4826_v62 = vadd.f32 %v4825_v17, %v4824_v56 }
 0x1e0   :  { %v4784_v60 = vpop.f32.mrf.mxu0  ;;  %3749 = vmatmul.mubr.bf16.gmra.mxu0 %v4211_v41  ;;  %v4827_v0 = vpop.f32.mrf.mxu1 }
 0x1e1   :  { %v2749_v55 = vadd.f32 %v4823_v34, %v4783_v21 }
 0x1e2   :  { %v4785_v27 = vpop.f32.mrf.mxu0  ;;  %v4828_v47 = vpop.f32.mrf.mxu1 }
 0x1e3   :  { %v4786_v46 = vadd.f32 %v4785_v27, %v4784_v60 }
 0x1e4   :  { %v4787_v22 = vpop.f32.mrf.mxu0 }
 0x1e5   :  { %v2754_v26 = vadd.f32 %v4826_v62, %v4786_v46  ;;  %v4886_v24 = vpop.f32.mrf.mxu1 }
 0x1e6   :  { %v4788_v33 = vpop.f32.mrf.mxu0 }
 0x1e7   :  { %v4887_v13 = vpop.f32.mrf.mxu1 }
 0x1e8   :  { %v4846_v48 = vpop.f32.mrf.mxu0  ;;  %v4888_v39 = vadd.f32 %v4887_v13, %v4886_v24 }
 0x1e9   :  { %v4889_v18 = vpop.f32.mrf.mxu1 }
 0x1ea   :  { %v4847_v44 = vpop.f32.mrf.mxu0 }
 0x1eb   :  { %v4848_v12 = vadd.f32 %v4847_v44, %v4846_v48  ;;  %v4890_v52 = vpop.f32.mrf.mxu1 }
 0x1ec   :  { %v4849_v37 = vpop.f32.mrf.mxu0  ;;  %v4891_v42 = vadd.f32 %v4890_v52, %v4889_v18 }
 0x1ed   :  { %v2794_v30 = vadd.f32 %v4848_v12, %v8072_v61  ;;  %v4892_v28 = vpop.f32.mrf.mxu1 }
 0x1ee   :  { %v4850_v7 = vpop.f32.mrf.mxu0 }
 0x1ef   :  { %v2858_v29 = vadd.f32 %v4888_v39, %v2794_v30  ;;  %v4851_v5 = vadd.f32 %v4850_v7, %v4849_v37  ;;  %v4893_v36 = vpop.f32.mrf.mxu1 }
 0x1f0   :  { %v4852_v50 = vpop.f32.mrf.mxu0  ;;  %v4894_v41 = vadd.f32 %v4893_v36, %v4892_v28 }
 0x1f1   :  { %v2797_v19 = vadd.f32 %v4851_v5, %v2733_v58  ;;  %v4895_v54 = vpop.f32.mrf.mxu1 }
 0x1f2   :  { %v4853_v31 = vpop.f32.mrf.mxu0 }
 0x1f3   :  { %v2861_v25 = vadd.f32 %v4891_v42, %v2797_v19  ;;  %v4854_v23 = vadd.f32 %v4853_v31, %v4852_v50  ;;  %v4896_v60 = vpop.f32.mrf.mxu1 }
 0x1f4   :  { %v4855_v32 = vpop.f32.mrf.mxu0  ;;  %v4897_v27 = vadd.f32 %v4896_v60, %v4895_v54 }
 0x1f5   :  { %v2802_v21 = vadd.f32 %v4854_v23, %v2738_v11  ;;  %v4898_v46 = vpop.f32.mrf.mxu1 }
 0x1f6   :  { %v4856_v34 = vpop.f32.mrf.mxu0 }
 0x1f7   :  { %v2866_v56 = vadd.f32 %v4894_v41, %v2802_v21  ;;  %v4857_v61 = vadd.f32 %v4856_v34, %v4855_v32  ;;  %v4899_v0 = vpop.f32.mrf.mxu1 }
 0x1f8   :  { %v4858_v17 = vpop.f32.mrf.mxu0  ;;  %v4900_v47 = vadd.f32 %v4899_v0, %v4898_v46 }
 0x1f9   :  { %v2805_v62 = vadd.f32 %v4857_v61, %v2741_v6  ;;  %v4901_v24 = vpop.f32.mrf.mxu1 }
 0x1fa   :  { %v4859_v22 = vpop.f32.mrf.mxu0 }
 0x1fb   :  { %v2869_v33 = vadd.f32 %v4897_v27, %v2805_v62  ;;  %v4860_v58 = vadd.f32 %v4859_v22, %v4858_v17  ;;  %v4902_v12 = vpop.f32.mrf.mxu1 }
 0x1fc   :  { %v4861_v48 = vpop.f32.mrf.mxu0  ;;  %v4903_v37 = vadd.f32 %v4902_v12, %v4901_v24 }
 0x1fd   :  { %v2810_v44 = vadd.f32 %v4860_v58, %v2746_v15  ;;  %v4904_v30 = vpop.f32.mrf.mxu1 }
 0x1fe   :  { %v4862_v13 = vpop.f32.mrf.mxu0 }
 0x1ff   :  { %v2874_v39 = vadd.f32 %v4900_v47, %v2810_v44  ;;  %v4863_v11 = vadd.f32 %v4862_v13, %v4861_v48  ;;  %v4905_v5 = vpop.f32.mrf.mxu1 }
 0x200   :  { %v4864_v18 = vpop.f32.mrf.mxu0  ;;  %v4906_v50 = vadd.f32 %v4905_v5, %v4904_v30 }
 0x201   :  { %v2813_v7 = vadd.f32 %v4863_v11, %v2749_v55  ;;  %v4907_v19 = vpop.f32.mrf.mxu1 }
 0x202   :  { %v4865_v52 = vpop.f32.mrf.mxu0 }
 0x203   :  { %v2877_v42 = vadd.f32 %v4903_v37, %v2813_v7  ;;  %v4866_v6 = vadd.f32 %v4865_v52, %v4864_v18  ;;  %v4908_v23 = vpop.f32.mrf.mxu1 }
 0x204   :  { %v4867_v28 = vpop.f32.mrf.mxu0 }
 0x205   :  { %v2818_v31 = vadd.f32 %v4866_v6, %v2754_v26 }
 0x206   :  { %v4868_v36 = vpop.f32.mrf.mxu0  ;;  %v4966_v32 = vpop.f32.mrf.mxu1 }
 0x207   :  { %v2882_v41 = vadd.f32 %v4906_v50, %v2818_v31 }
 0x208   :  { %v4926_v15 = vpop.f32.mrf.mxu0  ;;  %v4967_v21 = vpop.f32.mrf.mxu1 }
 0x209   :  { %v4968_v60 = vadd.f32 %v4967_v21, %v4966_v32 }
 0x20a   :  { %v4927_v54 = vpop.f32.mrf.mxu0  ;;  %v4969_v27 = vpop.f32.mrf.mxu1 }
 0x20b   :  { %v4928_v34 = vadd.f32 %v4927_v54, %v4926_v15 }
 0x20c   :  { %v4929_v61 = vpop.f32.mrf.mxu0  ;;  %v4970_v46 = vpop.f32.mrf.mxu1 }
 0x20d   :  { %v2922_v55 = vadd.f32 %v4928_v34, %v2858_v29  ;;  %v4971_v22 = vadd.f32 %v4970_v46, %v4969_v27 }
 0x20e   :  { %v4930_v17 = vpop.f32.mrf.mxu0  ;;  %v4972_v47 = vpop.f32.mrf.mxu1 }
 0x20f   :  { %v4931_v62 = vadd.f32 %v4930_v17, %v4929_v61  ;;  %v2986_v0 = vadd.f32 %v4968_v60, %v2922_v55 }
 0x210   :  { %v4932_v58 = vpop.f32.mrf.mxu0  ;;  %v4973_v24 = vpop.f32.mrf.mxu1 }
 0x211   :  { %v2925_v26 = vadd.f32 %v4931_v62, %v2861_v25  ;;  %v4974_v13 = vadd.f32 %v4973_v24, %v4972_v47 }
 0x212   :  { %v4933_v48 = vpop.f32.mrf.mxu0  ;;  %v4975_v37 = vpop.f32.mrf.mxu1 }
 0x213   :  { %v4934_v44 = vadd.f32 %v4933_v48, %v4932_v58  ;;  %v2989_v12 = vadd.f32 %v4971_v22, %v2925_v26 }
 0x214   :  { %v4935_v11 = vpop.f32.mrf.mxu0  ;;  %v4976_v7 = vpop.f32.mrf.mxu1 }
 0x215   :  { %v2930_v18 = vadd.f32 %v4934_v44, %v2866_v56  ;;  %v4977_v29 = vadd.f32 %v4976_v7, %v4975_v37 }
 0x216   :  { %v4936_v30 = vpop.f32.mrf.mxu0  ;;  %v4978_v50 = vpop.f32.mrf.mxu1 }
 0x217   :  { %v4937_v52 = vadd.f32 %v4936_v30, %v4935_v11  ;;  %v2994_v5 = vadd.f32 %v4974_v13, %v2930_v18 }
 0x218   :  { %v4938_v6 = vpop.f32.mrf.mxu0  ;;  %v4979_v31 = vpop.f32.mrf.mxu1 }
 0x219   :  { %v2933_v28 = vadd.f32 %v4937_v52, %v2869_v33  ;;  %v4980_v25 = vadd.f32 %v4979_v31, %v4978_v50 }
 0x21a   :  { %v4939_v19 = vpop.f32.mrf.mxu0  ;;  %v4981_v32 = vpop.f32.mrf.mxu1 }
 0x21b   :  { %v4940_v36 = vadd.f32 %v4939_v19, %v4938_v6  ;;  %v2997_v23 = vadd.f32 %v4977_v29, %v2933_v28 }
 0x21c   :  { %v4941_v15 = vpop.f32.mrf.mxu0  ;;  %v4982_v34 = vpop.f32.mrf.mxu1 }
 0x21d   :  { %v2938_v54 = vadd.f32 %v4940_v36, %v2874_v39  ;;  %v4983_v56 = vadd.f32 %v4982_v34, %v4981_v32 }
 0x21e   :  { %v4942_v21 = vpop.f32.mrf.mxu0  ;;  %v4984_v55 = vpop.f32.mrf.mxu1 }
 0x21f   :  { %v4943_v60 = vadd.f32 %v4942_v21, %v4941_v15  ;;  %v3002_v61 = vadd.f32 %v4980_v25, %v2938_v54 }
 0x220   :  { %v4944_v27 = vpop.f32.mrf.mxu0  ;;  %v4985_v62 = vpop.f32.mrf.mxu1 }
 0x221   :  { %v2941_v17 = vadd.f32 %v4943_v60, %v2877_v42  ;;  %v4986_v33 = vadd.f32 %v4985_v62, %v4984_v55 }
 0x222   :  { %v4945_v46 = vpop.f32.mrf.mxu0  ;;  %v4987_v26 = vpop.f32.mrf.mxu1 }
 0x223   :  { %v4946_v22 = vadd.f32 %v4945_v46, %v4944_v27  ;;  %v3005_v58 = vadd.f32 %v4983_v56, %v2941_v17 }
 0x224   :  { %v4947_v47 = vpop.f32.mrf.mxu0  ;;  %v4988_v44 = vpop.f32.mrf.mxu1 }
 0x225   :  { %v2946_v48 = vadd.f32 %v4946_v22, %v2882_v41 }
 0x226   :  { %v4948_v24 = vpop.f32.mrf.mxu0  ;;  %v5018_v11 = vpop.f32.mrf.mxu1 }
 0x227   :  { %v3010_v13 = vadd.f32 %v4986_v33, %v2946_v48 }
 0x228   :  { %v5320_v39 = vpop.f32.mrf.mxu0  ;;  %v5019_v30 = vpop.f32.mrf.mxu1 }
 0x229   :  { %v8084_v37 = vadd.f32 %v5320_v39, %v2994_v5  ;;  %v5020_v42 = vadd.f32 %v5019_v30, %v5018_v11 }
 0x22a   :  { %v3049_v18 = vpop.f32.mrf.mxu0  ;;  %v5021_v29 = vpop.f32.mrf.mxu1 }
 0x22b   :  { %8373 = vst [vmem:[#allocation3_spill] sm:$0xff] %v8084_v37  ;;  %v8086_v7 = vadd.f32 %v3049_v18, %v2986_v0 }
 0x22c   :  { %v5321_v52 = vpop.f32.mrf.mxu0  ;;  %v5022_v28 = vpop.f32.mrf.mxu1 }
 0x22d   :  { %v8088_v6 = vadd.f32 %v5321_v52, %v2997_v23  ;;  %v8092_v41 = vadd.f32 %v5022_v28, %v5021_v29 }
 0x22e   :  { %v3052_v50 = vpop.f32.mrf.mxu0  ;;  %v5024_v36 = vpop.f32.mrf.mxu1 }
 0x22f   :  { %8374 = vst [vmem:[#allocation4_spill] sm:$0xff] %v8088_v6  ;;  %v8090_v19 = vadd.f32 %v3052_v50, %v2989_v12 }
 0x230   :  { %v5324_v31 = vpop.f32.mrf.mxu0  ;;  %v5025_v15 = vpop.f32.mrf.mxu1 }
 0x231   :  { %v8094_v25 = vadd.f32 %v5324_v31, %v3010_v13  ;;  %v5026_v0 = vadd.f32 %v5025_v15, %v5024_v36 }
 0x232   :  { %v3065_v5 = vpop.f32.mrf.mxu0  ;;  %v5027_v21 = vpop.f32.mrf.mxu1 }
 0x233   :  { %8375 = vst [vmem:[#allocation5_spill] sm:$0xff] %v8094_v25  ;;  %v8096_v32 = vadd.f32 %v3065_v5, %v3002_v61 }
 0x234   :  { %v5325_v54 = vpop.f32.mrf.mxu0  ;;  %v5028_v23 = vpop.f32.mrf.mxu1 }
 0x235   :  { %8376 = vst [vmem:[#allocation6_spill] sm:$0xff] %v8096_v32  ;;  %v8100_v56 = vadd.f32 %v5028_v23, %v5027_v21 }
 0x236   :  { %v3068_v34 = vpop.f32.mrf.mxu0  ;;  %v5030_v12 = vpop.f32.mrf.mxu1 }
 0x237   :  { %v8098_v60 = vadd.f32 %v3068_v34, %v3005_v58 }
 0x238   :  { %v5031_v27 = vpop.f32.mrf.mxu1 }
 0x239   :  { %8377 = vst [vmem:[#allocation7_spill] sm:$0xff] %v8098_v60  ;;  %v5032_v55 = vadd.f32 %v5031_v27, %v5030_v12 }
 0x23a   :  { %v5033_v17 = vpop.f32.mrf.mxu1 }
 0x23c   :  { %v5034_v46 = vpop.f32.mrf.mxu1 }
 0x23d   :  { %v8102_v62 = vadd.f32 %v5034_v46, %v5033_v17 }
 0x23e   :  { %v5036_v22 = vpop.f32.mrf.mxu1 }
 0x240   :  { %v5037_v33 = vpop.f32.mrf.mxu1 }
 0x241   :  { %v8104_v61 = vadd.f32 %v5037_v33, %v5036_v22 }
 0x242   :  { %v5039_v47 = vpop.f32.mrf.mxu1 }
 0x244   :  { %v5040_v26 = vpop.f32.mrf.mxu1 }
 0x246   :  { %v5098_v24 = vpop.f32.mrf.mxu1 }
 0x248   :  { %v5058_v48 = vpop.f32.mrf.mxu0  ;;  %v5099_v58 = vpop.f32.mrf.mxu1 }
 0x249   :  { %v5100_v39 = vadd.f32 %v5099_v58, %v5098_v24 }
 0x24a   :  { %v5059_v44 = vpop.f32.mrf.mxu0  ;;  %v8108_v18 = vpop.f32.mrf.mxu1 }
 0x24b   :  { %v5060_v13 = vadd.f32 %v5059_v44, %v5058_v48 }
 0x24c   :  { %v8106_v11 = vpop.f32.mrf.mxu0  ;;  %v8110_v29 = vpop.f32.mrf.mxu1 }
 0x24d   :  { %v3471_v30 = vadd.f32 %v5060_v13, %v5020_v42  ;;  %v5103_v10 = vadd.f32 %v8110_v29, %v8108_v18 }
 0x24e   :  { %v5062_v52 = vpop.f32.mrf.mxu0  ;;  %v5104_v31 = vpop.f32.mrf.mxu1 }
 0x24f   :  { %v8112_v50 = vadd.f32 %v5100_v39, %v3471_v30  ;;  %v5063_v35 = vadd.f32 %v5062_v52, %v8106_v11 }
 0x250   :  { %v5064_v28 = vpop.f32.mrf.mxu0  ;;  %v5105_v5 = vpop.f32.mrf.mxu1 }
 0x251   :  { %v5106_v54 = vadd.f32 %v5105_v5, %v5104_v31  ;;  %v3474_v45 = vadd.f32 %v5063_v35, %v8092_v41 }
 0x252   :  { %v5065_v36 = vpop.f32.mrf.mxu0  ;;  %v8116_v34 = vpop.f32.mrf.mxu1 }
 0x253   :  { %v5066_v15 = vadd.f32 %v5065_v36, %v5064_v28  ;;  %v3538_v52 = vadd.f32 %v5103_v10, %v3474_v45 }
 0x254   :  { %v8114_v21 = vpop.f32.mrf.mxu0  ;;  %v8120_v27 = vpop.f32.mrf.mxu1 }
 0x255   :  { %v3479_v23 = vadd.f32 %v5066_v15, %v5026_v0 }
 0x256   :  { %v8118_v12 = vpop.f32.mrf.mxu0  ;;  %v5110_v46 = vpop.f32.mrf.mxu1 }
 0x257   :  { %v8122_v42 = vadd.f32 %v5106_v54, %v3479_v23 }
 0x258   :  { %v5070_v17 = vpop.f32.mrf.mxu0  ;;  %v5111_v33 = vpop.f32.mrf.mxu1 }
 0x259   :  { %v5112_v26 = vadd.f32 %v5111_v33, %v5110_v46 }
 0x25a   :  { %v5071_v22 = vpop.f32.mrf.mxu0  ;;  %v8126_v24 = vpop.f32.mrf.mxu1 }
 0x25b   :  { %v5072_v47 = vadd.f32 %v5071_v22, %v5070_v17 }
 0x25c   :  { %v8124_v48 = vpop.f32.mrf.mxu0  ;;  %v8130_v0 = vpop.f32.mrf.mxu1 }
 0x25d   :  { %v3487_v44 = vadd.f32 %v5072_v47, %v5032_v55 }
 0x25e   :  { %v8128_v58 = vpop.f32.mrf.mxu0  ;;  %v8136_v30 = vpop.f32.mrf.mxu1 }
 0x25f   :  { %v8132_v13 = vadd.f32 %v5112_v26, %v3487_v44 }
 0x260   :  { %v8134_v39 = vpop.f32.mrf.mxu0  ;;  %v8140_v31 = vpop.f32.mrf.mxu1 }
 0x261   :  { %8378 = vst [vmem:[#allocation8_spill] sm:$0xff] %v8140_v31 }
 0x262   :  { %v8138_v28 = vpop.f32.mrf.mxu0  ;;  %v5119_v5 = vpop.f32.mrf.mxu1 }
 0x264   :  { %v5079_v36 = vpop.f32.mrf.mxu0  ;;  %v5120_v54 = vpop.f32.mrf.mxu1 }
 0x266   :  { %v5080_v15 = vpop.f32.mrf.mxu0  ;;  %v5178_v55 = vpop.f32.mrf.mxu1 }
 0x268   :  { %v5138_v23 = vpop.f32.mrf.mxu0  ;;  %v5179_v46 = vpop.f32.mrf.mxu1 }
 0x269   :  { %v5180_v37 = vadd.f32 %v5179_v46, %v5178_v55 }
 0x26a   :  { %v5139_v17 = vpop.f32.mrf.mxu0  ;;  %v5181_v33 = vpop.f32.mrf.mxu1 }
 0x26b   :  { %v5140_v38 = vadd.f32 %v5139_v17, %v5138_v23 }
 0x26c   :  { %v5141_v22 = vpop.f32.mrf.mxu0  ;;  %v5182_v26 = vpop.f32.mrf.mxu1 }
 0x26d   :  { %v5183_v41 = vadd.f32 %v5182_v26, %v5181_v33 }
 0x26e   :  { %v5142_v47 = vpop.f32.mrf.mxu0  ;;  %v5184_v51 = vpop.f32.mrf.mxu1 }
 0x270   :  { %v5144_v44 = vpop.f32.mrf.mxu0  ;;  %v5185_v4 = vpop.f32.mrf.mxu1 }
 0x271   :  { %v5186_v45 = vadd.f32 %v5185_v4, %v5184_v51 }
 0x272   :  { %v5145_v16 = vpop.f32.mrf.mxu0  ;;  %v5187_v8 = vpop.f32.mrf.mxu1 }
 0x273   :  { %v5146_v23 = vadd.f32 %v5145_v16, %v5144_v44 }
 0x274   :  { %v5147_v49 = vpop.f32.mrf.mxu0  ;;  %v5188_v57 = vpop.f32.mrf.mxu1 }
 0x275   :  { %v3607_v10 = vadd.f32 %v5146_v23, %v8122_v42  ;;  %v5189_v42 = vadd.f32 %v5188_v57, %v5187_v8  ;;  %v5078_v57 = vadd.f32 %v8138_v28, %v8134_v39  ;;  %v8386_v39 = vmax.f32 %v7610_v53, %v7987_v20 }
 0x276   :  { %v5148_v40 = vpop.f32.mrf.mxu0  ;;  %v8142_v5 = vpop.f32.mrf.mxu1 }
 0x277   :  { %v3495_v23 = vadd.f32 %v5078_v57, %v8104_v61  ;;  %v8393_v61 = vld [vmem:[#allocation25_spill] sm:$0xff] }
 0x278   :  { %v5150_v36 = vpop.f32.mrf.mxu0  ;;  %v8144_v54 = vpop.f32.mrf.mxu1 }
 0x27a   :  { %v5151_v15 = vpop.f32.mrf.mxu0  ;;  %v8148_v14 = vpop.f32.mrf.mxu1 }
 0x27b   :  { %8379 = vst [vmem:[#allocation9_spill] sm:$0xff] %v8148_v14 }
 0x27c   :  { %v8146_v2 = vpop.f32.mrf.mxu0  ;;  %v8152_v59 = vpop.f32.mrf.mxu1 }
 0x27d   :  { %8380 = vst [vmem:[#allocation10_spill] sm:$0xff] %v8152_v59 }
 0x27e   :  { %v8150_v25 = vpop.f32.mrf.mxu0  ;;  %v8156_v60 = vpop.f32.mrf.mxu1 }
 0x27f   :  { %8382 = vst [vmem:[#allocation13_spill] sm:$0xff] %v8156_v60  ;;  %v5143_v60 = vadd.f32 %v5142_v47, %v5141_v22 }
 0x280   :  { %v8154_v1 = vpop.f32.mrf.mxu0  ;;  %v8161_v32 = vpop.f32.mrf.mxu1 }
 0x281   :  { %8381 = vst [vmem:[#allocation11_spill] sm:$0xff] %v8154_v1  ;;  %8384 = vst [vmem:[#allocation17_spill] sm:$0xff] %v8161_v32  ;;  %v3599_v1 = vadd.f32 %v5140_v38, %v8112_v50  ;;  %v5069_v32 = vadd.f32 %v8118_v12, %v8114_v21  ;;  %v3602_v35 = vadd.f32 %v5143_v60, %v3538_v52 }
 0x282   :  { %v8159_v43 = vpop.f32.mrf.mxu0  ;;  %v5199_v6 = vpop.f32.mrf.mxu1  ;;  %v5109_v38 = vadd.f32 %v8120_v27, %v8116_v34  ;;  %v5149_v12 = vadd.f32 %v5148_v40, %v5147_v49  ;;  %v3671_v27 = vadd.f32 %v5186_v45, %v3607_v10  ;;  %v8385_v40 = vmax.f32 %v7587_v9, %v7974_v63  ;;  %v8394_v10 = vld [vmem:[#allocation12_spill] sm:$0xff] }
 0x283   :  { %8383 = vst [vmem:[#allocation15_spill] sm:$0xff] %v8159_v43  ;;  %v3663_v17 = vadd.f32 %v5180_v37, %v3599_v1  ;;  %v3666_v16 = vadd.f32 %v5183_v41, %v3602_v35  ;;  %v5075_v37 = vadd.f32 %v8128_v58, %v8124_v48  ;;  %v8184_v48 = vld [vmem:[%s8254_s5] ss:$0 sm:$0xff]  ;;  %v5192_v63 = vadd.f32 %v8144_v54, %v8142_v5  ;;  %v8387_v5 = vld [vmem:[#allocation8_spill] sm:$0xff] }
 0x284   :  { %v5159_v3 = vpop.f32.mrf.mxu0  ;;  %v5200_v59 = vpop.f32.mrf.mxu1  ;;  %v5118_v54 = vadd.f32 %v8387_v5, %v8136_v30  ;;  %v8390_v41 = vld [vmem:[#allocation10_spill] sm:$0xff]  ;;  %v8395_v45 = vmax.f32 %v8393_v61, %v8394_v10 }
 0x285   :  { %v3482_v59 = vadd.f32 %v5069_v32, %v8100_v56  ;;  %v5152_v56 = vadd.f32 %v5151_v15, %v5150_v36  ;;  %v3490_v33 = vadd.f32 %v5075_v37, %v8102_v62  ;;  %v5155_v36 = vadd.f32 %v8150_v25, %v8146_v2  ;;  %v8396_v37 = vld [vmem:[#allocation4_spill] sm:$0xff] }
 0x286   :  { %v5160_v14 = vpop.f32.mrf.mxu0  ;;  %v5344_v11 = vpop.f32.mrf.mxu1 }
 0x287   :  { %v3546_v32 = vadd.f32 %v5109_v38, %v3482_v59  ;;  %v3615_v9 = vadd.f32 %v5152_v56, %v8132_v13 }
 0x288   :  { %v5218_v31 = vpop.f32.mrf.mxu0  ;;  %v3790_v6 = vpop.f32.mrf.mxu1  ;;  %v8391_v53 = vld [vmem:[#allocation11_spill] sm:$0xff] }
 0x289   :  { %v3610_v46 = vadd.f32 %v5149_v12, %v3546_v32  ;;  %v3559_v12 = vadd.f32 %v5118_v54, %v3495_v23  ;;  %v8406_v23 = vld [vmem:[#allocation7_spill] sm:$0xff] }
 0x28a   :  { %v5219_v3 = vpop.f32.mrf.mxu0  ;;  %v5345_v14 = vpop.f32.mrf.mxu1  ;;  %v8392_v20 = vld [vmem:[#allocation15_spill] sm:$0xff] }
 0x28b   :  { %v5220_v43 = vadd.f32 %v5219_v3, %v5218_v31  ;;  %v3679_v3 = vadd.f32 %v5192_v63, %v3615_v9  ;;  %v5158_v59 = vadd.f32 %v8392_v20, %v8391_v53 }
 0x28c   :  { %v5221_v18 = vpop.f32.mrf.mxu0  ;;  %v3793_v21 = vpop.f32.mrf.mxu1 }
 0x28d   :  { %v3727_v29 = vadd.f32 %v5220_v43, %v3663_v17  ;;  %v3623_v56 = vadd.f32 %v5158_v59, %v3559_v12  ;;  %v8411_v59 = vld [vmem:[#allocation27_spill] sm:$0xff] }
 0x28e   :  { %v5222_v50 = vpop.f32.mrf.mxu0  ;;  %v8175_v31 = vpop.f32.mrf.mxu1 }
 0x28f   :  { %v5223_v55 = vadd.f32 %v5222_v50, %v5221_v18  ;;  %v3791_v1 = vadd.f32 %v3790_v6, %v3727_v29  ;;  %v8388_v6 = vld [vmem:[#allocation3_spill] sm:$0xff] }
 0x290   :  { %v5224_v60 = vpop.f32.mrf.mxu0  ;;  %v3806_v51 = vpop.f32.mrf.mxu1 }
 0x291   :  { %v3827_v34 = vmax.f32 %v8086_v7, %v3791_v1  ;;  %v3730_v43 = vadd.f32 %v5223_v55, %v3666_v16  ;;  %v5115_v7 = vadd.f32 %v8130_v0, %v8126_v24  ;;  %v3674_v24 = vadd.f32 %v5189_v42, %v3610_v46 }
 0x292   :  { %v5225_v4 = vpop.f32.mrf.mxu0  ;;  %v5349_v47 = vpop.f32.mrf.mxu1 }
 0x293   :  { %v3834_v49 = vmax.f32 %v8385_v40, %v3827_v34  ;;  %v5226_v58 = vadd.f32 %v5225_v4, %v5224_v60  ;;  %v3794_v22 = vadd.f32 %v3793_v21, %v3730_v43  ;;  %v3554_v13 = vadd.f32 %v5115_v7, %v3490_v33  ;;  %v8397_v34 = vld [vmem:[#allocation13_spill] sm:$0xff]  ;;  %v8400_v40 = vld [vmem:[#allocation14_spill] sm:$0xff] }
 0x294   :  { %v5227_v8 = vpop.f32.mrf.mxu0  ;;  %v8398_v43 = vld [vmem:[#allocation17_spill] sm:$0xff] }
 0x295   :  { %v3735_v26 = vadd.f32 %v5226_v58, %v3671_v27  ;;  %v3828_v44 = vmax.f32 %v8090_v19, %v3794_v22  ;;  %v3848_v62 = vadd.f32 %v8184_v48, %v3834_v49  ;;  %v3618_v35 = vadd.f32 %v5155_v36, %v3554_v13 }
 0x296   :  { %v5228_v15 = vpop.f32.mrf.mxu0  ;;  %v5198_v27 = vadd.f32 %v8398_v43, %v8397_v34 }
 0x297   :  { %v3799_v0 = vadd.f32 %v5344_v11, %v3735_v26  ;;  %v3835_v28 = vmax.f32 %v8386_v39, %v3828_v44  ;;  %v5229_v52 = vadd.f32 %v5228_v15, %v5227_v8  ;;  %v8389_v11 = vld [vmem:[#allocation9_spill] sm:$0xff]  ;;  %v3855_v38 = vmax.f32 %v3848_v62, 0.0  ;;  %v8402_v8 = vld [vmem:[#allocation6_spill] sm:$0xff]  ;;  %v3809_v44 = vpop.f32.mrf.mxu1  ;;  %v8403_v15 = vld [vmem:[#allocation28_spill] sm:$0xff] }
 0x298   :  { %v5230_v19 = vpop.f32.mrf.mxu0  ;;  %v5195_v18 = vadd.f32 %v8390_v41, %v8389_v11  ;;  %v3687_v63 = vadd.f32 %v5198_v27, %v3623_v56  ;;  %v8410_v41 = vld [vmem:[#allocation5_spill] sm:$0xff] }
 0x299   :  { %v3829_v2 = vmax.f32 %v8388_v6, %v3799_v0  ;;  %v3849_v25 = vadd.f32 %v8184_v48, %v3835_v28  ;;  %v3738_v17 = vadd.f32 %v5229_v52, %v3674_v24  ;;  %v8404_v24 = vld [vmem:[#allocation16_spill] sm:$0xff]  ;;  %v8407_v6 = vld [vmem:[#allocation29_spill] sm:$0xff] }
 0x29a   :  { %v5231_v29 = vpop.f32.mrf.mxu0  ;;  %v3682_v46 = vadd.f32 %v5195_v18, %v3618_v35  ;;  %v8405_v0 = vmax.f32 %v8403_v15, %v8404_v24 }
 0x29b   :  { %v3836_v30 = vmax.f32 %v8395_v45, %v3829_v2  ;;  %v3856_v50 = vmax.f32 %v3849_v25, 0.0  ;;  %v3802_v21 = vadd.f32 %v5345_v14, %v3738_v17  ;;  %v5232_v16 = vadd.f32 %v5231_v29, %v5230_v19  ;;  %v8399_v14 = vld [vmem:[#allocation26_spill] sm:$0xff] }
 0x29c   :  { %v5233_v55 = vpop.f32.mrf.mxu0  ;;  %v8401_v49 = vmax.f32 %v8399_v14, %v8400_v40  ;;  %v8408_v2 = vld [vmem:[#allocation18_spill] sm:$0xff] }
 0x29d   :  { %v4232_v1 = vpack.c.bf16 %v3856_v50, %v3855_v38  ;;  %v3830_v60 = vmax.f32 %v8396_v37, %v3802_v21  ;;  %v3743_v32 = vadd.f32 %v5232_v16, %v3679_v3  ;;  %v3850_v42 = vadd.f32 %v8184_v48, %v3836_v30  ;;  %v8412_v38 = vld [vmem:[#allocation2_spill] sm:$0xff] }
 0x29e   :  { %v5234_v4 = vpop.f32.mrf.mxu0  ;;  %v8409_v25 = vmax.f32 %v8407_v6, %v8408_v2  ;;  %v8413_v29 = vmax.f32 %v8411_v59, %v8412_v38 }
 0x29f   :  { %4233 = vst [vmem:[%s8255_s6] sm:$0xff] %v4232_v1   ;;  %v3837_v58 = vmax.f32 %v8401_v49, %v3830_v60  ;;  %v3807_v22 = vadd.f32 %v3806_v51, %v3743_v32  ;;  %v5235_v33 = vadd.f32 %v5234_v4, %v5233_v55  ;;  %v3857_v26 = vmax.f32 %v3850_v42, 0.0 }
 0x2a0   :  { %v5236_v7 = vpop.f32.mrf.mxu0 }
 0x2a1   :  { %v3851_v57 = vadd.f32 %v8184_v48, %v3837_v58  ;;  %v3831_v47 = vmax.f32 %v8402_v8, %v3807_v22  ;;  %v3746_v9 = vadd.f32 %v5235_v33, %v3682_v46 }
 0x2a2   :  { %v5237_v36 = vpop.f32.mrf.mxu0 }
 0x2a3   :  { %v3858_v62 = vmax.f32 %v3851_v57, 0.0  ;;  %v3838_v39 = vmax.f32 %v8405_v0, %v3831_v47  ;;  %v3810_v28 = vadd.f32 %v3809_v44, %v3746_v9  ;;  %v5238_v52 = vadd.f32 %v5237_v36, %v5236_v7 }
 0x2a4   :  { %v5239_v13 = vpop.f32.mrf.mxu0 }
 0x2a5   :  { %v4237_v51 = vpack.c.bf16 %v3858_v62, %v3857_v26  ;;  %v3832_v5 = vmax.f32 %v8406_v23, %v3810_v28  ;;  %v3751_v54 = vadd.f32 %v5238_v52, %v3687_v63  ;;  %v3852_v3 = vadd.f32 %v8184_v48, %v3838_v39 }
 0x2a6   :  { %v5240_v19 = vpop.f32.mrf.mxu0 }
 0x2a7   :  { %4244 = vst [vmem:[%s8255_s6 + $0x8] sm:$0xff] %v4237_v51   ;;  %v3839_v17 = vmax.f32 %v8409_v25, %v3832_v5  ;;  %v3815_v35 = vadd.f32 %v8175_v31, %v3751_v54  ;;  %v3859_v53 = vmax.f32 %v3852_v3, 0.0 }
 0x2a9   :  { %v3853_v11 = vadd.f32 %v8184_v48, %v3839_v17  ;;  %v3833_v18 = vmax.f32 %v8410_v41, %v3815_v35 }
 0x2ab   :  { %v3860_v20 = vmax.f32 %v3853_v11, 0.0  ;;  %v3840_v61 = vmax.f32 %v8413_v29, %v3833_v18 }
 0x2ad   :  { %v4242_v10 = vpack.c.bf16 %v3860_v20, %v3859_v53  ;;  %v3854_v45 = vadd.f32 %v8184_v48, %v3840_v61 }
 0x2af   :  { %4245 = vst [vmem:[%s8255_s6 + $0x10] sm:$0xff] %v4242_v10   ;;  %v3861_v30 = vmax.f32 %v3854_v45, 0.0 }
 0x2b1   :  { %v4228_v50 = vpack.c.bf16 %v3861_v30, %v3861_v30 }
 0x2b3   :  { %3897 = vst [vmem:[%s8255_s6 + $0x18] sm:$0xf] %v4228_v50 }

// kernel: convnet_vis_forward.5
= control target key start
LH: loop header
LB: loop body
LE: loop exit
PB: predicated region body
PF: predicated region fallthrough
CT: control target
= control target key end

     0   :  { %17 = vsyncpa [#allocation4], 0  ;;  %s5181_s0 = inlined_call_operand.vmem [shape: bf16[2,3200], index: 0, kind: input, shape index: {}]   ;;  %s5182_s1 = inlined_call_operand.vmem [shape: bf16[3200,1024], index: 1, kind: input, shape index: {}]   ;;  %s5183_s2 = inlined_call_operand.vmem [shape: f32[1,1024], index: 2, kind: input, shape index: {}]   ;;  %s5184_s3 = inlined_call_operand.vmem [shape: f32[1024,2], index: 3, kind: input, shape index: {}]   ;;  %s5185_s4 = inlined_call_operand.vmem [shape: f32[1,2], index: 4, kind: input, shape index: {}]   ;;  %s5186_s5 = inlined_call_operand.vmem [shape: f32[2,10], index: 5, kind: input, shape index: {}]   ;;  %s5187_s6 = inlined_call_operand.vmem [shape: f32[1,10], index: 6, kind: input, shape index: {}]   ;;  %s5188_s7 = inlined_call_operand.vmem [shape: f32[2,128], index: 7, kind: input, shape index: {}]   ;;  %s5189_s8 = inlined_call_operand.vmem [shape: f32[1,128], index: 8, kind: input, shape index: {}]   ;;  %s5190_s9 = inlined_call_operand.hbm [shape: f32[2,10], index: 9, kind: output, shape index: {0}]   ;;  %s5191_s10 = inlined_call_operand.hbm [shape: f32[2,128], index: 10, kind: output, shape index: {1}]   ;;  %s5192_s11 = inlined_call_operand.hbm [shape: f32[2,2], index: 11, kind: output, shape index: {2}]  }
   0x1   :  { %18 = vsyncpa [#allocation6], 0  ;;  %s4285_s17 = smov 0  }
   0x2 LB: > { %s4291_s18 = sadd.s32 4294967295, %s4214_s17   ;;  %p3611_p0 = scmp.ge.s32.totalorder %s4214_s17, 1  ;;  %s4214_s17 = sphi %s4285_s17, %s24_s17  }
   0x3   : > { %p341_p1 = scmp.lt.s32.totalorder %s4214_s17, 6 }
   0x5   : > { %p342_p2 = pnand %p3611_p0, %p341_p1 }
   0x6   : > { %s381_s19 = smul.u32 (!%p342_p2), 5, %s4291_s18  ;;  %p3614_p5 = scmp.ne.s32.totalorder (!%p342_p2), %s4291_s18, 0 }
   0x7   : > { %345 = sbr.rel (%p342_p2) target bundleno = 1163 (0x48b), region = 56 }
   0x8   : > { %s386_s20 = smul.u32 (!%p342_p2), 80, %s4291_s18  ;;  %p382_p3 = scmp.lt.s32.totalorder (!%p342_p2), %s381_s19, 24 }
   0xa   : > { %p387_p4 = scmp.lt.s32.totalorder (!%p342_p2), %s386_s20, 399 }
   0xc   : > { %s5194_s19 = smov (!%p382_p3, %s381_s19), 24  ;;  %s5196_s20 = smov (!%p387_p4, %s386_s20), 399 }
   0xd   : > { %s384_s23 = scalar_lea.vmem %s5181_s0, %s5194_s19  ;;  %s3947_s24 = sshll.u32 %s5196_s20, 5 }
   0xe   : > { %s4306_s27 = scalar_lea.vmem %s5182_s1, %s3947_s24  ;;  %397 = sbr.rel (%p3614_p5) target bundleno = 21 (0x15), region = 60 }
  0x13   : > { %v4216_v0 = vmov 0.0  }
  0x14   : > { %398 = vst [vmem:[#allocation2] sm:$0xff] %v4216_v0  ;;  %399 = vst [vmem:[#allocation2 + $0x8] sm:$0xff] %v4216_v0 }
  0x15 PF: > { %v459_v1 = vld [vmem:[%s4306_s27 + $0x1c0] sm:$0xff]  ;;  %v4217_v33 = vmov 1966171168   ;;  %v728_v35 = vlaneseq  ;;  %p3935_p6 = scmp.ne.s32.totalorder %s4291_s18, 4 }
  0x16   : > { %v463_v2 = vld [vmem:[%s4306_s27 + $0x1e0] sm:$0xff]  ;;  %v726_v34 = vunpack.c.l.s4 %v4217_v33 }
  0x17   : > { %v587_v3 = vld [vmem:[%s4306_s27 + $0x5c0] sm:$0xff]  ;;  %v3672_v4 = vcombine.high %v459_v1, %v463_v2  ;;  %v3671_v6 = vcombine.low %v459_v1, %v463_v2  ;;  %v4331_v45 = vshrl.u32 %v728_v35, 7 }
  0x18   : > { %v591_v5 = vld [vmem:[%s4306_s27 + $0x5e0] sm:$0xff]  ;;  %v727_v44 = vunpack.c.0.s8 %v726_v34 }
  0x19   : > { %v451_v7 = vld [vmem:[%s4306_s27 + $0x180] sm:$0xff]  ;;  %v3800_v9 = vcombine.high %v587_v3, %v591_v5  ;;  %v3799_v10 = vcombine.low %v587_v3, %v591_v5  ;;  %2368 = vmatprep.subr.bf16.mxu0 %v3672_v4 }
  0x1a   : > { %v455_v8 = vld [vmem:[%s4306_s27 + $0x1a0] sm:$0xff]  ;;  %2369 = vmatpush1.bf16.msra.mxu0 %v3671_v6  ;;  %v4338_v54 = vsub.s32 %v727_v44, %v4331_v45 }
  0x1b   : > { %v3664_v11 = vcombine.high %v451_v7, %v455_v8  ;;  %v579_v12 = vld [vmem:[%s4306_s27 + $0x580] sm:$0xff]  ;;  %2409 = vmatprep.subr.bf16.mxu1 %v3800_v9  ;;  %v3663_v19 = vcombine.low %v451_v7, %v455_v8 }
  0x1c   : > { %v583_v13 = vld [vmem:[%s4306_s27 + $0x5a0] sm:$0xff]  ;;  %2410 = vmatpush1.bf16.msra.mxu1 %v3799_v10 }
  0x1d   : > { %v443_v14 = vld [vmem:[%s4306_s27 + $0x140] sm:$0xff]  ;;  %v3792_v15 = vcombine.high %v579_v12, %v583_v13  ;;  %2370 = vmatprep.subr.bf16.mxu0 %v3664_v11  ;;  %v3791_v20 = vcombine.low %v579_v12, %v583_v13 }
  0x1e   : > { %v447_v16 = vld [vmem:[%s4306_s27 + $0x160] sm:$0xff]  ;;  %2371 = vmatpush1.bf16.msra.mxu0 %v3663_v19 }
  0x1f   : > { %v571_v17 = vld [vmem:[%s4306_s27 + $0x540] sm:$0xff]  ;;  %v3656_v21 = vcombine.high %v443_v14, %v447_v16  ;;  %2411 = vmatprep.subr.bf16.mxu1 %v3792_v15  ;;  %v3655_v27 = vcombine.low %v443_v14, %v447_v16 }
  0x20   : > { %v575_v18 = vld [vmem:[%s4306_s27 + $0x560] sm:$0xff]  ;;  %2412 = vmatpush1.bf16.msra.mxu1 %v3791_v20 }
  0x21   : > { %v3784_v22 = vcombine.high %v571_v17, %v575_v18  ;;  %v435_v23 = vld [vmem:[%s4306_s27 + $0x100] sm:$0xff]  ;;  %2372 = vmatprep.subr.bf16.mxu0 %v3656_v21  ;;  %v3783_v28 = vcombine.low %v571_v17, %v575_v18 }
  0x22   : > { %v439_v24 = vld [vmem:[%s4306_s27 + $0x120] sm:$0xff]  ;;  %2373 = vmatpush1.bf16.msra.mxu0 %v3655_v27 }
  0x23   : > { %v563_v25 = vld [vmem:[%s4306_s27 + $0x500] sm:$0xff]  ;;  %v3648_v29 = vcombine.high %v435_v23, %v439_v24  ;;  %2413 = vmatprep.subr.bf16.mxu1 %v3784_v22  ;;  %v3647_v38 = vcombine.low %v435_v23, %v439_v24 }
  0x24   : > { %v567_v26 = vld [vmem:[%s4306_s27 + $0x520] sm:$0xff]  ;;  %2414 = vmatpush1.bf16.msra.mxu1 %v3783_v28 }
  0x25   : > { %v3776_v30 = vcombine.high %v563_v25, %v567_v26  ;;  %v427_v31 = vld [vmem:[%s4306_s27 + $0xc0] sm:$0xff]  ;;  %2374 = vmatprep.subr.bf16.mxu0 %v3648_v29  ;;  %v3775_v39 = vcombine.low %v563_v25, %v567_v26 }
  0x26   : > { %v431_v32 = vld [vmem:[%s4306_s27 + $0xe0] sm:$0xff]  ;;  %2375 = vmatpush1.bf16.msra.mxu0 %v3647_v38 }
  0x27   : > { %v555_v36 = vld [vmem:[%s4306_s27 + $0x4c0] sm:$0xff]  ;;  %v3640_v40 = vcombine.high %v427_v31, %v431_v32  ;;  %2415 = vmatprep.subr.bf16.mxu1 %v3776_v30  ;;  %v3639_v48 = vcombine.low %v427_v31, %v431_v32 }
  0x28   : > { %v559_v37 = vld [vmem:[%s4306_s27 + $0x4e0] sm:$0xff]  ;;  %2416 = vmatpush1.bf16.msra.mxu1 %v3775_v39 }
  0x29   : > { %v3768_v41 = vcombine.high %v555_v36, %v559_v37  ;;  %v419_v42 = vld [vmem:[%s4306_s27 + $0x80] sm:$0xff]  ;;  %2376 = vmatprep.subr.bf16.mxu0 %v3640_v40  ;;  %v3767_v49 = vcombine.low %v555_v36, %v559_v37 }
  0x2a   : > { %v423_v43 = vld [vmem:[%s4306_s27 + $0xa0] sm:$0xff]  ;;  %2377 = vmatpush1.bf16.msra.mxu0 %v3639_v48 }
  0x2b   : > { %v547_v46 = vld [vmem:[%s4306_s27 + $0x480] sm:$0xff]  ;;  %v3632_v50 = vcombine.high %v419_v42, %v423_v43  ;;  %2417 = vmatprep.subr.bf16.mxu1 %v3768_v41  ;;  %v3631_v57 = vcombine.low %v419_v42, %v423_v43 }
  0x2c   : > { %v551_v47 = vld [vmem:[%s4306_s27 + $0x4a0] sm:$0xff]  ;;  %2418 = vmatpush1.bf16.msra.mxu1 %v3767_v49 }
  0x2d   : > { %v3760_v51 = vcombine.high %v547_v46, %v551_v47  ;;  %v411_v52 = vld [vmem:[%s4306_s27 + $0x40] sm:$0xff]  ;;  %2378 = vmatprep.subr.bf16.mxu0 %v3632_v50  ;;  %v3759_v58 = vcombine.low %v547_v46, %v551_v47 }
  0x2e   : > { %v415_v53 = vld [vmem:[%s4306_s27 + $0x60] sm:$0xff]  ;;  %2379 = vmatpush1.bf16.msra.mxu0 %v3631_v57 }
  0x2f   : > { %v539_v55 = vld [vmem:[%s4306_s27 + $0x440] sm:$0xff]  ;;  %v3624_v59 = vcombine.high %v411_v52, %v415_v53  ;;  %2419 = vmatprep.subr.bf16.mxu1 %v3760_v51  ;;  %v3623_v3 = vcombine.low %v411_v52, %v415_v53 }
  0x30   : > { %v543_v56 = vld [vmem:[%s4306_s27 + $0x460] sm:$0xff]  ;;  %2420 = vmatpush1.bf16.msra.mxu1 %v3759_v58 }
  0x31   : > { %v402_v60 = vld [vmem:[%s384_s23] sm:$0x1f]  ;;  %v3752_v61 = vcombine.high %v539_v55, %v543_v56  ;;  %2380 = vmatprep.subr.bf16.mxu0 %v3624_v59  ;;  %v3751_v5 = vcombine.low %v539_v55, %v543_v56 }
  0x32   : > { %v403_v62 = vld [vmem:[%s4306_s27] sm:$0xff]  ;;  %v4350_v0 = vrot.slane %v402_v60, %v4338_v54  ;;  %2381 = vmatpush1.bf16.msra.mxu0 %v3623_v3  ;;  %v724_v15 = vcombine.high %v402_v60, %v402_v60 }
  0x33   : > { %v407_v63 = vld [vmem:[%s4306_s27 + $0x20] sm:$0xff]  ;;  %2421 = vmatprep.subr.bf16.mxu1 %v3752_v61 }
  0x34   : > { %v531_v1 = vld [vmem:[%s4306_s27 + $0x400] sm:$0xff]  ;;  %v739_v4 = vcombine.high %v4350_v0, %v4350_v0  ;;  %v3616_v6 = vcombine.high %v403_v62, %v407_v63  ;;  %v3615_v13 = vcombine.low %v403_v62, %v407_v63  ;;  %2422 = vmatpush1.bf16.msra.mxu1 %v3751_v5  ;;  %v738_v24 = vrot.slane %v724_v15, %v4338_v54 }
  0x35   : > { %v535_v2 = vld [vmem:[%s4306_s27 + $0x420] sm:$0xff] }
  0x36   : > { %v3744_v7 = vcombine.high %v531_v1, %v535_v2  ;;  %v523_v8 = vld [vmem:[%s4306_s27 + $0x3c0] sm:$0xff]  ;;  %v4359_v10 = vrot.slane %v739_v4, %v4338_v54  ;;  %2382 = vmatprep.subr.bf16.mxu0 %v3616_v6  ;;  %v3743_v16 = vcombine.low %v531_v1, %v535_v2  ;;  %v4377_v30 = vrot.slane %v738_v24, %v4338_v54 }
  0x37   : > { %v527_v9 = vld [vmem:[%s4306_s27 + $0x3e0] sm:$0xff]  ;;  %2383 = vmatpush1.bf16.msra.mxu0 %v3615_v13 }
  0x38   : > { %v651_v11 = vld [vmem:[%s4306_s27 + $0x7c0] sm:$0xff]  ;;  %2400 = vmatprep.mubr.bf16.mxu0 %v4359_v10  ;;  %v4366_v14 = vcombine.high %v4359_v10, %v4359_v10  ;;  %v3736_v17 = vcombine.high %v523_v8, %v527_v9  ;;  %2423 = vmatprep.subr.bf16.mxu1 %v3744_v7  ;;  %v3735_v23 = vcombine.low %v523_v8, %v527_v9 }
  0x39   : > { %v655_v12 = vld [vmem:[%s4306_s27 + $0x7e0] sm:$0xff]  ;;  %2424 = vmatpush1.bf16.msra.mxu1 %v3743_v16 }
  0x3a   : > { %v3864_v18 = vcombine.high %v651_v11, %v655_v12  ;;  %v515_v19 = vld [vmem:[%s4306_s27 + $0x380] sm:$0xff]  ;;  %2441 = vmatprep.mubr.bf16.mxu1 %v4366_v14  ;;  %2384 = vmatprep.subr.bf16.mxu0 %v3736_v17  ;;  %v3863_v25 = vcombine.low %v651_v11, %v655_v12 }
  0x3b   : > { %v519_v20 = vld [vmem:[%s4306_s27 + $0x3a0] sm:$0xff]  ;;  %2385 = vmatpush2.bf16.msra.mxu0 %v3735_v23  ;;  %v4407_v23 = vrot.slane %v4350_v0, %v4338_v54 }
  0x3c   : > { %v643_v21 = vld [vmem:[%s4306_s27 + $0x780] sm:$0xff]  ;;  %v3728_v26 = vcombine.high %v515_v19, %v519_v20  ;;  %2425 = vmatprep.subr.bf16.mxu1 %v3864_v18  ;;  %v3727_v33 = vcombine.low %v515_v19, %v519_v20  ;;  %v460_v20 = vld [vmem:[%s4306_s27 + $0x1c8] sm:$0xff] }
  0x3d   : > { %v647_v22 = vld [vmem:[%s4306_s27 + $0x7a0] sm:$0xff]  ;;  %2426 = vmatpush2.bf16.msra.mxu1 %v3863_v25 }
  0x3e   : > { %v3856_v27 = vcombine.high %v643_v21, %v647_v22  ;;  %v507_v28 = vld [vmem:[%s4306_s27 + $0x340] sm:$0xff]  ;;  %2386 = vmatprep.subr.bf16.mxu0 %v3728_v26  ;;  %v3855_v34 = vcombine.low %v643_v21, %v647_v22  ;;  %v464_v21 = vld [vmem:[%s4306_s27 + $0x1e8] sm:$0xff] }
  0x3f   : > { %v511_v29 = vld [vmem:[%s4306_s27 + $0x360] sm:$0xff]  ;;  %2387 = vmatpush2.bf16.msra.mxu0 %v3727_v33  ;;  %v3674_v26 = vcombine.high %v460_v20, %v464_v21  ;;  %v3673_v0 = vcombine.low %v460_v20, %v464_v21  ;;  %v408_v20 = vld [vmem:[%s4306_s27 + $0x28] sm:$0xff] }
  0x40   : > { %v635_v31 = vld [vmem:[%s4306_s27 + $0x740] sm:$0xff]  ;;  %v3720_v35 = vcombine.high %v507_v28, %v511_v29  ;;  %2427 = vmatprep.subr.bf16.mxu1 %v3856_v27  ;;  %v3719_v41 = vcombine.low %v507_v28, %v511_v29  ;;  %v452_v29 = vld [vmem:[%s4306_s27 + $0x188] sm:$0xff] }
  0x41   : > { %v639_v32 = vld [vmem:[%s4306_s27 + $0x760] sm:$0xff]  ;;  %2428 = vmatpush2.bf16.msra.mxu1 %v3855_v34 }
  0x42   : > { %v3848_v36 = vcombine.high %v635_v31, %v639_v32  ;;  %v499_v37 = vld [vmem:[%s4306_s27 + $0x300] sm:$0xff]  ;;  %2388 = vmatprep.subr.bf16.mxu0 %v3720_v35  ;;  %v3847_v42 = vcombine.low %v635_v31, %v639_v32  ;;  %v456_v31 = vld [vmem:[%s4306_s27 + $0x1a8] sm:$0xff]  ;;  %v4415_v32 = vcombine.high %v4407_v23, %v4407_v23 }
  0x43   : > { %v503_v38 = vld [vmem:[%s4306_s27 + $0x320] sm:$0xff]  ;;  %2389 = vmatpush2.bf16.msra.mxu0 %v3719_v41  ;;  %v3666_v34 = vcombine.high %v452_v29, %v456_v31 }
  0x44   : > { %v627_v39 = vld [vmem:[%s4306_s27 + $0x700] sm:$0xff]  ;;  %v3712_v43 = vcombine.high %v499_v37, %v503_v38  ;;  %2429 = vmatprep.subr.bf16.mxu1 %v3848_v36  ;;  %v3711_v50 = vcombine.low %v499_v37, %v503_v38  ;;  %v444_v37 = vld [vmem:[%s4306_s27 + $0x148] sm:$0xff] }
  0x45   : > { %v631_v40 = vld [vmem:[%s4306_s27 + $0x720] sm:$0xff]  ;;  %2430 = vmatpush2.bf16.msra.mxu1 %v3847_v42  ;;  %v448_v38 = vld [vmem:[%s4306_s27 + $0x168] sm:$0xff] }
  0x46   : > { %v3840_v44 = vcombine.high %v627_v39, %v631_v40  ;;  %v491_v46 = vld [vmem:[%s4306_s27 + $0x2c0] sm:$0xff]  ;;  %2390 = vmatprep.subr.bf16.mxu0 %v3712_v43  ;;  %v3839_v51 = vcombine.low %v627_v39, %v631_v40  ;;  %v3665_v40 = vcombine.low %v452_v29, %v456_v31  ;;  %v3658_v42 = vcombine.high %v444_v37, %v448_v38  ;;  %v528_v29 = vld [vmem:[%s4306_s27 + $0x3e8] sm:$0xff] }
  0x47   : > { %v495_v47 = vld [vmem:[%s4306_s27 + $0x2e0] sm:$0xff]  ;;  %2391 = vmatpush2.bf16.msra.mxu0 %v3711_v50  ;;  %v3657_v50 = vcombine.low %v444_v37, %v448_v38  ;;  %v520_v37 = vld [vmem:[%s4306_s27 + $0x3a8] sm:$0xff] }
  0x48   : > { %v619_v48 = vld [vmem:[%s4306_s27 + $0x6c0] sm:$0xff]  ;;  %v3704_v52 = vcombine.high %v491_v46, %v495_v47  ;;  %2431 = vmatprep.subr.bf16.mxu1 %v3840_v44  ;;  %v3703_v59 = vcombine.low %v491_v46, %v495_v47  ;;  %v4218_v46 = vmov 0   ;;  %v436_v47 = vld [vmem:[%s4306_s27 + $0x108] sm:$0xff] }
  0x49   : > { %v623_v49 = vld [vmem:[%s4306_s27 + $0x6e0] sm:$0xff]  ;;  %2432 = vmatpush2.bf16.msra.mxu1 %v3839_v51 }
  0x4a   : > { %v3832_v53 = vcombine.high %v619_v48, %v623_v49  ;;  %v483_v55 = vld [vmem:[%s4306_s27 + $0x280] sm:$0xff]  ;;  %2392 = vmatprep.subr.bf16.mxu0 %v3704_v52  ;;  %v3831_v60 = vcombine.low %v619_v48, %v623_v49  ;;  %v440_v48 = vld [vmem:[%s4306_s27 + $0x128] sm:$0xff] }
  0x4b   : > { %v487_v56 = vld [vmem:[%s4306_s27 + $0x2a0] sm:$0xff]  ;;  %2393 = vmatpush2.bf16.msra.mxu0 %v3703_v59  ;;  %v3650_v52 = vcombine.high %v436_v47, %v440_v48  ;;  %v3649_v59 = vcombine.low %v436_v47, %v440_v48  ;;  %v512_v47 = vld [vmem:[%s4306_s27 + $0x368] sm:$0xff] }
  0x4c   : > { %v611_v57 = vld [vmem:[%s4306_s27 + $0x680] sm:$0xff]  ;;  %v3696_v61 = vcombine.high %v483_v55, %v487_v56  ;;  %2433 = vmatprep.subr.bf16.mxu1 %v3832_v53  ;;  %v3695_v4 = vcombine.low %v483_v55, %v487_v56  ;;  %v428_v56 = vld [vmem:[%s4306_s27 + $0xc8] sm:$0xff] }
  0x4d   : > { %v615_v58 = vld [vmem:[%s4306_s27 + $0x6a0] sm:$0xff]  ;;  %2434 = vmatpush2.bf16.msra.mxu1 %v3831_v60 }
  0x4e   : > { %v3824_v62 = vcombine.high %v611_v57, %v615_v58  ;;  %v475_v63 = vld [vmem:[%s4306_s27 + $0x240] sm:$0xff]  ;;  %2394 = vmatprep.subr.bf16.mxu0 %v3696_v61  ;;  %v3823_v5 = vcombine.low %v611_v57, %v615_v58  ;;  %v432_v57 = vld [vmem:[%s4306_s27 + $0xe8] sm:$0xff] }
  0x4f   : > { %v479_v1 = vld [vmem:[%s4306_s27 + $0x260] sm:$0xff]  ;;  %2395 = vmatpush2.bf16.msra.mxu0 %v3695_v4  ;;  %v3642_v61 = vcombine.high %v428_v56, %v432_v57  ;;  %v3641_v4 = vcombine.low %v428_v56, %v432_v57  ;;  %v504_v56 = vld [vmem:[%s4306_s27 + $0x328] sm:$0xff] }
  0x50   : > { %v603_v2 = vld [vmem:[%s4306_s27 + $0x640] sm:$0xff]  ;;  %v3688_v6 = vcombine.high %v475_v63, %v479_v1  ;;  %2435 = vmatprep.subr.bf16.mxu1 %v3824_v62  ;;  %v3687_v13 = vcombine.low %v475_v63, %v479_v1  ;;  %v420_v1 = vld [vmem:[%s4306_s27 + $0x88] sm:$0xff] }
  0x51   : > { %v607_v3 = vld [vmem:[%s4306_s27 + $0x660] sm:$0xff]  ;;  %2436 = vmatpush2.bf16.msra.mxu1 %v3823_v5 }
  0x52   : > { %v3816_v7 = vcombine.high %v603_v2, %v607_v3  ;;  %v467_v8 = vld [vmem:[%s4306_s27 + $0x200] sm:$0xff]  ;;  %2396 = vmatprep.subr.bf16.mxu0 %v3688_v6  ;;  %v3815_v15 = vcombine.low %v603_v2, %v607_v3  ;;  %v424_v2 = vld [vmem:[%s4306_s27 + $0xa8] sm:$0xff] }
  0x53   : > { %v471_v9 = vld [vmem:[%s4306_s27 + $0x220] sm:$0xff]  ;;  %2397 = vmatpush2.bf16.msra.mxu0 %v3687_v13  ;;  %v3634_v6 = vcombine.high %v420_v1, %v424_v2  ;;  %v3633_v13 = vcombine.low %v420_v1, %v424_v2  ;;  %v496_v1 = vld [vmem:[%s4306_s27 + $0x2e8] sm:$0xff] }
  0x54   : > { %v595_v11 = vld [vmem:[%s4306_s27 + $0x600] sm:$0xff]  ;;  %v3680_v16 = vcombine.high %v467_v8, %v471_v9  ;;  %2437 = vmatprep.subr.bf16.mxu1 %v3816_v7  ;;  %v3679_v22 = vcombine.low %v467_v8, %v471_v9  ;;  %v412_v9 = vld [vmem:[%s4306_s27 + $0x48] sm:$0xff] }
  0x55   : > { %v599_v12 = vld [vmem:[%s4306_s27 + $0x620] sm:$0xff]  ;;  %2438 = vmatpush2.bf16.msra.mxu1 %v3815_v15 }
  0x56   : > { %v3808_v17 = vcombine.high %v595_v11, %v599_v12  ;;  %v715_v18 = vld [vmem:[%s4306_s27 + $0x9c0] sm:$0xff]  ;;  %2398 = vmatprep.subr.bf16.mxu0 %v3680_v16  ;;  %v3807_v24 = vcombine.low %v595_v11, %v599_v12  ;;  %v416_v11 = vld [vmem:[%s4306_s27 + $0x68] sm:$0xff] }
  0x57   : > { %v719_v19 = vld [vmem:[%s4306_s27 + $0x9e0] sm:$0xff]  ;;  %2399 = vmatpush2.bf16.msra.mxu0 %v3679_v22  ;;  %v3626_v16 = vcombine.high %v412_v9, %v416_v11  ;;  %v3625_v22 = vcombine.low %v412_v9, %v416_v11  ;;  %v488_v9 = vld [vmem:[%s4306_s27 + $0x2a8] sm:$0xff] }
  0x58   : > { %v3928_v25 = vcombine.high %v715_v18, %v719_v19  ;;  %2439 = vmatprep.subr.bf16.mxu1 %v3808_v17  ;;  %v707_v27 = vld [vmem:[%s4306_s27 + $0x980] sm:$0xff]  ;;  %v3927_v54 = vcombine.low %v715_v18, %v719_v19  ;;  %v404_v19 = vld [vmem:[%s4306_s27 + $0x8] sm:$0xff] }
  0x59   : > { %v711_v28 = vld [vmem:[%s4306_s27 + $0x9a0] sm:$0xff]  ;;  %2440 = vmatpush2.bf16.msra.mxu1 %v3807_v24 }
  0x5a   : > { %2450 = vmatprep.subr.bf16.mxu0 %v3928_v25  ;;  %v3920_v33 = vcombine.high %v707_v27, %v711_v28  ;;  %2491 = vmatprep.subr.bf16.mxu1 %v3674_v26  ;;  %v699_v35 = vld [vmem:[%s4306_s27 + $0x940] sm:$0xff]  ;;  %v3919_v39 = vcombine.low %v707_v27, %v711_v28  ;;  %v3618_v25 = vcombine.high %v404_v19, %v408_v20  ;;  %v588_v26 = vld [vmem:[%s4306_s27 + $0x5c8] sm:$0xff] }
  0x5b   : > { %v703_v36 = vld [vmem:[%s4306_s27 + $0x960] sm:$0xff]  ;;  %2401 = vmatmul.mubr.bf16.vlgmr.msra.gmra.mxu0 %v4407_v23  ;;  %v592_v27 = vld [vmem:[%s4306_s27 + $0x5e8] sm:$0xff] }
  0x5c   : > { %2442 = vmatmul.mubr.bf16.vlgmr.msra.gmra.mxu1 %v4415_v32  ;;  %2451 = vmatpush1.bf16.msra.mxu0 %v3927_v54  ;;  %v3912_v41 = vcombine.high %v699_v35, %v703_v36  ;;  %v691_v43 = vld [vmem:[%s4306_s27 + $0x900] sm:$0xff]  ;;  %v3911_v49 = vcombine.low %v699_v35, %v703_v36  ;;  %v524_v28 = vld [vmem:[%s4306_s27 + $0x3c8] sm:$0xff]  ;;  %v3617_v54 = vcombine.low %v404_v19, %v408_v20 }
  0x5d   : > { %2492 = vmatpush1.bf16.msra.mxu1 %v3673_v0  ;;  %2452 = vmatprep.subr.bf16.mxu0 %v3920_v33  ;;  %v695_v44 = vld [vmem:[%s4306_s27 + $0x920] sm:$0xff]  ;;  %v3802_v0 = vcombine.high %v588_v26, %v592_v27  ;;  %v3738_v33 = vcombine.high %v524_v28, %v528_v29  ;;  %v584_v35 = vld [vmem:[%s4306_s27 + $0x5a8] sm:$0xff]  ;;  %v3801_v38 = vcombine.low %v588_v26, %v592_v27 }
  0x5e   : > { %2493 = vmatprep.subr.bf16.mxu1 %v3666_v34  ;;  %2482 = vmatprep.mubr.bf16.mxu0 %v4218_v46  ;;  %v3904_v51 = vcombine.high %v691_v43, %v695_v44  ;;  %v683_v53 = vld [vmem:[%s4306_s27 + $0x8c0] sm:$0xff]  ;;  %v3903_v58 = vcombine.low %v691_v43, %v695_v44  ;;  %v580_v34 = vld [vmem:[%s4306_s27 + $0x588] sm:$0xff] }
  0x5f   : > { %2523 = vmatprep.mubr.bf16.mxu1 %v4359_v10  ;;  %v687_v55 = vld [vmem:[%s4306_s27 + $0x8e0] sm:$0xff]  ;;  %v516_v36 = vld [vmem:[%s4306_s27 + $0x388] sm:$0xff]  ;;  %v3793_v48 = vcombine.low %v580_v34, %v584_v35 }
  0x60   : > { %2453 = vmatpush1.bf16.msra.mxu0 %v3919_v39  ;;  %v3896_v60 = vcombine.high %v683_v53, %v687_v55  ;;  %v675_v62 = vld [vmem:[%s4306_s27 + $0x880] sm:$0xff]  ;;  %v3895_v3 = vcombine.low %v683_v53, %v687_v55  ;;  %v3737_v39 = vcombine.low %v524_v28, %v528_v29  ;;  %v576_v43 = vld [vmem:[%s4306_s27 + $0x568] sm:$0xff] }
  0x61   : > { %2494 = vmatpush1.bf16.msra.mxu1 %v3665_v40  ;;  %2454 = vmatprep.subr.bf16.mxu0 %v3912_v41  ;;  %v679_v63 = vld [vmem:[%s4306_s27 + $0x8a0] sm:$0xff]  ;;  %v3794_v40 = vcombine.high %v580_v34, %v584_v35  ;;  %v3730_v41 = vcombine.high %v516_v36, %v520_v37  ;;  %v508_v44 = vld [vmem:[%s4306_s27 + $0x348] sm:$0xff] }
  0x62   : > { %2495 = vmatprep.subr.bf16.mxu1 %v3658_v42  ;;  %v3888_v5 = vcombine.high %v675_v62, %v679_v63  ;;  %v667_v7 = vld [vmem:[%s4306_s27 + $0x840] sm:$0xff]  ;;  %v3887_v12 = vcombine.low %v675_v62, %v679_v63  ;;  %v572_v42 = vld [vmem:[%s4306_s27 + $0x548] sm:$0xff] }
  0x63   : > { %v671_v8 = vld [vmem:[%s4306_s27 + $0x860] sm:$0xff]  ;;  %v568_v53 = vld [vmem:[%s4306_s27 + $0x528] sm:$0xff]  ;;  %v3785_v57 = vcombine.low %v572_v42, %v576_v43 }
  0x64   : > { %2455 = vmatpush1.bf16.msra.mxu0 %v3911_v49  ;;  %v3880_v15 = vcombine.high %v667_v7, %v671_v8  ;;  %v659_v17 = vld [vmem:[%s4306_s27 + $0x800] sm:$0xff]  ;;  %v3879_v21 = vcombine.low %v667_v7, %v671_v8  ;;  %v3729_v49 = vcombine.low %v516_v36, %v520_v37  ;;  %v500_v55 = vld [vmem:[%s4306_s27 + $0x308] sm:$0xff] }
  0x65   : > { %2496 = vmatpush1.bf16.msra.mxu1 %v3657_v50  ;;  %2456 = vmatprep.subr.bf16.mxu0 %v3904_v51  ;;  %v663_v18 = vld [vmem:[%s4306_s27 + $0x820] sm:$0xff]  ;;  %v3786_v50 = vcombine.high %v572_v42, %v576_v43  ;;  %v3722_v51 = vcombine.high %v508_v44, %v512_v47  ;;  %v560_v62 = vld [vmem:[%s4306_s27 + $0x4e8] sm:$0xff] }
  0x66   : > { %2497 = vmatprep.subr.bf16.mxu1 %v3650_v52  ;;  %v3872_v24 = vcombine.high %v659_v17, %v663_v18  ;;  %v3871_v31 = vcombine.low %v659_v17, %v663_v18  ;;  %v564_v52 = vld [vmem:[%s4306_s27 + $0x508] sm:$0xff] }
  0x67   : > { %v492_v63 = vld [vmem:[%s4306_s27 + $0x2c8] sm:$0xff]  ;;  %v3777_v2 = vcombine.low %v564_v52, %v568_v53 }
  0x68   : > { %2457 = vmatpush1.bf16.msra.mxu0 %v3903_v58  ;;  %v3721_v58 = vcombine.low %v508_v44, %v512_v47  ;;  %v552_v7 = vld [vmem:[%s4306_s27 + $0x4a8] sm:$0xff] }
  0x69   : > { %2498 = vmatpush1.bf16.msra.mxu1 %v3649_v59  ;;  %2458 = vmatprep.subr.bf16.mxu0 %v3896_v60  ;;  %v3778_v59 = vcombine.high %v564_v52, %v568_v53  ;;  %v3714_v60 = vcombine.high %v500_v55, %v504_v56  ;;  %v484_v8 = vld [vmem:[%s4306_s27 + $0x288] sm:$0xff] }
  0x6a   : > { %2499 = vmatprep.subr.bf16.mxu1 %v3642_v61  ;;  %v556_v61 = vld [vmem:[%s4306_s27 + $0x4c8] sm:$0xff] }
  0x6b   : > { %v3769_v11 = vcombine.low %v556_v61, %v560_v62  ;;  %v544_v17 = vld [vmem:[%s4306_s27 + $0x468] sm:$0xff] }
  0x6c   : > { %2459 = vmatpush1.bf16.msra.mxu0 %v3895_v3  ;;  %v3713_v3 = vcombine.low %v500_v55, %v504_v56  ;;  %v476_v18 = vld [vmem:[%s4306_s27 + $0x248] sm:$0xff] }
  0x6d   : > { %2500 = vmatpush1.bf16.msra.mxu1 %v3641_v4  ;;  %2460 = vmatprep.subr.bf16.mxu0 %v3888_v5  ;;  %v3770_v4 = vcombine.high %v556_v61, %v560_v62  ;;  %v3706_v5 = vcombine.high %v492_v63, %v496_v1  ;;  %v480_v19 = vld [vmem:[%s4306_s27 + $0x268] sm:$0xff] }
  0x6e   : > { %2501 = vmatprep.subr.bf16.mxu1 %v3634_v6  ;;  %v548_v6 = vld [vmem:[%s4306_s27 + $0x488] sm:$0xff] }
  0x6f   : > { %v3761_v20 = vcombine.low %v548_v6, %v552_v7  ;;  %v536_v26 = vld [vmem:[%s4306_s27 + $0x428] sm:$0xff] }
  0x70   : > { %2461 = vmatpush1.bf16.msra.mxu0 %v3887_v12  ;;  %v3705_v12 = vcombine.low %v492_v63, %v496_v1  ;;  %v468_v27 = vld [vmem:[%s4306_s27 + $0x208] sm:$0xff] }
  0x71   : > { %2502 = vmatpush1.bf16.msra.mxu1 %v3633_v13  ;;  %2462 = vmatprep.subr.bf16.mxu0 %v3880_v15  ;;  %v3762_v13 = vcombine.high %v548_v6, %v552_v7  ;;  %v3698_v15 = vcombine.high %v484_v8, %v488_v9  ;;  %v472_v28 = vld [vmem:[%s4306_s27 + $0x228] sm:$0xff] }
  0x72   : > { %2503 = vmatprep.subr.bf16.mxu1 %v3626_v16  ;;  %v540_v16 = vld [vmem:[%s4306_s27 + $0x448] sm:$0xff] }
  0x73   : > { %v3753_v29 = vcombine.low %v540_v16, %v544_v17  ;;  %v656_v34 = vld [vmem:[%s4306_s27 + $0x7e8] sm:$0xff] }
  0x74   : > { %2463 = vmatpush1.bf16.msra.mxu0 %v3879_v21  ;;  %v3697_v21 = vcombine.low %v484_v8, %v488_v9  ;;  %v716_v35 = vld [vmem:[%s4306_s27 + $0x9c8] sm:$0xff] }
  0x75   : > { %2504 = vmatpush1.bf16.msra.mxu1 %v3625_v22  ;;  %2464 = vmatprep.subr.bf16.mxu0 %v3872_v24  ;;  %v3754_v22 = vcombine.high %v540_v16, %v544_v17  ;;  %v3690_v24 = vcombine.high %v476_v18, %v480_v19  ;;  %v720_v36 = vld [vmem:[%s4306_s27 + $0x9e8] sm:$0xff] }
  0x76   : > { %2505 = vmatprep.subr.bf16.mxu1 %v3618_v25  ;;  %v532_v25 = vld [vmem:[%s4306_s27 + $0x408] sm:$0xff] }
  0x77   : > { %v3745_v37 = vcombine.low %v532_v25, %v536_v26  ;;  %v648_v42 = vld [vmem:[%s4306_s27 + $0x7a8] sm:$0xff] }
  0x78   : > { %2465 = vmatpush1.bf16.msra.mxu0 %v3871_v31  ;;  %v3689_v31 = vcombine.low %v476_v18, %v480_v19  ;;  %v708_v43 = vld [vmem:[%s4306_s27 + $0x988] sm:$0xff] }
  0x79   : > { %2506 = vmatpush1.bf16.msra.mxu1 %v3617_v54  ;;  %2532 = vmatprep.subr.bf16.mxu0 %v3802_v0  ;;  %v3746_v54 = vcombine.high %v532_v25, %v536_v26  ;;  %v3682_v0 = vcombine.high %v468_v27, %v472_v28  ;;  %v712_v44 = vld [vmem:[%s4306_s27 + $0x9a8] sm:$0xff] }
  0x7a   : > { %2507 = vmatprep.subr.bf16.mxu1 %v3738_v33  ;;  %v652_v33 = vld [vmem:[%s4306_s27 + $0x7c8] sm:$0xff] }
  0x7b   : > { %2483 = vmatmul.mubr.bf16.vlgmr.msra.gmra.mxu0 %v4377_v30  ;;  %v3865_v47 = vcombine.low %v652_v33, %v656_v34  ;;  %v640_v52 = vld [vmem:[%s4306_s27 + $0x768] sm:$0xff] }
  0x7c   : > { %2533 = vmatpush1.bf16.msra.mxu0 %v3801_v38  ;;  %2564 = vmatprep.mubr.bf16.mxu0 %v4366_v14  ;;  %v3681_v38 = vcombine.low %v468_v27, %v472_v28  ;;  %v700_v53 = vld [vmem:[%s4306_s27 + $0x948] sm:$0xff] }
  0x7d   : > { %2508 = vmatpush2.bf16.msra.mxu1 %v3737_v39  ;;  %2534 = vmatprep.subr.bf16.mxu0 %v3794_v40  ;;  %v3866_v39 = vcombine.high %v652_v33, %v656_v34  ;;  %v3930_v40 = vcombine.high %v716_v35, %v720_v36  ;;  %v704_v55 = vld [vmem:[%s4306_s27 + $0x968] sm:$0xff] }
  0x7e   : > { %2509 = vmatprep.subr.bf16.mxu1 %v3730_v41  ;;  %v644_v41 = vld [vmem:[%s4306_s27 + $0x788] sm:$0xff] }
  0x7f   : > { %v3857_v56 = vcombine.low %v644_v41, %v648_v42  ;;  %v632_v61 = vld [vmem:[%s4306_s27 + $0x728] sm:$0xff] }
  0x80   : > { %2535 = vmatpush1.bf16.msra.mxu0 %v3793_v48  ;;  %v3929_v48 = vcombine.low %v716_v35, %v720_v36  ;;  %v692_v62 = vld [vmem:[%s4306_s27 + $0x908] sm:$0xff] }
  0x81   : > { %2510 = vmatpush2.bf16.msra.mxu1 %v3729_v49  ;;  %2536 = vmatprep.subr.bf16.mxu0 %v3786_v50  ;;  %v3858_v49 = vcombine.high %v644_v41, %v648_v42  ;;  %v3922_v50 = vcombine.high %v708_v43, %v712_v44  ;;  %v696_v63 = vld [vmem:[%s4306_s27 + $0x928] sm:$0xff]  ;;  %v465_v41 = vld [vmem:[%s4306_s27 + $0x1f0] sm:$0xff] }
  0x82   : > { %2511 = vmatprep.subr.bf16.mxu1 %v3722_v51  ;;  %v636_v51 = vld [vmem:[%s4306_s27 + $0x748] sm:$0xff]  ;;  %v589_v42 = vld [vmem:[%s4306_s27 + $0x5d0] sm:$0xff] }
  0x83   : > { %v3849_v1 = vcombine.low %v636_v51, %v640_v52  ;;  %v624_v6 = vld [vmem:[%s4306_s27 + $0x6e8] sm:$0xff] }
  0x84   : > { %2537 = vmatpush1.bf16.msra.mxu0 %v3785_v57  ;;  %v3921_v57 = vcombine.low %v708_v43, %v712_v44  ;;  %v684_v7 = vld [vmem:[%s4306_s27 + $0x8c8] sm:$0xff]  ;;  %v593_v43 = vld [vmem:[%s4306_s27 + $0x5f0] sm:$0xff] }
  0x85   : > { %2512 = vmatpush2.bf16.msra.mxu1 %v3721_v58  ;;  %2538 = vmatprep.subr.bf16.mxu0 %v3778_v59  ;;  %v3850_v58 = vcombine.high %v636_v51, %v640_v52  ;;  %v3914_v59 = vcombine.high %v700_v53, %v704_v55  ;;  %v688_v8 = vld [vmem:[%s4306_s27 + $0x8e8] sm:$0xff]  ;;  %v457_v51 = vld [vmem:[%s4306_s27 + $0x1b0] sm:$0xff] }
  0x86   : > { %2513 = vmatprep.subr.bf16.mxu1 %v3714_v60  ;;  %v628_v60 = vld [vmem:[%s4306_s27 + $0x708] sm:$0xff]  ;;  %v581_v52 = vld [vmem:[%s4306_s27 + $0x590] sm:$0xff] }
  0x87   : > { %v3841_v9 = vcombine.low %v628_v60, %v632_v61  ;;  %v616_v16 = vld [vmem:[%s4306_s27 + $0x6a8] sm:$0xff] }
  0x88   : > { %2539 = vmatpush1.bf16.msra.mxu0 %v3777_v2  ;;  %v3913_v2 = vcombine.low %v700_v53, %v704_v55  ;;  %v676_v17 = vld [vmem:[%s4306_s27 + $0x888] sm:$0xff]  ;;  %v585_v53 = vld [vmem:[%s4306_s27 + $0x5b0] sm:$0xff] }
  0x89   : > { %2514 = vmatpush2.bf16.msra.mxu1 %v3713_v3  ;;  %2540 = vmatprep.subr.bf16.mxu0 %v3770_v4  ;;  %v3842_v3 = vcombine.high %v628_v60, %v632_v61  ;;  %v3906_v4 = vcombine.high %v692_v62, %v696_v63  ;;  %v680_v18 = vld [vmem:[%s4306_s27 + $0x8a8] sm:$0xff]  ;;  %v449_v60 = vld [vmem:[%s4306_s27 + $0x170] sm:$0xff] }
  0x8a   : > { %2515 = vmatprep.subr.bf16.mxu1 %v3706_v5  ;;  %v620_v5 = vld [vmem:[%s4306_s27 + $0x6c8] sm:$0xff]  ;;  %v573_v61 = vld [vmem:[%s4306_s27 + $0x550] sm:$0xff] }
  0x8b   : > { %v3833_v19 = vcombine.low %v620_v5, %v624_v6  ;;  %v608_v25 = vld [vmem:[%s4306_s27 + $0x668] sm:$0xff] }
  0x8c   : > { %2541 = vmatpush1.bf16.msra.mxu0 %v3769_v11  ;;  %v3905_v11 = vcombine.low %v692_v62, %v696_v63  ;;  %v668_v26 = vld [vmem:[%s4306_s27 + $0x848] sm:$0xff]  ;;  %v577_v62 = vld [vmem:[%s4306_s27 + $0x570] sm:$0xff] }
  0x8d   : > { %2516 = vmatpush2.bf16.msra.mxu1 %v3705_v12  ;;  %2542 = vmatprep.subr.bf16.mxu0 %v3762_v13  ;;  %v3834_v12 = vcombine.high %v620_v5, %v624_v6  ;;  %v3898_v13 = vcombine.high %v684_v7, %v688_v8  ;;  %v672_v27 = vld [vmem:[%s4306_s27 + $0x868] sm:$0xff]  ;;  %v441_v5 = vld [vmem:[%s4306_s27 + $0x130] sm:$0xff] }
  0x8e   : > { %2517 = vmatprep.subr.bf16.mxu1 %v3698_v15  ;;  %v612_v15 = vld [vmem:[%s4306_s27 + $0x688] sm:$0xff]  ;;  %v565_v6 = vld [vmem:[%s4306_s27 + $0x510] sm:$0xff] }
  0x8f   : > { %v3825_v28 = vcombine.low %v612_v15, %v616_v16  ;;  %v600_v33 = vld [vmem:[%s4306_s27 + $0x628] sm:$0xff] }
  0x90   : > { %2543 = vmatpush1.bf16.msra.mxu0 %v3761_v20  ;;  %v3897_v20 = vcombine.low %v684_v7, %v688_v8  ;;  %v660_v34 = vld [vmem:[%s4306_s27 + $0x808] sm:$0xff]  ;;  %v569_v7 = vld [vmem:[%s4306_s27 + $0x530] sm:$0xff] }
  0x91   : > { %2518 = vmatpush2.bf16.msra.mxu1 %v3697_v21  ;;  %2544 = vmatprep.subr.bf16.mxu0 %v3754_v22  ;;  %v3826_v21 = vcombine.high %v612_v15, %v616_v16  ;;  %v3890_v22 = vcombine.high %v676_v17, %v680_v18  ;;  %v664_v35 = vld [vmem:[%s4306_s27 + $0x828] sm:$0xff]  ;;  %v433_v15 = vld [vmem:[%s4306_s27 + $0xf0] sm:$0xff] }
  0x92   : > { %2519 = vmatprep.subr.bf16.mxu1 %v3690_v24  ;;  %v604_v24 = vld [vmem:[%s4306_s27 + $0x648] sm:$0xff]  ;;  %v557_v16 = vld [vmem:[%s4306_s27 + $0x4d0] sm:$0xff] }
  0x93   : > { %v3817_v36 = vcombine.low %v604_v24, %v608_v25 }
  0x94   : > { %2545 = vmatpush1.bf16.msra.mxu0 %v3753_v29  ;;  %v3889_v29 = vcombine.low %v676_v17, %v680_v18  ;;  %v561_v17 = vld [vmem:[%s4306_s27 + $0x4f0] sm:$0xff] }
  0x95   : > { %2520 = vmatpush2.bf16.msra.mxu1 %v3689_v31  ;;  %2546 = vmatprep.subr.bf16.mxu0 %v3746_v54  ;;  %v3818_v31 = vcombine.high %v604_v24, %v608_v25  ;;  %v3882_v54 = vcombine.high %v668_v26, %v672_v27  ;;  %v425_v24 = vld [vmem:[%s4306_s27 + $0xb0] sm:$0xff] }
  0x96   : > { %2521 = vmatprep.subr.bf16.mxu1 %v3682_v0  ;;  %v596_v0 = vld [vmem:[%s4306_s27 + $0x608] sm:$0xff]  ;;  %v549_v25 = vld [vmem:[%s4306_s27 + $0x490] sm:$0xff] }
  0x97   : > { %v3809_v44 = vcombine.low %v596_v0, %v600_v33 }
  0x98   : > { %2547 = vmatpush1.bf16.msra.mxu0 %v3745_v37  ;;  %v3881_v37 = vcombine.low %v668_v26, %v672_v27  ;;  %v553_v26 = vld [vmem:[%s4306_s27 + $0x4b0] sm:$0xff] }
  0x99   : > { %2522 = vmatpush2.bf16.msra.mxu1 %v3681_v38  ;;  %2548 = vmatprep.subr.bf16.mxu0 %v3866_v39  ;;  %v3810_v38 = vcombine.high %v596_v0, %v600_v33  ;;  %v3874_v39 = vcombine.high %v660_v34, %v664_v35  ;;  %v417_v0 = vld [vmem:[%s4306_s27 + $0x70] sm:$0xff] }
  0x9a   : > { %2573 = vmatprep.subr.bf16.mxu1 %v3930_v40  ;;  %v461_v40 = vld [vmem:[%s4306_s27 + $0x1d0] sm:$0xff] }
  0x9b   : > { %v3675_v55 = vcombine.low %v461_v40, %v465_v41  ;;  %v541_v33 = vld [vmem:[%s4306_s27 + $0x450] sm:$0xff] }
  0x9c   : > { %2524 = vmatmul.mubr.bf16.vlgmr.msra.gmra.mxu1 %v4407_v23  ;;  %2549 = vmatpush2.bf16.msra.mxu0 %v3865_v47  ;;  %v3873_v47 = vcombine.low %v660_v34, %v664_v35  ;;  %v545_v34 = vld [vmem:[%s4306_s27 + $0x470] sm:$0xff] }
  0x9d   : > { %2574 = vmatpush1.bf16.msra.mxu1 %v3929_v48  ;;  %2550 = vmatprep.subr.bf16.mxu0 %v3858_v49  ;;  %v3676_v48 = vcombine.high %v461_v40, %v465_v41  ;;  %v3804_v49 = vcombine.high %v589_v42, %v593_v43  ;;  %v409_v40 = vld [vmem:[%s4306_s27 + $0x30] sm:$0xff] }
  0x9e   : > { %2575 = vmatprep.subr.bf16.mxu1 %v3922_v50  ;;  %2605 = vmatprep.mubr.bf16.mxu1 %v4218_v46  ;;  %v453_v50 = vld [vmem:[%s4306_s27 + $0x190] sm:$0xff] }
  0x9f   : > { %v3667_v63 = vcombine.low %v453_v50, %v457_v51  ;;  %v533_v41 = vld [vmem:[%s4306_s27 + $0x410] sm:$0xff] }
  0xa0   : > { %2551 = vmatpush2.bf16.msra.mxu0 %v3857_v56  ;;  %v3803_v56 = vcombine.low %v589_v42, %v593_v43  ;;  %v537_v42 = vld [vmem:[%s4306_s27 + $0x430] sm:$0xff] }
  0xa1   : > { %2576 = vmatpush1.bf16.msra.mxu1 %v3921_v57  ;;  %2552 = vmatprep.subr.bf16.mxu0 %v3850_v58  ;;  %v3668_v57 = vcombine.high %v453_v50, %v457_v51  ;;  %v3796_v58 = vcombine.high %v581_v52, %v585_v53  ;;  %v529_v50 = vld [vmem:[%s4306_s27 + $0x3f0] sm:$0xff] }
  0xa2   : > { %2577 = vmatprep.subr.bf16.mxu1 %v3914_v59  ;;  %v445_v59 = vld [vmem:[%s4306_s27 + $0x150] sm:$0xff] }
  0xa3   : > { %v3659_v8 = vcombine.low %v445_v59, %v449_v60  ;;  %v653_v51 = vld [vmem:[%s4306_s27 + $0x7d0] sm:$0xff] }
  0xa4   : > { %2553 = vmatpush2.bf16.msra.mxu0 %v3849_v1  ;;  %v3795_v1 = vcombine.low %v581_v52, %v585_v53  ;;  %v657_v52 = vld [vmem:[%s4306_s27 + $0x7f0] sm:$0xff] }
  0xa5   : > { %2578 = vmatpush1.bf16.msra.mxu1 %v3913_v2  ;;  %2554 = vmatprep.subr.bf16.mxu0 %v3842_v3  ;;  %v3660_v2 = vcombine.high %v445_v59, %v449_v60  ;;  %v3788_v3 = vcombine.high %v573_v61, %v577_v62  ;;  %v521_v59 = vld [vmem:[%s4306_s27 + $0x3b0] sm:$0xff] }
  0xa6   : > { %2579 = vmatprep.subr.bf16.mxu1 %v3906_v4  ;;  %v437_v4 = vld [vmem:[%s4306_s27 + $0x110] sm:$0xff] }
  0xa7   : > { %v3651_v18 = vcombine.low %v437_v4, %v441_v5  ;;  %v645_v60 = vld [vmem:[%s4306_s27 + $0x790] sm:$0xff] }
  0xa8   : > { %2555 = vmatpush2.bf16.msra.mxu0 %v3841_v9  ;;  %v3787_v9 = vcombine.low %v573_v61, %v577_v62  ;;  %v649_v61 = vld [vmem:[%s4306_s27 + $0x7b0] sm:$0xff] }
  0xa9   : > { %2580 = vmatpush1.bf16.msra.mxu1 %v3905_v11  ;;  %2556 = vmatprep.subr.bf16.mxu0 %v3834_v12  ;;  %v3652_v11 = vcombine.high %v437_v4, %v441_v5  ;;  %v3780_v12 = vcombine.high %v565_v6, %v569_v7  ;;  %v513_v4 = vld [vmem:[%s4306_s27 + $0x370] sm:$0xff] }
  0xaa   : > { %2581 = vmatprep.subr.bf16.mxu1 %v3898_v13  ;;  %v429_v13 = vld [vmem:[%s4306_s27 + $0xd0] sm:$0xff] }
  0xab   : > { %v3643_v27 = vcombine.low %v429_v13, %v433_v15  ;;  %v637_v5 = vld [vmem:[%s4306_s27 + $0x750] sm:$0xff] }
  0xac   : > { %2557 = vmatpush2.bf16.msra.mxu0 %v3833_v19  ;;  %v3779_v19 = vcombine.low %v565_v6, %v569_v7  ;;  %v641_v6 = vld [vmem:[%s4306_s27 + $0x770] sm:$0xff] }
  0xad   : > { %2582 = vmatpush1.bf16.msra.mxu1 %v3897_v20  ;;  %2558 = vmatprep.subr.bf16.mxu0 %v3826_v21  ;;  %v3644_v20 = vcombine.high %v429_v13, %v433_v15  ;;  %v3772_v21 = vcombine.high %v557_v16, %v561_v17  ;;  %v505_v13 = vld [vmem:[%s4306_s27 + $0x330] sm:$0xff] }
  0xae   : > { %2583 = vmatprep.subr.bf16.mxu1 %v3890_v22  ;;  %v421_v22 = vld [vmem:[%s4306_s27 + $0x90] sm:$0xff] }
  0xaf   : > { %v3635_v35 = vcombine.low %v421_v22, %v425_v24  ;;  %v629_v15 = vld [vmem:[%s4306_s27 + $0x710] sm:$0xff] }
  0xb0   : > { %2559 = vmatpush2.bf16.msra.mxu0 %v3825_v28  ;;  %v3771_v28 = vcombine.low %v557_v16, %v561_v17  ;;  %v633_v16 = vld [vmem:[%s4306_s27 + $0x730] sm:$0xff] }
  0xb1   : > { %2584 = vmatpush1.bf16.msra.mxu1 %v3889_v29  ;;  %2560 = vmatprep.subr.bf16.mxu0 %v3818_v31  ;;  %v3636_v29 = vcombine.high %v421_v22, %v425_v24  ;;  %v3764_v31 = vcombine.high %v549_v25, %v553_v26  ;;  %v497_v22 = vld [vmem:[%s4306_s27 + $0x2f0] sm:$0xff] }
  0xb2   : > { %2585 = vmatprep.subr.bf16.mxu1 %v3882_v54  ;;  %v413_v54 = vld [vmem:[%s4306_s27 + $0x50] sm:$0xff] }
  0xb3   : > { %v3627_v43 = vcombine.low %v413_v54, %v417_v0  ;;  %v621_v24 = vld [vmem:[%s4306_s27 + $0x6d0] sm:$0xff] }
  0xb4   : > { %2561 = vmatpush2.bf16.msra.mxu0 %v3817_v36  ;;  %v3763_v36 = vcombine.low %v549_v25, %v553_v26  ;;  %v625_v25 = vld [vmem:[%s4306_s27 + $0x6f0] sm:$0xff] }
  0xb5   : > { %2586 = vmatpush1.bf16.msra.mxu1 %v3881_v37  ;;  %2562 = vmatprep.subr.bf16.mxu0 %v3810_v38  ;;  %v3628_v37 = vcombine.high %v413_v54, %v417_v0  ;;  %v3756_v38 = vcombine.high %v541_v33, %v545_v34  ;;  %v489_v54 = vld [vmem:[%s4306_s27 + $0x2b0] sm:$0xff] }
  0xb6   : > { %2587 = vmatprep.subr.bf16.mxu1 %v3874_v39  ;;  %v405_v39 = vld [vmem:[%s4306_s27 + $0x10] sm:$0xff] }
  0xb7   : > { %v3619_v53 = vcombine.low %v405_v39, %v409_v40  ;;  %v613_v0 = vld [vmem:[%s4306_s27 + $0x690] sm:$0xff] }
  0xb8   : > { %2563 = vmatpush2.bf16.msra.mxu0 %v3809_v44  ;;  %v3755_v44 = vcombine.low %v541_v33, %v545_v34  ;;  %v617_v33 = vld [vmem:[%s4306_s27 + $0x6b0] sm:$0xff] }
  0xb9   : > { %2588 = vmatpush1.bf16.msra.mxu1 %v3873_v47  ;;  %2614 = vmatprep.subr.bf16.mxu0 %v3676_v48  ;;  %v3620_v47 = vcombine.high %v405_v39, %v409_v40  ;;  %v3748_v48 = vcombine.high %v533_v41, %v537_v42  ;;  %v481_v39 = vld [vmem:[%s4306_s27 + $0x270] sm:$0xff] }
  0xba   : > { %2655 = vmatprep.subr.bf16.mxu1 %v3804_v49  ;;  %v525_v49 = vld [vmem:[%s4306_s27 + $0x3d0] sm:$0xff] }
  0xbb   : > { %2565 = vmatmul.mubr.bf16.vlgmr.msra.gmra.mxu0 %v4415_v32  ;;  %v3739_v62 = vcombine.low %v525_v49, %v529_v50  ;;  %v605_v40 = vld [vmem:[%s4306_s27 + $0x650] sm:$0xff] }
  0xbc   : > { %2606 = vmatmul.mubr.bf16.vlgmr.msra.gmra.mxu1 %v4377_v30  ;;  %2615 = vmatpush1.bf16.msra.mxu0 %v3675_v55  ;;  %v3747_v55 = vcombine.low %v533_v41, %v537_v42  ;;  %v609_v41 = vld [vmem:[%s4306_s27 + $0x670] sm:$0xff] }
  0xbd   : > { %2656 = vmatpush1.bf16.msra.mxu1 %v3803_v56  ;;  %2616 = vmatprep.subr.bf16.mxu0 %v3668_v57  ;;  %v3740_v56 = vcombine.high %v525_v49, %v529_v50  ;;  %v3868_v57 = vcombine.high %v653_v51, %v657_v52  ;;  %v473_v49 = vld [vmem:[%s4306_s27 + $0x230] sm:$0xff] }
  0xbe   : > { %2657 = vmatprep.subr.bf16.mxu1 %v3796_v58  ;;  %2646 = vmatprep.mubr.bf16.mxu0 %v4359_v10  ;;  %v517_v58 = vld [vmem:[%s4306_s27 + $0x390] sm:$0xff] }
  0xbf   : > { %2687 = vmatprep.mubr.bf16.mxu1 %v4366_v14  ;;  %v3731_v7 = vcombine.low %v517_v58, %v521_v59  ;;  %v597_v50 = vld [vmem:[%s4306_s27 + $0x610] sm:$0xff] }
  0xc0   : > { %2617 = vmatpush1.bf16.msra.mxu0 %v3667_v63  ;;  %v3867_v63 = vcombine.low %v653_v51, %v657_v52  ;;  %v601_v51 = vld [vmem:[%s4306_s27 + $0x630] sm:$0xff] }
  0xc1   : > { %2658 = vmatpush1.bf16.msra.mxu1 %v3795_v1  ;;  %2618 = vmatprep.subr.bf16.mxu0 %v3660_v2  ;;  %v3732_v1 = vcombine.high %v517_v58, %v521_v59  ;;  %v3860_v2 = vcombine.high %v645_v60, %v649_v61  ;;  %v721_v58 = vld [vmem:[%s4306_s27 + $0x9f0] sm:$0xff]  ;;  %v462_v59 = vld [vmem:[%s4306_s27 + $0x1d8] sm:$0xff] }
  0xc2   : > { %2659 = vmatprep.subr.bf16.mxu1 %v3788_v3  ;;  %v509_v3 = vld [vmem:[%s4306_s27 + $0x350] sm:$0xff] }
  0xc3   : > { %v3723_v17 = vcombine.low %v509_v3, %v513_v4 }
  0xc4   : > { %2619 = vmatpush1.bf16.msra.mxu0 %v3659_v8  ;;  %v3859_v8 = vcombine.low %v645_v60, %v649_v61  ;;  %v466_v60 = vld [vmem:[%s4306_s27 + $0x1f8] sm:$0xff] }
  0xc5   : > { %2660 = vmatpush1.bf16.msra.mxu1 %v3787_v9  ;;  %2620 = vmatprep.subr.bf16.mxu0 %v3652_v11  ;;  %v3724_v9 = vcombine.high %v509_v3, %v513_v4  ;;  %v3852_v11 = vcombine.high %v637_v5, %v641_v6  ;;  %v713_v3 = vld [vmem:[%s4306_s27 + $0x9b0] sm:$0xff]  ;;  %v454_v4 = vld [vmem:[%s4306_s27 + $0x198] sm:$0xff] }
  0xc6   : > { %2661 = vmatprep.subr.bf16.mxu1 %v3780_v12  ;;  %v501_v12 = vld [vmem:[%s4306_s27 + $0x310] sm:$0xff] }
  0xc7   : > { %v3715_v26 = vcombine.low %v501_v12, %v505_v13 }
  0xc8   : > { %2621 = vmatpush1.bf16.msra.mxu0 %v3651_v18  ;;  %v3851_v18 = vcombine.low %v637_v5, %v641_v6  ;;  %v458_v5 = vld [vmem:[%s4306_s27 + $0x1b8] sm:$0xff] }
  0xc9   : > { %2662 = vmatpush1.bf16.msra.mxu1 %v3779_v19  ;;  %2622 = vmatprep.subr.bf16.mxu0 %v3644_v20  ;;  %v3716_v19 = vcombine.high %v501_v12, %v505_v13  ;;  %v3844_v20 = vcombine.high %v629_v15, %v633_v16  ;;  %v705_v12 = vld [vmem:[%s4306_s27 + $0x970] sm:$0xff]  ;;  %v446_v13 = vld [vmem:[%s4306_s27 + $0x158] sm:$0xff] }
  0xca   : > { %2663 = vmatprep.subr.bf16.mxu1 %v3772_v21  ;;  %v493_v21 = vld [vmem:[%s4306_s27 + $0x2d0] sm:$0xff] }
  0xcb   : > { %v3707_v34 = vcombine.low %v493_v21, %v497_v22 }
  0xcc   : > { %2623 = vmatpush1.bf16.msra.mxu0 %v3643_v27  ;;  %v3843_v27 = vcombine.low %v629_v15, %v633_v16  ;;  %v450_v15 = vld [vmem:[%s4306_s27 + $0x178] sm:$0xff] }
  0xcd   : > { %2664 = vmatpush1.bf16.msra.mxu1 %v3771_v28  ;;  %2624 = vmatprep.subr.bf16.mxu0 %v3636_v29  ;;  %v3708_v28 = vcombine.high %v493_v21, %v497_v22  ;;  %v3836_v29 = vcombine.high %v621_v24, %v625_v25  ;;  %v697_v21 = vld [vmem:[%s4306_s27 + $0x930] sm:$0xff]  ;;  %v438_v22 = vld [vmem:[%s4306_s27 + $0x118] sm:$0xff] }
  0xce   : > { %2665 = vmatprep.subr.bf16.mxu1 %v3764_v31  ;;  %v485_v31 = vld [vmem:[%s4306_s27 + $0x290] sm:$0xff] }
  0xcf   : > { %v3699_v42 = vcombine.low %v485_v31, %v489_v54 }
  0xd0   : > { %2625 = vmatpush1.bf16.msra.mxu0 %v3635_v35  ;;  %v3835_v35 = vcombine.low %v621_v24, %v625_v25  ;;  %v442_v24 = vld [vmem:[%s4306_s27 + $0x138] sm:$0xff] }
  0xd1   : > { %2666 = vmatpush1.bf16.msra.mxu1 %v3763_v36  ;;  %2626 = vmatprep.subr.bf16.mxu0 %v3628_v37  ;;  %v3700_v36 = vcombine.high %v485_v31, %v489_v54  ;;  %v3828_v37 = vcombine.high %v613_v0, %v617_v33  ;;  %v689_v31 = vld [vmem:[%s4306_s27 + $0x8f0] sm:$0xff]  ;;  %v430_v54 = vld [vmem:[%s4306_s27 + $0xd8] sm:$0xff] }
  0xd2   : > { %2667 = vmatprep.subr.bf16.mxu1 %v3756_v38  ;;  %v477_v38 = vld [vmem:[%s4306_s27 + $0x250] sm:$0xff] }
  0xd3   : > { %v3691_v52 = vcombine.low %v477_v38, %v481_v39 }
  0xd4   : > { %2627 = vmatpush1.bf16.msra.mxu0 %v3627_v43  ;;  %v3827_v43 = vcombine.low %v613_v0, %v617_v33  ;;  %v434_v0 = vld [vmem:[%s4306_s27 + $0xf8] sm:$0xff] }
  0xd5   : > { %2668 = vmatpush1.bf16.msra.mxu1 %v3755_v44  ;;  %2628 = vmatprep.subr.bf16.mxu0 %v3620_v47  ;;  %v3692_v44 = vcombine.high %v477_v38, %v481_v39  ;;  %v3820_v47 = vcombine.high %v605_v40, %v609_v41  ;;  %v422_v38 = vld [vmem:[%s4306_s27 + $0x98] sm:$0xff] }
  0xd6   : > { %2669 = vmatprep.subr.bf16.mxu1 %v3748_v48  ;;  %v469_v48 = vld [vmem:[%s4306_s27 + $0x210] sm:$0xff]  ;;  %v426_v39 = vld [vmem:[%s4306_s27 + $0xb8] sm:$0xff] }
  0xd7   : > { %v3683_v61 = vcombine.low %v469_v48, %v473_v49 }
  0xd8   : > { %2629 = vmatpush1.bf16.msra.mxu0 %v3619_v53  ;;  %v3819_v53 = vcombine.low %v605_v40, %v609_v41  ;;  %v3645_v41 = vcombine.low %v430_v54, %v434_v0 }
  0xd9   : > { %2670 = vmatpush1.bf16.msra.mxu1 %v3747_v55  ;;  %2630 = vmatprep.subr.bf16.mxu0 %v3740_v56  ;;  %v3684_v55 = vcombine.high %v469_v48, %v473_v49  ;;  %v3812_v56 = vcombine.high %v597_v50, %v601_v51  ;;  %v414_v48 = vld [vmem:[%s4306_s27 + $0x58] sm:$0xff] }
  0xda   : > { %2671 = vmatprep.subr.bf16.mxu1 %v3868_v57  ;;  %v717_v57 = vld [vmem:[%s4306_s27 + $0x9d0] sm:$0xff]  ;;  %v418_v49 = vld [vmem:[%s4306_s27 + $0x78] sm:$0xff] }
  0xdb   : > { %v3931_v6 = vcombine.low %v717_v57, %v721_v58 }
  0xdc   : > { %2631 = vmatpush2.bf16.msra.mxu0 %v3739_v62  ;;  %v3811_v62 = vcombine.low %v597_v50, %v601_v51  ;;  %v3637_v51 = vcombine.low %v422_v38, %v426_v39 }
  0xdd   : > { %2672 = vmatpush2.bf16.msra.mxu1 %v3867_v63  ;;  %2632 = vmatprep.subr.bf16.mxu0 %v3732_v1  ;;  %v3932_v63 = vcombine.high %v717_v57, %v721_v58  ;;  %v3678_v1 = vcombine.high %v462_v59, %v466_v60  ;;  %v406_v57 = vld [vmem:[%s4306_s27 + $0x18] sm:$0xff] }
  0xde   : > { %2673 = vmatprep.subr.bf16.mxu1 %v3860_v2  ;;  %v709_v2 = vld [vmem:[%s4306_s27 + $0x990] sm:$0xff]  ;;  %v410_v58 = vld [vmem:[%s4306_s27 + $0x38] sm:$0xff] }
  0xdf   : > { %v3923_v16 = vcombine.low %v709_v2, %v713_v3 }
  0xe0   : > { %2633 = vmatpush2.bf16.msra.mxu0 %v3731_v7  ;;  %v3677_v7 = vcombine.low %v462_v59, %v466_v60  ;;  %v3629_v60 = vcombine.low %v414_v48, %v418_v49 }
  0xe1   : > { %2674 = vmatpush2.bf16.msra.mxu1 %v3859_v8  ;;  %2634 = vmatprep.subr.bf16.mxu0 %v3724_v9  ;;  %v3924_v8 = vcombine.high %v709_v2, %v713_v3  ;;  %v3670_v9 = vcombine.high %v454_v4, %v458_v5  ;;  %v526_v2 = vld [vmem:[%s4306_s27 + $0x3d8] sm:$0xff] }
  0xe2   : > { %2675 = vmatprep.subr.bf16.mxu1 %v3852_v11  ;;  %v701_v11 = vld [vmem:[%s4306_s27 + $0x950] sm:$0xff]  ;;  %v530_v3 = vld [vmem:[%s4306_s27 + $0x3f8] sm:$0xff] }
  0xe3   : > { %v3915_v25 = vcombine.low %v701_v11, %v705_v12 }
  0xe4   : > { %2635 = vmatpush2.bf16.msra.mxu0 %v3723_v17  ;;  %v3669_v17 = vcombine.low %v454_v4, %v458_v5  ;;  %v3621_v5 = vcombine.low %v406_v57, %v410_v58 }
  0xe5   : > { %2676 = vmatpush2.bf16.msra.mxu1 %v3851_v18  ;;  %2636 = vmatprep.subr.bf16.mxu0 %v3716_v19  ;;  %v3916_v18 = vcombine.high %v701_v11, %v705_v12  ;;  %v3662_v19 = vcombine.high %v446_v13, %v450_v15  ;;  %v518_v11 = vld [vmem:[%s4306_s27 + $0x398] sm:$0xff] }
  0xe6   : > { %2677 = vmatprep.subr.bf16.mxu1 %v3844_v20  ;;  %v693_v20 = vld [vmem:[%s4306_s27 + $0x910] sm:$0xff]  ;;  %v522_v12 = vld [vmem:[%s4306_s27 + $0x3b8] sm:$0xff] }
  0xe7   : > { %v3907_v33 = vcombine.low %v693_v20, %v697_v21 }
  0xe8   : > { %2637 = vmatpush2.bf16.msra.mxu0 %v3715_v26  ;;  %v3661_v26 = vcombine.low %v446_v13, %v450_v15  ;;  %v3741_v15 = vcombine.low %v526_v2, %v530_v3 }
  0xe9   : > { %2678 = vmatpush2.bf16.msra.mxu1 %v3843_v27  ;;  %2638 = vmatprep.subr.bf16.mxu0 %v3708_v28  ;;  %v3908_v27 = vcombine.high %v693_v20, %v697_v21  ;;  %v3654_v28 = vcombine.high %v438_v22, %v442_v24  ;;  %v510_v21 = vld [vmem:[%s4306_s27 + $0x358] sm:$0xff] }
  0xea   : > { %2679 = vmatprep.subr.bf16.mxu1 %v3836_v29  ;;  %v685_v29 = vld [vmem:[%s4306_s27 + $0x8d0] sm:$0xff] }
  0xeb   : > { %v3899_v40 = vcombine.low %v685_v29, %v689_v31 }
  0xec   : > { %2639 = vmatpush2.bf16.msra.mxu0 %v3707_v34  ;;  %v3900_v34 = vcombine.high %v685_v29, %v689_v31 }
  0xed   : > { %2680 = vmatpush2.bf16.msra.mxu1 %v3835_v35  ;;  %2640 = vmatprep.subr.bf16.mxu0 %v3700_v36  ;;  %v3646_v35 = vcombine.high %v430_v54, %v434_v0  ;;  %v677_v36 = vld [vmem:[%s4306_s27 + $0x890] sm:$0xff]  ;;  %v566_v0 = vld [vmem:[%s4306_s27 + $0x518] sm:$0xff] }
  0xee   : > { %2681 = vmatprep.subr.bf16.mxu1 %v3828_v37  ;;  %v681_v37 = vld [vmem:[%s4306_s27 + $0x8b0] sm:$0xff] }
  0xef   : > { %v3891_v50 = vcombine.low %v677_v36, %v681_v37 }
  0xf0   : > { %2641 = vmatpush2.bf16.msra.mxu0 %v3699_v42  ;;  %v3892_v42 = vcombine.high %v677_v36, %v681_v37 }
  0xf1   : > { %2682 = vmatpush2.bf16.msra.mxu1 %v3827_v43  ;;  %2642 = vmatprep.subr.bf16.mxu0 %v3692_v44  ;;  %v3638_v43 = vcombine.high %v422_v38, %v426_v39  ;;  %v669_v44 = vld [vmem:[%s4306_s27 + $0x850] sm:$0xff] }
  0xf2   : > { %2683 = vmatprep.subr.bf16.mxu1 %v3820_v47  ;;  %v673_v47 = vld [vmem:[%s4306_s27 + $0x870] sm:$0xff] }
  0xf3   : > { %v3883_v59 = vcombine.low %v669_v44, %v673_v47 }
  0xf4   : > { %2643 = vmatpush2.bf16.msra.mxu0 %v3691_v52  ;;  %v3884_v52 = vcombine.high %v669_v44, %v673_v47  ;;  %v562_v44 = vld [vmem:[%s4306_s27 + $0x4f8] sm:$0xff] }
  0xf5   : > { %2684 = vmatpush2.bf16.msra.mxu1 %v3819_v53  ;;  %2644 = vmatprep.subr.bf16.mxu0 %v3684_v55  ;;  %v3630_v53 = vcombine.high %v414_v48, %v418_v49  ;;  %v661_v55 = vld [vmem:[%s4306_s27 + $0x810] sm:$0xff]  ;;  %v494_v47 = vld [vmem:[%s4306_s27 + $0x2d8] sm:$0xff] }
  0xf6   : > { %2685 = vmatprep.subr.bf16.mxu1 %v3812_v56  ;;  %v665_v56 = vld [vmem:[%s4306_s27 + $0x830] sm:$0xff]  ;;  %v498_v48 = vld [vmem:[%s4306_s27 + $0x2f8] sm:$0xff] }
  0xf7   : > { %v3875_v4 = vcombine.low %v661_v55, %v665_v56 }
  0xf8   : > { %2645 = vmatpush2.bf16.msra.mxu0 %v3683_v61  ;;  %v3876_v61 = vcombine.high %v661_v55, %v665_v56  ;;  %v554_v55 = vld [vmem:[%s4306_s27 + $0x4b8] sm:$0xff] }
  0xf9   : > { %2686 = vmatpush2.bf16.msra.mxu1 %v3811_v62  ;;  %2696 = vmatprep.subr.bf16.mxu0 %v3932_v63  ;;  %v3622_v62 = vcombine.high %v406_v57, %v410_v58  ;;  %v590_v63 = vld [vmem:[%s4306_s27 + $0x5d8] sm:$0xff] }
  0xfa   : > { %2737 = vmatprep.subr.bf16.mxu1 %v3678_v1  ;;  %v594_v1 = vld [vmem:[%s4306_s27 + $0x5f8] sm:$0xff] }
  0xfb   : > { %2647 = vmatmul.mubr.bf16.vlgmr.msra.gmra.mxu0 %v4407_v23  ;;  %v3805_v13 = vcombine.low %v590_v63, %v594_v1  ;;  %v486_v56 = vld [vmem:[%s4306_s27 + $0x298] sm:$0xff] }
  0xfc   : > { %2688 = vmatmul.mubr.bf16.vlgmr.msra.gmra.mxu1 %v4415_v32  ;;  %2697 = vmatpush1.bf16.msra.mxu0 %v3931_v6  ;;  %v3806_v6 = vcombine.high %v590_v63, %v594_v1  ;;  %v490_v57 = vld [vmem:[%s4306_s27 + $0x2b8] sm:$0xff] }
  0xfd   : > { %2738 = vmatpush1.bf16.msra.mxu1 %v3677_v7  ;;  %2698 = vmatprep.subr.bf16.mxu0 %v3924_v8  ;;  %v3742_v7 = vcombine.high %v526_v2, %v530_v3  ;;  %v582_v8 = vld [vmem:[%s4306_s27 + $0x598] sm:$0xff] }
  0xfe   : > { %2739 = vmatprep.subr.bf16.mxu1 %v3670_v9  ;;  %2728 = vmatprep.mubr.bf16.mxu0 %v4218_v46  ;;  %v586_v9 = vld [vmem:[%s4306_s27 + $0x5b8] sm:$0xff] }
  0xff   : > { %2769 = vmatprep.mubr.bf16.mxu1 %v4359_v10  ;;  %v3653_v10 = vcombine.low %v438_v22, %v442_v24  ;;  %v514_v22 = vld [vmem:[%s4306_s27 + $0x378] sm:$0xff] }
 0x100   : > { %2699 = vmatpush1.bf16.msra.mxu0 %v3923_v16  ;;  %v3798_v16 = vcombine.high %v582_v8, %v586_v9  ;;  %v3726_v54 = vcombine.high %v510_v21, %v514_v22  ;;  %v3725_v39 = vcombine.low %v510_v21, %v514_v22  ;;  %v546_v63 = vld [vmem:[%s4306_s27 + $0x478] sm:$0xff] }
 0x101   : > { %2740 = vmatpush1.bf16.msra.mxu1 %v3669_v17  ;;  %2700 = vmatprep.subr.bf16.mxu0 %v3916_v18  ;;  %v3734_v17 = vcombine.high %v518_v11, %v522_v12  ;;  %v574_v18 = vld [vmem:[%s4306_s27 + $0x558] sm:$0xff] }
 0x102   : > { %2741 = vmatprep.subr.bf16.mxu1 %v3662_v19  ;;  %v578_v19 = vld [vmem:[%s4306_s27 + $0x578] sm:$0xff] }
 0x103   : > { %v3790_v29 = vcombine.high %v574_v18, %v578_v19  ;;  %v3789_v37 = vcombine.low %v574_v18, %v578_v19  ;;  %v478_v1 = vld [vmem:[%s4306_s27 + $0x258] sm:$0xff] }
 0x104   : > { %2701 = vmatpush1.bf16.msra.mxu0 %v3915_v25  ;;  %v3797_v25 = vcombine.low %v582_v8, %v586_v9  ;;  %v482_v2 = vld [vmem:[%s4306_s27 + $0x278] sm:$0xff] }
 0x105   : > { %2742 = vmatpush1.bf16.msra.mxu1 %v3661_v26  ;;  %2702 = vmatprep.subr.bf16.mxu0 %v3908_v27  ;;  %v538_v8 = vld [vmem:[%s4306_s27 + $0x438] sm:$0xff] }
 0x106   : > { %2743 = vmatprep.subr.bf16.mxu1 %v3654_v28  ;;  %v3733_v28 = vcombine.low %v518_v11, %v522_v12  ;;  %v470_v9 = vld [vmem:[%s4306_s27 + $0x218] sm:$0xff] }
 0x107   : > { %v474_v11 = vld [vmem:[%s4306_s27 + $0x238] sm:$0xff] }
 0x108   : > { %2703 = vmatpush1.bf16.msra.mxu0 %v3907_v33  ;;  %v570_v33 = vld [vmem:[%s4306_s27 + $0x538] sm:$0xff]  ;;  %v3685_v22 = vcombine.low %v470_v9, %v474_v11 }
 0x109   : > { %2744 = vmatpush1.bf16.msra.mxu1 %v3653_v10  ;;  %2704 = vmatprep.subr.bf16.mxu0 %v3900_v34  ;;  %v3781_v49 = vcombine.low %v566_v0, %v570_v33  ;;  %v658_v18 = vld [vmem:[%s4306_s27 + $0x7f8] sm:$0xff] }
 0x10a   : > { %2745 = vmatprep.subr.bf16.mxu1 %v3646_v35  ;;  %v502_v35 = vld [vmem:[%s4306_s27 + $0x318] sm:$0xff] }
 0x10b   : > { %v718_v19 = vld [vmem:[%s4306_s27 + $0x9d8] sm:$0xff] }
 0x10c   : > { %2705 = vmatpush1.bf16.msra.mxu0 %v3899_v40  ;;  %v3782_v40 = vcombine.high %v566_v0, %v570_v33 }
 0x10d   : > { %2746 = vmatpush1.bf16.msra.mxu1 %v3645_v41  ;;  %2706 = vmatprep.subr.bf16.mxu0 %v3892_v42 }
 0x10e   : > { %2747 = vmatprep.subr.bf16.mxu1 %v3638_v43  ;;  %v558_v43 = vld [vmem:[%s4306_s27 + $0x4d8] sm:$0xff] }
 0x10f   : > { %v3773_v58 = vcombine.low %v558_v43, %v562_v44 }
 0x110   : > { %2707 = vmatpush1.bf16.msra.mxu0 %v3891_v50 }
 0x111   : > { %2748 = vmatpush1.bf16.msra.mxu1 %v3637_v51  ;;  %2708 = vmatprep.subr.bf16.mxu0 %v3884_v52  ;;  %v3774_v51 = vcombine.high %v558_v43, %v562_v44  ;;  %v3710_v52 = vcombine.high %v494_v47, %v498_v48 }
 0x112   : > { %2749 = vmatprep.subr.bf16.mxu1 %v3630_v53  ;;  %v550_v53 = vld [vmem:[%s4306_s27 + $0x498] sm:$0xff] }
 0x113   : > { %v3765_v3 = vcombine.low %v550_v53, %v554_v55 }
 0x114   : > { %2709 = vmatpush1.bf16.msra.mxu0 %v3883_v59  ;;  %v3709_v59 = vcombine.low %v494_v47, %v498_v48  ;;  %v630_v48 = vld [vmem:[%s4306_s27 + $0x718] sm:$0xff] }
 0x115   : > { %2750 = vmatpush1.bf16.msra.mxu1 %v3629_v60  ;;  %2710 = vmatprep.subr.bf16.mxu0 %v3876_v61  ;;  %v3766_v60 = vcombine.high %v550_v53, %v554_v55  ;;  %v3702_v61 = vcombine.high %v486_v56, %v490_v57 }
 0x116   : > { %2751 = vmatprep.subr.bf16.mxu1 %v3622_v62  ;;  %v542_v62 = vld [vmem:[%s4306_s27 + $0x458] sm:$0xff] }
 0x117   : > { %v3757_v12 = vcombine.low %v542_v62, %v546_v63 }
 0x118   : > { %2711 = vmatpush1.bf16.msra.mxu0 %v3875_v4  ;;  %v3701_v4 = vcombine.low %v486_v56, %v490_v57  ;;  %v622_v56 = vld [vmem:[%s4306_s27 + $0x6d8] sm:$0xff] }
 0x119   : > { %2752 = vmatpush1.bf16.msra.mxu1 %v3621_v5  ;;  %2778 = vmatprep.subr.bf16.mxu0 %v3806_v6  ;;  %v3758_v5 = vcombine.high %v542_v62, %v546_v63  ;;  %v3694_v6 = vcombine.high %v478_v1, %v482_v2  ;;  %v626_v57 = vld [vmem:[%s4306_s27 + $0x6f8] sm:$0xff] }
 0x11a   : > { %2753 = vmatprep.subr.bf16.mxu1 %v3742_v7  ;;  %v534_v7 = vld [vmem:[%s4306_s27 + $0x418] sm:$0xff]  ;;  %v3838_v62 = vcombine.high %v622_v56, %v626_v57 }
 0x11b   : > { %v2402_v20 = vpop.f32.mrf.mxu0  ;;  %2729 = vmatmul.mubr.bf16.vlgmr.msra.gmra.mxu0 %v4377_v30  ;;  %v3749_v21 = vcombine.low %v534_v7, %v538_v8 }
 0x11c   : > { %v2443_v24 = vpop.f32.mrf.mxu1  ;;  %2779 = vmatpush1.bf16.msra.mxu0 %v3805_v13  ;;  %2810 = vmatprep.mubr.bf16.mxu0 %v4366_v14  ;;  %v506_v14 = vld [vmem:[%s4306_s27 + $0x338] sm:$0xff]  ;;  %v3693_v13 = vcombine.low %v478_v1, %v482_v2 }
 0x11d   : > { %v4631_v26 = vadd.f32 %v2443_v24, %v2402_v20  ;;  %2754 = vmatpush2.bf16.msra.mxu1 %v3741_v15  ;;  %v2404_v27 = vpop.f32.mrf.mxu0  ;;  %2780 = vmatprep.subr.bf16.mxu0 %v3798_v16  ;;  %v3718_v42 = vcombine.high %v502_v35, %v506_v14  ;;  %v3717_v50 = vcombine.low %v502_v35, %v506_v14  ;;  %v722_v20 = vld [vmem:[%s4306_s27 + $0x9f8] sm:$0xff] }
 0x11e   : > { %v2445_v31 = vpop.f32.mrf.mxu1  ;;  %2755 = vmatprep.subr.bf16.mxu1 %v3734_v17  ;;  %v3750_v15 = vcombine.high %v534_v7, %v538_v8  ;;  %v3686_v16 = vcombine.high %v470_v9, %v474_v11  ;;  %v654_v17 = vld [vmem:[%s4306_s27 + $0x7d8] sm:$0xff]  ;;  %v3933_v0 = vcombine.low %v718_v19, %v722_v20 }
 0x11f   : > { %v4635_v10 = vadd.f32 %v2445_v31, %v2404_v27  ;;  %v2406_v34 = vpop.f32.mrf.mxu0  ;;  %v3870_v24 = vcombine.high %v654_v17, %v658_v18  ;;  %v646_v27 = vld [vmem:[%s4306_s27 + $0x798] sm:$0xff] }
 0x120   : > { %v2447_v36 = vpop.f32.mrf.mxu1  ;;  %2781 = vmatpush1.bf16.msra.mxu0 %v3797_v25  ;;  %v3934_v25 = vcombine.high %v718_v19, %v722_v20  ;;  %v714_v31 = vld [vmem:[%s4306_s27 + $0x9b8] sm:$0xff] }
 0x121   : > { %2756 = vmatpush2.bf16.msra.mxu1 %v3733_v28  ;;  %v2407_v38 = vpop.f32.mrf.mxu0  ;;  %2782 = vmatprep.subr.bf16.mxu0 %v3790_v29  ;;  %v650_v28 = vld [vmem:[%s4306_s27 + $0x7b8] sm:$0xff] }
 0x122   : > { %v2448_v41 = vpop.f32.mrf.mxu1  ;;  %2757 = vmatprep.subr.bf16.mxu1 %v3726_v54  ;;  %v710_v29 = vld [vmem:[%s4306_s27 + $0x998] sm:$0xff]  ;;  %v3869_v54 = vcombine.low %v654_v17, %v658_v18  ;;  %v3862_v33 = vcombine.high %v646_v27, %v650_v28 }
 0x123   : > { %v3926_v34 = vcombine.high %v710_v29, %v714_v31  ;;  %v638_v35 = vld [vmem:[%s4306_s27 + $0x758] sm:$0xff] }
 0x124   : > { %2783 = vmatpush1.bf16.msra.mxu0 %v3789_v37  ;;  %v642_v14 = vld [vmem:[%s4306_s27 + $0x778] sm:$0xff] }
 0x125   : > { %2758 = vmatpush2.bf16.msra.mxu1 %v3725_v39  ;;  %2784 = vmatprep.subr.bf16.mxu0 %v3782_v40  ;;  %v702_v37 = vld [vmem:[%s4306_s27 + $0x958] sm:$0xff]  ;;  %v3861_v40 = vcombine.low %v646_v27, %v650_v28  ;;  %v3854_v43 = vcombine.high %v638_v35, %v642_v14 }
 0x126   : > { %2759 = vmatprep.subr.bf16.mxu1 %v3718_v42  ;;  %v706_v38 = vld [vmem:[%s4306_s27 + $0x978] sm:$0xff]  ;;  %v3925_v42 = vcombine.low %v710_v29, %v714_v31 }
 0x127   : > { %v3918_v47 = vcombine.high %v702_v37, %v706_v38  ;;  %v3917_v53 = vcombine.low %v702_v37, %v706_v38  ;;  %v614_v1 = vld [vmem:[%s4306_s27 + $0x698] sm:$0xff] }
 0x128   : > { %2785 = vmatpush1.bf16.msra.mxu0 %v3781_v49  ;;  %v694_v49 = vld [vmem:[%s4306_s27 + $0x918] sm:$0xff] }
 0x129   : > { %2760 = vmatpush2.bf16.msra.mxu1 %v3717_v50  ;;  %2786 = vmatprep.subr.bf16.mxu0 %v3774_v51  ;;  %v698_v50 = vld [vmem:[%s4306_s27 + $0x938] sm:$0xff] }
 0x12a   : > { %2761 = vmatprep.subr.bf16.mxu1 %v3710_v52  ;;  %v3853_v52 = vcombine.low %v638_v35, %v642_v14  ;;  %v618_v2 = vld [vmem:[%s4306_s27 + $0x6b8] sm:$0xff]  ;;  %v4219_v35 = vmov 1983009808  }
 0x12b   : > { %v3830_v7 = vcombine.high %v614_v1, %v618_v2  ;;  %v606_v9 = vld [vmem:[%s4306_s27 + $0x658] sm:$0xff]  ;;  %v2871_v14 = vunpack.c.l.s4 %v4219_v35 }
 0x12c   : > { %2787 = vmatpush1.bf16.msra.mxu0 %v3773_v58  ;;  %v686_v58 = vld [vmem:[%s4306_s27 + $0x8d8] sm:$0xff] }
 0x12d   : > { %2762 = vmatpush2.bf16.msra.mxu1 %v3709_v59  ;;  %2788 = vmatprep.subr.bf16.mxu0 %v3766_v60  ;;  %v690_v59 = vld [vmem:[%s4306_s27 + $0x8f8] sm:$0xff]  ;;  %v2872_v37 = vunpack.c.0.s8 %v2871_v14 }
 0x12e   : > { %2763 = vmatprep.subr.bf16.mxu1 %v3702_v61  ;;  %v3909_v61 = vcombine.low %v694_v49, %v698_v50  ;;  %v3902_v63 = vcombine.high %v686_v58, %v690_v59  ;;  %v610_v11 = vld [vmem:[%s4306_s27 + $0x678] sm:$0xff] }
 0x12f   : > { %v3822_v17 = vcombine.high %v606_v9, %v610_v11  ;;  %v598_v19 = vld [vmem:[%s4306_s27 + $0x618] sm:$0xff] }
 0x130   : > { %2789 = vmatpush1.bf16.msra.mxu0 %v3765_v3  ;;  %v678_v3 = vld [vmem:[%s4306_s27 + $0x898] sm:$0xff] }
 0x131   : > { %2764 = vmatpush2.bf16.msra.mxu1 %v3701_v4  ;;  %2790 = vmatprep.subr.bf16.mxu0 %v3758_v5  ;;  %v682_v4 = vld [vmem:[%s4306_s27 + $0x8b8] sm:$0xff]  ;;  %v3837_v5 = vcombine.low %v622_v56, %v626_v57 }
 0x132   : > { %2765 = vmatprep.subr.bf16.mxu1 %v3694_v6  ;;  %v3901_v6 = vcombine.low %v686_v58, %v690_v59  ;;  %v3894_v8 = vcombine.high %v678_v3, %v682_v4  ;;  %v602_v20 = vld [vmem:[%s4306_s27 + $0x638] sm:$0xff] }
 0x133   : > { %v3814_v27 = vcombine.high %v598_v19, %v602_v20  ;;  %v3813_v29 = vcombine.low %v598_v19, %v602_v20 }
 0x134   : > { %2791 = vmatpush1.bf16.msra.mxu0 %v3757_v12  ;;  %v670_v12 = vld [vmem:[%s4306_s27 + $0x858] sm:$0xff] }
 0x135   : > { %2766 = vmatpush2.bf16.msra.mxu1 %v3693_v13  ;;  %2792 = vmatprep.subr.bf16.mxu0 %v3750_v15  ;;  %v674_v13 = vld [vmem:[%s4306_s27 + $0x878] sm:$0xff]  ;;  %v3829_v15 = vcombine.low %v614_v1, %v618_v2 }
 0x136   : > { %2767 = vmatprep.subr.bf16.mxu1 %v3686_v16  ;;  %v3893_v16 = vcombine.low %v678_v3, %v682_v4  ;;  %v3886_v18 = vcombine.high %v670_v12, %v674_v13 }
 0x138   : > { %2793 = vmatpush1.bf16.msra.mxu0 %v3749_v21  ;;  %v662_v21 = vld [vmem:[%s4306_s27 + $0x818] sm:$0xff] }
 0x139   : > { %2768 = vmatpush2.bf16.msra.mxu1 %v3685_v22  ;;  %2794 = vmatprep.subr.bf16.mxu0 %v3870_v24  ;;  %v666_v22 = vld [vmem:[%s4306_s27 + $0x838] sm:$0xff]  ;;  %v3821_v24 = vcombine.low %v606_v9, %v610_v11 }
 0x13a   : > { %2819 = vmatprep.subr.bf16.mxu1 %v3934_v25  ;;  %v3885_v25 = vcombine.low %v670_v12, %v674_v13  ;;  %v3878_v28 = vcombine.high %v662_v21, %v666_v22  ;;  %v3877_v31 = vcombine.low %v662_v21, %v666_v22 }
 0x13b   : > { %v2484_v36 = vpop.f32.mrf.mxu0 }
 0x13c   : > { %v4668_v39 = vadd.f32 %v2484_v36, %v4631_v26  ;;  %2770 = vmatmul.mubr.bf16.vlgmr.msra.gmra.mxu1 %v4407_v23  ;;  %2795 = vmatpush2.bf16.msra.mxu0 %v3869_v54  ;;  %v634_v26 = vld [vmem:[%s4306_s27 + $0x738] sm:$0xff] }
 0x13d   : > { %2820 = vmatpush1.bf16.msra.mxu1 %v3933_v0  ;;  %v2486_v41 = vpop.f32.mrf.mxu0  ;;  %2796 = vmatprep.subr.bf16.mxu0 %v3862_v33  ;;  %v3846_v55 = vcombine.high %v630_v48, %v634_v26  ;;  %v3845_v60 = vcombine.low %v630_v48, %v634_v26  ;;  %v4700_v48 = vsub.s32 %v2872_v37, %v4331_v45 }
 0x13e   : > { %v4672_v44 = vadd.f32 %v2486_v41, %v4635_v10  ;;  %2821 = vmatprep.subr.bf16.mxu1 %v3926_v34  ;;  %2851 = vmatprep.mubr.bf16.mxu1 %v4218_v46  ;;  %v3910_v46 = vcombine.high %v694_v49, %v698_v50 }
 0x13f   : > { %v2488_v23 = vpop.f32.mrf.mxu0 }
 0x140   : > { %v2868_v51 = vcombine.low %v4668_v39, %v4672_v44  ;;  %2797 = vmatpush2.bf16.msra.mxu0 %v3861_v40 }
 0x141   : > { %2822 = vmatpush1.bf16.msra.mxu1 %v3925_v42  ;;  %v2489_v10 = vpop.f32.mrf.mxu0  ;;  %2798 = vmatprep.subr.bf16.mxu0 %v3854_v43 }
 0x142   : > { %2823 = vmatprep.subr.bf16.mxu1 %v3918_v47 }
 0x144   : > { %2799 = vmatpush2.bf16.msra.mxu0 %v3853_v52  ;;  %v2876_v52 = vrot.slane %v2868_v51, %v4700_v48 }
 0x145   : > { %2824 = vmatpush1.bf16.msra.mxu1 %v3917_v53  ;;  %2800 = vmatprep.subr.bf16.mxu0 %v3846_v55  ;;  %v400_v53 = vld [vmem:[#allocation2] sm:$0xff] }
 0x146   : > { %2825 = vmatprep.subr.bf16.mxu1 %v3910_v46 }
 0x148   : > { %2801 = vmatpush2.bf16.msra.mxu0 %v3845_v60 }
 0x149   : > { %2826 = vmatpush1.bf16.msra.mxu1 %v3909_v61  ;;  %2802 = vmatprep.subr.bf16.mxu0 %v3838_v62 }
 0x14a   : > { %2827 = vmatprep.subr.bf16.mxu1 %v3902_v63 }
 0x14c   : > { %2803 = vmatpush2.bf16.msra.mxu0 %v3837_v5 }
 0x14d   : > { %2828 = vmatpush1.bf16.msra.mxu1 %v3901_v6  ;;  %2804 = vmatprep.subr.bf16.mxu0 %v3830_v7 }
 0x14e   : > { %2829 = vmatprep.subr.bf16.mxu1 %v3894_v8 }
 0x150   : > { %2805 = vmatpush2.bf16.msra.mxu0 %v3829_v15 }
 0x151   : > { %2830 = vmatpush1.bf16.msra.mxu1 %v3893_v16  ;;  %2806 = vmatprep.subr.bf16.mxu0 %v3822_v17 }
 0x152   : > { %2831 = vmatprep.subr.bf16.mxu1 %v3886_v18 }
 0x154   : > { %2807 = vmatpush2.bf16.msra.mxu0 %v3821_v24 }
 0x155   : > { %2832 = vmatpush1.bf16.msra.mxu1 %v3885_v25  ;;  %2808 = vmatprep.subr.bf16.mxu0 %v3814_v27 }
 0x156   : > { %2833 = vmatprep.subr.bf16.mxu1 %v3878_v28 }
 0x158   : > { %2809 = vmatpush2.bf16.msra.mxu0 %v3813_v29 }
 0x159   : > { %2834 = vmatpush1.bf16.msra.mxu1 %v3877_v31  ;;  %v401_v31 = vld [vmem:[#allocation2 + $0x8] sm:$0xff] }
 0x15b   : > { %2811 = vmatmul.mubr.bf16.vlgmr.msra.gmra.mxu0 %v4415_v32 }
 0x15c   : > { %v2525_v54 = vpop.f32.mrf.mxu1  ;;  %2852 = vmatmul.mubr.bf16.vlgmr.msra.gmra.mxu1 %v4377_v30 }
 0x15e   : > { %v2527_v0 = vpop.f32.mrf.mxu1 }
 0x160   : > { %v2529_v33 = vpop.f32.mrf.mxu1 }
 0x162   : > { %v2530_v34 = vpop.f32.mrf.mxu1 }
 0x17b   : > { %v2566_v36 = vpop.f32.mrf.mxu0 }
 0x17c   : > { %v2567_v38 = vadd.f32 %v2566_v36, %v2525_v54  ;;  %v2607_v40 = vpop.f32.mrf.mxu1 }
 0x17d   : > { %v2568_v41 = vpop.f32.mrf.mxu0 }
 0x17e   : > { %v2569_v42 = vadd.f32 %v2568_v41, %v2527_v0  ;;  %v2609_v43 = vpop.f32.mrf.mxu1  ;;  %v2608_v32 = vadd.f32 %v2607_v40, %v2567_v38 }
 0x17f   : > { %v2570_v47 = vpop.f32.mrf.mxu0 }
 0x180   : > { %v2610_v26 = vadd.f32 %v2609_v43, %v2569_v42  ;;  %v2611_v23 = vpop.f32.mrf.mxu1 }
 0x181   : > { %v2571_v30 = vpop.f32.mrf.mxu0 }
 0x182   : > { %v2869_v49 = vcombine.low %v2608_v32, %v2610_v26  ;;  %v2612_v50 = vpop.f32.mrf.mxu1 }
 0x184   : > { %v2883_v10 = vrot.slane %v2869_v49, %v4700_v48 }
 0x186   : > { %v2884_v55 = vcombine.low %v2876_v52, %v2883_v10 }
 0x188   : > { %v2904_v46 = vadd.f32 %v2884_v55, %v400_v53 }
 0x18a   : > { %2906 = vst [vmem:[#allocation2] sm:$0xff] %v2904_v46 }
 0x1bb   : > { %v2648_v56 = vpop.f32.mrf.mxu0 }
 0x1bc   : > { %v2689_v57 = vpop.f32.mrf.mxu1 }
 0x1bd   : > { %v2690_v58 = vadd.f32 %v2689_v57, %v2648_v56  ;;  %v2650_v59 = vpop.f32.mrf.mxu0 }
 0x1be   : > { %v2691_v60 = vpop.f32.mrf.mxu1 }
 0x1bf   : > { %v2692_v61 = vadd.f32 %v2691_v60, %v2650_v59  ;;  %v2652_v62 = vpop.f32.mrf.mxu0 }
 0x1c0   : > { %v2693_v63 = vpop.f32.mrf.mxu1 }
 0x1c1   : > { %v2653_v1 = vpop.f32.mrf.mxu0 }
 0x1c2   : > { %v2694_v2 = vpop.f32.mrf.mxu1 }
 0x1db   : > { %v2730_v3 = vpop.f32.mrf.mxu0 }
 0x1dc   : > { %v2731_v4 = vadd.f32 %v2730_v3, %v2690_v58 }
 0x1dd   : > { %v2732_v39 = vpop.f32.mrf.mxu0 }
 0x1de   : > { %v2733_v44 = vadd.f32 %v2732_v39, %v2692_v61 }
 0x1df   : > { %v2734_v51 = vpop.f32.mrf.mxu0 }
 0x1e0   : > { %v2885_v5 = vcombine.low %v2731_v4, %v2733_v44 }
 0x1e1   : > { %v2735_v6 = vpop.f32.mrf.mxu0 }
 0x1e2   : > { %v2893_v28 = vrot.slane %v2885_v5, %v4700_v48 }
 0x1fc   : > { %v2771_v7 = vpop.f32.mrf.mxu1 }
 0x1fe   : > { %v2773_v8 = vpop.f32.mrf.mxu1 }
 0x200   : > { %v2775_v9 = vpop.f32.mrf.mxu1 }
 0x202   : > { %v2776_v11 = vpop.f32.mrf.mxu1 }
 0x21b   : > { %v2812_v12 = vpop.f32.mrf.mxu0 }
 0x21c   : > { %v2813_v13 = vadd.f32 %v2812_v12, %v2771_v7  ;;  %v2853_v15 = vpop.f32.mrf.mxu1 }
 0x21d   : > { %v2814_v16 = vpop.f32.mrf.mxu0 }
 0x21e   : > { %v2815_v17 = vadd.f32 %v2814_v16, %v2773_v8  ;;  %v2855_v18 = vpop.f32.mrf.mxu1  ;;  %v2854_v20 = vadd.f32 %v2853_v15, %v2813_v13 }
 0x21f   : > { %v2816_v19 = vpop.f32.mrf.mxu0 }
 0x220   : > { %v2856_v21 = vadd.f32 %v2855_v18, %v2815_v17  ;;  %v2857_v22 = vpop.f32.mrf.mxu1 }
 0x221   : > { %v2817_v24 = vpop.f32.mrf.mxu0 }
 0x222   : > { %v2886_v25 = vcombine.low %v2854_v20, %v2856_v21  ;;  %v2858_v27 = vpop.f32.mrf.mxu1 }
 0x224   : > { %v2900_v29 = vrot.slane %v2886_v25, %v4700_v48 }
 0x226   : > { %v2901_v54 = vcombine.low %v2893_v28, %v2900_v29  ;;  %2911 = sbr.rel (%p3935_p6) target bundleno = 1122 (0x462), region = 64 }
 0x228   : > { %v2905_v0 = vadd.f32 %v2901_v54, %v401_v31 }
 0x22a   : > { %2907 = vst [vmem:[#allocation2 + $0x8] sm:$0xff] %v2905_v0 }
 0x22b   : > { %v3019_v33 = vld [vmem:[%s5184_s3 + $0xf8] sm:$0xff]  ;;  %v3018_v36 = vld [vmem:[%s5184_s3 + $0xf0] sm:$0xff]  ;;  %v3017_v41 = vld [vmem:[%s5184_s3 + $0xe8] sm:$0xff]  ;;  %v4837_v9 = vsub.s32 0, %v4331_v45  ;;  %v4840_v11 = vsub.s32 1, %v4331_v45  ;;  %v2926_v12 = vsub.s32 2, %v4331_v45 }
 0x22c   : > { %v3051_v34 = vld [vmem:[%s5184_s3 + $0x1f8] sm:$0xff]  ;;  %3948 = vmatprep.subr.mxu0 %v3019_v33  ;;  %v3050_v37 = vld [vmem:[%s5184_s3 + $0x1f0] sm:$0xff]  ;;  %v3049_v42 = vld [vmem:[%s5184_s3 + $0x1e8] sm:$0xff]  ;;  %v2930_v16 = vsub.s32 3, %v4331_v45  ;;  %vm3508_vm0 = vcmask 9216   ;;  %vm3504_vm1 = vcmask 74752  }
 0x22d   : > { %v3003_v35 = vld [vmem:[%s5184_s3 + $0x78] sm:$0xff]  ;;  %3983 = vmatprep.subr.mxu1 %v3051_v34  ;;  %v3002_v38 = vld [vmem:[%s5184_s3 + $0x70] sm:$0xff]  ;;  %v3001_v43 = vld [vmem:[%s5184_s3 + $0x68] sm:$0xff]  ;;  %vm3498_vm2 = vcmask 1041408  }
 0x22e   : > { %v3035_v14 = vld [vmem:[%s5184_s3 + $0x178] sm:$0xff]  ;;  %3949 = vmatpush3.msra.mxu0 %v3003_v35  ;;  %v3034_v40 = vld [vmem:[%s5184_s3 + $0x170] sm:$0xff]  ;;  %v3033_v47 = vld [vmem:[%s5184_s3 + $0x168] sm:$0xff] }
 0x22f   : > { %3984 = vmatpush3.msra.mxu1 %v3035_v14  ;;  %3950 = vmatprep.subr.mxu0 %v3018_v36  ;;  %v3016_v32 = vld [vmem:[%s5184_s3 + $0xe0] sm:$0xff]  ;;  %v3015_v49 = vld [vmem:[%s5184_s3 + $0xd8] sm:$0xff]  ;;  %v3014_v53 = vld [vmem:[%s5184_s3 + $0xd0] sm:$0xff] }
 0x230   : > { %3985 = vmatprep.subr.mxu1 %v3050_v37  ;;  %3951 = vmatpush3.msra.mxu0 %v3002_v38  ;;  %v3048_v26 = vld [vmem:[%s5184_s3 + $0x1e0] sm:$0xff]  ;;  %v3047_v50 = vld [vmem:[%s5184_s3 + $0x1d8] sm:$0xff]  ;;  %v3046_v55 = vld [vmem:[%s5184_s3 + $0x1d0] sm:$0xff] }
 0x231   : > { %3986 = vmatpush3.msra.mxu1 %v3034_v40  ;;  %3952 = vmatprep.subr.mxu0 %v3017_v41  ;;  %v3000_v23 = vld [vmem:[%s5184_s3 + $0x60] sm:$0xff]  ;;  %v2999_v52 = vld [vmem:[%s5184_s3 + $0x58] sm:$0xff]  ;;  %v2998_v46 = vld [vmem:[%s5184_s3 + $0x50] sm:$0xff] }
 0x232   : > { %3987 = vmatprep.subr.mxu1 %v3049_v42  ;;  %v3032_v30 = vld [vmem:[%s5184_s3 + $0x160] sm:$0xff]  ;;  %3953 = vmatpush3.msra.mxu0 %v3001_v43  ;;  %v3031_v10 = vld [vmem:[%s5184_s3 + $0x158] sm:$0xff]  ;;  %v3030_v56 = vld [vmem:[%s5184_s3 + $0x150] sm:$0xff] }
 0x233   : > { %3988 = vmatpush3.msra.mxu1 %v3033_v47  ;;  %3954 = vmatprep.subr.mxu0 %v3016_v32  ;;  %v3013_v57 = vld [vmem:[%s5184_s3 + $0xc8] sm:$0xff]  ;;  %v3012_v61 = vld [vmem:[%s5184_s3 + $0xc0] sm:$0xff]  ;;  %v3011_v2 = vld [vmem:[%s5184_s3 + $0xb8] sm:$0xff] }
 0x234   : > { %3989 = vmatprep.subr.mxu1 %v3048_v26  ;;  %3955 = vmatpush3.msra.mxu0 %v3000_v23  ;;  %v3045_v58 = vld [vmem:[%s5184_s3 + $0x1c8] sm:$0xff]  ;;  %v3044_v62 = vld [vmem:[%s5184_s3 + $0x1c0] sm:$0xff]  ;;  %v3043_v3 = vld [vmem:[%s5184_s3 + $0x1b8] sm:$0xff] }
 0x235   : > { %3990 = vmatpush3.msra.mxu1 %v3032_v30  ;;  %3956 = vmatprep.subr.mxu0 %v3015_v49  ;;  %v2997_v59 = vld [vmem:[%s5184_s3 + $0x48] sm:$0xff]  ;;  %v2996_v63 = vld [vmem:[%s5184_s3 + $0x40] sm:$0xff]  ;;  %v2995_v4 = vld [vmem:[%s5184_s3 + $0x38] sm:$0xff] }
 0x236   : > { %3991 = vmatprep.subr.mxu1 %v3047_v50  ;;  %3957 = vmatpush3.msra.mxu0 %v2999_v52  ;;  %v3029_v60 = vld [vmem:[%s5184_s3 + $0x148] sm:$0xff]  ;;  %v3028_v1 = vld [vmem:[%s5184_s3 + $0x140] sm:$0xff]  ;;  %v3027_v39 = vld [vmem:[%s5184_s3 + $0x138] sm:$0xff] }
 0x237   : > { %3992 = vmatpush3.msra.mxu1 %v3031_v10  ;;  %3958 = vmatprep.subr.mxu0 %v3014_v53  ;;  %v3010_v44 = vld [vmem:[%s5184_s3 + $0xb0] sm:$0xff]  ;;  %v3009_v7 = vld [vmem:[%s5184_s3 + $0xa8] sm:$0xff]  ;;  %v3008_v17 = vld [vmem:[%s5184_s3 + $0xa0] sm:$0xff]  ;;  %v2934_v53 = vsub.s32 4, %v4331_v45 }
 0x238   : > { %3993 = vmatprep.subr.mxu1 %v3046_v55  ;;  %3959 = vmatpush3.msra.mxu0 %v2998_v46  ;;  %v3042_v51 = vld [vmem:[%s5184_s3 + $0x1b0] sm:$0xff]  ;;  %v3041_v8 = vld [vmem:[%s5184_s3 + $0x1a8] sm:$0xff]  ;;  %v3040_v18 = vld [vmem:[%s5184_s3 + $0x1a0] sm:$0xff]  ;;  %v2938_v55 = vsub.s32 5, %v4331_v45 }
 0x239   : > { %3994 = vmatpush3.msra.mxu1 %v3030_v56  ;;  %3960 = vmatprep.subr.mxu0 %v3013_v57  ;;  %v2994_v5 = vld [vmem:[%s5184_s3 + $0x30] sm:$0xff]  ;;  %v2993_v13 = vld [vmem:[%s5184_s3 + $0x28] sm:$0xff]  ;;  %v2992_v19 = vld [vmem:[%s5184_s3 + $0x20] sm:$0xff]  ;;  %v2942_v56 = vsub.s32 6, %v4331_v45  ;;  %v2946_v57 = vsub.s32 7, %v4331_v45 }
 0x23a   : > { %3995 = vmatprep.subr.mxu1 %v3045_v58  ;;  %3961 = vmatpush3.msra.mxu0 %v2997_v59  ;;  %v3026_v6 = vld [vmem:[%s5184_s3 + $0x130] sm:$0xff]  ;;  %v3025_v15 = vld [vmem:[%s5184_s3 + $0x128] sm:$0xff]  ;;  %v3024_v20 = vld [vmem:[%s5184_s3 + $0x120] sm:$0xff] }
 0x23b   : > { %3996 = vmatpush3.msra.mxu1 %v3029_v60  ;;  %3962 = vmatprep.subr.mxu0 %v3012_v61  ;;  %v4865_v21 = vld [vmem:[%s5183_s2] sm:$0xff]  ;;  %v3007_v22 = vld [vmem:[%s5184_s3 + $0x98] sm:$0xff]  ;;  %v3006_v0 = vld [vmem:[%s5184_s3 + $0x90] sm:$0xff] }
 0x23c   : > { %3997 = vmatprep.subr.mxu1 %v3044_v62  ;;  %3963 = vmatpush3.msra.mxu0 %v2996_v63  ;;  %v3039_v24 = vld [vmem:[%s5184_s3 + $0x198] sm:$0xff]  ;;  %v2919_v25 = vrot.slane %v4865_v21, %v4837_v9  ;;  %v2923_v27 = vrot.slane %v4865_v21, %v4840_v11  ;;  %v2927_v28 = vrot.slane %v4865_v21, %v2926_v12  ;;  %v3038_v33 = vld [vmem:[%s5184_s3 + $0x190] sm:$0xff]  ;;  %v3005_v37 = vld [vmem:[%s5184_s3 + $0x88] sm:$0xff] }
 0x23d   : > { %3998 = vmatpush3.msra.mxu1 %v3028_v1  ;;  %3964 = vmatprep.subr.mxu0 %v3011_v2  ;;  %v2991_v29 = vld [vmem:[%s5184_s3 + $0x18] sm:$0xff]  ;;  %v2931_v54 = vrot.slane %v4865_v21, %v2930_v16  ;;  %v2990_v35 = vld [vmem:[%s5184_s3 + $0x10] sm:$0xff]  ;;  %v3037_v38 = vld [vmem:[%s5184_s3 + $0x188] sm:$0xff]  ;;  %v2935_v60 = vrot.slane %v4865_v21, %v2934_v53  ;;  %v2939_v61 = vrot.slane %v4865_v21, %v2938_v55 }
 0x23e   : > { %3999 = vmatprep.subr.mxu1 %v3043_v3  ;;  %3965 = vmatpush3.msra.mxu0 %v2995_v4  ;;  %v3023_v31 = vld [vmem:[%s5184_s3 + $0x118] sm:$0xff]  ;;  %v2948_v34 = vcombine.low %v2919_v25, %v2923_v27  ;;  %v3022_v14 = vld [vmem:[%s5184_s3 + $0x110] sm:$0xff]  ;;  %v2989_v41 = vld [vmem:[%s5184_s3 + $0x8] sm:$0xff]  ;;  %v2943_v1 = vrot.slane %v4865_v21, %v2942_v56  ;;  %v2947_v2 = vrot.slane %v4865_v21, %v2946_v57 }
 0x23f   : > { %4000 = vmatpush3.msra.mxu1 %v3027_v39  ;;  %3966 = vmatprep.subr.mxu0 %v3010_v44  ;;  %v2949_v36 = vcombine.low %v2927_v28, %v2931_v54  ;;  %v3021_v42 = vld [vmem:[%s5184_s3 + $0x108] sm:$0xff]  ;;  %v3004_v47 = vld [vmem:[%s5184_s3 + $0x80] sm:$0xff]  ;;  %v3083_v50 = vld [vmem:[%s5184_s3 + $0x2f8] sm:$0xff] }
 0x240   : > { %4001 = vmatprep.subr.mxu1 %v3042_v51  ;;  %3967 = vmatpush3.msra.mxu0 %v2994_v5  ;;  %v2956_v40 = vrot.slane %v2948_v34, %v4700_v48  ;;  %v3036_v32 = vld [vmem:[%s5184_s3 + $0x180] sm:$0xff]  ;;  %v3115_v52 = vld [vmem:[%s5184_s3 + $0x3f8] sm:$0xff]  ;;  %v3082_v4 = vld [vmem:[%s5184_s3 + $0x2f0] sm:$0xff] }
 0x241   : > { %4002 = vmatpush3.msra.mxu1 %v3026_v6  ;;  %3968 = vmatprep.subr.mxu0 %v3009_v7  ;;  %v2963_v43 = vrot.slane %v2949_v36, %v4700_v48  ;;  %v2912_v26 = vld [vmem:[#allocation2] sm:$0xff]  ;;  %v3067_v3 = vld [vmem:[%s5184_s3 + $0x278] sm:$0xff]  ;;  %v3066_v44 = vld [vmem:[%s5184_s3 + $0x270] sm:$0xff]  ;;  %v2965_v6 = vcombine.low %v2935_v60, %v2939_v61  ;;  %v2966_v7 = vcombine.low %v2943_v1, %v2947_v2 }
 0x242   : > { %4003 = vmatprep.subr.mxu1 %v3041_v8  ;;  %3969 = vmatpush3.msra.mxu0 %v2993_v13  ;;  %v2988_v23 = vld [vmem:[%s5184_s3] sm:$0xff]  ;;  %v3099_v39 = vld [vmem:[%s5184_s3 + $0x378] sm:$0xff]  ;;  %v3114_v51 = vld [vmem:[%s5184_s3 + $0x3f0] sm:$0xff] }
 0x243   : > { %4004 = vmatpush3.msra.mxu1 %v3025_v15  ;;  %3970 = vmatprep.subr.mxu0 %v3008_v17  ;;  %v2964_v30 = vcombine.low %v2956_v40, %v2963_v43  ;;  %v3020_v49 = vld [vmem:[%s5184_s3 + $0x100] sm:$0xff]  ;;  %v3081_v5 = vld [vmem:[%s5184_s3 + $0x2e8] sm:$0xff]  ;;  %v3098_v8 = vld [vmem:[%s5184_s3 + $0x370] sm:$0xff]  ;;  %v2980_v21 = vrot.slane %v2966_v7, %v4700_v48 }
 0x244   : > { %4005 = vmatprep.subr.mxu1 %v3040_v18  ;;  %3971 = vmatpush3.msra.mxu0 %v2992_v19  ;;  %v3065_v12 = vld [vmem:[%s5184_s3 + $0x268] sm:$0xff]  ;;  %v3080_v15 = vld [vmem:[%s5184_s3 + $0x2e0] sm:$0xff]  ;;  %v3079_v19 = vld [vmem:[%s5184_s3 + $0x2d8] sm:$0xff] }
 0x245   : > { %4006 = vmatpush3.msra.mxu1 %v3024_v20  ;;  %3972 = vmatprep.subr.mxu0 %v3007_v22  ;;  %v2984_v10 = vadd.f32 %v2964_v30, %v2912_v26  ;;  %v3113_v13 = vld [vmem:[%s5184_s3 + $0x3e8] sm:$0xff]  ;;  %v3064_v17 = vld [vmem:[%s5184_s3 + $0x260] sm:$0xff]  ;;  %v2973_v20 = vrot.slane %v2965_v6, %v4700_v48  ;;  %v3111_v25 = vld [vmem:[%s5184_s3 + $0x3d8] sm:$0xff] }
 0x246   : > { %4007 = vmatprep.subr.mxu1 %v3039_v24  ;;  %3973 = vmatpush3.msra.mxu0 %v2991_v29  ;;  %v3097_v16 = vld [vmem:[%s5184_s3 + $0x368] sm:$0xff]  ;;  %v3112_v18 = vld [vmem:[%s5184_s3 + $0x3e0] sm:$0xff]  ;;  %v3063_v24 = vld [vmem:[%s5184_s3 + $0x258] sm:$0xff] }
 0x247   : > { %4008 = vmatpush3.msra.mxu1 %v3023_v31  ;;  %3974 = vmatprep.subr.mxu0 %v3006_v0  ;;  %v2986_v46 = vmax.f32 %v2984_v10, 0.0  ;;  %v3096_v22 = vld [vmem:[%s5184_s3 + $0x360] sm:$0xff]  ;;  %v3078_v27 = vld [vmem:[%s5184_s3 + $0x2d0] sm:$0xff]  ;;  %v3095_v28 = vld [vmem:[%s5184_s3 + $0x358] sm:$0xff]  ;;  %v2981_v0 = vcombine.low %v2973_v20, %v2980_v21 }
 0x248   : > { %4009 = vmatprep.subr.mxu1 %v3038_v33  ;;  %3975 = vmatpush3.msra.mxu0 %v2990_v35  ;;  %v3062_v29 = vld [vmem:[%s5184_s3 + $0x250] sm:$0xff]  ;;  %v3077_v54 = vld [vmem:[%s5184_s3 + $0x2c8] sm:$0xff]  ;;  %v3076_v36 = vld [vmem:[%s5184_s3 + $0x2c0] sm:$0xff] }
 0x249   : > { %4010 = vmatpush3.msra.mxu1 %v3022_v14  ;;  %3976 = vmatprep.subr.mxu0 %v3005_v37  ;;  %v3132_v58 = vrot.slane %v2986_v46, %v4700_v48  ;;  %v3125_v59 = vcombine.high %v2986_v46, %v2986_v46  ;;  %v3110_v31 = vld [vmem:[%s5184_s3 + $0x3d0] sm:$0xff]  ;;  %v3061_v34 = vld [vmem:[%s5184_s3 + $0x248] sm:$0xff]  ;;  %v3108_v40 = vld [vmem:[%s5184_s3 + $0x3c0] sm:$0xff] }
 0x24a   : > { %4011 = vmatprep.subr.mxu1 %v3037_v38  ;;  %3977 = vmatpush3.msra.mxu0 %v2989_v41  ;;  %v3094_v33 = vld [vmem:[%s5184_s3 + $0x350] sm:$0xff]  ;;  %v2913_v35 = vld [vmem:[#allocation2 + $0x8] sm:$0xff]  ;;  %v3060_v38 = vld [vmem:[%s5184_s3 + $0x240] sm:$0xff] }
 0x24b   : > { %4012 = vmatpush3.msra.mxu1 %v3021_v42  ;;  %3978 = vmatprep.subr.mxu0 %v3004_v47  ;;  %v3140_v62 = vcombine.high %v3132_v58, %v3132_v58  ;;  %v3139_v63 = vrot.slane %v3125_v59, %v4700_v48  ;;  %v3109_v14 = vld [vmem:[%s5184_s3 + $0x3c8] sm:$0xff]  ;;  %v3075_v41 = vld [vmem:[%s5184_s3 + $0x2b8] sm:$0xff]  ;;  %v2985_v42 = vadd.f32 %v2981_v0, %v2913_v35  ;;  %v3092_v43 = vld [vmem:[%s5184_s3 + $0x340] sm:$0xff] }
 0x24c   : > { %4013 = vmatprep.subr.mxu1 %v3036_v32  ;;  %3979 = vmatpush3.msra.mxu0 %v2988_v23  ;;  %v3093_v37 = vld [vmem:[%s5184_s3 + $0x348] sm:$0xff]  ;;  %v3059_v47 = vld [vmem:[%s5184_s3 + $0x238] sm:$0xff]  ;;  %v3074_v26 = vld [vmem:[%s5184_s3 + $0x2b0] sm:$0xff] }
 0x24d   : > { %4014 = vmatpush3.msra.mxu1 %v3020_v49  ;;  %4018 = vmatprep.subr.mxu0 %v3083_v50  ;;  %v3141_v45 = vcombine.high %v3139_v63, %v3139_v63  ;;  %v3107_v32 = vld [vmem:[%s5184_s3 + $0x3b8] sm:$0xff]  ;;  %v3058_v30 = vld [vmem:[%s5184_s3 + $0x230] sm:$0xff]  ;;  %v3073_v50 = vld [vmem:[%s5184_s3 + $0x2a8] sm:$0xff] }
 0x24e   : > { %4053 = vmatprep.subr.mxu1 %v3115_v52  ;;  %3231 = vmatprep.mubr.f32.mxu0 %v3140_v62  ;;  %v3091_v23 = vld [vmem:[%s5184_s3 + $0x338] sm:$0xff]  ;;  %v3106_v49 = vld [vmem:[%s5184_s3 + $0x3b0] sm:$0xff]  ;;  %v2987_v52 = vmax.f32 %v2985_v42, 0.0  ;;  %v3057_v53 = vld [vmem:[%s5184_s3 + $0x228] sm:$0xff] }
 0x24f   : > { %3232 = vmatmul.mubr.f32.vlgmr.msra.gmra.mxu0 %v3132_v58  ;;  %3301 = vmatprep.mubr.f32.mxu1 %v3141_v45  ;;  %v3090_v10 = vld [vmem:[%s5184_s3 + $0x330] sm:$0xff]  ;;  %v3105_v55 = vld [vmem:[%s5184_s3 + $0x3a8] sm:$0xff]  ;;  %v3072_v46 = vld [vmem:[%s5184_s3 + $0x2a0] sm:$0xff] }
 0x250   : > { %4019 = vmatpush3.msra.mxu0 %v3067_v3  ;;  %3302 = vmatmul.mubr.f32.vlgmr.msra.gmra.mxu1 %v3139_v63  ;;  %v3089_v56 = vld [vmem:[%s5184_s3 + $0x328] sm:$0xff]  ;;  %v3056_v57 = vld [vmem:[%s5184_s3 + $0x220] sm:$0xff]  ;;  %v3071_v59 = vld [vmem:[%s5184_s3 + $0x298] sm:$0xff]  ;;  %v3142_v60 = vcombine.high %v2987_v52, %v2987_v52  ;;  %v3149_v45 = vrot.slane %v2987_v52, %v4700_v48 }
 0x251   : > { %4020 = vmatprep.subr.mxu0 %v3082_v4  ;;  %4054 = vmatpush3.msra.mxu1 %v3099_v39  ;;  %v3104_v58 = vld [vmem:[%s5184_s3 + $0x3a0] sm:$0xff]  ;;  %v3055_v62 = vld [vmem:[%s5184_s3 + $0x218] sm:$0xff]  ;;  %v3070_v1 = vld [vmem:[%s5184_s3 + $0x290] sm:$0xff] }
 0x252   : > { %4021 = vmatpush3.msra.mxu0 %v3066_v44  ;;  %4055 = vmatprep.subr.mxu1 %v3114_v51  ;;  %v3088_v61 = vld [vmem:[%s5184_s3 + $0x320] sm:$0xff]  ;;  %v3103_v63 = vld [vmem:[%s5184_s3 + $0x398] sm:$0xff]  ;;  %v3054_v3 = vld [vmem:[%s5184_s3 + $0x210] sm:$0xff]  ;;  %v3156_v44 = vrot.slane %v3142_v60, %v4700_v48 }
 0x253   : > { %4022 = vmatprep.subr.mxu0 %v3081_v5  ;;  %4056 = vmatpush3.msra.mxu1 %v3098_v8  ;;  %v3087_v2 = vld [vmem:[%s5184_s3 + $0x318] sm:$0xff]  ;;  %v3102_v4 = vld [vmem:[%s5184_s3 + $0x390] sm:$0xff]  ;;  %v3069_v39 = vld [vmem:[%s5184_s3 + $0x288] sm:$0xff] }
 0x254   : > { %4023 = vmatpush3.msra.mxu0 %v3065_v12  ;;  %4057 = vmatprep.subr.mxu1 %v3113_v13  ;;  %v3086_v51 = vld [vmem:[%s5184_s3 + $0x310] sm:$0xff]  ;;  %v3053_v5 = vld [vmem:[%s5184_s3 + $0x208] sm:$0xff]  ;;  %v3068_v48 = vld [vmem:[%s5184_s3 + $0x280] sm:$0xff]  ;;  %v3157_v12 = vcombine.high %v3149_v45, %v3149_v45 }
 0x255   : > { %4024 = vmatprep.subr.mxu0 %v3080_v15  ;;  %4058 = vmatpush3.msra.mxu1 %v3097_v16  ;;  %v3101_v6 = vld [vmem:[%s5184_s3 + $0x388] sm:$0xff]  ;;  %v3052_v8 = vld [vmem:[%s5184_s3 + $0x200] sm:$0xff]  ;;  %v3158_v15 = vcombine.high %v3156_v44, %v3156_v44 }
 0x256   : > { %4025 = vmatpush3.msra.mxu0 %v3064_v17  ;;  %4059 = vmatprep.subr.mxu1 %v3112_v18  ;;  %v3085_v7 = vld [vmem:[%s5184_s3 + $0x308] sm:$0xff]  ;;  %v3100_v13 = vld [vmem:[%s5184_s3 + $0x380] sm:$0xff]  ;;  %v4220_v17 = vmov 0  }
 0x257   : > { %4026 = vmatprep.subr.mxu0 %v3079_v19  ;;  %4060 = vmatpush3.msra.mxu1 %v3096_v22  ;;  %v3084_v16 = vld [vmem:[%s5184_s3 + $0x300] sm:$0xff] }
 0x258   : > { %4027 = vmatpush3.msra.mxu0 %v3063_v24  ;;  %4061 = vmatprep.subr.mxu1 %v3111_v25  ;;  %v3936_v22 = vld [vmem:[%s5185_s4] ss:$0 sm:$0xff] }
 0x259   : > { %4028 = vmatprep.subr.mxu0 %v3078_v27  ;;  %4062 = vmatpush3.msra.mxu1 %v3095_v28  ;;  %v3937_v52 = vld [vmem:[%s5187_s6] ss:$0 sm:$0xff] }
 0x25a   : > { %4029 = vmatpush3.msra.mxu0 %v3062_v29  ;;  %4063 = vmatprep.subr.mxu1 %v3110_v31 }
 0x25b   : > { %4030 = vmatprep.subr.mxu0 %v3077_v54  ;;  %4064 = vmatpush3.msra.mxu1 %v3094_v33 }
 0x25c   : > { %4031 = vmatpush3.msra.mxu0 %v3061_v34  ;;  %4065 = vmatprep.subr.mxu1 %v3109_v14 }
 0x25d   : > { %4032 = vmatprep.subr.mxu0 %v3076_v36  ;;  %4066 = vmatpush3.msra.mxu1 %v3093_v37  ;;  %v4221_v37 = vmov 1  }
 0x25e   : > { %4033 = vmatpush3.msra.mxu0 %v3060_v38  ;;  %4067 = vmatprep.subr.mxu1 %v3108_v40  ;;  %v3448_v38 = vld [vmem:[%s5186_s5] sm:$0x3] }
 0x25f   : > { %4034 = vmatprep.subr.mxu0 %v3075_v41  ;;  %4068 = vmatpush3.msra.mxu1 %v3092_v43  ;;  %v3449_v40 = vld [vmem:[%s5188_s7] sm:$0x3]  ;;  %v3458_v42 = vrot.slane %v3448_v38, %v4837_v9 }
 0x260   : > { %4035 = vmatpush3.msra.mxu0 %v3059_v47  ;;  %4069 = vmatprep.subr.mxu1 %v3107_v32  ;;  %v3481_v43 = vrot.slane %v3449_v40, %v4837_v9  ;;  %v3467_v47 = vrot.slane %v3448_v38, %v4840_v11  ;;  %v3486_v32 = vrot.slane %v3449_v40, %v4840_v11 }
 0x261   : > { %4036 = vmatprep.subr.mxu0 %v3074_v26  ;;  %4070 = vmatpush3.msra.mxu1 %v3091_v23 }
 0x262   : > { %4037 = vmatpush3.msra.mxu0 %v3058_v30  ;;  %4071 = vmatprep.subr.mxu1 %v3106_v49 }
 0x263   : > { %4038 = vmatprep.subr.mxu0 %v3073_v50  ;;  %4072 = vmatpush3.msra.mxu1 %v3090_v10  ;;  %v3938_v10 = vld [vmem:[%s5189_s8] ss:$0 sm:$0xff] }
 0x264   : > { %4039 = vmatpush3.msra.mxu0 %v3057_v53  ;;  %4073 = vmatprep.subr.mxu1 %v3105_v55 }
 0x265   : > { %4040 = vmatprep.subr.mxu0 %v3072_v46  ;;  %4074 = vmatpush3.msra.mxu1 %v3089_v56 }
 0x266   : > { %4041 = vmatpush3.msra.mxu0 %v3056_v57  ;;  %4075 = vmatprep.subr.mxu1 %v3104_v58 }
 0x267   : > { %4042 = vmatprep.subr.mxu0 %v3071_v59  ;;  %4076 = vmatpush3.msra.mxu1 %v3088_v61 }
 0x268   : > { %4043 = vmatpush3.msra.mxu0 %v3055_v62  ;;  %4077 = vmatprep.subr.mxu1 %v3103_v63 }
 0x269   : > { %4044 = vmatprep.subr.mxu0 %v3070_v1  ;;  %4078 = vmatpush3.msra.mxu1 %v3087_v2 }
 0x26a   : > { %4045 = vmatpush3.msra.mxu0 %v3054_v3  ;;  %4079 = vmatprep.subr.mxu1 %v3102_v4 }
 0x26b   : > { %4046 = vmatprep.subr.mxu0 %v3069_v39  ;;  %4080 = vmatpush3.msra.mxu1 %v3086_v51 }
 0x26c   : > { %4047 = vmatpush3.msra.mxu0 %v3053_v5  ;;  %4081 = vmatprep.subr.mxu1 %v3101_v6 }
 0x26d   : > { %4048 = vmatprep.subr.mxu0 %v3068_v48  ;;  %4082 = vmatpush3.msra.mxu1 %v3085_v7 }
 0x26e   : > { %4049 = vmatpush3.msra.mxu0 %v3052_v8  ;;  %4083 = vmatprep.subr.mxu1 %v3100_v13 }
 0x26f   : > { %3371 = vmatprep.mubr.f32.mxu0 %v3157_v12  ;;  %4084 = vmatpush3.msra.mxu1 %v3084_v16 }
 0x270   : > { %3441 = vmatprep.mubr.f32.mxu1 %v3158_v15  ;;  %3372 = vmatmul.mubr.f32.vlgmr.msra.gmra.mxu0 %v3149_v45 }
 0x271   : > { %3442 = vmatmul.mubr.f32.vlgmr.msra.gmra.mxu1 %v3156_v44  ;;  %4124 = vset.pattern.permute.xlu0 %v4220_v17 }
 0x30f   : > { %v3980_v18 = vpop.f32.mrf.mxu0 }
 0x310   : > { %v4015_v19 = vpop.f32.mrf.mxu1 }
 0x311   : > { %v3981_v20 = vpop.f32.mrf.mxu0 }
 0x312   : > { %v3982_v21 = vadd.f32 %v3981_v20, %v3980_v18  ;;  %v4016_v24 = vpop.f32.mrf.mxu1 }
 0x313   : > { %v4017_v27 = vadd.f32 %v4016_v24, %v4015_v19 }
 0x314   : > { %v3234_v25 = vadd.f32 %v3982_v21, %v3936_v22 }
 0x316   : > { %v3304_v0 = vadd.f32 %v4017_v27, %v3234_v25 }
 0x330   : > { %v4050_v28 = vpop.f32.mrf.mxu0 }
 0x331   : > { %v4085_v29 = vpop.f32.mrf.mxu1 }
 0x332   : > { %v4051_v31 = vpop.f32.mrf.mxu0 }
 0x333   : > { %v4086_v54 = vpop.f32.mrf.mxu1  ;;  %v4052_v33 = vadd.f32 %v4051_v31, %v4050_v28 }
 0x334   : > { %v4087_v35 = vadd.f32 %v4086_v54, %v4085_v29 }
 0x335   : > { %v3374_v34 = vadd.f32 %v4052_v33, %v3304_v0 }
 0x337   : > { %v3444_v14 = vadd.f32 %v4087_v35, %v3374_v34 }
 0x339   : > { %v3447_v36 = vmax.f32 %v3444_v14, 0.0 }
 0x33b   : > { %3509 = vst.msk [vmem:[#allocation7] sm:$0x3] %vm3508_vm0, %v3447_v36  ;;  %3452 = vperm.xlu0 %4124, %v3447_v36  }
 0x33f   : > { %4125 = vset.pattern.permute.xlu0 %v4221_v37 }
 0x340   : > { %3461 = vperm.xlu0 %4125, %v3447_v36  }
 0x3b6   : > { %v3453_v41 = vpop.permute.xlu0 %3452 }
 0x3b7   : > { %v3459_v23 = vmul.f32 %v3458_v42, %v3453_v41  ;;  %v3482_v30 = vmul.f32 %v3481_v43, %v3453_v41 }
 0x3bb   : > { %v3462_v26 = vpop.permute.xlu0 %3461 }
 0x3bc   : > { %v3468_v49 = vmul.f32 %v3467_v47, %v3462_v26  ;;  %v3487_v50 = vmul.f32 %v3486_v32, %v3462_v26 }
 0x3be   : > { %v3469_v53 = vadd.f32 %v3468_v49, %v3459_v23  ;;  %v3488_v55 = vadd.f32 %v3487_v50, %v3482_v30 }
 0x3c0   : > { %v3477_v9 = vadd.f32 %v3937_v52, %v3469_v53  ;;  %v3496_v46 = vadd.f32 %v3938_v10, %v3488_v55 }
 0x3c2   : > { %3505 = vst.msk [vmem:[#allocation3] sm:$0x3] %vm3504_vm1, %v3477_v9  ;;  %v3497_v11 = vmul.f32 %v3496_v46, %v3496_v46 }
 0x3c4   : > { %v3499_v56 = vsel %vm3498_vm2, %v3497_v11, 0.0 }
 0x3c5   : > { %3500 = vadd.xlane.f32.xlu1 %v3499_v56 }
 0x44e   : > { %v3501_v57 = vpop.xlane.xlu1 %3500 }
 0x44f   : > { %v3502_v58 = vmax.f32 %v3501_v57, 1e-24 }
 0x451   : > { %4126 = vrsqrt.f32 %v3502_v58 }
 0x45e   : > { %v4127_v59 = vpop.eup %4126 }
 0x45f   : > { %v3506_v60 = vmul.f32 %v4127_v59, %v3496_v46 }
 0x461   : > { %3507 = vst [vmem:[#allocation5] sm:$0x3] %v3506_v60 }
 0x462 PF: > { %p4100_p7 = scmp.eq.s32.totalorder %s4291_s18, 4  ;;  %s4222_s26 = smov [#allocation5]  }
 0x463   : > { %s3528_s27 = sshll.u32 %s4222_s26, 4  ;;  %s4223_s28 = smov [#allocation3]   ;;  %s3529_s27 = int_to_ptr.vmem [resolvable:$true] %s3528_s27 }
 0x464   : > { %s3517_s29 = sshll.u32 %s4223_s28, 4  ;;  %s4128_s30 = scalar_lea.vmem %s3529_s27, 32  ;;  %s3518_s29 = int_to_ptr.vmem [resolvable:$true] %s3517_s29 }
 0x465   : > { %p4129_p8 = scmp.ne.s32.totalorder %s3529_s27, %s4128_s30  ;;  %p4135_p11 = scmp.lt.s32.totalorder %s3529_s27, %s3529_s27 }
 0x466   : > { %p4136_p12 = scmp.lt.s32.totalorder %s4128_s30, %s4128_s30 }
 0x467   : > { %p4130_p9 = pnand %p4129_p8, %p4100_p7 }
 0x468   : > { %p4137_p13 = por %p4136_p12, %p4135_p11 }
 0x469   : > { %p4131_p10 = pneg %p4130_p9 }
 0x46b   : > { %p4138_p0 = pnand %p4137_p13, %p4131_p10 }
 0x46d   : > { %4141 = shalt.err (!%p4138_p0)
}
 0x46e   : > { %4091 = dma.vmem_to_hbm [thread:$0]  (%p4100_p7), %s3529_s27, 32, %s5191_s10, [#allocation6]  }
 0x46f   : > { %s4152_s14 = scalar_lea.vmem %s3518_s29, 32  ;;  %p4159_p4 = scmp.lt.s32.totalorder %s3518_s29, %s3518_s29 }
 0x470   : > { %p4153_p1 = scmp.ne.s32.totalorder %s3518_s29, %s4152_s14  ;;  %p4160_p5 = scmp.lt.s32.totalorder %s4152_s14, %s4152_s14 }
 0x472   : > { %p4154_p2 = pnand %p4153_p1, %p4100_p7  ;;  %p4161_p6 = por %p4160_p5, %p4159_p4 }
 0x474   : > { %p4155_p3 = pneg %p4154_p2 }
 0x476   : > { %p4162_p8 = pnand %p4161_p6, %p4155_p3 }
 0x478   : > { %4165 = shalt.err (!%p4162_p8)
}
 0x479   : > { %4089 = dma.vmem_to_hbm [thread:$0]  (%p4100_p7), %s3518_s29, 32, %s5190_s9, [#allocation4]  }
 0x47a   : > { %s4224_s19 = smov [#allocation7]  }
 0x47b   : > { %s3539_s20 = sshll.u32 %s4224_s19, 4  ;;  %s3540_s20 = int_to_ptr.vmem [resolvable:$true] %s3539_s20 }
 0x47c   : > { %s4176_s21 = scalar_lea.vmem %s3540_s20, 32  ;;  %p4183_p12 = scmp.lt.s32.totalorder %s3540_s20, %s3540_s20 }
 0x47d   : > { %p4177_p9 = scmp.ne.s32.totalorder %s3540_s20, %s4176_s21  ;;  %p4184_p13 = scmp.lt.s32.totalorder %s4176_s21, %s4176_s21 }
 0x47f   : > { %p4178_p10 = pnand %p4177_p9, %p4100_p7  ;;  %p4185_p0 = por %p4184_p13, %p4183_p12 }
 0x481   : > { %p4179_p11 = pneg %p4178_p10 }
 0x483   : > { %p4186_p1 = pnand %p4185_p0, %p4179_p11 }
 0x485   : > { %4189 = shalt.err (!%p4186_p1)
}
 0x486   : > { %4093 = dma.vmem_to_hbm [thread:$0]  (%p4100_p7), %s3540_s20, 32, %s5192_s11, [#allocation6]  }
 0x487   : > { %4205 = dma.done.wait (%p4100_p7), [#allocation4], 32  }
 0x488   : > { %4207 = vsyncadd (%p4100_p7), [#allocation4], 4294967264 }
 0x489   : > { %4209 = dma.done.wait (%p4100_p7), [#allocation6], 64  }
 0x48a   : > { %4211 = vsyncadd (%p4100_p7), [#allocation6], 4294967232 }
 0x48b PF: > { %s24_s17 = sadd.s32 1, %s4214_s17  }
 0x48c   : > { %p21_p2 = scmp.ge.s32.totalorder %s24_s17, 7  }
 0x48e   :  { %23 = sbr.rel (!%p21_p2) target bundleno = 2 (0x2), region = 110 }
 0x493   :  { %3560 = vsyncpa [#allocation4], 1 }
 0x494   :  { %3562 = vsyncpa [#allocation4 + $0x1], 1 }
 0x495   :  { %3563 = vsyncpa [#allocation6], 1 }

</bundles_post_ra>
